<compile_context>
chip_gen: v7x
topology: tpu7x:2x2x1
jax: 0.10.0
libtpu: 0.0.40
codegen_flags: <defaults>
</compile_context>

<pallas_src>
import functools

import jax
import jax.numpy as jnp
from jax.experimental import pallas as pl
from jax.experimental.pallas import tpu as pltpu


# ---------------------------------------------------------------------------
# Fused kernel: processes one image per grid step; activations never leave VMEM.
# ---------------------------------------------------------------------------
def _conv_set_kernel(
    x_ref,                                   # (H*W, C_in)            VMEM
    w1_ref, s1_ref, b1_ref,                  # 1x1: (Cin,Cout) (1,Cout) (1,Cout)
    w2_ref, s2_ref, b2_ref,                  # 3x3: (9*Cout,Cin) (1,Cin) (1,Cin)
    w3_ref, s3_ref, b3_ref,                  # 1x1
    w4_ref, s4_ref, b4_ref,                  # 3x3
    w5_ref, s5_ref, b5_ref,                  # 1x1
    alpha_ref,                               # (5,) f32               SMEM
    o_ref,                                   # (H*W, C_out)           VMEM
    xpad_ref,                                # (H+2, W+2, C3)         VMEM scratch
    col_ref,                                 # (H*W, 9*C3)            VMEM scratch
    *, H, W,
):
    def bn_prelu(y, s_ref, b_ref, idx):
        y = y * s_ref[...] + b_ref[...]      # folded eval-mode BatchNorm2d
        a = alpha_ref[idx]                   # PReLU scalar weight (SMEM read)
        return jnp.where(y > 0, y, a * y)

    def conv1x1(act, w_ref, s_ref, b_ref, idx):
        y = jnp.dot(act, w_ref[...], preferred_element_type=jnp.float32)
        return bn_prelu(y, s_ref, b_ref, idx)

    def conv3x3(act, w_ref, s_ref, b_ref, idx):
        c = act.shape[-1]
        # Zero-padded (H+2, W+2, C) image built directly in VMEM (padding=1);
        # no HBM pad round-trip.
        xpad_ref[...] = jnp.zeros_like(xpad_ref)
        xpad_ref[1:H + 1, 1:W + 1, :] = act.reshape(H, W, c)
        # im2col tile (H*W, 9*C): one MXU contraction with K = 9*C instead of
        # nine skinny K=C matmuls.
        for k in range(9):                   # statically unrolled 3x3 taps
            ky, kx = k // 3, k % 3
            col_ref[:, k * c:(k + 1) * c] = (
                xpad_ref[ky:ky + H, kx:kx + W, :].reshape(H * W, c))
        y = jnp.dot(col_ref[...], w_ref[...], preferred_element_type=jnp.float32)
        return bn_prelu(y, s_ref, b_ref, idx)

    act = x_ref[...]                                   # (H*W, C_in)
    act = conv1x1(act, w1_ref, s1_ref, b1_ref, 0)      # C_in  -> C_out, 1x1
    act = conv3x3(act, w2_ref, s2_ref, b2_ref, 1)      # C_out -> C_in,  3x3 p=1
    act = conv1x1(act, w3_ref, s3_ref, b3_ref, 2)      # C_in  -> C_out, 1x1
    act = conv3x3(act, w4_ref, s4_ref, b4_ref, 3)      # C_out -> C_in,  3x3 p=1
    act = conv1x1(act, w5_ref, s5_ref, b5_ref, 4)      # C_in  -> C_out, 1x1
    o_ref[...] = act


# ---------------------------------------------------------------------------
# Wrapper: layout plumbing + single pallas_call
# ---------------------------------------------------------------------------
def convolutional_set_forward(x_nchw, params):
    """(N, C_in, H, W) f32 -> (N, C_out, H, W) f32, fused ConvolutionalSet."""
    N, Cin, H, W = x_nchw.shape
    layers = params["layers"]
    alphas = params["alphas"]                        # (5,) f32
    c_final = layers[-1]["w"].shape[-1]              # output_channels
    c3 = layers[1]["w"].shape[0] // 9                # channels feeding 3x3 convs

    # NCHW -> (N, H*W, C): channel axis minor (lane dim) inside the kernel.
    x = jnp.transpose(x_nchw, (0, 2, 3, 1)).reshape(N, H * W, Cin)

    # Per-layer operands in kernel-argument order: (w, scale, shift) x 5.
    operands, op_specs = [], []
    for p in layers:
        for a in (p["w"], p["scale"].reshape(1, -1), p["shift"].reshape(1, -1)):
            operands.append(a)
            op_specs.append(
                pl.BlockSpec(a.shape, lambda n, nd=a.ndim: (0,) * nd))

    # Advisory cost estimate for XLA scheduling around the custom call.
    M = N * H * W
    flops = 0
    param_bytes = alphas.size * 4
    for p in layers:
        K, Co = p["w"].shape
        flops += 2 * M * K * Co
        param_bytes += 4 * (p["w"].size + p["scale"].size + p["shift"].size)
    bytes_accessed = int(x.size * 4 + M * c_final * 4 + param_bytes)

    out = pl.pallas_call(
        functools.partial(_conv_set_kernel, H=H, W=W),
        out_shape=jax.ShapeDtypeStruct((N, H * W, c_final), jnp.float32),
        grid_spec=pltpu.PrefetchScalarGridSpec(
            num_scalar_prefetch=0,
            grid=(N,),
            in_specs=(
                [pl.BlockSpec((None, H * W, Cin), lambda n: (n, 0, 0))]
                + op_specs
                + [pl.BlockSpec(memory_space=pltpu.MemorySpace.SMEM)]),
            out_specs=pl.BlockSpec((None, H * W, c_final), lambda n: (n, 0, 0)),
            scratch_shapes=[
                pltpu.VMEM((H + 2, W + 2, c3), jnp.float32),   # padded image
                pltpu.VMEM((H * W, 9 * c3), jnp.float32),      # im2col tile
            ]),
        compiler_params=pltpu.CompilerParams(
            dimension_semantics=("parallel",),                 # 2 TCs on v7x
            vmem_limit_bytes=32 * 1024 * 1024),
        cost_estimate=pl.CostEstimate(
            flops=flops, transcendentals=0, bytes_accessed=bytes_accessed),
    )(x, *operands, alphas)

    return jnp.transpose(out.reshape(N, H, W, c_final), (0, 3, 1, 2))


# ---------------------------------------------------------------------------
# Parameter init (deterministic, synthetic) — BatchNorm folded (eval mode)
# ---------------------------------------------------------------------------
def init_conv_layer(key, cin, cout, ksize):
    kw, kg, kb, km, kv = jax.random.split(key, 5)
    if ksize == 1:
        w = jax.random.normal(kw, (cin, cout), jnp.float32) * 0.2       # (Cin, Cout)
    else:
        # HWIO taps flattened tap-major -> (9*Cin, Cout); matches the kernel's
        # im2col column order (k = ky*3 + kx, then ci).
        w = jax.random.normal(kw, (3, 3, cin, cout), jnp.float32) * 0.1
        w = w.reshape(9 * cin, cout)
    gamma = 1.0 + 0.1 * jax.random.normal(kg, (cout,), jnp.float32)
    beta = 0.1 * jax.random.normal(kb, (cout,), jnp.float32)
    running_mean = 0.1 * jax.random.normal(km, (cout,), jnp.float32)
    running_var = 1.0 + 0.1 * jnp.abs(jax.random.normal(kv, (cout,), jnp.float32))
    eps = 1e-5
    scale = gamma / jnp.sqrt(running_var + eps)      # BatchNorm2d eval-mode fold
    shift = beta - running_mean * scale
    return dict(w=w, scale=scale, shift=shift, ksize=ksize)


# ---------------------------------------------------------------------------
# Pure-JAX reference (for correctness check)
# ---------------------------------------------------------------------------
def reference_forward(x_nchw, params):
    x = jnp.transpose(x_nchw, (0, 2, 3, 1))
    alphas = params["alphas"]
    for i, p in enumerate(params["layers"]):
        if p["ksize"] == 1:
            w = p["w"].reshape(1, 1, *p["w"].shape)
            pad = "VALID"
        else:
            cin, cout = p["w"].shape[0] // 9, p["w"].shape[1]
            w = p["w"].reshape(3, 3, cin, cout)
            pad = "SAME"
        y = jax.lax.conv_general_dilated(
            x, w, (1, 1), pad,
            dimension_numbers=("NHWC", "HWIO", "NHWC"),
            precision=jax.lax.Precision.HIGHEST)
        y = y * p["scale"] + p["shift"]
        x = jnp.where(y > 0, y, alphas[i] * y)
    return jnp.transpose(x, (0, 3, 1, 2))


# ---------------------------------------------------------------------------
if __name__ == "__main__":
    key = jax.random.PRNGKey(0)
    kx, k1, k2, k3, k4, k5 = jax.random.split(key, 6)

    input_channels, output_channels = 4, 8
    N, H, W = 2, 16, 16
    x = jax.random.normal(kx, (N, input_channels, H, W), jnp.float32)

    # ConvolutionalSet: 1x1(Cin->Cout), 3x3(Cout->Cin), 1x1(Cin->Cout),
    #                   3x3(Cout->Cin), 1x1(Cin->Cout)
    specs = [(input_channels, output_channels, 1),
             (output_channels, input_channels, 3),
             (input_channels, output_channels, 1),
             (output_channels, input_channels, 3),
             (input_channels, output_channels, 1)]
    layers = [init_conv_layer(k, ci, co, ks)
              for k, (ci, co, ks) in zip([k1, k2, k3, k4, k5], specs)]
    params = dict(layers=layers,
                  alphas=jnp.full((5,), 0.25, jnp.float32))   # nn.PReLU() default

    fwd = jax.jit(convolutional_set_forward)
    out = jax.block_until_ready(fwd(x, params))
    assert out.shape == (N, output_channels, H, W), out.shape
    assert out.dtype == jnp.float32

    ref = jax.block_until_ready(reference_forward(x, params))
    max_err = float(jnp.max(jnp.abs(out - ref)))
    assert jnp.allclose(out, ref, atol=2e-3, rtol=2e-3), max_err

    print("KERNEL_OK")
</pallas_src>

<mosaic_0001>
module attributes {stable_mosaic.version = 11 : i64} {
  func.func @_conv_set_kernel(%arg0: i32, %arg1: memref<1x256x4xf32, #tpu.memory_space<vmem>>, %arg2: memref<4x8xf32, #tpu.memory_space<vmem>>, %arg3: memref<1x8xf32, #tpu.memory_space<vmem>>, %arg4: memref<1x8xf32, #tpu.memory_space<vmem>>, %arg5: memref<72x4xf32, #tpu.memory_space<vmem>>, %arg6: memref<1x4xf32, #tpu.memory_space<vmem>>, %arg7: memref<1x4xf32, #tpu.memory_space<vmem>>, %arg8: memref<4x8xf32, #tpu.memory_space<vmem>>, %arg9: memref<1x8xf32, #tpu.memory_space<vmem>>, %arg10: memref<1x8xf32, #tpu.memory_space<vmem>>, %arg11: memref<72x4xf32, #tpu.memory_space<vmem>>, %arg12: memref<1x4xf32, #tpu.memory_space<vmem>>, %arg13: memref<1x4xf32, #tpu.memory_space<vmem>>, %arg14: memref<4x8xf32, #tpu.memory_space<vmem>>, %arg15: memref<1x8xf32, #tpu.memory_space<vmem>>, %arg16: memref<1x8xf32, #tpu.memory_space<vmem>>, %arg17: memref<5xf32, #tpu.memory_space<smem>>, %arg18: memref<1x256x8xf32, #tpu.memory_space<vmem>>, %arg19: memref<18x18x8xf32, #tpu.memory_space<vmem>>, %arg20: memref<256x72xf32, #tpu.memory_space<vmem>>) attributes {dimension_semantics = [#tpu.dimension_semantics<parallel>], iteration_bounds = array<i64: 2>, scalar_prefetch = 0 : i64, scratch_operands = 2 : i64, tpu.core_type = #tpu.core_type<tc>, window_params = [{transform_indices = @transform_0, window_bounds = array<i64: 1, 256, 4>}, {pipeline_mode = #tpu.pipeline_mode<synchronous>, transform_indices = @transform_1, window_bounds = array<i64: 4, 8>}, {pipeline_mode = #tpu.pipeline_mode<synchronous>, transform_indices = @transform_2, window_bounds = array<i64: 1, 8>}, {pipeline_mode = #tpu.pipeline_mode<synchronous>, transform_indices = @transform_3, window_bounds = array<i64: 1, 8>}, {pipeline_mode = #tpu.pipeline_mode<synchronous>, transform_indices = @transform_4, window_bounds = array<i64: 72, 4>}, {pipeline_mode = #tpu.pipeline_mode<synchronous>, transform_indices = @transform_5, window_bounds = array<i64: 1, 4>}, {pipeline_mode = #tpu.pipeline_mode<synchronous>, transform_indices = @transform_6, window_bounds = array<i64: 1, 4>}, {pipeline_mode = #tpu.pipeline_mode<synchronous>, transform_indices = @transform_7, window_bounds = array<i64: 4, 8>}, {pipeline_mode = #tpu.pipeline_mode<synchronous>, transform_indices = @transform_8, window_bounds = array<i64: 1, 8>}, {pipeline_mode = #tpu.pipeline_mode<synchronous>, transform_indices = @transform_9, window_bounds = array<i64: 1, 8>}, {pipeline_mode = #tpu.pipeline_mode<synchronous>, transform_indices = @transform_10, window_bounds = array<i64: 72, 4>}, {pipeline_mode = #tpu.pipeline_mode<synchronous>, transform_indices = @transform_11, window_bounds = array<i64: 1, 4>}, {pipeline_mode = #tpu.pipeline_mode<synchronous>, transform_indices = @transform_12, window_bounds = array<i64: 1, 4>}, {pipeline_mode = #tpu.pipeline_mode<synchronous>, transform_indices = @transform_13, window_bounds = array<i64: 4, 8>}, {pipeline_mode = #tpu.pipeline_mode<synchronous>, transform_indices = @transform_14, window_bounds = array<i64: 1, 8>}, {pipeline_mode = #tpu.pipeline_mode<synchronous>, transform_indices = @transform_15, window_bounds = array<i64: 1, 8>}, {transform_indices = @transform_16, window_bounds = array<i64: 5>}, {transform_indices = @transform_17, window_bounds = array<i64: 1, 256, 8>}]} {
    %c0 = arith.constant 0 : index
    %c0_0 = arith.constant 0 : index
    %c0_1 = arith.constant 0 : index
    %0 = vector.load %arg1[%c0, %c0_0, %c0_1] : memref<1x256x4xf32, #tpu.memory_space<vmem>>, vector<1x256x4xf32>
    %1 = vector.shape_cast %0 : vector<1x256x4xf32> to vector<256x4xf32>
    %c0_2 = arith.constant 0 : index
    %c0_3 = arith.constant 0 : index
    %2 = vector.load %arg2[%c0_2, %c0_3] : memref<4x8xf32, #tpu.memory_space<vmem>>, vector<4x8xf32>
    %cst = arith.constant dense<0.000000e+00> : vector<256x8xf32>
    %3 = tpu.matmul %1, %2, %cst {dimension_numbers = #tpu.dot_dimension_numbers<[1], [0], [0], [1], [0, 0, 1, 1], [], []>} : vector<256x4xf32>, vector<4x8xf32>, vector<256x8xf32> -> vector<256x8xf32>
    %c0_4 = arith.constant 0 : index
    %c0_5 = arith.constant 0 : index
    %4 = vector.load %arg3[%c0_4, %c0_5] : memref<1x8xf32, #tpu.memory_space<vmem>>, vector<1x8xf32>
    %5 = vector.broadcast %4 : vector<1x8xf32> to vector<256x8xf32>
    %6 = arith.mulf %3, %5 : vector<256x8xf32>
    %c0_6 = arith.constant 0 : index
    %c0_7 = arith.constant 0 : index
    %7 = vector.load %arg4[%c0_6, %c0_7] : memref<1x8xf32, #tpu.memory_space<vmem>>, vector<1x8xf32>
    %8 = vector.broadcast %7 : vector<1x8xf32> to vector<256x8xf32>
    %9 = arith.addf %6, %8 : vector<256x8xf32>
    %c0_8 = arith.constant 0 : index
    %10 = memref.load %arg17[%c0_8] : memref<5xf32, #tpu.memory_space<smem>>
    %cst_9 = arith.constant 0.000000e+00 : f32
    %11 = vector.broadcast %cst_9 : f32 to vector<256x8xf32>
    %12 = arith.cmpf ogt, %9, %11 : vector<256x8xf32>
    %13 = vector.broadcast %10 : f32 to vector<256x8xf32>
    %14 = arith.mulf %13, %9 : vector<256x8xf32>
    %15 = arith.select %12, %9, %14 : vector<256x8xi1>, vector<256x8xf32>
    %cst_10 = arith.constant 0.000000e+00 : f32
    %16 = vector.broadcast %cst_10 : f32 to vector<18x18x8xf32>
    %c0_11 = arith.constant 0 : index
    %c0_12 = arith.constant 0 : index
    %c0_13 = arith.constant 0 : index
    %17 = vector.load %arg19[%c0_11, %c0_12, %c0_13] : memref<18x18x8xf32, #tpu.memory_space<vmem>>, vector<18x18x8xf32>
    tpu.vector_store %arg19[%c0_11, %c0_12, %c0_13], %16 {strides = array<i32>} : memref<18x18x8xf32, #tpu.memory_space<vmem>>, vector<18x18x8xf32>,
    %18 = vector.shape_cast %15 : vector<256x8xf32> to vector<16x16x8xf32>
    %c1 = arith.constant 1 : index
    %c1_14 = arith.constant 1 : index
    %c0_15 = arith.constant 0 : index
    %19 = vector.load %arg19[%c1, %c1_14, %c0_15] : memref<18x18x8xf32, #tpu.memory_space<vmem>>, vector<16x16x8xf32>
    tpu.vector_store %arg19[%c1, %c1_14, %c0_15], %18 {strides = array<i32>} : memref<18x18x8xf32, #tpu.memory_space<vmem>>, vector<16x16x8xf32>,
    %c0_16 = arith.constant 0 : index
    %c0_17 = arith.constant 0 : index
    %c0_18 = arith.constant 0 : index
    %20 = vector.load %arg19[%c0_16, %c0_17, %c0_18] : memref<18x18x8xf32, #tpu.memory_space<vmem>>, vector<16x16x8xf32>
    %21 = vector.shape_cast %20 : vector<16x16x8xf32> to vector<256x8xf32>
    %c0_19 = arith.constant 0 : index
    %c0_20 = arith.constant 0 : index
    %22 = vector.load %arg20[%c0_19, %c0_20] : memref<256x72xf32, #tpu.memory_space<vmem>>, vector<256x8xf32>
    tpu.vector_store %arg20[%c0_19, %c0_20], %21 {strides = array<i32>} : memref<256x72xf32, #tpu.memory_space<vmem>>, vector<256x8xf32>,
    %c0_21 = arith.constant 0 : index
    %c1_22 = arith.constant 1 : index
    %c0_23 = arith.constant 0 : index
    %23 = vector.load %arg19[%c0_21, %c1_22, %c0_23] : memref<18x18x8xf32, #tpu.memory_space<vmem>>, vector<16x16x8xf32>
    %24 = vector.shape_cast %23 : vector<16x16x8xf32> to vector<256x8xf32>
    %c0_24 = arith.constant 0 : index
    %c8 = arith.constant 8 : index
    %25 = vector.load %arg20[%c0_24, %c8] : memref<256x72xf32, #tpu.memory_space<vmem>>, vector<256x8xf32>
    tpu.vector_store %arg20[%c0_24, %c8], %24 {strides = array<i32>} : memref<256x72xf32, #tpu.memory_space<vmem>>, vector<256x8xf32>,
    %c0_25 = arith.constant 0 : index
    %c2 = arith.constant 2 : index
    %c0_26 = arith.constant 0 : index
    %26 = vector.load %arg19[%c0_25, %c2, %c0_26] : memref<18x18x8xf32, #tpu.memory_space<vmem>>, vector<16x16x8xf32>
    %27 = vector.shape_cast %26 : vector<16x16x8xf32> to vector<256x8xf32>
    %c0_27 = arith.constant 0 : index
    %c16 = arith.constant 16 : index
    %28 = vector.load %arg20[%c0_27, %c16] : memref<256x72xf32, #tpu.memory_space<vmem>>, vector<256x8xf32>
    tpu.vector_store %arg20[%c0_27, %c16], %27 {strides = array<i32>} : memref<256x72xf32, #tpu.memory_space<vmem>>, vector<256x8xf32>,
    %c1_28 = arith.constant 1 : index
    %c0_29 = arith.constant 0 : index
    %c0_30 = arith.constant 0 : index
    %29 = vector.load %arg19[%c1_28, %c0_29, %c0_30] : memref<18x18x8xf32, #tpu.memory_space<vmem>>, vector<16x16x8xf32>
    %30 = vector.shape_cast %29 : vector<16x16x8xf32> to vector<256x8xf32>
    %c0_31 = arith.constant 0 : index
    %c24 = arith.constant 24 : index
    %31 = vector.load %arg20[%c0_31, %c24] : memref<256x72xf32, #tpu.memory_space<vmem>>, vector<256x8xf32>
    tpu.vector_store %arg20[%c0_31, %c24], %30 {strides = array<i32>} : memref<256x72xf32, #tpu.memory_space<vmem>>, vector<256x8xf32>,
    %c1_32 = arith.constant 1 : index
    %c1_33 = arith.constant 1 : index
    %c0_34 = arith.constant 0 : index
    %32 = vector.load %arg19[%c1_32, %c1_33, %c0_34] : memref<18x18x8xf32, #tpu.memory_space<vmem>>, vector<16x16x8xf32>
    %33 = vector.shape_cast %32 : vector<16x16x8xf32> to vector<256x8xf32>
    %c0_35 = arith.constant 0 : index
    %c32 = arith.constant 32 : index
    %34 = vector.load %arg20[%c0_35, %c32] : memref<256x72xf32, #tpu.memory_space<vmem>>, vector<256x8xf32>
    tpu.vector_store %arg20[%c0_35, %c32], %33 {strides = array<i32>} : memref<256x72xf32, #tpu.memory_space<vmem>>, vector<256x8xf32>,
    %c1_36 = arith.constant 1 : index
    %c2_37 = arith.constant 2 : index
    %c0_38 = arith.constant 0 : index
    %35 = vector.load %arg19[%c1_36, %c2_37, %c0_38] : memref<18x18x8xf32, #tpu.memory_space<vmem>>, vector<16x16x8xf32>
    %36 = vector.shape_cast %35 : vector<16x16x8xf32> to vector<256x8xf32>
    %c0_39 = arith.constant 0 : index
    %c40 = arith.constant 40 : index
    %37 = vector.load %arg20[%c0_39, %c40] : memref<256x72xf32, #tpu.memory_space<vmem>>, vector<256x8xf32>
    tpu.vector_store %arg20[%c0_39, %c40], %36 {strides = array<i32>} : memref<256x72xf32, #tpu.memory_space<vmem>>, vector<256x8xf32>,
    %c2_40 = arith.constant 2 : index
    %c0_41 = arith.constant 0 : index
    %c0_42 = arith.constant 0 : index
    %38 = vector.load %arg19[%c2_40, %c0_41, %c0_42] : memref<18x18x8xf32, #tpu.memory_space<vmem>>, vector<16x16x8xf32>
    %39 = vector.shape_cast %38 : vector<16x16x8xf32> to vector<256x8xf32>
    %c0_43 = arith.constant 0 : index
    %c48 = arith.constant 48 : index
    %40 = vector.load %arg20[%c0_43, %c48] : memref<256x72xf32, #tpu.memory_space<vmem>>, vector<256x8xf32>
    tpu.vector_store %arg20[%c0_43, %c48], %39 {strides = array<i32>} : memref<256x72xf32, #tpu.memory_space<vmem>>, vector<256x8xf32>,
    %c2_44 = arith.constant 2 : index
    %c1_45 = arith.constant 1 : index
    %c0_46 = arith.constant 0 : index
    %41 = vector.load %arg19[%c2_44, %c1_45, %c0_46] : memref<18x18x8xf32, #tpu.memory_space<vmem>>, vector<16x16x8xf32>
    %42 = vector.shape_cast %41 : vector<16x16x8xf32> to vector<256x8xf32>
    %c0_47 = arith.constant 0 : index
    %c56 = arith.constant 56 : index
    %43 = vector.load %arg20[%c0_47, %c56] : memref<256x72xf32, #tpu.memory_space<vmem>>, vector<256x8xf32>
    tpu.vector_store %arg20[%c0_47, %c56], %42 {strides = array<i32>} : memref<256x72xf32, #tpu.memory_space<vmem>>, vector<256x8xf32>,
    %c2_48 = arith.constant 2 : index
    %c2_49 = arith.constant 2 : index
    %c0_50 = arith.constant 0 : index
    %44 = vector.load %arg19[%c2_48, %c2_49, %c0_50] : memref<18x18x8xf32, #tpu.memory_space<vmem>>, vector<16x16x8xf32>
    %45 = vector.shape_cast %44 : vector<16x16x8xf32> to vector<256x8xf32>
    %c0_51 = arith.constant 0 : index
    %c64 = arith.constant 64 : index
    %46 = vector.load %arg20[%c0_51, %c64] : memref<256x72xf32, #tpu.memory_space<vmem>>, vector<256x8xf32>
    tpu.vector_store %arg20[%c0_51, %c64], %45 {strides = array<i32>} : memref<256x72xf32, #tpu.memory_space<vmem>>, vector<256x8xf32>,
    %c0_52 = arith.constant 0 : index
    %c0_53 = arith.constant 0 : index
    %47 = vector.load %arg20[%c0_52, %c0_53] : memref<256x72xf32, #tpu.memory_space<vmem>>, vector<256x72xf32>
    %c0_54 = arith.constant 0 : index
    %c0_55 = arith.constant 0 : index
    %48 = vector.load %arg5[%c0_54, %c0_55] : memref<72x4xf32, #tpu.memory_space<vmem>>, vector<72x4xf32>
    %cst_56 = arith.constant dense<0.000000e+00> : vector<256x4xf32>
    %49 = tpu.matmul %47, %48, %cst_56 {dimension_numbers = #tpu.dot_dimension_numbers<[1], [0], [0], [1], [0, 0, 1, 1], [], []>} : vector<256x72xf32>, vector<72x4xf32>, vector<256x4xf32> -> vector<256x4xf32>
    %c0_57 = arith.constant 0 : index
    %c0_58 = arith.constant 0 : index
    %50 = vector.load %arg6[%c0_57, %c0_58] : memref<1x4xf32, #tpu.memory_space<vmem>>, vector<1x4xf32>
    %51 = vector.broadcast %50 : vector<1x4xf32> to vector<256x4xf32>
    %52 = arith.mulf %49, %51 : vector<256x4xf32>
    %c0_59 = arith.constant 0 : index
    %c0_60 = arith.constant 0 : index
    %53 = vector.load %arg7[%c0_59, %c0_60] : memref<1x4xf32, #tpu.memory_space<vmem>>, vector<1x4xf32>
    %54 = vector.broadcast %53 : vector<1x4xf32> to vector<256x4xf32>
    %55 = arith.addf %52, %54 : vector<256x4xf32>
    %c1_61 = arith.constant 1 : index
    %56 = memref.load %arg17[%c1_61] : memref<5xf32, #tpu.memory_space<smem>>
    %cst_62 = arith.constant 0.000000e+00 : f32
    %57 = vector.broadcast %cst_62 : f32 to vector<256x4xf32>
    %58 = arith.cmpf ogt, %55, %57 : vector<256x4xf32>
    %59 = vector.broadcast %56 : f32 to vector<256x4xf32>
    %60 = arith.mulf %59, %55 : vector<256x4xf32>
    %61 = arith.select %58, %55, %60 : vector<256x4xi1>, vector<256x4xf32>
    %c0_63 = arith.constant 0 : index
    %c0_64 = arith.constant 0 : index
    %62 = vector.load %arg8[%c0_63, %c0_64] : memref<4x8xf32, #tpu.memory_space<vmem>>, vector<4x8xf32>
    %cst_65 = arith.constant dense<0.000000e+00> : vector<256x8xf32>
    %63 = tpu.matmul %61, %62, %cst_65 {dimension_numbers = #tpu.dot_dimension_numbers<[1], [0], [0], [1], [0, 0, 1, 1], [], []>} : vector<256x4xf32>, vector<4x8xf32>, vector<256x8xf32> -> vector<256x8xf32>
    %c0_66 = arith.constant 0 : index
    %c0_67 = arith.constant 0 : index
    %64 = vector.load %arg9[%c0_66, %c0_67] : memref<1x8xf32, #tpu.memory_space<vmem>>, vector<1x8xf32>
    %65 = vector.broadcast %64 : vector<1x8xf32> to vector<256x8xf32>
    %66 = arith.mulf %63, %65 : vector<256x8xf32>
    %c0_68 = arith.constant 0 : index
    %c0_69 = arith.constant 0 : index
    %67 = vector.load %arg10[%c0_68, %c0_69] : memref<1x8xf32, #tpu.memory_space<vmem>>, vector<1x8xf32>
    %68 = vector.broadcast %67 : vector<1x8xf32> to vector<256x8xf32>
    %69 = arith.addf %66, %68 : vector<256x8xf32>
    %c2_70 = arith.constant 2 : index
    %70 = memref.load %arg17[%c2_70] : memref<5xf32, #tpu.memory_space<smem>>
    %cst_71 = arith.constant 0.000000e+00 : f32
    %71 = vector.broadcast %cst_71 : f32 to vector<256x8xf32>
    %72 = arith.cmpf ogt, %69, %71 : vector<256x8xf32>
    %73 = vector.broadcast %70 : f32 to vector<256x8xf32>
    %74 = arith.mulf %73, %69 : vector<256x8xf32>
    %75 = arith.select %72, %69, %74 : vector<256x8xi1>, vector<256x8xf32>
    %cst_72 = arith.constant 0.000000e+00 : f32
    %76 = vector.broadcast %cst_72 : f32 to vector<18x18x8xf32>
    %c0_73 = arith.constant 0 : index
    %c0_74 = arith.constant 0 : index
    %c0_75 = arith.constant 0 : index
    %77 = vector.load %arg19[%c0_73, %c0_74, %c0_75] : memref<18x18x8xf32, #tpu.memory_space<vmem>>, vector<18x18x8xf32>
    tpu.vector_store %arg19[%c0_73, %c0_74, %c0_75], %76 {strides = array<i32>} : memref<18x18x8xf32, #tpu.memory_space<vmem>>, vector<18x18x8xf32>,
    %78 = vector.shape_cast %75 : vector<256x8xf32> to vector<16x16x8xf32>
    %c1_76 = arith.constant 1 : index
    %c1_77 = arith.constant 1 : index
    %c0_78 = arith.constant 0 : index
    %79 = vector.load %arg19[%c1_76, %c1_77, %c0_78] : memref<18x18x8xf32, #tpu.memory_space<vmem>>, vector<16x16x8xf32>
    tpu.vector_store %arg19[%c1_76, %c1_77, %c0_78], %78 {strides = array<i32>} : memref<18x18x8xf32, #tpu.memory_space<vmem>>, vector<16x16x8xf32>,
    %c0_79 = arith.constant 0 : index
    %c0_80 = arith.constant 0 : index
    %c0_81 = arith.constant 0 : index
    %80 = vector.load %arg19[%c0_79, %c0_80, %c0_81] : memref<18x18x8xf32, #tpu.memory_space<vmem>>, vector<16x16x8xf32>
    %81 = vector.shape_cast %80 : vector<16x16x8xf32> to vector<256x8xf32>
    %c0_82 = arith.constant 0 : index
    %c0_83 = arith.constant 0 : index
    %82 = vector.load %arg20[%c0_82, %c0_83] : memref<256x72xf32, #tpu.memory_space<vmem>>, vector<256x8xf32>
    tpu.vector_store %arg20[%c0_82, %c0_83], %81 {strides = array<i32>} : memref<256x72xf32, #tpu.memory_space<vmem>>, vector<256x8xf32>,
    %c0_84 = arith.constant 0 : index
    %c1_85 = arith.constant 1 : index
    %c0_86 = arith.constant 0 : index
    %83 = vector.load %arg19[%c0_84, %c1_85, %c0_86] : memref<18x18x8xf32, #tpu.memory_space<vmem>>, vector<16x16x8xf32>
    %84 = vector.shape_cast %83 : vector<16x16x8xf32> to vector<256x8xf32>
    %c0_87 = arith.constant 0 : index
    %c8_88 = arith.constant 8 : index
    %85 = vector.load %arg20[%c0_87, %c8_88] : memref<256x72xf32, #tpu.memory_space<vmem>>, vector<256x8xf32>
    tpu.vector_store %arg20[%c0_87, %c8_88], %84 {strides = array<i32>} : memref<256x72xf32, #tpu.memory_space<vmem>>, vector<256x8xf32>,
    %c0_89 = arith.constant 0 : index
    %c2_90 = arith.constant 2 : index
    %c0_91 = arith.constant 0 : index
    %86 = vector.load %arg19[%c0_89, %c2_90, %c0_91] : memref<18x18x8xf32, #tpu.memory_space<vmem>>, vector<16x16x8xf32>
    %87 = vector.shape_cast %86 : vector<16x16x8xf32> to vector<256x8xf32>
    %c0_92 = arith.constant 0 : index
    %c16_93 = arith.constant 16 : index
    %88 = vector.load %arg20[%c0_92, %c16_93] : memref<256x72xf32, #tpu.memory_space<vmem>>, vector<256x8xf32>
    tpu.vector_store %arg20[%c0_92, %c16_93], %87 {strides = array<i32>} : memref<256x72xf32, #tpu.memory_space<vmem>>, vector<256x8xf32>,
    %c1_94 = arith.constant 1 : index
    %c0_95 = arith.constant 0 : index
    %c0_96 = arith.constant 0 : index
    %89 = vector.load %arg19[%c1_94, %c0_95, %c0_96] : memref<18x18x8xf32, #tpu.memory_space<vmem>>, vector<16x16x8xf32>
    %90 = vector.shape_cast %89 : vector<16x16x8xf32> to vector<256x8xf32>
    %c0_97 = arith.constant 0 : index
    %c24_98 = arith.constant 24 : index
    %91 = vector.load %arg20[%c0_97, %c24_98] : memref<256x72xf32, #tpu.memory_space<vmem>>, vector<256x8xf32>
    tpu.vector_store %arg20[%c0_97, %c24_98], %90 {strides = array<i32>} : memref<256x72xf32, #tpu.memory_space<vmem>>, vector<256x8xf32>,
    %c1_99 = arith.constant 1 : index
    %c1_100 = arith.constant 1 : index
    %c0_101 = arith.constant 0 : index
    %92 = vector.load %arg19[%c1_99, %c1_100, %c0_101] : memref<18x18x8xf32, #tpu.memory_space<vmem>>, vector<16x16x8xf32>
    %93 = vector.shape_cast %92 : vector<16x16x8xf32> to vector<256x8xf32>
    %c0_102 = arith.constant 0 : index
    %c32_103 = arith.constant 32 : index
    %94 = vector.load %arg20[%c0_102, %c32_103] : memref<256x72xf32, #tpu.memory_space<vmem>>, vector<256x8xf32>
    tpu.vector_store %arg20[%c0_102, %c32_103], %93 {strides = array<i32>} : memref<256x72xf32, #tpu.memory_space<vmem>>, vector<256x8xf32>,
    %c1_104 = arith.constant 1 : index
    %c2_105 = arith.constant 2 : index
    %c0_106 = arith.constant 0 : index
    %95 = vector.load %arg19[%c1_104, %c2_105, %c0_106] : memref<18x18x8xf32, #tpu.memory_space<vmem>>, vector<16x16x8xf32>
    %96 = vector.shape_cast %95 : vector<16x16x8xf32> to vector<256x8xf32>
    %c0_107 = arith.constant 0 : index
    %c40_108 = arith.constant 40 : index
    %97 = vector.load %arg20[%c0_107, %c40_108] : memref<256x72xf32, #tpu.memory_space<vmem>>, vector<256x8xf32>
    tpu.vector_store %arg20[%c0_107, %c40_108], %96 {strides = array<i32>} : memref<256x72xf32, #tpu.memory_space<vmem>>, vector<256x8xf32>,
    %c2_109 = arith.constant 2 : index
    %c0_110 = arith.constant 0 : index
    %c0_111 = arith.constant 0 : index
    %98 = vector.load %arg19[%c2_109, %c0_110, %c0_111] : memref<18x18x8xf32, #tpu.memory_space<vmem>>, vector<16x16x8xf32>
    %99 = vector.shape_cast %98 : vector<16x16x8xf32> to vector<256x8xf32>
    %c0_112 = arith.constant 0 : index
    %c48_113 = arith.constant 48 : index
    %100 = vector.load %arg20[%c0_112, %c48_113] : memref<256x72xf32, #tpu.memory_space<vmem>>, vector<256x8xf32>
    tpu.vector_store %arg20[%c0_112, %c48_113], %99 {strides = array<i32>} : memref<256x72xf32, #tpu.memory_space<vmem>>, vector<256x8xf32>,
    %c2_114 = arith.constant 2 : index
    %c1_115 = arith.constant 1 : index
    %c0_116 = arith.constant 0 : index
    %101 = vector.load %arg19[%c2_114, %c1_115, %c0_116] : memref<18x18x8xf32, #tpu.memory_space<vmem>>, vector<16x16x8xf32>
    %102 = vector.shape_cast %101 : vector<16x16x8xf32> to vector<256x8xf32>
    %c0_117 = arith.constant 0 : index
    %c56_118 = arith.constant 56 : index
    %103 = vector.load %arg20[%c0_117, %c56_118] : memref<256x72xf32, #tpu.memory_space<vmem>>, vector<256x8xf32>
    tpu.vector_store %arg20[%c0_117, %c56_118], %102 {strides = array<i32>} : memref<256x72xf32, #tpu.memory_space<vmem>>, vector<256x8xf32>,
    %c2_119 = arith.constant 2 : index
    %c2_120 = arith.constant 2 : index
    %c0_121 = arith.constant 0 : index
    %104 = vector.load %arg19[%c2_119, %c2_120, %c0_121] : memref<18x18x8xf32, #tpu.memory_space<vmem>>, vector<16x16x8xf32>
    %105 = vector.shape_cast %104 : vector<16x16x8xf32> to vector<256x8xf32>
    %c0_122 = arith.constant 0 : index
    %c64_123 = arith.constant 64 : index
    %106 = vector.load %arg20[%c0_122, %c64_123] : memref<256x72xf32, #tpu.memory_space<vmem>>, vector<256x8xf32>
    tpu.vector_store %arg20[%c0_122, %c64_123], %105 {strides = array<i32>} : memref<256x72xf32, #tpu.memory_space<vmem>>, vector<256x8xf32>,
    %c0_124 = arith.constant 0 : index
    %c0_125 = arith.constant 0 : index
    %107 = vector.load %arg20[%c0_124, %c0_125] : memref<256x72xf32, #tpu.memory_space<vmem>>, vector<256x72xf32>
    %c0_126 = arith.constant 0 : index
    %c0_127 = arith.constant 0 : index
    %108 = vector.load %arg11[%c0_126, %c0_127] : memref<72x4xf32, #tpu.memory_space<vmem>>, vector<72x4xf32>
    %cst_128 = arith.constant dense<0.000000e+00> : vector<256x4xf32>
    %109 = tpu.matmul %107, %108, %cst_128 {dimension_numbers = #tpu.dot_dimension_numbers<[1], [0], [0], [1], [0, 0, 1, 1], [], []>} : vector<256x72xf32>, vector<72x4xf32>, vector<256x4xf32> -> vector<256x4xf32>
    %c0_129 = arith.constant 0 : index
    %c0_130 = arith.constant 0 : index
    %110 = vector.load %arg12[%c0_129, %c0_130] : memref<1x4xf32, #tpu.memory_space<vmem>>, vector<1x4xf32>
    %111 = vector.broadcast %110 : vector<1x4xf32> to vector<256x4xf32>
    %112 = arith.mulf %109, %111 : vector<256x4xf32>
    %c0_131 = arith.constant 0 : index
    %c0_132 = arith.constant 0 : index
    %113 = vector.load %arg13[%c0_131, %c0_132] : memref<1x4xf32, #tpu.memory_space<vmem>>, vector<1x4xf32>
    %114 = vector.broadcast %113 : vector<1x4xf32> to vector<256x4xf32>
    %115 = arith.addf %112, %114 : vector<256x4xf32>
    %c3 = arith.constant 3 : index
    %116 = memref.load %arg17[%c3] : memref<5xf32, #tpu.memory_space<smem>>
    %cst_133 = arith.constant 0.000000e+00 : f32
    %117 = vector.broadcast %cst_133 : f32 to vector<256x4xf32>
    %118 = arith.cmpf ogt, %115, %117 : vector<256x4xf32>
    %119 = vector.broadcast %116 : f32 to vector<256x4xf32>
    %120 = arith.mulf %119, %115 : vector<256x4xf32>
    %121 = arith.select %118, %115, %120 : vector<256x4xi1>, vector<256x4xf32>
    %c0_134 = arith.constant 0 : index
    %c0_135 = arith.constant 0 : index
    %122 = vector.load %arg14[%c0_134, %c0_135] : memref<4x8xf32, #tpu.memory_space<vmem>>, vector<4x8xf32>
    %cst_136 = arith.constant dense<0.000000e+00> : vector<256x8xf32>
    %123 = tpu.matmul %121, %122, %cst_136 {dimension_numbers = #tpu.dot_dimension_numbers<[1], [0], [0], [1], [0, 0, 1, 1], [], []>} : vector<256x4xf32>, vector<4x8xf32>, vector<256x8xf32> -> vector<256x8xf32>
    %c0_137 = arith.constant 0 : index
    %c0_138 = arith.constant 0 : index
    %124 = vector.load %arg15[%c0_137, %c0_138] : memref<1x8xf32, #tpu.memory_space<vmem>>, vector<1x8xf32>
    %125 = vector.broadcast %124 : vector<1x8xf32> to vector<256x8xf32>
    %126 = arith.mulf %123, %125 : vector<256x8xf32>
    %c0_139 = arith.constant 0 : index
    %c0_140 = arith.constant 0 : index
    %127 = vector.load %arg16[%c0_139, %c0_140] : memref<1x8xf32, #tpu.memory_space<vmem>>, vector<1x8xf32>
    %128 = vector.broadcast %127 : vector<1x8xf32> to vector<256x8xf32>
    %129 = arith.addf %126, %128 : vector<256x8xf32>
    %c4 = arith.constant 4 : index
    %130 = memref.load %arg17[%c4] : memref<5xf32, #tpu.memory_space<smem>>
    %cst_141 = arith.constant 0.000000e+00 : f32
    %131 = vector.broadcast %cst_141 : f32 to vector<256x8xf32>
    %132 = arith.cmpf ogt, %129, %131 : vector<256x8xf32>
    %133 = vector.broadcast %130 : f32 to vector<256x8xf32>
    %134 = arith.mulf %133, %129 : vector<256x8xf32>
    %135 = arith.select %132, %129, %134 : vector<256x8xi1>, vector<256x8xf32>
    %c0_142 = arith.constant 0 : index
    %c0_143 = arith.constant 0 : index
    %c0_144 = arith.constant 0 : index
    %136 = vector.load %arg18[%c0_142, %c0_143, %c0_144] : memref<1x256x8xf32, #tpu.memory_space<vmem>>, vector<1x256x8xf32>
    %137 = vector.shape_cast %136 : vector<1x256x8xf32> to vector<256x8xf32>
    %138 = vector.shape_cast %135 : vector<256x8xf32> to vector<1x256x8xf32>
    tpu.vector_store %arg18[%c0_142, %c0_143, %c0_144], %138 {strides = array<i32>} : memref<1x256x8xf32, #tpu.memory_space<vmem>>, vector<1x256x8xf32>,
    return
  }
  func.func @transform_0(%arg0: i32) -> (i32, i32, i32) {
    %c0_i32 = arith.constant 0 : i32
    %c0_i32_0 = arith.constant 0 : i32
    %c0_i32_1 = arith.constant 0 : i32
    return %arg0, %c0_i32, %c0_i32_0 : i32, i32, i32
  }
  func.func @transform_1(%arg0: i32) -> (i32, i32) {
    %c0_i32 = arith.constant 0 : i32
    %c0_i32_0 = arith.constant 0 : i32
    %c0_i32_1 = arith.constant 0 : i32
    return %c0_i32, %c0_i32_0 : i32, i32
  }
  func.func @transform_2(%arg0: i32) -> (i32, i32) {
    %c0_i32 = arith.constant 0 : i32
    %c0_i32_0 = arith.constant 0 : i32
    %c0_i32_1 = arith.constant 0 : i32
    return %c0_i32, %c0_i32_0 : i32, i32
  }
  func.func @transform_3(%arg0: i32) -> (i32, i32) {
    %c0_i32 = arith.constant 0 : i32
    %c0_i32_0 = arith.constant 0 : i32
    %c0_i32_1 = arith.constant 0 : i32
    return %c0_i32, %c0_i32_0 : i32, i32
  }
  func.func @transform_4(%arg0: i32) -> (i32, i32) {
    %c0_i32 = arith.constant 0 : i32
    %c0_i32_0 = arith.constant 0 : i32
    %c0_i32_1 = arith.constant 0 : i32
    return %c0_i32, %c0_i32_0 : i32, i32
  }
  func.func @transform_5(%arg0: i32) -> (i32, i32) {
    %c0_i32 = arith.constant 0 : i32
    %c0_i32_0 = arith.constant 0 : i32
    %c0_i32_1 = arith.constant 0 : i32
    return %c0_i32, %c0_i32_0 : i32, i32
  }
  func.func @transform_6(%arg0: i32) -> (i32, i32) {
    %c0_i32 = arith.constant 0 : i32
    %c0_i32_0 = arith.constant 0 : i32
    %c0_i32_1 = arith.constant 0 : i32
    return %c0_i32, %c0_i32_0 : i32, i32
  }
  func.func @transform_7(%arg0: i32) -> (i32, i32) {
    %c0_i32 = arith.constant 0 : i32
    %c0_i32_0 = arith.constant 0 : i32
    %c0_i32_1 = arith.constant 0 : i32
    return %c0_i32, %c0_i32_0 : i32, i32
  }
  func.func @transform_8(%arg0: i32) -> (i32, i32) {
    %c0_i32 = arith.constant 0 : i32
    %c0_i32_0 = arith.constant 0 : i32
    %c0_i32_1 = arith.constant 0 : i32
    return %c0_i32, %c0_i32_0 : i32, i32
  }
  func.func @transform_9(%arg0: i32) -> (i32, i32) {
    %c0_i32 = arith.constant 0 : i32
    %c0_i32_0 = arith.constant 0 : i32
    %c0_i32_1 = arith.constant 0 : i32
    return %c0_i32, %c0_i32_0 : i32, i32
  }
  func.func @transform_10(%arg0: i32) -> (i32, i32) {
    %c0_i32 = arith.constant 0 : i32
    %c0_i32_0 = arith.constant 0 : i32
    %c0_i32_1 = arith.constant 0 : i32
    return %c0_i32, %c0_i32_0 : i32, i32
  }
  func.func @transform_11(%arg0: i32) -> (i32, i32) {
    %c0_i32 = arith.constant 0 : i32
    %c0_i32_0 = arith.constant 0 : i32
    %c0_i32_1 = arith.constant 0 : i32
    return %c0_i32, %c0_i32_0 : i32, i32
  }
  func.func @transform_12(%arg0: i32) -> (i32, i32) {
    %c0_i32 = arith.constant 0 : i32
    %c0_i32_0 = arith.constant 0 : i32
    %c0_i32_1 = arith.constant 0 : i32
    return %c0_i32, %c0_i32_0 : i32, i32
  }
  func.func @transform_13(%arg0: i32) -> (i32, i32) {
    %c0_i32 = arith.constant 0 : i32
    %c0_i32_0 = arith.constant 0 : i32
    %c0_i32_1 = arith.constant 0 : i32
    return %c0_i32, %c0_i32_0 : i32, i32
  }
  func.func @transform_14(%arg0: i32) -> (i32, i32) {
    %c0_i32 = arith.constant 0 : i32
    %c0_i32_0 = arith.constant 0 : i32
    %c0_i32_1 = arith.constant 0 : i32
    return %c0_i32, %c0_i32_0 : i32, i32
  }
  func.func @transform_15(%arg0: i32) -> (i32, i32) {
    %c0_i32 = arith.constant 0 : i32
    %c0_i32_0 = arith.constant 0 : i32
    %c0_i32_1 = arith.constant 0 : i32
    return %c0_i32, %c0_i32_0 : i32, i32
  }
  func.func @transform_16(%arg0: i32) -> i32 {
    %c0_i32 = arith.constant 0 : i32
    %c0_i32_0 = arith.constant 0 : i32
    return %c0_i32 : i32
  }
  func.func @transform_17(%arg0: i32) -> (i32, i32, i32) {
    %c0_i32 = arith.constant 0 : i32
    %c0_i32_0 = arith.constant 0 : i32
    %c0_i32_1 = arith.constant 0 : i32
    return %arg0, %c0_i32, %c0_i32_0 : i32, i32, i32
  }
}

</mosaic_0001>

<bundles_post_ra>
// kernel: convolutional_set_forward.1
= control target key start
LH: loop header
LB: loop body
LE: loop exit
PB: predicated region body
PF: predicated region fallthrough
CT: control target
= control target key end

     0   :  { %s10421_s0 = inlined_call_operand.vmem [shape: f32[2,256,4], index: 0, kind: input, shape index: {}]   ;;  %s10422_s1 = inlined_call_operand.vmem [shape: f32[4,8], index: 1, kind: input, shape index: {}]   ;;  %s10423_s2 = inlined_call_operand.vmem [shape: f32[1,8], index: 2, kind: input, shape index: {}]   ;;  %s10424_s3 = inlined_call_operand.vmem [shape: f32[1,8], index: 3, kind: input, shape index: {}]   ;;  %s10425_s4 = inlined_call_operand.vmem [shape: f32[72,4], index: 4, kind: input, shape index: {}]   ;;  %s10426_s5 = inlined_call_operand.vmem [shape: f32[1,4], index: 5, kind: input, shape index: {}]   ;;  %s10427_s6 = inlined_call_operand.vmem [shape: f32[1,4], index: 6, kind: input, shape index: {}]   ;;  %s10428_s7 = inlined_call_operand.vmem [shape: f32[4,8], index: 7, kind: input, shape index: {}]   ;;  %s10429_s8 = inlined_call_operand.vmem [shape: f32[1,8], index: 8, kind: input, shape index: {}]   ;;  %s10430_s9 = inlined_call_operand.vmem [shape: f32[1,8], index: 9, kind: input, shape index: {}]   ;;  %s10431_s10 = inlined_call_operand.vmem [shape: f32[72,4], index: 10, kind: input, shape index: {}]   ;;  %s10432_s11 = inlined_call_operand.vmem [shape: f32[1,4], index: 11, kind: input, shape index: {}]   ;;  %s10433_s12 = inlined_call_operand.vmem [shape: f32[1,4], index: 12, kind: input, shape index: {}]   ;;  %s10434_s13 = inlined_call_operand.vmem [shape: f32[4,8], index: 13, kind: input, shape index: {}]   ;;  %s10435_s14 = inlined_call_operand.vmem [shape: f32[1,8], index: 14, kind: input, shape index: {}]   ;;  %s10436_s15 = inlined_call_operand.vmem [shape: f32[1,8], index: 15, kind: input, shape index: {}]   ;;  %s10437_s16 = inlined_call_operand.vmem [shape: f32[5], index: 16, kind: input, shape index: {}]   ;;  %s10438_s17 = inlined_call_operand.vmem [shape: f32[2,256,8], index: 17, kind: output, shape index: {}]  }
   0x1   :  { %10447 = sst [smem:[#allocation7_spill]] %s10421_s0 }
   0x2   :  { %10448 = sst [smem:[#allocation8_spill]] %s10422_s1 }
   0x3   :  { %22 = vsyncpa [#allocation5], 0  ;;  %s7514_s24 = smov 0  }
   0x4 LB: > { %s7520_s25 = sadd.s32 4294967295, %s7412_s24   ;;  %p6662_p0 = scmp.ge.s32.totalorder %s7412_s24, 1  ;;  %s7412_s24 = sphi %s7514_s24, %s28_s24  }
   0x5   : > { %p421_p1 = scmp.lt.s32.totalorder %s7412_s24, 3  ;;  %s479_s28 = sshll.u32 %s10437_s16, 4  ;;  %s480_s28 = int_to_ptr.vmem [resolvable:$true] %s479_s28 }
   0x6   : > { %p7357_p3 = scmp.eq.s32.totalorder %s7520_s25, 0  ;;  %s7387_s0 = scalar_lea.vmem %s480_s28, 16 }
   0x7   : > { %p7527_p2 = pnand %p6662_p0, %p421_p1  ;;  %p7388_p6 = scmp.ne.s32.totalorder %s480_s28, %s7387_s0 }
   0x8   : > { %p7395_p10 = scmp.lt.s32.totalorder %s480_s28, %s480_s28  ;;  %p7396_p11 = scmp.lt.s32.totalorder %s7387_s0, %s7387_s0 }
   0x9   : > { %p7353_p4 = pneg %p7527_p2 }
   0xa   : > { %p7397_p12 = por %p7396_p11, %p7395_p10 }
   0xb   : > { %p7354_p5 = pnand %p7357_p3, %p7353_p4 }
   0xd   : > { %p7389_p7 = pneg %p7354_p5 }
   0xf   : > { %p7390_p8 = pnand %p7389_p7, %p7388_p6 }
  0x11   : > { %p7391_p9 = pneg %p7390_p8 }
  0x13   : > { %p7398_p13 = pnand %p7397_p12, %p7391_p9 }
  0x15   : > { %7401 = shalt.err (!%p7398_p13)
}
  0x16   : > { %s7414_s30 = smov [#allocation4]   ;;  %500 = sbr.rel (%p7527_p2) target bundleno = 1985 (0x7c1), region = 88 }
  0x17   : > { %7356 = dma.vmem_to_smem (!%p7354_p5), %s480_s28, 16, %s7414_s30, [#allocation5]  }
  0x1d   : > { %7407 = dma.done.wait (%p7357_p3), [#allocation5], 16  }
  0x1e   : > { %7409 = vsyncadd (%p7357_p3), [#allocation5], 4294967280 }
  0x1f   : > { %506 = sfence }
  0x20   : > { %s10450_s1 = sld [smem:[#allocation8_spill]]  ;;  %vm10440_vm0 = vcmask 1043456   ;;  %p553_p0 = scmp.lt.s32.totalorder %s7520_s25, 1  ;;  %vm596_vm1 = vcmask 31744   ;;  %vm1098_vm2 = vcmask 64512   ;;  %v7415_v17 = vmov 0.0  }
  0x21   : > { %s10451_s23 = sld [smem:[#allocation7_spill]]  ;;  %1104 = vst.msk [vmem:[#allocation2 + $0x20] sm:$0xff] %vm1098_vm2, %v7415_v17  ;;  %1099 = vst.msk [vmem:[#allocation2] sm:$0xff] %vm1098_vm2, %v7415_v17  ;;  %vm1101_vm3 = vcmask 58368   ;;  %s10445_s27 = smov 8   ;;  %vm1411_vm4 = vcmask 130112  }
  0x22   : > { %s10459_s25 = smov (!%p553_p0, %s7520_s25), 1  ;;  %1100 = vst.msk [vmem:[#allocation2 + $0x8] sm:$0xff] %vm1098_vm2, %v7415_v17  ;;  %1103 = vst.msk [vmem:[#allocation2 + $0x18] sm:$0xff] %vm1098_vm2, %v7415_v17  ;;  %s10441_s28 = smov 16   ;;  %vm1604_vm5 = vcmask 195712  }
  0x23   : > { %s10439_s20 = sshll.u32 %s10459_s25, 8  ;;  %1106 = vst.msk [vmem:[#allocation2 + $0x30] sm:$0xff] %vm1098_vm2, %v7415_v17  ;;  %1107 = vst.msk [vmem:[#allocation2 + $0x38] sm:$0xff] %vm1098_vm2, %v7415_v17  ;;  %s1000_s29 = sld [smem:[#allocation4]]  ;;  %v7731_v34 = vld [vmem:[%s10423_s2] ss:$0 sm:$0xff] }
  0x24   : > { %1109 = vst.msk [vmem:[#allocation2 + $0x48] sm:$0xff] %vm1098_vm2, %v7415_v17  ;;  %1110 = vst.msk [vmem:[#allocation2 + $0x50] sm:$0xff] %vm1098_vm2, %v7415_v17  ;;  %v7740_v38 = vld [vmem:[%s10424_s3] ss:$0 sm:$0xff]  ;;  %s7419_s21 = smov 24   ;;  %s10443_s22 = smov 40  }
  0x25   : > { %1112 = vst.msk [vmem:[#allocation2 + $0x60] sm:$0xff] %vm1098_vm2, %v7415_v17  ;;  %1113 = vst.msk [vmem:[#allocation2 + $0x68] sm:$0xff] %vm1098_vm2, %v7415_v17  ;;  %s7423_s0 = smov 64   ;;  %s6740_s18 = sld [smem:[#allocation4 + $0x1]] }
  0x26   : > { %v595_v0 = vld [vmem:[%s10450_s1] sm:$0xf]  ;;  %1115 = vst.msk [vmem:[#allocation2 + $0x78] sm:$0xff] %vm1098_vm2, %v7415_v17  ;;  %1116 = vst.msk [vmem:[#allocation2 + $0x80] sm:$0xff] %vm1098_vm2, %v7415_v17  ;;  %s7418_s1 = smov 32  }
  0x27   : > { %7033 = vmatprep.subr.msk.mxu0 %vm10440_vm0, %v595_v0  ;;  %7347 = vmatprep.subr.msk.mxu1 %vm10440_vm0, %v595_v0  ;;  %s7559_s26 = scalar_lea.vmem %s10451_s23, %s10439_s20  ;;  %1118 = vst.msk [vmem:[#allocation2 + $0x90] sm:$0xff] %vm1098_vm2, %v7415_v17  ;;  %1119 = vst.msk [vmem:[#allocation2 + $0x98] sm:$0xff] %vm1098_vm2, %v7415_v17  ;;  %s7421_s23 = smov 56  }
  0x28   : > { %7034 = vmatpush3.msk.msra.mxu0 %vm10440_vm0, %v595_v0  ;;  %7348 = vmatpush3.msk.msra.mxu1 %vm10440_vm0, %v595_v0  ;;  %v563_v1 = vld [vmem:[%s7559_s26] sm:$0xff]  ;;  %v564_v2 = vld [vmem:[%s7559_s26 + $0x8] sm:$0xff]  ;;  %v565_v5 = vld [vmem:[%s7559_s26 + $0x10] sm:$0xff]  ;;  %1121 = vst.msk [vmem:[#allocation2 + $0xa8] sm:$0xff] %vm1098_vm2, %v7415_v17  ;;  %s10454_s20 = smov 40  }
  0x29   : > { %v579_v3 = vld [vmem:[%s7559_s26 + $0x80] sm:$0xff]  ;;  %7035 = vmatprep.mubr.msk.f32.mxu0 %vm596_vm1, %v563_v1  ;;  %v580_v4 = vld [vmem:[%s7559_s26 + $0x88] sm:$0xff]  ;;  %v566_v6 = vld [vmem:[%s7559_s26 + $0x18] sm:$0xff]  ;;  %1122 = vst.msk [vmem:[#allocation2 + $0xb0] sm:$0xff] %vm1098_vm2, %v7415_v17  ;;  %v7745_v44 = vstv %s1000_s29  ;;  %s7422_s29 = smov 48  }
  0x2a   : > { %7059 = vmatprep.mubr.msk.f32.mxu1 %vm596_vm1, %v579_v3  ;;  %7036 = vmatmul.mubr.msk.f32.vlgmr.msra.gmra.mrb[0].mxu0 %vm596_vm1, %v564_v2  ;;  %v567_v7 = vld [vmem:[%s7559_s26 + $0x20] sm:$0xff]  ;;  %v568_v8 = vld [vmem:[%s7559_s26 + $0x28] sm:$0xff]  ;;  %v569_v9 = vld [vmem:[%s7559_s26 + $0x30] sm:$0xff]  ;;  %1124 = vst.msk [vmem:[#allocation2 + $0xc0] sm:$0xff] %vm1098_vm2, %v7415_v17 }
  0x2b   : > { %7060 = vmatmul.mubr.msk.f32.vlgmr.msra.gmra.mrb[0].mxu1 %vm596_vm1, %v580_v4  ;;  %7038 = vmatprep.mubr.msk.f32.mxu0 %vm596_vm1, %v565_v5  ;;  %v570_v10 = vld [vmem:[%s7559_s26 + $0x38] sm:$0xff]  ;;  %v571_v11 = vld [vmem:[%s7559_s26 + $0x40] sm:$0xff]  ;;  %v572_v12 = vld [vmem:[%s7559_s26 + $0x48] sm:$0xff]  ;;  %1125 = vst.msk [vmem:[#allocation2 + $0xc8] sm:$0xff] %vm1098_vm2, %v7415_v17 }
  0x2c   : > { %v573_v13 = vld [vmem:[%s7559_s26 + $0x50] sm:$0xff]  ;;  %v574_v14 = vld [vmem:[%s7559_s26 + $0x58] sm:$0xff]  ;;  %v575_v15 = vld [vmem:[%s7559_s26 + $0x60] sm:$0xff]  ;;  %1127 = vst.msk [vmem:[#allocation2 + $0xd8] sm:$0xff] %vm1098_vm2, %v7415_v17 }
  0x2d   : > { %v576_v16 = vld [vmem:[%s7559_s26 + $0x68] sm:$0xff]  ;;  %1128 = vst.msk [vmem:[#allocation2 + $0xe0] sm:$0xff] %vm1098_vm2, %v7415_v17  ;;  %1130 = vst.msk [vmem:[#allocation2 + $0xf0] sm:$0xff] %vm1098_vm2, %v7415_v17  ;;  %v577_v20 = vld [vmem:[%s7559_s26 + $0x70] sm:$0xff] }
  0x2e   : > { %7039 = vmatmul.mubr.msk.f32.gmra.mrb[2].mxu0 %vm596_vm1, %v566_v6  ;;  %1131 = vst.msk [vmem:[#allocation2 + $0xf8] sm:$0xff] %vm1098_vm2, %v7415_v17  ;;  %1133 = vst.msk [vmem:[#allocation2 + $0x108] sm:$0xff] %vm1098_vm2, %v7415_v17  ;;  %v1251_v18 = vld [vmem:[#allocation2 + $0x1] sm:$0xff]  ;;  %v578_v21 = vld [vmem:[%s7559_s26 + $0x78] sm:$0xff] }
  0x2f   : > { %7041 = vmatprep.mubr.msk.f32.mxu0 %vm596_vm1, %v567_v7  ;;  %1134 = vst.msk [vmem:[#allocation2 + $0x110] sm:$0xff] %vm1098_vm2, %v7415_v17  ;;  %1136 = vst.msk [vmem:[#allocation2 + $0x120] sm:$0xff] %vm1098_vm2, %v7415_v17  ;;  %1315 = vrot.lane.b32.xlu0 %v1251_v18, %s10445_s27  ;;  %v1444_v19 = vld [vmem:[#allocation2 + $0x2] sm:$0xff]  ;;  %v581_v24 = vld [vmem:[%s7559_s26 + $0x90] sm:$0xff] }
  0x30   : > { %1137 = vst.msk [vmem:[#allocation2 + $0x128] sm:$0xff] %vm1098_vm2, %v7415_v17  ;;  %1139 = vst.msk [vmem:[#allocation2 + $0x138] sm:$0xff] %vm1098_vm2, %v7415_v17  ;;  %1508 = vrot.lane.b32.xlu1 %v1444_v19, %s10441_s28  ;;  %7062 = vmatprep.mubr.msk.f32.mxu1 %vm596_vm1, %v581_v24  ;;  %v582_v25 = vld [vmem:[%s7559_s26 + $0x98] sm:$0xff]  ;;  %v583_v26 = vld [vmem:[%s7559_s26 + $0xa0] sm:$0xff] }
  0x31   : > { %1140 = vst.msk [vmem:[#allocation2 + $0x140] sm:$0xff] %vm1098_vm2, %v7415_v17  ;;  %1142 = vst.msk [vmem:[#allocation2 + $0x150] sm:$0xff] %vm1098_vm2, %v7415_v17  ;;  %7063 = vmatmul.mubr.msk.f32.gmra.mrb[2].mxu1 %vm596_vm1, %v582_v25  ;;  %v584_v27 = vld [vmem:[%s7559_s26 + $0xa8] sm:$0xff]  ;;  %v1187_v28 = vld [vmem:[#allocation2] sm:$0xff] }
  0x32   : > { %7042 = vmatmul.mubr.msk.f32.gmra.mrb[4].mxu0 %vm596_vm1, %v568_v8  ;;  %1143 = vst.msk [vmem:[#allocation2 + $0x158] sm:$0xff] %vm1098_vm2, %v7415_v17  ;;  %1145 = vst.msk [vmem:[#allocation2 + $0x168] sm:$0xff] %vm1098_vm2, %v7415_v17  ;;  %7065 = vmatprep.mubr.msk.f32.mxu1 %vm596_vm1, %v583_v26  ;;  %v585_v29 = vld [vmem:[%s7559_s26 + $0xb0] sm:$0xff]  ;;  %v586_v32 = vld [vmem:[%s7559_s26 + $0xb8] sm:$0xff] }
  0x33   : > { %7044 = vmatprep.mubr.msk.f32.mxu0 %vm596_vm1, %v569_v9  ;;  %1146 = vst.msk [vmem:[#allocation2 + $0x170] sm:$0xff] %vm1098_vm2, %v7415_v17  ;;  %1148 = vst.msk [vmem:[#allocation2 + $0x180] sm:$0xff] %vm1098_vm2, %v7415_v17  ;;  %v1188_v33 = vld [vmem:[#allocation2 + $0x8] sm:$0xff] }
  0x34   : > { %1149 = vst.msk [vmem:[#allocation2 + $0x188] sm:$0xff] %vm1098_vm2, %v7415_v17  ;;  %1151 = vst.msk [vmem:[#allocation2 + $0x198] sm:$0xff] %vm1098_vm2, %v7415_v17 }
  0x35   : > { %1152 = vst.msk [vmem:[#allocation2 + $0x1a0] sm:$0xff] %vm1098_vm2, %v7415_v17  ;;  %7066 = vmatmul.mubr.msk.f32.gmra.mrb[4].mxu1 %vm596_vm1, %v584_v27  ;;  %1219 = vst.msk [vmem:[#allocation3] sm:$0xff] %vm1098_vm2, %v1187_v28 }
  0x36   : > { %7045 = vmatmul.mubr.msk.f32.gmra.mrb[6].mxu0 %vm596_vm1, %v570_v10  ;;  %1105 = vst.msk [vmem:[#allocation2 + $0x28] sm:$0x3] %vm1101_vm3, %v7415_v17  ;;  %1102 = vst.msk [vmem:[#allocation2 + $0x10] sm:$0x3] %vm1101_vm3, %v7415_v17  ;;  %7068 = vmatprep.mubr.msk.f32.mxu1 %vm596_vm1, %v585_v29 }
  0x37   : > { %7047 = vmatprep.mubr.msk.f32.mxu0 %vm596_vm1, %v571_v11  ;;  %1108 = vst.msk [vmem:[#allocation2 + $0x40] sm:$0x3] %vm1101_vm3, %v7415_v17  ;;  %1111 = vst.msk [vmem:[#allocation2 + $0x58] sm:$0x3] %vm1101_vm3, %v7415_v17 }
  0x38   : > { %1114 = vst.msk [vmem:[#allocation2 + $0x70] sm:$0x3] %vm1101_vm3, %v7415_v17  ;;  %1117 = vst.msk [vmem:[#allocation2 + $0x88] sm:$0x3] %vm1101_vm3, %v7415_v17 }
  0x39   : > { %1120 = vst.msk [vmem:[#allocation2 + $0xa0] sm:$0x3] %vm1101_vm3, %v7415_v17  ;;  %1123 = vst.msk [vmem:[#allocation2 + $0xb8] sm:$0x3] %vm1101_vm3, %v7415_v17  ;;  %7069 = vmatmul.mubr.msk.f32.gmra.mrb[6].mxu1 %vm596_vm1, %v586_v32 }
  0x3a   : > { %7048 = vmatmul.mubr.msk.f32.gmra.mrb[8].mxu0 %vm596_vm1, %v572_v12  ;;  %1126 = vst.msk [vmem:[#allocation2 + $0xd0] sm:$0x3] %vm1101_vm3, %v7415_v17  ;;  %1129 = vst.msk [vmem:[#allocation2 + $0xe8] sm:$0x3] %vm1101_vm3, %v7415_v17 }
  0x3b   : > { %7050 = vmatprep.mubr.msk.f32.mxu0 %vm596_vm1, %v573_v13  ;;  %1132 = vst.msk [vmem:[#allocation2 + $0x100] sm:$0x3] %vm1101_vm3, %v7415_v17  ;;  %1135 = vst.msk [vmem:[#allocation2 + $0x118] sm:$0x3] %vm1101_vm3, %v7415_v17 }
  0x3c   : > { %1138 = vst.msk [vmem:[#allocation2 + $0x130] sm:$0x3] %vm1101_vm3, %v7415_v17  ;;  %1141 = vst.msk [vmem:[#allocation2 + $0x148] sm:$0x3] %vm1101_vm3, %v7415_v17 }
  0x3d   : > { %1144 = vst.msk [vmem:[#allocation2 + $0x160] sm:$0x3] %vm1101_vm3, %v7415_v17  ;;  %1147 = vst.msk [vmem:[#allocation2 + $0x178] sm:$0x3] %vm1101_vm3, %v7415_v17  ;;  %v1252_v22 = vld [vmem:[#allocation2 + $0x9] sm:$0xff] }
  0x3e   : > { %7051 = vmatmul.mubr.msk.f32.gmra.mrb[10].mxu0 %vm596_vm1, %v574_v14  ;;  %1150 = vst.msk [vmem:[#allocation2 + $0x190] sm:$0x3] %vm1101_vm3, %v7415_v17  ;;  %1153 = vst.msk [vmem:[#allocation2 + $0x1a8] sm:$0x3] %vm1101_vm3, %v7415_v17  ;;  %v1445_v23 = vld [vmem:[#allocation2 + $0xa] sm:$0xff]  ;;  %1317 = vrot.lane.b32.xlu0 %v1252_v22, %s10445_s27 }
  0x3f   : > { %7053 = vmatprep.mubr.msk.f32.mxu0 %vm596_vm1, %v575_v15  ;;  %3838 = vst.msk [vmem:[#allocation2 + $0x10] sm:$0x3] %vm1101_vm3, %v7415_v17  ;;  %1510 = vrot.lane.b32.xlu1 %v1445_v23, %s10441_s28 }
  0x40   : > { %3836 = vst.msk [vmem:[#allocation2] sm:$0xff] %vm1098_vm2, %v7415_v17  ;;  %1220 = vst.msk [vmem:[#allocation3 + $0x8] sm:$0xff] %vm1098_vm2, %v1188_v33 }
  0x41   : > { %3837 = vst.msk [vmem:[#allocation2 + $0x8] sm:$0xff] %vm1098_vm2, %v7415_v17 }
  0x42   : > { %7054 = vmatmul.mubr.msk.f32.gmra.mrb[12].mxu0 %vm596_vm1, %v576_v16 }
  0x43   : > { %7056 = vmatprep.mubr.msk.f32.mxu0 %vm596_vm1, %v577_v20 }
  0x46   : > { %7057 = vmatmul.mubr.msk.f32.gmra.mrb[14].mxu0 %vm596_vm1, %v578_v21 }
  0xa1   : > { %v1316_v30 = vpop.permute.xlu0 %1315 }
  0xa2   : > { %1412 = vst.msk [vmem:[#allocation3] sm:$0xff] %vm1411_vm4, %v1316_v30  ;;  %v1509_v31 = vpop.permute.xlu1 %1508 }
  0xa3   : > { %1605 = vst.msk [vmem:[#allocation3] sm:$0xff] %vm1604_vm5, %v1509_v31 }
  0xb0   : > { %v1318_v35 = vpop.permute.xlu0 %1317 }
  0xb1   : > { %1413 = vst.msk [vmem:[#allocation3 + $0x8] sm:$0xff] %vm1411_vm4, %v1318_v35  ;;  %v1511_v36 = vpop.permute.xlu1 %1510 }
  0xb2   : > { %1606 = vst.msk [vmem:[#allocation3 + $0x8] sm:$0xff] %vm1604_vm5, %v1511_v36 }
  0xfd   : > { %v7037_v37 = vpop.f32.mrb[0].mxu0 }
  0xfe   : > { %v7061_v39 = vpop.f32.mrb[0].mxu1  ;;  %v930_v40 = vmul.f32 %v7037_v37, %v7731_v34  ;;  %v763_v41 = vpop.f32.mrb[1].mxu0 }
  0xff   : > { %v946_v42 = vmul.f32 %v7061_v39, %v7731_v34  ;;  %v843_v43 = vpop.f32.mrb[1].mxu1  ;;  %v929_v45 = vmul.f32 %v7731_v34, %v763_v41 }
 0x100   : > { %v945_v46 = vmul.f32 %v7731_v34, %v843_v43  ;;  %v969_v47 = vadd.f32 %v7740_v38, %v930_v40 }
 0x101   : > { %v985_v48 = vadd.f32 %v7740_v38, %v946_v42  ;;  %v968_v49 = vadd.f32 %v7740_v38, %v929_v45  ;;  %v7040_v51 = vpop.f32.mrb[2].mxu0 }
 0x102   : > { %v984_v50 = vadd.f32 %v7740_v38, %v945_v46  ;;  %vm1002_vm6 = vcmp.gt.f32.partialorder %v969_v47, 0.0  ;;  %v1035_v52 = vmul.f32 %v7745_v44, %v969_v47  ;;  %v773_v54 = vpop.f32.mrb[3].mxu0  ;;  %v932_v59 = vmul.f32 %v7040_v51, %v7731_v34 }
 0x103   : > { %vm1018_vm7 = vcmp.gt.f32.partialorder %v985_v48, 0.0  ;;  %v1051_v53 = vmul.f32 %v7745_v44, %v985_v48  ;;  %vm1001_vm8 = vcmp.gt.f32.partialorder %v968_v49, 0.0  ;;  %v1034_v55 = vmul.f32 %v7745_v44, %v968_v49 }
 0x104   : > { %vm1017_vm9 = vcmp.gt.f32.partialorder %v984_v50, 0.0  ;;  %v1050_v56 = vmul.f32 %v7745_v44, %v984_v50  ;;  %v1067_v57 = vsel %vm1002_vm6, %v969_v47, %v1035_v52  ;;  %v931_v60 = vmul.f32 %v7731_v34, %v773_v54 }
 0x105   : > { %v1083_v58 = vsel %vm1018_vm7, %v985_v48, %v1051_v53  ;;  %1156 = vst.msk [vmem:[#allocation2 + $0x21] sm:$0xff] %vm1098_vm2, %v1067_v57  ;;  %v1066_v61 = vsel %vm1001_vm8, %v968_v49, %v1034_v55  ;;  %v7043_v63 = vpop.f32.mrb[4].mxu0  ;;  %v971_v0 = vadd.f32 %v7740_v38, %v932_v59 }
 0x106   : > { %1172 = vst.msk [vmem:[#allocation2 + $0xe1] sm:$0xff] %vm1098_vm2, %v1083_v58  ;;  %v1082_v62 = vsel %vm1017_vm9, %v984_v50, %v1050_v56  ;;  %1155 = vst.msk [vmem:[#allocation2 + $0x19] sm:$0xff] %vm1098_vm2, %v1066_v61  ;;  %v970_v1 = vadd.f32 %v7740_v38, %v931_v60  ;;  %v934_v2 = vmul.f32 %v7043_v63, %v7731_v34  ;;  %v783_v3 = vpop.f32.mrb[5].mxu0 }
 0x107   : > { %1171 = vst.msk [vmem:[#allocation2 + $0xd9] sm:$0xff] %vm1098_vm2, %v1082_v62  ;;  %v933_v4 = vmul.f32 %v7731_v34, %v783_v3  ;;  %vm1004_vm10 = vcmp.gt.f32.partialorder %v971_v0, 0.0  ;;  %v1037_v5 = vmul.f32 %v7745_v44, %v971_v0 }
 0x108   : > { %vm1003_vm11 = vcmp.gt.f32.partialorder %v970_v1, 0.0  ;;  %v1036_v6 = vmul.f32 %v7745_v44, %v970_v1  ;;  %v973_v7 = vadd.f32 %v7740_v38, %v934_v2 }
 0x109   : > { %v972_v8 = vadd.f32 %v7740_v38, %v933_v4  ;;  %v7046_v9 = vpop.f32.mrb[6].mxu0  ;;  %v1069_v10 = vsel %vm1004_vm10, %v971_v0, %v1037_v5 }
 0x10a   : > { %v1068_v11 = vsel %vm1003_vm11, %v970_v1, %v1036_v6  ;;  %v936_v12 = vmul.f32 %v7046_v9, %v7731_v34  ;;  %v793_v13 = vpop.f32.mrb[7].mxu0  ;;  %1158 = vst.msk [vmem:[#allocation2 + $0x39] sm:$0xff] %vm1098_vm2, %v1069_v10  ;;  %vm1006_vm12 = vcmp.gt.f32.partialorder %v973_v7, 0.0  ;;  %v1039_v14 = vmul.f32 %v7745_v44, %v973_v7  ;;  %v587_v6 = vld [vmem:[%s7559_s26 + $0xc0] sm:$0xff] }
 0x10b   : > { %1157 = vst.msk [vmem:[#allocation2 + $0x31] sm:$0xff] %vm1098_vm2, %v1068_v11  ;;  %vm1005_vm13 = vcmp.gt.f32.partialorder %v972_v8, 0.0  ;;  %v1038_v15 = vmul.f32 %v7745_v44, %v972_v8  ;;  %v935_v20 = vmul.f32 %v7731_v34, %v793_v13  ;;  %7071 = vmatprep.mubr.msk.f32.mxu1 %vm596_vm1, %v587_v6 }
 0x10c   : > { %v1831_v16 = vld [vmem:[#allocation2 + $0x21] sm:$0xff]  ;;  %v975_v19 = vadd.f32 %v7740_v38, %v936_v12  ;;  %v1071_v24 = vsel %vm1006_vm12, %v973_v7, %v1039_v14 }
 0x10d   : > { %v7776_v18 = vld [vmem:[#allocation2 + $0x22] sm:$0xff]  ;;  %1896 = vrot.lane.b32.xlu0 %v1831_v16, %s7418_s1  ;;  %v7781_v22 = vld [vmem:[#allocation2 + $0x19] sm:$0xff]  ;;  %v1070_v25 = vsel %vm1005_vm13, %v972_v8, %v1038_v15  ;;  %v7049_v26 = vpop.f32.mrb[8].mxu0  ;;  %1160 = vst.msk [vmem:[#allocation2 + $0x51] sm:$0xff] %vm1098_vm2, %v1071_v24  ;;  %v974_v30 = vadd.f32 %v7740_v38, %v935_v20 }
 0x10e   : > { %v1638_v21 = vld [vmem:[#allocation2 + $0x20] sm:$0xff]  ;;  %3841 = vst.msk [vmem:[#allocation2 + $0x28] sm:$0x3] %vm1101_vm3, %v7415_v17  ;;  %v7790_v28 = vld [vmem:[#allocation2 + $0x18] sm:$0xff]  ;;  %vm1008_vm14 = vcmp.gt.f32.partialorder %v975_v19, 0.0  ;;  %v1041_v29 = vmul.f32 %v7745_v44, %v975_v19  ;;  %v938_v31 = vmul.f32 %v7049_v26, %v7731_v34  ;;  %v803_v32 = vpop.f32.mrb[9].mxu0 }
 0x10f   : > { %v7783_v23 = vld [vmem:[#allocation2 + $0x1a] sm:$0xff]  ;;  %1703 = vrot.lane.b32.xlu1 %v1638_v21, %s7419_s21  ;;  %1159 = vst.msk [vmem:[#allocation2 + $0x49] sm:$0xff] %vm1098_vm2, %v1070_v25  ;;  %1222 = vst.msk [vmem:[#allocation3 + $0x18] sm:$0xff] %vm1098_vm2, %v1638_v21  ;;  %v937_v39 = vmul.f32 %v7731_v34, %v803_v32  ;;  %vm1007_vm15 = vcmp.gt.f32.partialorder %v974_v30, 0.0  ;;  %v1040_v41 = vmul.f32 %v7745_v44, %v974_v30  ;;  %v7819_v46 = vld [vmem:[#allocation2 + $0xe2] sm:$0xff] }
 0x110   : > { %v7788_v27 = vld [vmem:[#allocation2 + $0xe1] sm:$0xff]  ;;  %3840 = vst.msk [vmem:[#allocation2 + $0x20] sm:$0xff] %vm1098_vm2, %v7415_v17  ;;  %v7800_v33 = vld [vmem:[#allocation2 + $0xd8] sm:$0xff]  ;;  %1221 = vst.msk [vmem:[#allocation3 + $0x10] sm:$0xff] %vm1098_vm2, %v7790_v28  ;;  %v1073_v40 = vsel %vm1008_vm14, %v975_v19, %v1041_v29  ;;  %v977_v42 = vadd.f32 %v7740_v38, %v938_v31  ;;  %vm1797_vm14 = vcmask 261312  }
 0x111   : > { %v7802_v35 = vld [vmem:[#allocation2 + $0xd9] sm:$0xff]  ;;  %3839 = vst.msk [vmem:[#allocation2 + $0x18] sm:$0xff] %vm1098_vm2, %v7415_v17  ;;  %v7817_v45 = vld [vmem:[#allocation2 + $0xe1] sm:$0xff]  ;;  %1321 = vrot.lane.b32.xlu0 %v1831_v16, %s10445_s27  ;;  %1162 = vst.msk [vmem:[#allocation2 + $0x69] sm:$0xff] %vm1098_vm2, %v1073_v40  ;;  %v976_v47 = vadd.f32 %v7740_v38, %v937_v39  ;;  %v1072_v54 = vsel %vm1007_vm15, %v974_v30, %v1040_v41  ;;  %v7052_v19 = vpop.f32.mrb[10].mxu0  ;;  %vm1990_vm15 = vcmask 326912  }
 0x112   : > { %v7804_v36 = vld [vmem:[#allocation2 + $0xe0] sm:$0xff]  ;;  %3865 = vst.msk [vmem:[#allocation2 + $0xe8] sm:$0x3] %vm1101_vm3, %v7415_v17  ;;  %v1205_v49 = vld [vmem:[#allocation2 + $0xd8] sm:$0xff]  ;;  %v7834_v53 = vld [vmem:[#allocation2 + $0x30] sm:$0xff]  ;;  %vm1010_vm6 = vcmp.gt.f32.partialorder %v977_v42, 0.0  ;;  %v1043_v55 = vmul.f32 %v7745_v44, %v977_v42  ;;  %v940_v20 = vmul.f32 %v7052_v19, %v7731_v34 }
 0x113   : > { %v7806_v37 = vld [vmem:[#allocation2 + $0xda] sm:$0xff]  ;;  %1319 = vrot.lane.b32.xlu1 %v7781_v22, %s10445_s27  ;;  %1237 = vst.msk [vmem:[#allocation3 + $0x90] sm:$0xff] %vm1098_vm2, %v1205_v49  ;;  %v7848_v57 = vld [vmem:[#allocation2 + $0x31] sm:$0xff]  ;;  %1161 = vst.msk [vmem:[#allocation2 + $0x61] sm:$0xff] %vm1098_vm2, %v1072_v54  ;;  %vm1009_vm7 = vcmp.gt.f32.partialorder %v976_v47, 0.0  ;;  %v1042_v59 = vmul.f32 %v7745_v44, %v976_v47  ;;  %v813_v21 = vpop.f32.mrb[11].mxu0 }
 0x114   : > { %v7815_v43 = vld [vmem:[#allocation2 + $0xd9] sm:$0xff]  ;;  %1223 = vst.msk [vmem:[#allocation3 + $0x20] sm:$0xff] %vm1098_vm2, %v7834_v53  ;;  %v1075_v60 = vsel %vm1010_vm6, %v977_v42, %v1043_v55  ;;  %v7864_v61 = vld [vmem:[#allocation2 + $0x51] sm:$0xff]  ;;  %v588_v7 = vld [vmem:[%s7559_s26 + $0xc8] sm:$0xff]  ;;  %v979_v24 = vadd.f32 %v7740_v38, %v940_v20  ;;  %vm2183_vm6 = vcmask 392512  }
 0x115   : > { %v7824_v48 = vld [vmem:[#allocation2 + $0xda] sm:$0xff]  ;;  %v7850_v58 = vld [vmem:[#allocation2 + $0x32] sm:$0xff]  ;;  %2089 = vrot.lane.b32.xlu0 %v7776_v18, %s10443_s22  ;;  %1164 = vst.msk [vmem:[#allocation2 + $0x81] sm:$0xff] %vm1098_vm2, %v1075_v60  ;;  %v1074_v0 = vsel %vm1009_vm7, %v976_v47, %v1042_v59  ;;  %7072 = vmatmul.mubr.msk.f32.gmra.mrb[8].mxu1 %vm596_vm1, %v588_v7  ;;  %v592_v59 = vld [vmem:[%s7559_s26 + $0xe8] sm:$0xff]  ;;  %v7055_v6 = vpop.f32.mrb[12].mxu0 }
 0x116   : > { %v1206_v50 = vld [vmem:[#allocation2 + $0xe0] sm:$0xff]  ;;  %3863 = vst.msk [vmem:[#allocation2 + $0xd8] sm:$0xff] %vm1098_vm2, %v7415_v17  ;;  %v7846_v56 = vld [vmem:[#allocation2 + $0x38] sm:$0xff]  ;;  %3842 = vst.msk [vmem:[#allocation2 + $0x30] sm:$0xff] %vm1098_vm2, %v7415_v17  ;;  %vm1012_vm8 = vcmp.gt.f32.partialorder %v979_v24, 0.0  ;;  %v1045_v26 = vmul.f32 %v7745_v44, %v979_v24  ;;  %v823_v7 = vpop.f32.mrb[13].mxu0 }
 0x117   : > { %v7830_v51 = vld [vmem:[#allocation2 + $0x39] sm:$0xff]  ;;  %1238 = vst.msk [vmem:[#allocation3 + $0x98] sm:$0xff] %vm1098_vm2, %v1206_v50  ;;  %3864 = vst.msk [vmem:[#allocation2 + $0xe0] sm:$0xff] %vm1098_vm2, %v7415_v17  ;;  %v7868_v63 = vld [vmem:[#allocation2 + $0x48] sm:$0xff]  ;;  %2087 = vrot.lane.b32.xlu1 %v7783_v23, %s10443_s22 }
 0x118   : > { %v7832_v52 = vld [vmem:[#allocation2 + $0x3a] sm:$0xff]  ;;  %1224 = vst.msk [vmem:[#allocation3 + $0x28] sm:$0xff] %vm1098_vm2, %v7846_v56  ;;  %v7866_v62 = vld [vmem:[#allocation2 + $0x52] sm:$0xff]  ;;  %v7877_v2 = vld [vmem:[#allocation2 + $0x49] sm:$0xff] }
 0x119   : > { %3844 = vst.msk [vmem:[#allocation2 + $0x40] sm:$0x3] %vm1101_vm3, %v7415_v17  ;;  %3847 = vst.msk [vmem:[#allocation2 + $0x58] sm:$0x3] %vm1101_vm3, %v7415_v17  ;;  %v7875_v1 = vld [vmem:[#allocation2 + $0x50] sm:$0xff]  ;;  %1514 = vrot.lane.b32.xlu0 %v7776_v18, %s10441_s28  ;;  %v2831_v41 = vld [vmem:[%s10425_s4 + $0x18] sm:$0xff] }
 0x11a   : > { %3843 = vst.msk [vmem:[#allocation2 + $0x38] sm:$0xff] %vm1098_vm2, %v7415_v17  ;;  %v7879_v3 = vld [vmem:[#allocation2 + $0x4a] sm:$0xff]  ;;  %1163 = vst.msk [vmem:[#allocation2 + $0x79] sm:$0xff] %vm1098_vm2, %v1074_v0  ;;  %v7902_v8 = vld [vmem:[#allocation2 + $0x60] sm:$0xff] }
 0x11b   : > { %1225 = vst.msk [vmem:[#allocation3 + $0x30] sm:$0xff] %vm1098_vm2, %v7868_v63  ;;  %1226 = vst.msk [vmem:[#allocation3 + $0x38] sm:$0xff] %vm1098_vm2, %v7875_v1  ;;  %v7890_v4 = vld [vmem:[#allocation2 + $0x69] sm:$0xff]  ;;  %1512 = vrot.lane.b32.xlu1 %v7783_v23, %s10441_s28  ;;  %v7907_v10 = vld [vmem:[#allocation2 + $0x61] sm:$0xff]  ;;  %v939_v23 = vmul.f32 %v7731_v34, %v813_v21  ;;  %v941_v21 = vmul.f32 %v7731_v34, %v823_v7 }
 0x11c   : > { %3846 = vst.msk [vmem:[#allocation2 + $0x50] sm:$0xff] %vm1098_vm2, %v7415_v17  ;;  %3845 = vst.msk [vmem:[#allocation2 + $0x48] sm:$0xff] %vm1098_vm2, %v7415_v17  ;;  %v7892_v5 = vld [vmem:[#allocation2 + $0x6a] sm:$0xff]  ;;  %v7909_v11 = vld [vmem:[#allocation2 + $0x62] sm:$0xff] }
 0x11d   : > { %3850 = vst.msk [vmem:[#allocation2 + $0x70] sm:$0x3] %vm1101_vm3, %v7415_v17  ;;  %v7904_v9 = vld [vmem:[#allocation2 + $0x68] sm:$0xff]  ;;  %2504 = vrot.lane.b32.xlu0 %v7788_v27, %s7421_s23  ;;  %v978_v25 = vadd.f32 %v7740_v38, %v939_v23  ;;  %v2830_v40 = vld [vmem:[%s10425_s4 + $0x10] sm:$0xff]  ;;  %v590_v49 = vld [vmem:[%s7559_s26 + $0xd8] sm:$0xff] }
 0x11e   : > { %1228 = vst.msk [vmem:[#allocation3 + $0x48] sm:$0xff] %vm1098_vm2, %v7904_v9  ;;  %1227 = vst.msk [vmem:[#allocation3 + $0x40] sm:$0xff] %vm1098_vm2, %v7902_v8  ;;  %v7916_v12 = vld [vmem:[#allocation2 + $0x81] sm:$0xff]  ;;  %v7319_v42 = vpack.c.bf16 %v2831_v41, %v2830_v40  ;;  %v589_v47 = vld [vmem:[%s7559_s26 + $0xd0] sm:$0xff] }
 0x11f   : > { %v7918_v13 = vld [vmem:[#allocation2 + $0x82] sm:$0xff]  ;;  %3849 = vst.msk [vmem:[#allocation2 + $0x68] sm:$0xff] %vm1098_vm2, %v7415_v17  ;;  %3848 = vst.msk [vmem:[#allocation2 + $0x60] sm:$0xff] %vm1098_vm2, %v7415_v17  ;;  %2309 = vrot.lane.b32.xlu1 %v7800_v33, %s7422_s29  ;;  %vm1011_vm9 = vcmp.gt.f32.partialorder %v978_v25, 0.0  ;;  %v1044_v27 = vmul.f32 %v7745_v44, %v978_v25  ;;  %7074 = vmatprep.mubr.msk.f32.mxu1 %vm596_vm1, %v589_v47  ;;  %v2834_v60 = vld [vmem:[%s10425_s4 + $0x30] sm:$0xff] }
 0x120   : > { %3853 = vst.msk [vmem:[#allocation2 + $0x88] sm:$0x3] %vm1101_vm3, %v7415_v17  ;;  %v2832_v50 = vld [vmem:[%s10425_s4 + $0x20] sm:$0xff]  ;;  %7075 = vmatmul.mubr.msk.f32.gmra.mrb[10].mxu1 %vm596_vm1, %v590_v49  ;;  %v2835_v0 = vld [vmem:[%s10425_s4 + $0x38] sm:$0xff]  ;;  %v593_v19 = vld [vmem:[%s7559_s26 + $0xf0] sm:$0xff] }
 0x121   : > { %v7926_v14 = vld [vmem:[#allocation2 + $0x78] sm:$0xff]  ;;  %v7930_v15 = vld [vmem:[#allocation2 + $0x80] sm:$0xff]  ;;  %1701 = vrot.lane.b32.xlu0 %v7790_v28, %s7419_s21  ;;  %v1077_v28 = vsel %vm1012_vm8, %v979_v24, %v1045_v26  ;;  %v1076_v29 = vsel %vm1011_vm9, %v978_v25, %v1044_v27  ;;  %v980_v25 = vadd.f32 %v7740_v38, %v941_v21  ;;  %vm2377_vm9 = vcmask 458112  }
 0x122   : > { %v7934_v16 = vld [vmem:[#allocation2 + $0x79] sm:$0xff]  ;;  %1230 = vst.msk [vmem:[#allocation3 + $0x58] sm:$0xff] %vm1098_vm2, %v7930_v15  ;;  %1229 = vst.msk [vmem:[#allocation3 + $0x50] sm:$0xff] %vm1098_vm2, %v7926_v14 }
 0x123   : > { %v7936_v18 = vld [vmem:[#allocation2 + $0x7a] sm:$0xff]  ;;  %1733 = vrot.lane.b32.xlu1 %v7800_v33, %s7419_s21  ;;  %1166 = vst.msk [vmem:[#allocation2 + $0x99] sm:$0xff] %vm1098_vm2, %v1077_v28  ;;  %1165 = vst.msk [vmem:[#allocation2 + $0x91] sm:$0xff] %vm1098_vm2, %v1076_v29  ;;  %vm1013_vm11 = vcmp.gt.f32.partialorder %v980_v25, 0.0  ;;  %v1046_v27 = vmul.f32 %v7745_v44, %v980_v25 }
 0x124   : > { %3852 = vst.msk [vmem:[#allocation2 + $0x80] sm:$0xff] %vm1098_vm2, %v7415_v17  ;;  %3851 = vst.msk [vmem:[#allocation2 + $0x78] sm:$0xff] %vm1098_vm2, %v7415_v17  ;;  %v591_v55 = vld [vmem:[%s7559_s26 + $0xe0] sm:$0xff]  ;;  %v594_v20 = vld [vmem:[%s7559_s26 + $0xf8] sm:$0xff]  ;;  %s6811_s26 = sld [smem:[#allocation4 + $0x3]] }
 0x125   : > { %1894 = vrot.lane.b32.xlu0 %v7781_v22, %s7418_s1  ;;  %7077 = vmatprep.mubr.msk.f32.mxu1 %vm596_vm1, %v591_v55  ;;  %v2836_v24 = vld [vmem:[%s10425_s4 + $0x40] sm:$0xff]  ;;  %v1078_v29 = vsel %vm1013_vm11, %v980_v25, %v1046_v27 }
 0x126   : > { %7078 = vmatmul.mubr.msk.f32.gmra.mrb[12].mxu1 %vm596_vm1, %v592_v59  ;;  %1167 = vst.msk [vmem:[#allocation2 + $0xa9] sm:$0xff] %vm1098_vm2, %v1078_v29 }
 0x127   : > { %2502 = vrot.lane.b32.xlu1 %v7802_v35, %s7421_s23  ;;  %7080 = vmatprep.mubr.msk.f32.mxu1 %vm596_vm1, %v593_v19 }
 0x129   : > { %2311 = vrot.lane.b32.xlu0 %v7804_v36, %s7422_s29 }
 0x12a   : > { %v7970_v22 = vld [vmem:[#allocation2 + $0x99] sm:$0xff]  ;;  %v7974_v31 = vld [vmem:[#allocation2 + $0x90] sm:$0xff]  ;;  %7081 = vmatmul.mubr.msk.f32.gmra.mrb[14].mxu1 %vm596_vm1, %v594_v20 }
 0x12b   : > { %1926 = vrot.lane.b32.xlu1 %v7802_v35, %s7418_s1  ;;  %v7972_v30 = vld [vmem:[#allocation2 + $0x9a] sm:$0xff]  ;;  %v7982_v33 = vld [vmem:[#allocation2 + $0x91] sm:$0xff]  ;;  %1231 = vst.msk [vmem:[#allocation3 + $0x60] sm:$0xff] %vm1098_vm2, %v7974_v31 }
 0x12c   : > { %3856 = vst.msk [vmem:[#allocation2 + $0xa0] sm:$0x3] %vm1101_vm3, %v7415_v17  ;;  %v7980_v32 = vld [vmem:[#allocation2 + $0x98] sm:$0xff] }
 0x12d   : > { %1735 = vrot.lane.b32.xlu0 %v7804_v36, %s7419_s21  ;;  %v7984_v35 = vld [vmem:[#allocation2 + $0x92] sm:$0xff]  ;;  %v2828_v36 = vld [vmem:[%s10425_s4] sm:$0xff]  ;;  %1232 = vst.msk [vmem:[#allocation3 + $0x68] sm:$0xff] %vm1098_vm2, %v7980_v32 }
 0x12e   : > { %3855 = vst.msk [vmem:[#allocation2 + $0x98] sm:$0xff] %vm1098_vm2, %v7415_v17  ;;  %3854 = vst.msk [vmem:[#allocation2 + $0x90] sm:$0xff] %vm1098_vm2, %v7415_v17 }
 0x12f   : > { %2695 = vrot.lane.b32.xlu1 %v7806_v37, %s7423_s0  ;;  %v2829_v37 = vld [vmem:[%s10425_s4 + $0x8] sm:$0xff] }
 0x130   : > { %v7315_v39 = vpack.c.bf16 %v2829_v37, %v2828_v36  ;;  %v8075_v37 = vld [vmem:[#allocation2 + $0xa8] sm:$0xff] }
 0x131   : > { %2476 = vrot.lane.b32.xlu0 %v7830_v51, %s7421_s23  ;;  %1233 = vst.msk [vmem:[#allocation3 + $0x70] sm:$0xff] %vm1098_vm2, %v8075_v37 }
 0x132   : > { %7316 = vmatprep.subr.bf16.mxu1 %v7315_v39 }
 0x133   : > { %1900 = vrot.lane.b32.xlu1 %v7830_v51, %s7418_s1  ;;  %7318 = vmatpush3.bf16.msra.mxu1 %v7315_v39  ;;  %v8083_v39 = vld [vmem:[#allocation2 + $0xa9] sm:$0xff] }
 0x134   : > { %7320 = vmatprep.subr.bf16.mxu1 %v7319_v42 }
 0x135   : > { %1325 = vrot.lane.b32.xlu0 %v7830_v51, %s10445_s27  ;;  %v2833_v51 = vld [vmem:[%s10425_s4 + $0x28] sm:$0xff] }
 0x136   : > { %v7323_v54 = vpack.c.bf16 %v2833_v51, %v2832_v50 }
 0x137   : > { %2669 = vrot.lane.b32.xlu1 %v7832_v52, %s7423_s0  ;;  %7322 = vmatpush3.bf16.msra.mxu1 %v7319_v42 }
 0x138   : > { %7324 = vmatprep.subr.bf16.mxu1 %v7323_v54 }
 0x139   : > { %2093 = vrot.lane.b32.xlu0 %v7832_v52, %s10443_s22 }
 0x13b   : > { %2281 = vrot.lane.b32.xlu1 %v7834_v53, %s7422_s29  ;;  %7326 = vmatpush3.bf16.msra.mxu1 %v7323_v54 }
 0x13d   : > { %1518 = vrot.lane.b32.xlu0 %v7832_v52, %s10441_s28  ;;  %v7327_v52 = vpack.c.bf16 %v2835_v0, %v2834_v60 }
 0x13f   : > { %1705 = vrot.lane.b32.xlu1 %v7834_v53, %s7419_s21  ;;  %v942_v53 = vmul.f32 %v7055_v6, %v7731_v34  ;;  %7328 = vmatprep.subr.bf16.mxu1 %v7327_v52 }
 0x140   : > { %7330 = vmatpush3.bf16.msra.mxu1 %v7327_v52 }
 0x141   : > { %2283 = vrot.lane.b32.xlu0 %v7846_v56, %s7422_s29  ;;  %v981_v23 = vadd.f32 %v7740_v38, %v942_v53  ;;  %7099 = vmatprep.subr.mxu1 %v2836_v24 }
 0x143   : > { %2474 = vrot.lane.b32.xlu1 %v7848_v57, %s7421_s23  ;;  %vm1014_vm10 = vcmp.gt.f32.partialorder %v981_v23, 0.0  ;;  %v1047_v26 = vmul.f32 %v7745_v44, %v981_v23 }
 0x144   : > { %7100 = vmatpush3.msra.mxu1 %v2836_v24 }
 0x145   : > { %1707 = vrot.lane.b32.xlu0 %v7846_v56, %s7419_s21  ;;  %v1079_v28 = vsel %vm1014_vm10, %v981_v23, %v1047_v26  ;;  %vm2570_vm10 = vcmask 523712  }
 0x146   : > { %1168 = vst.msk [vmem:[#allocation2 + $0xb1] sm:$0xff] %vm1098_vm2, %v1079_v28 }
 0x147   : > { %1898 = vrot.lane.b32.xlu1 %v7848_v57, %s7418_s1 }
 0x149   : > { %1323 = vrot.lane.b32.xlu0 %v7848_v57, %s10445_s27 }
 0x14b   : > { %2667 = vrot.lane.b32.xlu1 %v7850_v58, %s7423_s0 }
 0x14d   : > { %2091 = vrot.lane.b32.xlu0 %v7850_v58, %s10443_s22  ;;  %v8071_v56 = vld [vmem:[#allocation2 + $0xb1] sm:$0xff] }
 0x14e   : > { %v8073_v36 = vld [vmem:[#allocation2 + $0xb2] sm:$0xff]  ;;  %v8085_v40 = vld [vmem:[#allocation2 + $0xaa] sm:$0xff] }
 0x14f   : > { %1516 = vrot.lane.b32.xlu1 %v7850_v58, %s10441_s28  ;;  %3859 = vst.msk [vmem:[#allocation2 + $0xb8] sm:$0x3] %vm1101_vm3, %v7415_v17  ;;  %v8081_v57 = vld [vmem:[#allocation2 + $0xb0] sm:$0xff]  ;;  %v7058_v58 = vpop.f32.mrb[14].mxu0 }
 0x150   : > { %1234 = vst.msk [vmem:[#allocation3 + $0x78] sm:$0xff] %vm1098_vm2, %v8081_v57  ;;  %3858 = vst.msk [vmem:[#allocation2 + $0xb0] sm:$0xff] %vm1098_vm2, %v7415_v17  ;;  %v833_v41 = vpop.f32.mrb[15].mxu0 }
 0x151   : > { %2480 = vrot.lane.b32.xlu0 %v7864_v61, %s7421_s23  ;;  %3857 = vst.msk [vmem:[#allocation2 + $0xa8] sm:$0xff] %vm1098_vm2, %v7415_v17  ;;  %v943_v42 = vmul.f32 %v7731_v34, %v833_v41 }
 0x153   : > { %1904 = vrot.lane.b32.xlu1 %v7864_v61, %s7418_s1  ;;  %v982_v49 = vadd.f32 %v7740_v38, %v943_v42 }
 0x155   : > { %1329 = vrot.lane.b32.xlu0 %v7864_v61, %s10445_s27  ;;  %v944_v61 = vmul.f32 %v7058_v58, %v7731_v34  ;;  %vm1015_vm13 = vcmp.gt.f32.partialorder %v982_v49, 0.0 }
 0x157   : > { %2673 = vrot.lane.b32.xlu1 %v7866_v62, %s7423_s0  ;;  %v983_v47 = vadd.f32 %v7740_v38, %v944_v61 }
 0x159   : > { %2097 = vrot.lane.b32.xlu0 %v7866_v62, %s10443_s22  ;;  %vm1016_vm12 = vcmp.gt.f32.partialorder %v983_v47, 0.0 }
 0x15b   : > { %2285 = vrot.lane.b32.xlu1 %v7868_v63, %s7422_s29 }
 0x15d   : > { %1522 = vrot.lane.b32.xlu0 %v7866_v62, %s10441_s28  ;;  %v1049_v62 = vmul.f32 %v7745_v44, %v983_v47 }
 0x15f   : > { %1709 = vrot.lane.b32.xlu1 %v7868_v63, %s7419_s21  ;;  %v1048_v63 = vmul.f32 %v7745_v44, %v982_v49  ;;  %v1081_v50 = vsel %vm1016_vm12, %v983_v47, %v1049_v62  ;;  %vm2763_vm12 = vcmask 589312  }
 0x160   : > { %1170 = vst.msk [vmem:[#allocation2 + $0xc9] sm:$0xff] %vm1098_vm2, %v1081_v50 }
 0x161   : > { %2287 = vrot.lane.b32.xlu0 %v7875_v1, %s7422_s29  ;;  %v1080_v51 = vsel %vm1015_vm13, %v982_v49, %v1048_v63 }
 0x162   : > { %1169 = vst.msk [vmem:[#allocation2 + $0xc1] sm:$0xff] %vm1098_vm2, %v1080_v51 }
 0x163   : > { %2478 = vrot.lane.b32.xlu1 %v7877_v2, %s7421_s23 }
 0x165   : > { %1711 = vrot.lane.b32.xlu0 %v7875_v1, %s7419_s21 }
 0x167   : > { %1902 = vrot.lane.b32.xlu1 %v7877_v2, %s7418_s1  ;;  %v8133_v1 = vld [vmem:[#allocation2 + $0xc9] sm:$0xff] }
 0x168   : > { %v8135_v54 = vld [vmem:[#allocation2 + $0xca] sm:$0xff] }
 0x169   : > { %1327 = vrot.lane.b32.xlu0 %v7877_v2, %s10445_s27  ;;  %v8137_v55 = vld [vmem:[#allocation2 + $0xc0] sm:$0xff]  ;;  %3862 = vst.msk [vmem:[#allocation2 + $0xd0] sm:$0x3] %vm1101_vm3, %v7415_v17  ;;  %v8143_v2 = vld [vmem:[#allocation2 + $0xc8] sm:$0xff] }
 0x16a   : > { %v8145_v59 = vld [vmem:[#allocation2 + $0xc1] sm:$0xff]  ;;  %1235 = vst.msk [vmem:[#allocation3 + $0x80] sm:$0xff] %vm1098_vm2, %v8137_v55  ;;  %1236 = vst.msk [vmem:[#allocation3 + $0x88] sm:$0xff] %vm1098_vm2, %v8143_v2 }
 0x16b   : > { %2671 = vrot.lane.b32.xlu1 %v7879_v3, %s7423_s0  ;;  %v8147_v60 = vld [vmem:[#allocation2 + $0xc2] sm:$0xff] }
 0x16c   : > { %3861 = vst.msk [vmem:[#allocation2 + $0xc8] sm:$0xff] %vm1098_vm2, %v7415_v17  ;;  %3860 = vst.msk [vmem:[#allocation2 + $0xc0] sm:$0xff] %vm1098_vm2, %v7415_v17 }
 0x16d   : > { %2095 = vrot.lane.b32.xlu0 %v7879_v3, %s10443_s22 }
 0x16f   : > { %1520 = vrot.lane.b32.xlu1 %v7879_v3, %s10441_s28 }
 0x171   : > { %2484 = vrot.lane.b32.xlu0 %v7890_v4, %s7421_s23 }
 0x173   : > { %1908 = vrot.lane.b32.xlu1 %v7890_v4, %s7418_s1 }
 0x175   : > { %1333 = vrot.lane.b32.xlu0 %v7890_v4, %s10445_s27 }
 0x177   : > { %2677 = vrot.lane.b32.xlu1 %v7892_v5, %s7423_s0 }
 0x179   : > { %2101 = vrot.lane.b32.xlu0 %v7892_v5, %s10443_s22 }
 0x17b   : > { %2289 = vrot.lane.b32.xlu1 %v7902_v8, %s7422_s29 }
 0x17d   : > { %1526 = vrot.lane.b32.xlu0 %v7892_v5, %s10441_s28 }
 0x17f   : > { %1713 = vrot.lane.b32.xlu1 %v7902_v8, %s7419_s21  ;;  %v1897_v3 = vpop.permute.xlu0 %1896 }
 0x181   : > { %v1704_v0 = vpop.permute.xlu1 %1703  ;;  %2291 = vrot.lane.b32.xlu0 %v7904_v9, %s7422_s29 }
 0x182   : > { %1799 = vst.msk [vmem:[#allocation3 + $0x8] sm:$0xff] %vm1797_vm14, %v1704_v0 }
 0x183   : > { %2482 = vrot.lane.b32.xlu1 %v7907_v10, %s7421_s23  ;;  %1992 = vst.msk [vmem:[#allocation3 + $0x8] sm:$0xff] %vm1990_vm15, %v1897_v3  ;;  %v1322_v4 = vpop.permute.xlu0 %1321 }
 0x184   : > { %1415 = vst.msk [vmem:[#allocation3 + $0x18] sm:$0xff] %vm1411_vm4, %v1322_v4 }
 0x185   : > { %v1320_v5 = vpop.permute.xlu1 %1319  ;;  %1715 = vrot.lane.b32.xlu0 %v7904_v9, %s7419_s21  ;;  %v7064_v9 = vpop.f32.mrb[2].mxu1 }
 0x186   : > { %1414 = vst.msk [vmem:[#allocation3 + $0x10] sm:$0xff] %vm1411_vm4, %v1320_v5  ;;  %v948_v7 = vmul.f32 %v7064_v9, %v7731_v34  ;;  %v853_v19 = vpop.f32.mrb[3].mxu1 }
 0x187   : > { %1906 = vrot.lane.b32.xlu1 %v7907_v10, %s7418_s1  ;;  %v2090_v8 = vpop.permute.xlu0 %2089  ;;  %v947_v20 = vmul.f32 %v7731_v34, %v853_v19  ;;  %v7067_v0 = vpop.f32.mrb[4].mxu1 }
 0x188   : > { %2185 = vst.msk [vmem:[#allocation3 + $0x8] sm:$0xff] %vm2183_vm6, %v2090_v8  ;;  %v987_v23 = vadd.f32 %v7740_v38, %v948_v7  ;;  %v863_v5 = vpop.f32.mrb[5].mxu1 }
 0x189   : > { %v2088_v52 = vpop.permute.xlu1 %2087  ;;  %1331 = vrot.lane.b32.xlu0 %v7907_v10, %s10445_s27  ;;  %v986_v24 = vadd.f32 %v7740_v38, %v947_v20 }
 0x18a   : > { %vm1020_vm7 = vcmp.gt.f32.partialorder %v987_v23, 0.0 }
 0x18b   : > { %2675 = vrot.lane.b32.xlu1 %v7909_v11, %s7423_s0  ;;  %v1515_v6 = vpop.permute.xlu0 %1514  ;;  %vm1019_vm8 = vcmp.gt.f32.partialorder %v986_v24, 0.0  ;;  %v1052_v26 = vmul.f32 %v7745_v44, %v986_v24 }
 0x18c   : > { %1608 = vst.msk [vmem:[#allocation3 + $0x18] sm:$0xff] %vm1604_vm5, %v1515_v6  ;;  %v949_v6 = vmul.f32 %v7731_v34, %v863_v5 }
 0x18d   : > { %v1513_v53 = vpop.permute.xlu1 %1512  ;;  %2099 = vrot.lane.b32.xlu0 %v7909_v11, %s10443_s22  ;;  %v1084_v29 = vsel %vm1019_vm8, %v986_v24, %v1052_v26 }
 0x18e   : > { %1607 = vst.msk [vmem:[#allocation3 + $0x10] sm:$0xff] %vm1604_vm5, %v1513_v53 }
 0x18f   : > { %1524 = vrot.lane.b32.xlu1 %v7909_v11, %s10441_s28  ;;  %v8195_v10 = vpop.permute.xlu0 %2504  ;;  %v1053_v11 = vmul.f32 %v7745_v44, %v987_v23  ;;  %1173 = vst.msk [vmem:[#allocation2 + $0xf1] sm:$0xff] %vm1098_vm2, %v1084_v29 }
 0x191   : > { %v8198_v21 = vpop.permute.xlu1 %2309  ;;  %2488 = vrot.lane.b32.xlu0 %v7916_v12, %s7421_s23  ;;  %v1085_v28 = vsel %vm1020_vm7, %v987_v23, %v1053_v11  ;;  %vm2837_vm7 = vcmask 588800  }
 0x192   : > { %1174 = vst.msk [vmem:[#allocation2 + $0xf9] sm:$0xff] %vm1098_vm2, %v1085_v28 }
 0x193   : > { %1912 = vrot.lane.b32.xlu1 %v7916_v12, %s7418_s1  ;;  %v1702_v25 = vpop.permute.xlu0 %1701 }
 0x194   : > { %1798 = vst.msk [vmem:[#allocation3] sm:$0xff] %vm1797_vm14, %v1702_v25 }
 0x195   : > { %v8209_v27 = vpop.permute.xlu1 %1733  ;;  %1337 = vrot.lane.b32.xlu0 %v7916_v12, %s10445_s27 }
 0x196   : > { %v8231_v42 = vld [vmem:[#allocation2 + $0xf0] sm:$0xff] }
 0x197   : > { %2681 = vrot.lane.b32.xlu1 %v7918_v13, %s7423_s0  ;;  %v1895_v58 = vpop.permute.xlu0 %1894  ;;  %1239 = vst.msk [vmem:[#allocation3 + $0xa0] sm:$0xff] %vm1098_vm2, %v8231_v42  ;;  %v8261_v3 = vld [vmem:[#allocation2 + $0xf1] sm:$0xff] }
 0x198   : > { %1991 = vst.msk [vmem:[#allocation3] sm:$0xff] %vm1990_vm15, %v1895_v58 }
 0x199   : > { %v8218_v61 = vpop.permute.xlu1 %2502  ;;  %2184 = vst.msk [vmem:[#allocation3] sm:$0xff] %vm2183_vm6, %v2088_v52  ;;  %2105 = vrot.lane.b32.xlu0 %v7918_v13, %s10443_s22  ;;  %v8247_v63 = vld [vmem:[#allocation2 + $0xf8] sm:$0xff] }
 0x19a   : > { %1240 = vst.msk [vmem:[#allocation3 + $0xa8] sm:$0xff] %vm1098_vm2, %v8247_v63  ;;  %v8263_v4 = vld [vmem:[#allocation2 + $0xf2] sm:$0xff]  ;;  %v8273_v53 = vld [vmem:[#allocation2 + $0xfa] sm:$0xff] }
 0x19b   : > { %2293 = vrot.lane.b32.xlu1 %v7926_v14, %s7422_s29  ;;  %v8225_v12 = vpop.permute.xlu0 %2311  ;;  %3866 = vst.msk [vmem:[#allocation2 + $0xf0] sm:$0xff] %vm1098_vm2, %v7415_v17  ;;  %v8270_v52 = vld [vmem:[#allocation2 + $0xf9] sm:$0xff] }
 0x19c   : > { %3868 = vst.msk [vmem:[#allocation2 + $0x100] sm:$0x3] %vm1101_vm3, %v7415_v17 }
 0x19d   : > { %v8227_v41 = vpop.permute.xlu1 %1926  ;;  %1530 = vrot.lane.b32.xlu0 %v7918_v13, %s10441_s28  ;;  %3867 = vst.msk [vmem:[#allocation2 + $0xf8] sm:$0xff] %vm1098_vm2, %v7415_v17 }
 0x19f   : > { %1717 = vrot.lane.b32.xlu1 %v7926_v14, %s7419_s21  ;;  %v8237_v47 = vpop.permute.xlu0 %1735 }
 0x1a1   : > { %v8239_v49 = vpop.permute.xlu1 %2695  ;;  %2295 = vrot.lane.b32.xlu0 %v7930_v15, %s7422_s29 }
 0x1a3   : > { %2486 = vrot.lane.b32.xlu1 %v7934_v16, %s7421_s23  ;;  %v2477_v62 = vpop.permute.xlu0 %2476 }
 0x1a5   : > { %v1901_v13 = vpop.permute.xlu1 %1900  ;;  %1719 = vrot.lane.b32.xlu0 %v7930_v15, %s7419_s21 }
 0x1a7   : > { %1910 = vrot.lane.b32.xlu1 %v7934_v16, %s7418_s1  ;;  %v1326_v14 = vpop.permute.xlu0 %1325 }
 0x1a8   : > { %1417 = vst.msk [vmem:[#allocation3 + $0x28] sm:$0xff] %vm1411_vm4, %v1326_v14 }
 0x1a9   : > { %v2670_v50 = vpop.permute.xlu1 %2669  ;;  %1335 = vrot.lane.b32.xlu0 %v7934_v16, %s10445_s27  ;;  %v950_v16 = vmul.f32 %v7067_v0, %v7731_v34 }
 0x1ab   : > { %2679 = vrot.lane.b32.xlu1 %v7936_v18, %s7423_s0  ;;  %v2094_v15 = vpop.permute.xlu0 %2093  ;;  %v989_v7 = vadd.f32 %v7740_v38, %v950_v16 }
 0x1ad   : > { %v2282_v51 = vpop.permute.xlu1 %2281  ;;  %2103 = vrot.lane.b32.xlu0 %v7936_v18, %s10443_s22  ;;  %vm1022_vm11 = vcmp.gt.f32.partialorder %v989_v7, 0.0  ;;  %v1055_v19 = vmul.f32 %v7745_v44, %v989_v7 }
 0x1ae   : > { %2378 = vst.msk [vmem:[#allocation3] sm:$0xff] %vm2377_vm9, %v2282_v51 }
 0x1af   : > { %1528 = vrot.lane.b32.xlu1 %v7936_v18, %s10441_s28  ;;  %v1519_v8 = vpop.permute.xlu0 %1518  ;;  %v988_v18 = vadd.f32 %v7740_v38, %v949_v6  ;;  %v1087_v11 = vsel %vm1022_vm11, %v989_v7, %v1055_v19  ;;  %v8355_v19 = vld [vmem:[%s10423_s2] ss:$0 sm:$0xff] }
 0x1b0   : > { %1610 = vst.msk [vmem:[#allocation3 + $0x28] sm:$0xff] %vm1604_vm5, %v1519_v8  ;;  %v7070_v8 = vpop.f32.mrb[6].mxu1 }
 0x1b1   : > { %v1706_v9 = vpop.permute.xlu1 %1705  ;;  %2492 = vrot.lane.b32.xlu0 %v7970_v22, %s7421_s23  ;;  %vm1021_vm13 = vcmp.gt.f32.partialorder %v988_v18, 0.0  ;;  %v1054_v23 = vmul.f32 %v7745_v44, %v988_v18  ;;  %1176 = vst.msk [vmem:[#allocation2 + $0x111] sm:$0xff] %vm1098_vm2, %v1087_v11 }
 0x1b2   : > { %1800 = vst.msk [vmem:[#allocation3 + $0x10] sm:$0xff] %vm1797_vm14, %v1706_v9  ;;  %v873_v9 = vpop.f32.mrb[7].mxu1 }
 0x1b3   : > { %1916 = vrot.lane.b32.xlu1 %v7970_v22, %s7418_s1  ;;  %v2284_v20 = vpop.permute.xlu0 %2283  ;;  %v1086_v25 = vsel %vm1021_vm13, %v988_v18, %v1054_v23 }
 0x1b4   : > { %2379 = vst.msk [vmem:[#allocation3 + $0x8] sm:$0xff] %vm2377_vm9, %v2284_v20  ;;  %v951_v20 = vmul.f32 %v8355_v19, %v873_v9 }
 0x1b5   : > { %v2475_v24 = vpop.permute.xlu1 %2474  ;;  %2572 = vst.msk [vmem:[#allocation3 + $0x8] sm:$0xff] %vm2570_vm10, %v2477_v62  ;;  %1341 = vrot.lane.b32.xlu0 %v7970_v22, %s10445_s27 }
 0x1b6   : > { %2571 = vst.msk [vmem:[#allocation3] sm:$0xff] %vm2570_vm10, %v2475_v24  ;;  %v8372_v24 = vld [vmem:[%s10424_s3] ss:$0 sm:$0xff] }
 0x1b7   : > { %2765 = vst.msk [vmem:[#allocation3 + $0x8] sm:$0xff] %vm2763_vm12, %v2670_v50  ;;  %2685 = vrot.lane.b32.xlu1 %v7972_v30, %s7423_s0  ;;  %v1708_v26 = vpop.permute.xlu0 %1707  ;;  %v990_v11 = vadd.f32 %v8372_v24, %v951_v20 }
 0x1b8   : > { %1175 = vst.msk [vmem:[#allocation2 + $0x109] sm:$0xff] %vm1098_vm2, %v1086_v25  ;;  %v8350_v18 = vld [vmem:[#allocation2 + $0x111] sm:$0xff] }
 0x1b9   : > { %1801 = vst.msk [vmem:[#allocation3 + $0x18] sm:$0xff] %vm1797_vm14, %v1708_v26  ;;  %v1899_v28 = vpop.permute.xlu1 %1898  ;;  %2109 = vrot.lane.b32.xlu0 %v7972_v30, %s10443_s22  ;;  %v8358_v23 = vld [vmem:[#allocation2 + $0x112] sm:$0xff]  ;;  %vm1023_vm11 = vcmp.gt.f32.partialorder %v990_v11, 0.0  ;;  %v1056_v26 = vmul.f32 %v7745_v44, %v990_v11 }
 0x1ba   : > { %1994 = vst.msk [vmem:[#allocation3 + $0x18] sm:$0xff] %vm1990_vm15, %v1901_v13  ;;  %1993 = vst.msk [vmem:[#allocation3 + $0x10] sm:$0xff] %vm1990_vm15, %v1899_v28 }
 0x1bb   : > { %2187 = vst.msk [vmem:[#allocation3 + $0x18] sm:$0xff] %vm2183_vm6, %v2094_v15  ;;  %2297 = vrot.lane.b32.xlu1 %v7974_v31, %s7422_s29  ;;  %v1324_v22 = vpop.permute.xlu0 %1323 }
 0x1bc   : > { %1416 = vst.msk [vmem:[#allocation3 + $0x20] sm:$0xff] %vm1411_vm4, %v1324_v22 }
 0x1bd   : > { %v2668_v29 = vpop.permute.xlu1 %2667  ;;  %1534 = vrot.lane.b32.xlu0 %v7972_v30, %s10441_s28  ;;  %3871 = vst.msk [vmem:[#allocation2 + $0x118] sm:$0x3] %vm1101_vm3, %v7415_v17 }
 0x1be   : > { %2764 = vst.msk [vmem:[#allocation3] sm:$0xff] %vm2763_vm12, %v2668_v29  ;;  %v1088_v29 = vsel %vm1023_vm11, %v990_v11, %v1056_v26 }
 0x1bf   : > { %v8311_v58 = vld [vmem:[#allocation2 + $0x108] sm:$0xff]  ;;  %1721 = vrot.lane.b32.xlu1 %v7974_v31, %s7419_s21  ;;  %v2092_v62 = vpop.permute.xlu0 %2091  ;;  %v2797_v31 = vld [vmem:[#allocation3 + $0x8] sm:$0xff]  ;;  %v8326_v15 = vld [vmem:[#allocation2 + $0x110] sm:$0xff]  ;;  %1177 = vst.msk [vmem:[#allocation2 + $0x121] sm:$0xff] %vm1098_vm2, %v1088_v29 }
 0x1c0   : > { %1241 = vst.msk [vmem:[#allocation3 + $0xb0] sm:$0xff] %vm1098_vm2, %v8311_v58  ;;  %1242 = vst.msk [vmem:[#allocation3 + $0xb8] sm:$0xff] %vm1098_vm2, %v8326_v15  ;;  %v8341_v5 = vld [vmem:[#allocation2 + $0x109] sm:$0xff] }
 0x1c1   : > { %2186 = vst.msk [vmem:[#allocation3 + $0x10] sm:$0xff] %vm2183_vm6, %v2092_v62  ;;  %v1517_v13 = vpop.permute.xlu1 %1516  ;;  %2299 = vrot.lane.b32.xlu0 %v7980_v32, %s7422_s29  ;;  %v8343_v6 = vld [vmem:[#allocation2 + $0x10a] sm:$0xff] }
 0x1c2   : > { %1609 = vst.msk [vmem:[#allocation3 + $0x20] sm:$0xff] %vm1604_vm5, %v1517_v13 }
 0x1c3   : > { %2490 = vrot.lane.b32.xlu1 %v7982_v33, %s7421_s23  ;;  %v2481_v30 = vpop.permute.xlu0 %2480  ;;  %3869 = vst.msk [vmem:[#allocation2 + $0x108] sm:$0xff] %vm1098_vm2, %v7415_v17  ;;  %3870 = vst.msk [vmem:[#allocation2 + $0x110] sm:$0xff] %vm1098_vm2, %v7415_v17 }
 0x1c5   : > { %v1905_v14 = vpop.permute.xlu1 %1904  ;;  %v2796_v50 = vld [vmem:[#allocation3] sm:$0xff]  ;;  %1723 = vrot.lane.b32.xlu0 %v7980_v32, %s7419_s21 }
 0x1c6   : > { %7101 = vmatprep.mubr.msk.f32.mxu1 %vm2837_vm7, %v2796_v50  ;;  %v8431_v9 = vld [vmem:[#allocation2 + $0x121] sm:$0xff] }
 0x1c7   : > { %7102 = vmatmul.mubr.msk.f32.vlgmr.msra.gmra.mrb[16].mxu1 %vm2837_vm7, %v2797_v31  ;;  %1914 = vrot.lane.b32.xlu1 %v7982_v33, %s7418_s1  ;;  %v1330_v51 = vpop.permute.xlu0 %1329 }
 0x1c8   : > { %1419 = vst.msk [vmem:[#allocation3 + $0x38] sm:$0xff] %vm1411_vm4, %v1330_v51 }
 0x1c9   : > { %v2674_v0 = vpop.permute.xlu1 %2673  ;;  %1339 = vrot.lane.b32.xlu0 %v7982_v33, %s10445_s27  ;;  %v952_v33 = vmul.f32 %v7070_v8, %v7731_v34 }
 0x1cb   : > { %2683 = vrot.lane.b32.xlu1 %v7984_v35, %s7423_s0  ;;  %v2098_v32 = vpop.permute.xlu0 %2097  ;;  %v991_v34 = vadd.f32 %v7740_v38, %v952_v33 }
 0x1cd   : > { %v2286_v16 = vpop.permute.xlu1 %2285  ;;  %2107 = vrot.lane.b32.xlu0 %v7984_v35, %s10443_s22  ;;  %vm1024_vm8 = vcmp.gt.f32.partialorder %v991_v34, 0.0  ;;  %v1057_v38 = vmul.f32 %v7745_v44, %v991_v34 }
 0x1ce   : > { %2380 = vst.msk [vmem:[#allocation3 + $0x10] sm:$0xff] %vm2377_vm9, %v2286_v16 }
 0x1cf   : > { %1532 = vrot.lane.b32.xlu1 %v7984_v35, %s10441_s28  ;;  %v1523_v7 = vpop.permute.xlu0 %1522  ;;  %v1089_v22 = vsel %vm1024_vm8, %v991_v34, %v1057_v38 }
 0x1d0   : > { %1612 = vst.msk [vmem:[#allocation3 + $0x38] sm:$0xff] %vm1604_vm5, %v1523_v7 }
 0x1d1   : > { %v1710_v35 = vpop.permute.xlu1 %1709  ;;  %2496 = vrot.lane.b32.xlu0 %v8071_v56, %s7421_s23  ;;  %1178 = vst.msk [vmem:[#allocation2 + $0x129] sm:$0xff] %vm1098_vm2, %v1089_v22 }
 0x1d2   : > { %1802 = vst.msk [vmem:[#allocation3 + $0x20] sm:$0xff] %vm1797_vm14, %v1710_v35 }
 0x1d3   : > { %1920 = vrot.lane.b32.xlu1 %v8071_v56, %s7418_s1  ;;  %v2288_v25 = vpop.permute.xlu0 %2287 }
 0x1d4   : > { %2381 = vst.msk [vmem:[#allocation3 + $0x18] sm:$0xff] %vm2377_vm9, %v2288_v25 }
 0x1d5   : > { %v2479_v28 = vpop.permute.xlu1 %2478  ;;  %2574 = vst.msk [vmem:[#allocation3 + $0x18] sm:$0xff] %vm2570_vm10, %v2481_v30  ;;  %1345 = vrot.lane.b32.xlu0 %v8071_v56, %s10445_s27 }
 0x1d6   : > { %2573 = vst.msk [vmem:[#allocation3 + $0x10] sm:$0xff] %vm2570_vm10, %v2479_v28 }
 0x1d7   : > { %2767 = vst.msk [vmem:[#allocation3 + $0x18] sm:$0xff] %vm2763_vm12, %v2674_v0  ;;  %2689 = vrot.lane.b32.xlu1 %v8073_v36, %s7423_s0  ;;  %v1712_v62 = vpop.permute.xlu0 %1711 }
 0x1d8   : > { %1803 = vst.msk [vmem:[#allocation3 + $0x28] sm:$0xff] %vm1797_vm14, %v1712_v62  ;;  %v8433_v7 = vld [vmem:[#allocation2 + $0x122] sm:$0xff]  ;;  %v8442_v38 = vld [vmem:[#allocation2 + $0x12a] sm:$0xff] }
 0x1d9   : > { %v1903_v13 = vpop.permute.xlu1 %1902  ;;  %1996 = vst.msk [vmem:[#allocation3 + $0x28] sm:$0xff] %vm1990_vm15, %v1905_v14  ;;  %2113 = vrot.lane.b32.xlu0 %v8073_v36, %s10443_s22  ;;  %v8401_v14 = vld [vmem:[#allocation2 + $0x120] sm:$0xff]  ;;  %v8440_v34 = vld [vmem:[#allocation2 + $0x129] sm:$0xff] }
 0x1da   : > { %1995 = vst.msk [vmem:[#allocation3 + $0x20] sm:$0xff] %vm1990_vm15, %v1903_v13 }
 0x1db   : > { %2189 = vst.msk [vmem:[#allocation3 + $0x28] sm:$0xff] %vm2183_vm6, %v2098_v32  ;;  %2301 = vrot.lane.b32.xlu1 %v8075_v37, %s7422_s29  ;;  %v1328_v56 = vpop.permute.xlu0 %1327  ;;  %v8416_v32 = vld [vmem:[#allocation2 + $0x128] sm:$0xff] }
 0x1dc   : > { %1418 = vst.msk [vmem:[#allocation3 + $0x30] sm:$0xff] %vm1411_vm4, %v1328_v56 }
 0x1dd   : > { %v2672_v30 = vpop.permute.xlu1 %2671  ;;  %1538 = vrot.lane.b32.xlu0 %v8073_v36, %s10441_s28  ;;  %1243 = vst.msk [vmem:[#allocation3 + $0xc0] sm:$0xff] %vm1098_vm2, %v8401_v14  ;;  %1244 = vst.msk [vmem:[#allocation3 + $0xc8] sm:$0xff] %vm1098_vm2, %v8416_v32 }
 0x1de   : > { %2766 = vst.msk [vmem:[#allocation3 + $0x10] sm:$0xff] %vm2763_vm12, %v2672_v30 }
 0x1df   : > { %1725 = vrot.lane.b32.xlu1 %v8075_v37, %s7419_s21  ;;  %v2096_v50 = vpop.permute.xlu0 %2095  ;;  %v2799_v37 = vld [vmem:[#allocation3 + $0x18] sm:$0xff]  ;;  %3872 = vst.msk [vmem:[#allocation2 + $0x120] sm:$0xff] %vm1098_vm2, %v7415_v17  ;;  %3873 = vst.msk [vmem:[#allocation2 + $0x128] sm:$0xff] %vm1098_vm2, %v7415_v17 }
 0x1e0   : > { %2188 = vst.msk [vmem:[#allocation3 + $0x20] sm:$0xff] %vm2183_vm6, %v2096_v50 }
 0x1e1   : > { %v1521_v31 = vpop.permute.xlu1 %1520  ;;  %2303 = vrot.lane.b32.xlu0 %v8081_v57, %s7422_s29  ;;  %3874 = vst.msk [vmem:[#allocation2 + $0x130] sm:$0x3] %vm1101_vm3, %v7415_v17 }
 0x1e2   : > { %1611 = vst.msk [vmem:[#allocation3 + $0x30] sm:$0xff] %vm1604_vm5, %v1521_v31 }
 0x1e3   : > { %2494 = vrot.lane.b32.xlu1 %v8083_v39, %s7421_s23  ;;  %v2485_v36 = vpop.permute.xlu0 %2484 }
 0x1e5   : > { %v1909_v51 = vpop.permute.xlu1 %1908  ;;  %v2798_v0 = vld [vmem:[#allocation3 + $0x10] sm:$0xff]  ;;  %1727 = vrot.lane.b32.xlu0 %v8081_v57, %s7419_s21 }
 0x1e6   : > { %7104 = vmatprep.mubr.msk.f32.mxu1 %vm2837_vm7, %v2798_v0 }
 0x1e7   : > { %7105 = vmatmul.mubr.msk.f32.gmra.mrb[18].mxu1 %vm2837_vm7, %v2799_v37  ;;  %1918 = vrot.lane.b32.xlu1 %v8083_v39, %s7418_s1  ;;  %v1334_v16 = vpop.permute.xlu0 %1333 }
 0x1e8   : > { %1421 = vst.msk [vmem:[#allocation3 + $0x48] sm:$0xff] %vm1411_vm4, %v1334_v16  ;;  %v7073_v20 = vpop.f32.mrb[8].mxu1 }
 0x1e9   : > { %v2678_v8 = vpop.permute.xlu1 %2677  ;;  %1343 = vrot.lane.b32.xlu0 %v8083_v39, %s10445_s27  ;;  %v954_v35 = vmul.f32 %v8355_v19, %v7073_v20  ;;  %v883_v11 = vpop.f32.mrb[9].mxu1 }
 0x1ea   : > { %v953_v26 = vmul.f32 %v8355_v19, %v883_v11 }
 0x1eb   : > { %2687 = vrot.lane.b32.xlu1 %v8085_v40, %s7423_s0  ;;  %v2102_v57 = vpop.permute.xlu0 %2101 }
 0x1ec   : > { %v992_v28 = vadd.f32 %v8372_v24, %v953_v26 }
 0x1ed   : > { %v2290_v33 = vpop.permute.xlu1 %2289  ;;  %2111 = vrot.lane.b32.xlu0 %v8085_v40, %s10443_s22 }
 0x1ee   : > { %2382 = vst.msk [vmem:[#allocation3 + $0x20] sm:$0xff] %vm2377_vm9, %v2290_v33  ;;  %vm1025_vm8 = vcmp.gt.f32.partialorder %v992_v28, 0.0  ;;  %v1058_v13 = vmul.f32 %v7745_v44, %v992_v28 }
 0x1ef   : > { %1536 = vrot.lane.b32.xlu1 %v8085_v40, %s10441_s28  ;;  %v1527_v39 = vpop.permute.xlu0 %1526  ;;  %v993_v40 = vadd.f32 %v8372_v24, %v954_v35 }
 0x1f0   : > { %1614 = vst.msk [vmem:[#allocation3 + $0x48] sm:$0xff] %vm1604_vm5, %v1527_v39  ;;  %v1090_v30 = vsel %vm1025_vm8, %v992_v28, %v1058_v13 }
 0x1f1   : > { %v1714_v25 = vpop.permute.xlu1 %1713  ;;  %2500 = vrot.lane.b32.xlu0 %v8133_v1, %s7421_s23  ;;  %vm1026_vm13 = vcmp.gt.f32.partialorder %v993_v40, 0.0  ;;  %v1059_v29 = vmul.f32 %v7745_v44, %v993_v40  ;;  %1179 = vst.msk [vmem:[#allocation2 + $0x139] sm:$0xff] %vm1098_vm2, %v1090_v30 }
 0x1f2   : > { %1804 = vst.msk [vmem:[#allocation3 + $0x30] sm:$0xff] %vm1797_vm14, %v1714_v25 }
 0x1f3   : > { %1924 = vrot.lane.b32.xlu1 %v8133_v1, %s7418_s1  ;;  %v2292_v22 = vpop.permute.xlu0 %2291  ;;  %v1091_v56 = vsel %vm1026_vm13, %v993_v40, %v1059_v29  ;;  %v7076_v25 = vpop.f32.mrb[10].mxu1 }
 0x1f4   : > { %2383 = vst.msk [vmem:[#allocation3 + $0x28] sm:$0xff] %vm2377_vm9, %v2292_v22  ;;  %v956_v22 = vmul.f32 %v8355_v19, %v7076_v25  ;;  %v893_v29 = vpop.f32.mrb[11].mxu1 }
 0x1f5   : > { %v2483_v62 = vpop.permute.xlu1 %2482  ;;  %2576 = vst.msk [vmem:[#allocation3 + $0x28] sm:$0xff] %vm2570_vm10, %v2485_v36  ;;  %1349 = vrot.lane.b32.xlu0 %v8133_v1, %s10445_s27 }
 0x1f6   : > { %2575 = vst.msk [vmem:[#allocation3 + $0x20] sm:$0xff] %vm2570_vm10, %v2483_v62  ;;  %v3335_v62 = vld [vmem:[%s10428_s7] sm:$0xf]  ;;  %v995_v13 = vadd.f32 %v8372_v24, %v956_v22 }
 0x1f7   : > { %2769 = vst.msk [vmem:[#allocation3 + $0x28] sm:$0xff] %vm2763_vm12, %v2678_v8  ;;  %2693 = vrot.lane.b32.xlu1 %v8135_v54, %s7423_s0  ;;  %v1716_v50 = vpop.permute.xlu0 %1715  ;;  %7149 = vmatprep.subr.msk.mxu0 %vm10440_vm0, %v3335_v62 }
 0x1f8   : > { %1180 = vst.msk [vmem:[#allocation2 + $0x141] sm:$0xff] %vm1098_vm2, %v1091_v56  ;;  %v8513_v35 = vld [vmem:[#allocation2 + $0x139] sm:$0xff]  ;;  %7150 = vmatpush3.msk.msra.mxu0 %vm10440_vm0, %v3335_v62  ;;  %vm1028_vm11 = vcmp.gt.f32.partialorder %v995_v13, 0.0 }
 0x1f9   : > { %1805 = vst.msk [vmem:[#allocation3 + $0x38] sm:$0xff] %vm1797_vm14, %v1716_v50  ;;  %v1907_v31 = vpop.permute.xlu1 %1906  ;;  %2117 = vrot.lane.b32.xlu0 %v8135_v54, %s10443_s22  ;;  %v1061_v50 = vmul.f32 %v7745_v44, %v995_v13 }
 0x1fa   : > { %1998 = vst.msk [vmem:[#allocation3 + $0x38] sm:$0xff] %vm1990_vm15, %v1909_v51  ;;  %1997 = vst.msk [vmem:[#allocation3 + $0x30] sm:$0xff] %vm1990_vm15, %v1907_v31  ;;  %v8483_v51 = vld [vmem:[#allocation2 + $0x138] sm:$0xff] }
 0x1fb   : > { %2191 = vst.msk [vmem:[#allocation3 + $0x38] sm:$0xff] %vm2183_vm6, %v2102_v57  ;;  %2305 = vrot.lane.b32.xlu1 %v8137_v55, %s7422_s29  ;;  %v1332_v1 = vpop.permute.xlu0 %1331 }
 0x1fc   : > { %1420 = vst.msk [vmem:[#allocation3 + $0x40] sm:$0xff] %vm1411_vm4, %v1332_v1  ;;  %v7079_v1 = vpop.f32.mrb[12].mxu1 }
 0x1fd   : > { %v2676_v36 = vpop.permute.xlu1 %2675  ;;  %1542 = vrot.lane.b32.xlu0 %v8135_v54, %s10441_s28  ;;  %1245 = vst.msk [vmem:[#allocation3 + $0xd0] sm:$0xff] %vm1098_vm2, %v8483_v51 }
 0x1fe   : > { %2768 = vst.msk [vmem:[#allocation3 + $0x20] sm:$0xff] %vm2763_vm12, %v2676_v36  ;;  %v2801_v8 = vld [vmem:[#allocation3 + $0x28] sm:$0xff]  ;;  %v1093_v36 = vsel %vm1028_vm11, %v995_v13, %v1061_v50 }
 0x1ff   : > { %1729 = vrot.lane.b32.xlu1 %v8137_v55, %s7419_s21  ;;  %v2100_v0 = vpop.permute.xlu0 %2099  ;;  %v8498_v57 = vld [vmem:[#allocation2 + $0x140] sm:$0xff]  ;;  %1182 = vst.msk [vmem:[#allocation2 + $0x159] sm:$0xff] %vm1098_vm2, %v1093_v36 }
 0x200   : > { %2190 = vst.msk [vmem:[#allocation3 + $0x30] sm:$0xff] %vm2183_vm6, %v2100_v0  ;;  %v8515_v11 = vld [vmem:[#allocation2 + $0x13a] sm:$0xff]  ;;  %v8523_v40 = vld [vmem:[#allocation2 + $0x142] sm:$0xff]  ;;  %v958_v0 = vmul.f32 %v8355_v19, %v7079_v1 }
 0x201   : > { %v1525_v37 = vpop.permute.xlu1 %1524  ;;  %2307 = vrot.lane.b32.xlu0 %v8143_v2, %s7422_s29  ;;  %1246 = vst.msk [vmem:[#allocation3 + $0xd8] sm:$0xff] %vm1098_vm2, %v8498_v57  ;;  %3875 = vst.msk [vmem:[#allocation2 + $0x138] sm:$0xff] %vm1098_vm2, %v7415_v17  ;;  %v8521_v26 = vld [vmem:[#allocation2 + $0x141] sm:$0xff] }
 0x202   : > { %1613 = vst.msk [vmem:[#allocation3 + $0x40] sm:$0xff] %vm1604_vm5, %v1525_v37  ;;  %v903_v37 = vpop.f32.mrb[13].mxu1 }
 0x203   : > { %2498 = vrot.lane.b32.xlu1 %v8145_v59, %s7421_s23  ;;  %v2489_v54 = vpop.permute.xlu0 %2488  ;;  %3877 = vst.msk [vmem:[#allocation2 + $0x148] sm:$0x3] %vm1101_vm3, %v7415_v17 }
 0x204   : > { %3876 = vst.msk [vmem:[#allocation2 + $0x140] sm:$0xff] %vm1098_vm2, %v7415_v17 }
 0x205   : > { %v8493_v16 = vpop.permute.xlu1 %1912  ;;  %v2800_v55 = vld [vmem:[#allocation3 + $0x20] sm:$0xff]  ;;  %1731 = vrot.lane.b32.xlu0 %v8143_v2, %s7419_s21 }
 0x206   : > { %7107 = vmatprep.mubr.msk.f32.mxu1 %vm2837_vm7, %v2800_v55 }
 0x207   : > { %7108 = vmatmul.mubr.msk.f32.gmra.mrb[20].mxu1 %vm2837_vm7, %v2801_v8  ;;  %1922 = vrot.lane.b32.xlu1 %v8145_v59, %s7418_s1  ;;  %v1338_v33 = vpop.permute.xlu0 %1337  ;;  %v957_v8 = vmul.f32 %v8355_v19, %v903_v37 }
 0x208   : > { %1423 = vst.msk [vmem:[#allocation3 + $0x58] sm:$0xff] %vm1411_vm4, %v1338_v33  ;;  %v7082_v33 = vpop.f32.mrb[14].mxu1 }
 0x209   : > { %v2682_v20 = vpop.permute.xlu1 %2681  ;;  %1347 = vrot.lane.b32.xlu0 %v8145_v59, %s10445_s27  ;;  %v913_v25 = vpop.f32.mrb[15].mxu1 }
 0x20a   : > { %v959_v22 = vmul.f32 %v8355_v19, %v913_v25 }
 0x20b   : > { %2691 = vrot.lane.b32.xlu1 %v8147_v60, %s7423_s0  ;;  %v2106_v2 = vpop.permute.xlu0 %2105 }
 0x20d   : > { %v2294_v39 = vpop.permute.xlu1 %2293  ;;  %2115 = vrot.lane.b32.xlu0 %v8147_v60, %s10443_s22 }
 0x20e   : > { %2384 = vst.msk [vmem:[#allocation3 + $0x30] sm:$0xff] %vm2377_vm9, %v2294_v39 }
 0x20f   : > { %1540 = vrot.lane.b32.xlu1 %v8147_v60, %s10441_s28  ;;  %v1531_v59 = vpop.permute.xlu0 %1530  ;;  %v955_v60 = vmul.f32 %v8355_v19, %v893_v29 }
 0x210   : > { %1616 = vst.msk [vmem:[#allocation3 + $0x58] sm:$0xff] %vm1604_vm5, %v1531_v59  ;;  %v960_v59 = vmul.f32 %v8355_v19, %v7082_v33  ;;  %v8620_v33 = vld [vmem:[#allocation2 + $0x15a] sm:$0xff] }
 0x211   : > { %v1718_v28 = vpop.permute.xlu1 %1717  ;;  %1351 = vrot.lane.b32.xlu0 %v7815_v43, %s10445_s27  ;;  %v994_v30 = vadd.f32 %v8372_v24, %v955_v60 }
 0x212   : > { %1806 = vst.msk [vmem:[#allocation3 + $0x40] sm:$0xff] %vm1797_vm14, %v1718_v28  ;;  %v996_v28 = vadd.f32 %v8372_v24, %v957_v8  ;;  %v999_v60 = vadd.f32 %v8372_v24, %v960_v59 }
 0x213   : > { %1928 = vrot.lane.b32.xlu1 %v7817_v45, %s7418_s1  ;;  %v2296_v56 = vpop.permute.xlu0 %2295  ;;  %vm1027_vm13 = vcmp.gt.f32.partialorder %v994_v30, 0.0  ;;  %v1060_v31 = vmul.f32 %v7745_v44, %v994_v30 }
 0x214   : > { %2385 = vst.msk [vmem:[#allocation3 + $0x38] sm:$0xff] %vm2377_vm9, %v2296_v56  ;;  %vm1029_vm11 = vcmp.gt.f32.partialorder %v996_v28, 0.0  ;;  %v1062_v62 = vmul.f32 %v7745_v44, %v996_v28 }
 0x215   : > { %v2487_v43 = vpop.permute.xlu1 %2486  ;;  %2578 = vst.msk [vmem:[#allocation3 + $0x38] sm:$0xff] %vm2570_vm10, %v2489_v54  ;;  %2119 = vrot.lane.b32.xlu0 %v7824_v48, %s10443_s22  ;;  %v1092_v54 = vsel %vm1027_vm13, %v994_v30, %v1060_v31  ;;  %vm1032_vm13 = vcmp.gt.f32.partialorder %v999_v60, 0.0 }
 0x216   : > { %2577 = vst.msk [vmem:[#allocation3 + $0x30] sm:$0xff] %vm2570_vm10, %v2487_v43 }
 0x217   : > { %2771 = vst.msk [vmem:[#allocation3 + $0x38] sm:$0xff] %vm2763_vm12, %v2682_v20  ;;  %2697 = vrot.lane.b32.xlu1 %v7819_v46, %s7423_s0  ;;  %v1720_v55 = vpop.permute.xlu0 %1719  ;;  %v997_v20 = vadd.f32 %v8372_v24, %v958_v0 }
 0x218   : > { %1807 = vst.msk [vmem:[#allocation3 + $0x48] sm:$0xff] %vm1797_vm14, %v1720_v55 }
 0x219   : > { %v1911_v39 = vpop.permute.xlu1 %1910  ;;  %1181 = vst.msk [vmem:[#allocation2 + $0x151] sm:$0xff] %vm1098_vm2, %v1092_v54  ;;  %1353 = vrot.lane.b32.xlu0 %v7817_v45, %s10445_s27  ;;  %vm1030_vm8 = vcmp.gt.f32.partialorder %v997_v20, 0.0  ;;  %v1063_v29 = vmul.f32 %v7745_v44, %v997_v20  ;;  %v998_v45 = vadd.f32 %v8372_v24, %v959_v22  ;;  %v8616_v54 = vld [vmem:[#allocation2 + $0x159] sm:$0xff] }
 0x21a   : > { %2000 = vst.msk [vmem:[#allocation3 + $0x48] sm:$0xff] %vm1990_vm15, %v8493_v16  ;;  %1999 = vst.msk [vmem:[#allocation3 + $0x40] sm:$0xff] %vm1990_vm15, %v1911_v39 }
 0x21b   : > { %2193 = vst.msk [vmem:[#allocation3 + $0x48] sm:$0xff] %vm2183_vm6, %v2106_v2  ;;  %1544 = vrot.lane.b32.xlu1 %v7824_v48, %s10441_s28  ;;  %v1336_v16 = vpop.permute.xlu0 %1335  ;;  %v1095_v19 = vsel %vm1030_vm8, %v997_v20, %v1063_v29  ;;  %v1065_v2 = vmul.f32 %v7745_v44, %v999_v60  ;;  %v1094_v48 = vsel %vm1029_vm11, %v996_v28, %v1062_v62  ;;  %vm1031_vm0 = vcmp.gt.f32.partialorder %v998_v45, 0.0 }
 0x21c   : > { %1422 = vst.msk [vmem:[#allocation3 + $0x50] sm:$0xff] %vm1411_vm4, %v1336_v16  ;;  %v1064_v56 = vmul.f32 %v7745_v44, %v998_v45 }
 0x21d   : > { %v2680_v13 = vpop.permute.xlu1 %2679  ;;  %2121 = vrot.lane.b32.xlu0 %v7819_v46, %s10443_s22  ;;  %1184 = vst.msk [vmem:[#allocation2 + $0x171] sm:$0xff] %vm1098_vm2, %v1095_v19  ;;  %1183 = vst.msk [vmem:[#allocation2 + $0x169] sm:$0xff] %vm1098_vm2, %v1094_v48  ;;  %v1097_v24 = vsel %vm1032_vm13, %v999_v60, %v1065_v2 }
 0x21e   : > { %2770 = vst.msk [vmem:[#allocation3 + $0x30] sm:$0xff] %vm2763_vm12, %v2680_v13  ;;  %v1096_v43 = vsel %vm1031_vm0, %v998_v45, %v1064_v56  ;;  %v2803_v0 = vld [vmem:[#allocation3 + $0x38] sm:$0xff] }
 0x21f   : > { %2313 = vrot.lane.b32.xlu1 %v8231_v42, %s7422_s29  ;;  %v2104_v30 = vpop.permute.xlu0 %2103  ;;  %1186 = vst.msk [vmem:[#allocation2 + $0x189] sm:$0xff] %vm1098_vm2, %v1097_v24  ;;  %1185 = vst.msk [vmem:[#allocation2 + $0x181] sm:$0xff] %vm1098_vm2, %v1096_v43 }
 0x220   : > { %v8586_v50 = vld [vmem:[#allocation2 + $0x150] sm:$0xff]  ;;  %2192 = vst.msk [vmem:[#allocation3 + $0x40] sm:$0xff] %vm2183_vm6, %v2104_v30  ;;  %v8602_v37 = vld [vmem:[#allocation2 + $0x158] sm:$0xff] }
 0x221   : > { %v1529_v31 = vpop.permute.xlu1 %1528  ;;  %1247 = vst.msk [vmem:[#allocation3 + $0xe0] sm:$0xff] %vm1098_vm2, %v8586_v50  ;;  %1546 = vrot.lane.b32.xlu0 %v7819_v46, %s10441_s28  ;;  %1248 = vst.msk [vmem:[#allocation3 + $0xe8] sm:$0xff] %vm1098_vm2, %v8602_v37  ;;  %v8612_v55 = vld [vmem:[#allocation2 + $0x151] sm:$0xff] }
 0x222   : > { %1615 = vst.msk [vmem:[#allocation3 + $0x50] sm:$0xff] %vm1604_vm5, %v1529_v31  ;;  %v8618_v8 = vld [vmem:[#allocation2 + $0x152] sm:$0xff] }
 0x223   : > { %1737 = vrot.lane.b32.xlu1 %v8231_v42, %s7419_s21  ;;  %v2493_v44 = vpop.permute.xlu0 %2492  ;;  %3880 = vst.msk [vmem:[#allocation2 + $0x160] sm:$0x3] %vm1101_vm3, %v7415_v17 }
 0x224   : > { %3878 = vst.msk [vmem:[#allocation2 + $0x150] sm:$0xff] %vm1098_vm2, %v7415_v17  ;;  %3879 = vst.msk [vmem:[#allocation2 + $0x158] sm:$0xff] %vm1098_vm2, %v7415_v17  ;;  %v8633_v20 = vld [vmem:[#allocation2 + $0x168] sm:$0xff]  ;;  %v8635_v59 = vld [vmem:[#allocation2 + $0x170] sm:$0xff] }
 0x225   : > { %v8597_v1 = vpop.permute.xlu1 %1916  ;;  %v2802_v36 = vld [vmem:[#allocation3 + $0x30] sm:$0xff]  ;;  %2315 = vrot.lane.b32.xlu0 %v8247_v63, %s7422_s29  ;;  %v8637_v25 = vld [vmem:[#allocation2 + $0x169] sm:$0xff]  ;;  %v8639_v22 = vld [vmem:[#allocation2 + $0x171] sm:$0xff]  ;;  %1249 = vst.msk [vmem:[#allocation3 + $0xf0] sm:$0xff] %vm1098_vm2, %v8633_v20 }
 0x226   : > { %7110 = vmatprep.mubr.msk.f32.mxu1 %vm2837_vm7, %v2802_v36  ;;  %v8641_v29 = vld [vmem:[#allocation2 + $0x16a] sm:$0xff]  ;;  %v8643_v60 = vld [vmem:[#allocation2 + $0x172] sm:$0xff]  ;;  %1250 = vst.msk [vmem:[#allocation3 + $0xf8] sm:$0xff] %vm1098_vm2, %v8635_v59  ;;  %v8661_v62 = vld [vmem:[#allocation2 + $0x180] sm:$0xff] }
 0x227   : > { %7111 = vmatmul.mubr.msk.f32.gmra.mrb[22].mxu1 %vm2837_vm7, %v2803_v0  ;;  %2506 = vrot.lane.b32.xlu1 %v8261_v3, %s7421_s23  ;;  %v1342_v46 = vpop.permute.xlu0 %1341  ;;  %3883 = vst.msk [vmem:[#allocation2 + $0x178] sm:$0x3] %vm1101_vm3, %v7415_v17  ;;  %v8663_v45 = vld [vmem:[#allocation2 + $0x188] sm:$0xff] }
 0x228   : > { %1425 = vst.msk [vmem:[#allocation3 + $0x68] sm:$0xff] %vm1411_vm4, %v1342_v46  ;;  %v8665_v13 = vld [vmem:[#allocation2 + $0x181] sm:$0xff]  ;;  %v8667_v2 = vld [vmem:[#allocation2 + $0x189] sm:$0xff] }
 0x229   : > { %v2686_v42 = vpop.permute.xlu1 %2685  ;;  %1739 = vrot.lane.b32.xlu0 %v8247_v63, %s7419_s21  ;;  %3881 = vst.msk [vmem:[#allocation2 + $0x168] sm:$0xff] %vm1098_vm2, %v7415_v17  ;;  %3882 = vst.msk [vmem:[#allocation2 + $0x170] sm:$0xff] %vm1098_vm2, %v7415_v17  ;;  %v8669_v48 = vld [vmem:[#allocation2 + $0x182] sm:$0xff]  ;;  %v8671_v56 = vld [vmem:[#allocation2 + $0x18a] sm:$0xff] }
 0x22a   : > { %3884 = vst.msk [vmem:[#allocation2 + $0x180] sm:$0xff] %vm1098_vm2, %v7415_v17  ;;  %3885 = vst.msk [vmem:[#allocation2 + $0x188] sm:$0xff] %vm1098_vm2, %v7415_v17 }
 0x22b   : > { %1930 = vrot.lane.b32.xlu1 %v8261_v3, %s7418_s1  ;;  %v2110_v39 = vpop.permute.xlu0 %2109  ;;  %3886 = vst.msk [vmem:[#allocation2 + $0x190] sm:$0x3] %vm1101_vm3, %v7415_v17 }
 0x22d   : > { %v2298_v63 = vpop.permute.xlu1 %2297  ;;  %2508 = vrot.lane.b32.xlu0 %v8270_v52, %s7421_s23 }
 0x22e   : > { %2386 = vst.msk [vmem:[#allocation3 + $0x40] sm:$0xff] %vm2377_vm9, %v2298_v63 }
 0x22f   : > { %2699 = vrot.lane.b32.xlu1 %v8263_v4, %s7423_s0  ;;  %v1535_v28 = vpop.permute.xlu0 %1534 }
 0x230   : > { %1618 = vst.msk [vmem:[#allocation3 + $0x68] sm:$0xff] %vm1604_vm5, %v1535_v28 }
 0x231   : > { %v1722_v16 = vpop.permute.xlu1 %1721  ;;  %1355 = vrot.lane.b32.xlu0 %v8261_v3, %s10445_s27 }
 0x232   : > { %1808 = vst.msk [vmem:[#allocation3 + $0x50] sm:$0xff] %vm1797_vm14, %v1722_v16 }
 0x233   : > { %1932 = vrot.lane.b32.xlu1 %v8270_v52, %s7418_s1  ;;  %v2300_v19 = vpop.permute.xlu0 %2299 }
 0x234   : > { %2387 = vst.msk [vmem:[#allocation3 + $0x48] sm:$0xff] %vm2377_vm9, %v2300_v19 }
 0x235   : > { %v2491_v24 = vpop.permute.xlu1 %2490  ;;  %2580 = vst.msk [vmem:[#allocation3 + $0x48] sm:$0xff] %vm2570_vm10, %v2493_v44  ;;  %2123 = vrot.lane.b32.xlu0 %v8263_v4, %s10443_s22 }
 0x236   : > { %2579 = vst.msk [vmem:[#allocation3 + $0x40] sm:$0xff] %vm2570_vm10, %v2491_v24 }
 0x237   : > { %2773 = vst.msk [vmem:[#allocation3 + $0x48] sm:$0xff] %vm2763_vm12, %v2686_v42  ;;  %2701 = vrot.lane.b32.xlu1 %v8273_v53, %s7423_s0  ;;  %v1724_v3 = vpop.permute.xlu0 %1723 }
 0x238   : > { %1809 = vst.msk [vmem:[#allocation3 + $0x58] sm:$0xff] %vm1797_vm14, %v1724_v3 }
 0x239   : > { %v1915_v30 = vpop.permute.xlu1 %1914  ;;  %2002 = vst.msk [vmem:[#allocation3 + $0x58] sm:$0xff] %vm1990_vm15, %v8597_v1  ;;  %1357 = vrot.lane.b32.xlu0 %v8270_v52, %s10445_s27 }
 0x23a   : > { %2001 = vst.msk [vmem:[#allocation3 + $0x50] sm:$0xff] %vm1990_vm15, %v1915_v30 }
 0x23b   : > { %2195 = vst.msk [vmem:[#allocation3 + $0x58] sm:$0xff] %vm2183_vm6, %v2110_v39  ;;  %1548 = vrot.lane.b32.xlu1 %v8263_v4, %s10441_s28  ;;  %v1340_v43 = vpop.permute.xlu0 %1339 }
 0x23c   : > { %1424 = vst.msk [vmem:[#allocation3 + $0x60] sm:$0xff] %vm1411_vm4, %v1340_v43 }
 0x23d   : > { %v2684_v31 = vpop.permute.xlu1 %2683  ;;  %2125 = vrot.lane.b32.xlu0 %v8273_v53, %s10443_s22 }
 0x23e   : > { %2772 = vst.msk [vmem:[#allocation3 + $0x40] sm:$0xff] %vm2763_vm12, %v2684_v31  ;;  %v2805_v0 = vld [vmem:[#allocation3 + $0x48] sm:$0xff] }
 0x23f   : > { %2317 = vrot.lane.b32.xlu1 %v8311_v58, %s7422_s29  ;;  %v2108_v44 = vpop.permute.xlu0 %2107 }
 0x240   : > { %2194 = vst.msk [vmem:[#allocation3 + $0x50] sm:$0xff] %vm2183_vm6, %v2108_v44 }
 0x241   : > { %v1533_v52 = vpop.permute.xlu1 %1532  ;;  %1550 = vrot.lane.b32.xlu0 %v8273_v53, %s10441_s28 }
 0x242   : > { %1617 = vst.msk [vmem:[#allocation3 + $0x60] sm:$0xff] %vm1604_vm5, %v1533_v52 }
 0x243   : > { %1741 = vrot.lane.b32.xlu1 %v8311_v58, %s7419_s21  ;;  %v2497_v4 = vpop.permute.xlu0 %2496 }
 0x245   : > { %v1921_v1 = vpop.permute.xlu1 %1920  ;;  %v2804_v36 = vld [vmem:[#allocation3 + $0x40] sm:$0xff]  ;;  %2319 = vrot.lane.b32.xlu0 %v8326_v15, %s7422_s29 }
 0x246   : > { %7113 = vmatprep.mubr.msk.f32.mxu1 %vm2837_vm7, %v2804_v36 }
 0x247   : > { %7114 = vmatmul.mubr.msk.f32.gmra.mrb[24].mxu1 %vm2837_vm7, %v2805_v0  ;;  %2510 = vrot.lane.b32.xlu1 %v8341_v5, %s7421_s23  ;;  %v1346_v46 = vpop.permute.xlu0 %1345 }
 0x248   : > { %1427 = vst.msk [vmem:[#allocation3 + $0x78] sm:$0xff] %vm1411_vm4, %v1346_v46 }
 0x249   : > { %v2690_v53 = vpop.permute.xlu1 %2689  ;;  %1743 = vrot.lane.b32.xlu0 %v8326_v15, %s7419_s21 }
 0x24b   : > { %1934 = vrot.lane.b32.xlu1 %v8341_v5, %s7418_s1  ;;  %v2114_v58 = vpop.permute.xlu0 %2113 }
 0x24d   : > { %v2302_v42 = vpop.permute.xlu1 %2301  ;;  %2512 = vrot.lane.b32.xlu0 %v8350_v18, %s7421_s23 }
 0x24e   : > { %2388 = vst.msk [vmem:[#allocation3 + $0x50] sm:$0xff] %vm2377_vm9, %v2302_v42 }
 0x24f   : > { %2703 = vrot.lane.b32.xlu1 %v8343_v6, %s7423_s0  ;;  %v1539_v39 = vpop.permute.xlu0 %1538 }
 0x250   : > { %1620 = vst.msk [vmem:[#allocation3 + $0x78] sm:$0xff] %vm1604_vm5, %v1539_v39 }
 0x251   : > { %v1726_v63 = vpop.permute.xlu1 %1725  ;;  %1359 = vrot.lane.b32.xlu0 %v8341_v5, %s10445_s27 }
 0x252   : > { %1810 = vst.msk [vmem:[#allocation3 + $0x60] sm:$0xff] %vm1797_vm14, %v1726_v63 }
 0x253   : > { %1936 = vrot.lane.b32.xlu1 %v8350_v18, %s7418_s1  ;;  %v2304_v15 = vpop.permute.xlu0 %2303 }
 0x254   : > { %2389 = vst.msk [vmem:[#allocation3 + $0x58] sm:$0xff] %vm2377_vm9, %v2304_v15 }
 0x255   : > { %v2495_v28 = vpop.permute.xlu1 %2494  ;;  %2582 = vst.msk [vmem:[#allocation3 + $0x58] sm:$0xff] %vm2570_vm10, %v2497_v4  ;;  %2127 = vrot.lane.b32.xlu0 %v8343_v6, %s10443_s22 }
 0x256   : > { %2581 = vst.msk [vmem:[#allocation3 + $0x50] sm:$0xff] %vm2570_vm10, %v2495_v28 }
 0x257   : > { %2775 = vst.msk [vmem:[#allocation3 + $0x58] sm:$0xff] %vm2763_vm12, %v2690_v53  ;;  %2705 = vrot.lane.b32.xlu1 %v8358_v23, %s7423_s0  ;;  %v1728_v5 = vpop.permute.xlu0 %1727 }
 0x258   : > { %1811 = vst.msk [vmem:[#allocation3 + $0x68] sm:$0xff] %vm1797_vm14, %v1728_v5  ;;  %v8868_v5 = vld [vmem:[%s10427_s6] ss:$0 sm:$0xff] }
 0x259   : > { %v1919_v16 = vpop.permute.xlu1 %1918  ;;  %2004 = vst.msk [vmem:[#allocation3 + $0x68] sm:$0xff] %vm1990_vm15, %v1921_v1  ;;  %1361 = vrot.lane.b32.xlu0 %v8350_v18, %s10445_s27 }
 0x25a   : > { %2003 = vst.msk [vmem:[#allocation3 + $0x60] sm:$0xff] %vm1990_vm15, %v1919_v16 }
 0x25b   : > { %2197 = vst.msk [vmem:[#allocation3 + $0x68] sm:$0xff] %vm2183_vm6, %v2114_v58  ;;  %1552 = vrot.lane.b32.xlu1 %v8343_v6, %s10441_s28  ;;  %v1344_v19 = vpop.permute.xlu0 %1343 }
 0x25c   : > { %1426 = vst.msk [vmem:[#allocation3 + $0x70] sm:$0xff] %vm1411_vm4, %v1344_v19 }
 0x25d   : > { %v2688_v24 = vpop.permute.xlu1 %2687  ;;  %2129 = vrot.lane.b32.xlu0 %v8358_v23, %s10443_s22 }
 0x25e   : > { %2774 = vst.msk [vmem:[#allocation3 + $0x50] sm:$0xff] %vm2763_vm12, %v2688_v24  ;;  %v2807_v31 = vld [vmem:[#allocation3 + $0x58] sm:$0xff]  ;;  %v8875_v24 = vstv %s6740_s18  ;;  %s6776_s18 = sld [smem:[#allocation4 + $0x2]] }
 0x25f   : > { %2321 = vrot.lane.b32.xlu1 %v8401_v14, %s7422_s29  ;;  %v2112_v3 = vpop.permute.xlu0 %2111 }
 0x260   : > { %2196 = vst.msk [vmem:[#allocation3 + $0x60] sm:$0xff] %vm2183_vm6, %v2112_v3 }
 0x261   : > { %v1537_v18 = vpop.permute.xlu1 %1536  ;;  %1554 = vrot.lane.b32.xlu0 %v8358_v23, %s10441_s28 }
 0x262   : > { %1619 = vst.msk [vmem:[#allocation3 + $0x70] sm:$0xff] %vm1604_vm5, %v1537_v18 }
 0x263   : > { %1745 = vrot.lane.b32.xlu1 %v8401_v14, %s7419_s21  ;;  %v2501_v6 = vpop.permute.xlu0 %2500 }
 0x265   : > { %v1925_v30 = vpop.permute.xlu1 %1924  ;;  %v2806_v43 = vld [vmem:[#allocation3 + $0x50] sm:$0xff]  ;;  %2323 = vrot.lane.b32.xlu0 %v8416_v32, %s7422_s29 }
 0x266   : > { %7116 = vmatprep.mubr.msk.f32.mxu1 %vm2837_vm7, %v2806_v43 }
 0x267   : > { %7117 = vmatmul.mubr.msk.f32.gmra.mrb[26].mxu1 %vm2837_vm7, %v2807_v31  ;;  %2514 = vrot.lane.b32.xlu1 %v8431_v9, %s7421_s23  ;;  %v1350_v44 = vpop.permute.xlu0 %1349 }
 0x268   : > { %1429 = vst.msk [vmem:[#allocation3 + $0x88] sm:$0xff] %vm1411_vm4, %v1350_v44 }
 0x269   : > { %v2694_v23 = vpop.permute.xlu1 %2693  ;;  %1747 = vrot.lane.b32.xlu0 %v8416_v32, %s7419_s21 }
 0x26b   : > { %1938 = vrot.lane.b32.xlu1 %v8431_v9, %s7418_s1  ;;  %v2118_v14 = vpop.permute.xlu0 %2117 }
 0x26d   : > { %v2306_v52 = vpop.permute.xlu1 %2305  ;;  %2516 = vrot.lane.b32.xlu0 %v8440_v34, %s7421_s23 }
 0x26e   : > { %2390 = vst.msk [vmem:[#allocation3 + $0x60] sm:$0xff] %vm2377_vm9, %v2306_v52  ;;  %v8895_v52 = vld [vmem:[#allocation2 + $0x198] sm:$0xff] }
 0x26f   : > { %2707 = vrot.lane.b32.xlu1 %v8433_v7, %s7423_s0  ;;  %v1543_v4 = vpop.permute.xlu0 %1542 }
 0x270   : > { %1622 = vst.msk [vmem:[#allocation3 + $0x88] sm:$0xff] %vm1604_vm5, %v1543_v4  ;;  %v8897_v4 = vld [vmem:[#allocation2 + $0x199] sm:$0xff] }
 0x271   : > { %v1730_v1 = vpop.permute.xlu1 %1729  ;;  %1815 = vst.msk [vmem:[#allocation3 + $0x88] sm:$0xff] %vm1797_vm14, %v8237_v47  ;;  %1363 = vrot.lane.b32.xlu0 %v8431_v9, %s10445_s27 }
 0x272   : > { %1812 = vst.msk [vmem:[#allocation3 + $0x70] sm:$0xff] %vm1797_vm14, %v1730_v1  ;;  %v8899_v1 = vld [vmem:[#allocation2 + $0x19a] sm:$0xff] }
 0x273   : > { %1940 = vrot.lane.b32.xlu1 %v8440_v34, %s7418_s1  ;;  %v2308_v32 = vpop.permute.xlu0 %2307  ;;  %3887 = vst.msk [vmem:[#allocation2 + $0x198] sm:$0xff] %vm1098_vm2, %v7415_v17 }
 0x274   : > { %2391 = vst.msk [vmem:[#allocation3 + $0x68] sm:$0xff] %vm2377_vm9, %v2308_v32 }
 0x275   : > { %v2499_v36 = vpop.permute.xlu1 %2498  ;;  %2584 = vst.msk [vmem:[#allocation3 + $0x68] sm:$0xff] %vm2570_vm10, %v2501_v6  ;;  %2131 = vrot.lane.b32.xlu0 %v8433_v7, %s10443_s22 }
 0x276   : > { %2583 = vst.msk [vmem:[#allocation3 + $0x60] sm:$0xff] %vm2570_vm10, %v2499_v36  ;;  %v8902_v36 = vld [vmem:[#allocation2 + $0x1a0] sm:$0xff] }
 0x277   : > { %2777 = vst.msk [vmem:[#allocation3 + $0x68] sm:$0xff] %vm2763_vm12, %v2694_v23  ;;  %2709 = vrot.lane.b32.xlu1 %v8442_v38, %s7423_s0  ;;  %v1732_v47 = vpop.permute.xlu0 %1731 }
 0x278   : > { %1813 = vst.msk [vmem:[#allocation3 + $0x78] sm:$0xff] %vm1797_vm14, %v1732_v47  ;;  %v8904_v47 = vld [vmem:[#allocation2 + $0x1a1] sm:$0xff] }
 0x279   : > { %v1923_v9 = vpop.permute.xlu1 %1922  ;;  %2006 = vst.msk [vmem:[#allocation3 + $0x78] sm:$0xff] %vm1990_vm15, %v1925_v30  ;;  %1365 = vrot.lane.b32.xlu0 %v8440_v34, %s10445_s27 }
 0x27a   : > { %2005 = vst.msk [vmem:[#allocation3 + $0x70] sm:$0xff] %vm1990_vm15, %v1923_v9 }
 0x27b   : > { %2199 = vst.msk [vmem:[#allocation3 + $0x78] sm:$0xff] %vm2183_vm6, %v2118_v14  ;;  %1556 = vrot.lane.b32.xlu1 %v8433_v7, %s10441_s28  ;;  %v1348_v0 = vpop.permute.xlu0 %1347 }
 0x27c   : > { %2393 = vst.msk [vmem:[#allocation3 + $0x78] sm:$0xff] %vm2377_vm9, %v8225_v12 }
 0x27d   : > { %2586 = vst.msk [vmem:[#allocation3 + $0x78] sm:$0xff] %vm2570_vm10, %v8195_v10  ;;  %v2692_v46 = vpop.permute.xlu1 %2691  ;;  %2133 = vrot.lane.b32.xlu0 %v8442_v38, %s10443_s22 }
 0x27e   : > { %1428 = vst.msk [vmem:[#allocation3 + $0x80] sm:$0xff] %vm1411_vm4, %v1348_v0 }
 0x27f   : > { %2776 = vst.msk [vmem:[#allocation3 + $0x60] sm:$0xff] %vm2763_vm12, %v2692_v46  ;;  %2325 = vrot.lane.b32.xlu1 %v8483_v51, %s7422_s29  ;;  %v2116_v34 = vpop.permute.xlu0 %2115 }
 0x280   : > { %2198 = vst.msk [vmem:[#allocation3 + $0x70] sm:$0xff] %vm2183_vm6, %v2116_v34 }
 0x281   : > { %v1541_v7 = vpop.permute.xlu1 %1540  ;;  %2392 = vst.msk [vmem:[#allocation3 + $0x70] sm:$0xff] %vm2377_vm9, %v8198_v21  ;;  %1558 = vrot.lane.b32.xlu0 %v8442_v38, %s10441_s28 }
 0x282   : > { %1621 = vst.msk [vmem:[#allocation3 + $0x80] sm:$0xff] %vm1604_vm5, %v1541_v7 }
 0x283   : > { %2585 = vst.msk [vmem:[#allocation3 + $0x70] sm:$0xff] %vm2570_vm10, %v8218_v61  ;;  %1749 = vrot.lane.b32.xlu1 %v8483_v51, %s7419_s21  ;;  %v1352_v10 = vpop.permute.xlu0 %1351 }
 0x284   : > { %1814 = vst.msk [vmem:[#allocation3 + $0x80] sm:$0xff] %vm1797_vm14, %v8209_v27  ;;  %v2809_v27 = vld [vmem:[#allocation3 + $0x68] sm:$0xff] }
 0x285   : > { %2778 = vst.msk [vmem:[#allocation3 + $0x70] sm:$0xff] %vm2763_vm12, %v8239_v49  ;;  %v1929_v21 = vpop.permute.xlu1 %1928  ;;  %2327 = vrot.lane.b32.xlu0 %v8498_v57, %s7422_s29 }
 0x286   : > { %2007 = vst.msk [vmem:[#allocation3 + $0x80] sm:$0xff] %vm1990_vm15, %v8227_v41  ;;  %v2808_v12 = vld [vmem:[#allocation3 + $0x60] sm:$0xff]  ;;  %2008 = vst.msk [vmem:[#allocation3 + $0x88] sm:$0xff] %vm1990_vm15, %v1929_v21 }
 0x287   : > { %1430 = vst.msk [vmem:[#allocation3 + $0x90] sm:$0xff] %vm1411_vm4, %v1352_v10  ;;  %7119 = vmatprep.mubr.msk.f32.mxu1 %vm2837_vm7, %v2808_v12  ;;  %2518 = vrot.lane.b32.xlu1 %v8513_v35, %s7421_s23  ;;  %v2120_v61 = vpop.permute.xlu0 %2119 }
 0x288   : > { %7120 = vmatmul.mubr.msk.f32.gmra.mrb[28].mxu1 %vm2837_vm7, %v2809_v27  ;;  %2200 = vst.msk [vmem:[#allocation3 + $0x80] sm:$0xff] %vm2183_vm6, %v2120_v61 }
 0x289   : > { %v2698_v41 = vpop.permute.xlu1 %2697  ;;  %1751 = vrot.lane.b32.xlu0 %v8498_v57, %s7419_s21 }
 0x28a   : > { %2779 = vst.msk [vmem:[#allocation3 + $0x78] sm:$0xff] %vm2763_vm12, %v2698_v41 }
 0x28b   : > { %1942 = vrot.lane.b32.xlu1 %v8513_v35, %s7418_s1  ;;  %v1354_v38 = vpop.permute.xlu0 %1353 }
 0x28c   : > { %v2810_v49 = vld [vmem:[#allocation3 + $0x70] sm:$0xff]  ;;  %1431 = vst.msk [vmem:[#allocation3 + $0x98] sm:$0xff] %vm1411_vm4, %v1354_v38 }
 0x28d   : > { %7122 = vmatprep.mubr.msk.f32.mxu1 %vm2837_vm7, %v2810_v49  ;;  %v1545_v51 = vpop.permute.xlu1 %1544  ;;  %2520 = vrot.lane.b32.xlu0 %v8521_v26, %s7421_s23 }
 0x28e   : > { %1623 = vst.msk [vmem:[#allocation3 + $0x90] sm:$0xff] %vm1604_vm5, %v1545_v51 }
 0x28f   : > { %2711 = vrot.lane.b32.xlu1 %v8515_v11, %s7423_s0  ;;  %v2122_v53 = vpop.permute.xlu0 %2121 }
 0x290   : > { %2201 = vst.msk [vmem:[#allocation3 + $0x88] sm:$0xff] %vm2183_vm6, %v2122_v53 }
 0x291   : > { %v2314_v57 = vpop.permute.xlu1 %2313  ;;  %v2811_v58 = vld [vmem:[#allocation3 + $0x78] sm:$0xff]  ;;  %1367 = vrot.lane.b32.xlu0 %v8513_v35, %s10445_s27  ;;  %v8861_v35 = vld [vmem:[%s10426_s5] ss:$0 sm:$0xff] }
 0x292   : > { %2394 = vst.msk [vmem:[#allocation3 + $0x80] sm:$0xff] %vm2377_vm9, %v2314_v57  ;;  %7123 = vmatmul.mubr.msk.f32.gmra.mrb[30].mxu1 %vm2837_vm7, %v2811_v58 }
 0x293   : > { %1944 = vrot.lane.b32.xlu1 %v8521_v26, %s7418_s1  ;;  %v1547_v42 = vpop.permute.xlu0 %1546 }
 0x294   : > { %1624 = vst.msk [vmem:[#allocation3 + $0x98] sm:$0xff] %vm1604_vm5, %v1547_v42 }
 0x295   : > { %v1738_v39 = vpop.permute.xlu1 %1737  ;;  %2135 = vrot.lane.b32.xlu0 %v8515_v11, %s10443_s22 }
 0x296   : > { %1816 = vst.msk [vmem:[#allocation3 + $0x90] sm:$0xff] %vm1797_vm14, %v1738_v39 }
 0x297   : > { %2713 = vrot.lane.b32.xlu1 %v8523_v40, %s7423_s0  ;;  %v2316_v63 = vpop.permute.xlu0 %2315 }
 0x298   : > { %2395 = vst.msk [vmem:[#allocation3 + $0x88] sm:$0xff] %vm2377_vm9, %v2316_v63 }
 0x299   : > { %v2507_v15 = vpop.permute.xlu1 %2506  ;;  %1369 = vrot.lane.b32.xlu0 %v8521_v26, %s10445_s27 }
 0x29a   : > { %2587 = vst.msk [vmem:[#allocation3 + $0x80] sm:$0xff] %vm2570_vm10, %v2507_v15  ;;  %v7103_v28 = vpop.f32.mrb[16].mxu1 }
 0x29b   : > { %v3167_v16 = vmul.f32 %v7103_v28, %v8861_v35  ;;  %v3000_v19 = vpop.f32.mrb[17].mxu1  ;;  %1560 = vrot.lane.b32.xlu1 %v8515_v11, %s10441_s28  ;;  %v1740_v18 = vpop.permute.xlu0 %1739 }
 0x29c   : > { %v3166_v3 = vmul.f32 %v8861_v35, %v3000_v19  ;;  %1817 = vst.msk [vmem:[#allocation3 + $0x98] sm:$0xff] %vm1797_vm14, %v1740_v18 }
 0x29d   : > { %v3206_v6 = vadd.f32 %v8868_v5, %v3167_v16  ;;  %v1931_v30 = vpop.permute.xlu1 %1930  ;;  %2137 = vrot.lane.b32.xlu0 %v8523_v40, %s10443_s22 }
 0x29e   : > { %v3205_v43 = vadd.f32 %v8868_v5, %v3166_v3  ;;  %2009 = vst.msk [vmem:[#allocation3 + $0x90] sm:$0xff] %vm1990_vm15, %v1931_v30 }
 0x29f   : > { %v3272_v26 = vmul.f32 %v8875_v24, %v3206_v6  ;;  %2329 = vrot.lane.b32.xlu1 %v8586_v50, %s7422_s29  ;;  %vm3239_vm0 = vcmp.gt.f32.partialorder %v3206_v6, 0.0  ;;  %v2509_v31 = vpop.permute.xlu0 %2508 }
 0x2a0   : > { %v3271_v11 = vmul.f32 %v8875_v24, %v3205_v43  ;;  %vm3238_vm8 = vcmp.gt.f32.partialorder %v3205_v43, 0.0  ;;  %2588 = vst.msk [vmem:[#allocation3 + $0x88] sm:$0xff] %vm2570_vm10, %v2509_v31 }
 0x2a1   : > { %v2700_v44 = vpop.permute.xlu1 %2699  ;;  %1562 = vrot.lane.b32.xlu0 %v8523_v40, %s10441_s28  ;;  %v3304_v14 = vsel %vm3239_vm0, %v3206_v6, %v3272_v26  ;;  %v8908_v40 = vld [vmem:[#allocation2 + $0x1a2] sm:$0xff] }
 0x2a2   : > { %2780 = vst.msk [vmem:[#allocation3 + $0x80] sm:$0xff] %vm2763_vm12, %v2700_v44  ;;  %v3303_v23 = vsel %vm3238_vm8, %v3205_v43, %v3271_v11 }
 0x2a3   : > { %7151 = vmatprep.mubr.msk.f32.mxu0 %vm596_vm1, %v3303_v23  ;;  %1753 = vrot.lane.b32.xlu1 %v8586_v50, %s7419_s21  ;;  %v1356_v32 = vpop.permute.xlu0 %1355  ;;  %3888 = vst.msk [vmem:[#allocation2 + $0x1a0] sm:$0xff] %vm1098_vm2, %v7415_v17 }
 0x2a4   : > { %7152 = vmatmul.mubr.msk.f32.vlgmr.msra.gmra.mrb[16].mxu0 %vm596_vm1, %v3304_v14  ;;  %1432 = vst.msk [vmem:[#allocation3 + $0xa0] sm:$0xff] %vm1411_vm4, %v1356_v32 }
 0x2a5   : > { %v1933_v50 = vpop.permute.xlu1 %1932  ;;  %3889 = vst.msk [vmem:[#allocation2 + $0x1a8] sm:$0x3] %vm1101_vm3, %v7415_v17  ;;  %2331 = vrot.lane.b32.xlu0 %v8602_v37, %s7422_s29 }
 0x2a6   : > { %2010 = vst.msk [vmem:[#allocation3 + $0x98] sm:$0xff] %vm1990_vm15, %v1933_v50 }
 0x2a7   : > { %2522 = vrot.lane.b32.xlu1 %v8612_v55, %s7421_s23  ;;  %v2124_v9 = vpop.permute.xlu0 %2123 }
 0x2a8   : > { %2202 = vst.msk [vmem:[#allocation3 + $0x90] sm:$0xff] %vm2183_vm6, %v2124_v9 }
 0x2a9   : > { %v2702_v0 = vpop.permute.xlu1 %2701  ;;  %v2812_v46 = vld [vmem:[#allocation3 + $0x80] sm:$0xff]  ;;  %1755 = vrot.lane.b32.xlu0 %v8602_v37, %s7419_s21 }
 0x2aa   : > { %2781 = vst.msk [vmem:[#allocation3 + $0x88] sm:$0xff] %vm2763_vm12, %v2702_v0  ;;  %7125 = vmatprep.mubr.msk.f32.mxu1 %vm2837_vm7, %v2812_v46 }
 0x2ab   : > { %1946 = vrot.lane.b32.xlu1 %v8612_v55, %s7418_s1  ;;  %v1358_v17 = vpop.permute.xlu0 %1357 }
 0x2ac   : > { %1433 = vst.msk [vmem:[#allocation3 + $0xa8] sm:$0xff] %vm1411_vm4, %v1358_v17 }
 0x2ad   : > { %v1549_v34 = vpop.permute.xlu1 %1548  ;;  %2524 = vrot.lane.b32.xlu0 %v8616_v54, %s7421_s23 }
 0x2ae   : > { %1625 = vst.msk [vmem:[#allocation3 + $0xa0] sm:$0xff] %vm1604_vm5, %v1549_v34 }
 0x2af   : > { %2715 = vrot.lane.b32.xlu1 %v8618_v8, %s7423_s0  ;;  %v2126_v7 = vpop.permute.xlu0 %2125 }
 0x2b0   : > { %2203 = vst.msk [vmem:[#allocation3 + $0x98] sm:$0xff] %vm2183_vm6, %v2126_v7 }
 0x2b1   : > { %v2318_v37 = vpop.permute.xlu1 %2317  ;;  %v2813_v10 = vld [vmem:[#allocation3 + $0x88] sm:$0xff]  ;;  %1371 = vrot.lane.b32.xlu0 %v8612_v55, %s10445_s27 }
 0x2b2   : > { %2396 = vst.msk [vmem:[#allocation3 + $0x90] sm:$0xff] %vm2377_vm9, %v2318_v37  ;;  %7126 = vmatmul.mubr.msk.f32.gmra.mrb[32].mxu1 %vm2837_vm7, %v2813_v10 }
 0x2b3   : > { %1948 = vrot.lane.b32.xlu1 %v8616_v54, %s7418_s1  ;;  %v1551_v21 = vpop.permute.xlu0 %1550 }
 0x2b4   : > { %1626 = vst.msk [vmem:[#allocation3 + $0xa8] sm:$0xff] %vm1604_vm5, %v1551_v21 }
 0x2b5   : > { %v1742_v12 = vpop.permute.xlu1 %1741  ;;  %2139 = vrot.lane.b32.xlu0 %v8618_v8, %s10443_s22 }
 0x2b6   : > { %1818 = vst.msk [vmem:[#allocation3 + $0xa0] sm:$0xff] %vm1797_vm14, %v1742_v12 }
 0x2b7   : > { %2717 = vrot.lane.b32.xlu1 %v8620_v33, %s7423_s0  ;;  %v2320_v27 = vpop.permute.xlu0 %2319 }
 0x2b8   : > { %2397 = vst.msk [vmem:[#allocation3 + $0x98] sm:$0xff] %vm2377_vm9, %v2320_v27 }
 0x2b9   : > { %v2511_v55 = vpop.permute.xlu1 %2510  ;;  %1373 = vrot.lane.b32.xlu0 %v8616_v54, %s10445_s27 }
 0x2ba   : > { %2589 = vst.msk [vmem:[#allocation3 + $0x90] sm:$0xff] %vm2570_vm10, %v2511_v55  ;;  %v7106_v61 = vpop.f32.mrb[18].mxu1 }
 0x2bb   : > { %v3169_v41 = vmul.f32 %v7106_v61, %v8861_v35  ;;  %v3010_v49 = vpop.f32.mrb[19].mxu1  ;;  %1564 = vrot.lane.b32.xlu1 %v8618_v8, %s10441_s28  ;;  %v1744_v51 = vpop.permute.xlu0 %1743 }
 0x2bc   : > { %v3168_v38 = vmul.f32 %v8861_v35, %v3010_v49  ;;  %1819 = vst.msk [vmem:[#allocation3 + $0xa8] sm:$0xff] %vm1797_vm14, %v1744_v51 }
 0x2bd   : > { %v3208_v53 = vadd.f32 %v8868_v5, %v3169_v41  ;;  %v1935_v57 = vpop.permute.xlu1 %1934  ;;  %2141 = vrot.lane.b32.xlu0 %v8620_v33, %s10443_s22 }
 0x2be   : > { %v3207_v58 = vadd.f32 %v8868_v5, %v3168_v38  ;;  %2011 = vst.msk [vmem:[#allocation3 + $0xa0] sm:$0xff] %vm1990_vm15, %v1935_v57 }
 0x2bf   : > { %v3274_v54 = vmul.f32 %v8875_v24, %v3208_v53  ;;  %2333 = vrot.lane.b32.xlu1 %v8633_v20, %s7422_s29  ;;  %v2513_v42 = vpop.permute.xlu0 %2512  ;;  %vm3241_vm11 = vcmp.gt.f32.partialorder %v3208_v53, 0.0 }
 0x2c0   : > { %v3273_v8 = vmul.f32 %v8875_v24, %v3207_v58  ;;  %vm3240_vm3 = vcmp.gt.f32.partialorder %v3207_v58, 0.0  ;;  %2590 = vst.msk [vmem:[#allocation3 + $0x98] sm:$0xff] %vm2570_vm10, %v2513_v42 }
 0x2c1   : > { %v2704_v39 = vpop.permute.xlu1 %2703  ;;  %1566 = vrot.lane.b32.xlu0 %v8620_v33, %s10441_s28  ;;  %v3306_v15 = vsel %vm3241_vm11, %v3208_v53, %v3274_v54 }
 0x2c2   : > { %2782 = vst.msk [vmem:[#allocation3 + $0x90] sm:$0xff] %vm2763_vm12, %v2704_v39  ;;  %v3305_v63 = vsel %vm3240_vm3, %v3207_v58, %v3273_v8 }
 0x2c3   : > { %7154 = vmatprep.mubr.msk.f32.mxu0 %vm596_vm1, %v3305_v63  ;;  %1757 = vrot.lane.b32.xlu1 %v8633_v20, %s7419_s21  ;;  %v1360_v28 = vpop.permute.xlu0 %1359 }
 0x2c4   : > { %7155 = vmatmul.mubr.msk.f32.gmra.mrb[18].mxu0 %vm596_vm1, %v3306_v15  ;;  %1434 = vst.msk [vmem:[#allocation3 + $0xb0] sm:$0xff] %vm1411_vm4, %v1360_v28  ;;  %v3987_v15 = vld [vmem:[#allocation2 + $0x9] sm:$0xff] }
 0x2c5   : > { %v1937_v16 = vpop.permute.xlu1 %1936  ;;  %2335 = vrot.lane.b32.xlu0 %v8635_v59, %s7422_s29 }
 0x2c6   : > { %2012 = vst.msk [vmem:[#allocation3 + $0xa8] sm:$0xff] %vm1990_vm15, %v1937_v16 }
 0x2c7   : > { %2526 = vrot.lane.b32.xlu1 %v8637_v25, %s7421_s23  ;;  %v2128_v33 = vpop.permute.xlu0 %2127 }
 0x2c8   : > { %2204 = vst.msk [vmem:[#allocation3 + $0xa0] sm:$0xff] %vm2183_vm6, %v2128_v33  ;;  %v4179_v33 = vld [vmem:[#allocation2 + $0xa] sm:$0xff] }
 0x2c9   : > { %v2706_v19 = vpop.permute.xlu1 %2705  ;;  %v2814_v20 = vld [vmem:[#allocation3 + $0x90] sm:$0xff]  ;;  %1759 = vrot.lane.b32.xlu0 %v8635_v59, %s7419_s21 }
 0x2ca   : > { %2783 = vst.msk [vmem:[#allocation3 + $0x98] sm:$0xff] %vm2763_vm12, %v2706_v19  ;;  %7128 = vmatprep.mubr.msk.f32.mxu1 %vm2837_vm7, %v2814_v20 }
 0x2cb   : > { %1950 = vrot.lane.b32.xlu1 %v8637_v25, %s7418_s1  ;;  %v1362_v3 = vpop.permute.xlu0 %1361 }
 0x2cc   : > { %1435 = vst.msk [vmem:[#allocation3 + $0xb8] sm:$0xff] %vm1411_vm4, %v1362_v3 }
 0x2cd   : > { %v1553_v18 = vpop.permute.xlu1 %1552  ;;  %2528 = vrot.lane.b32.xlu0 %v8639_v22, %s7421_s23 }
 0x2ce   : > { %1627 = vst.msk [vmem:[#allocation3 + $0xb0] sm:$0xff] %vm1604_vm5, %v1553_v18 }
 0x2cf   : > { %2719 = vrot.lane.b32.xlu1 %v8641_v29, %s7423_s0  ;;  %v2130_v6 = vpop.permute.xlu0 %2129 }
 0x2d0   : > { %2205 = vst.msk [vmem:[#allocation3 + $0xa8] sm:$0xff] %vm2183_vm6, %v2130_v6 }
 0x2d1   : > { %v2322_v59 = vpop.permute.xlu1 %2321  ;;  %v2815_v30 = vld [vmem:[#allocation3 + $0x98] sm:$0xff]  ;;  %1375 = vrot.lane.b32.xlu0 %v8637_v25, %s10445_s27 }
 0x2d2   : > { %2398 = vst.msk [vmem:[#allocation3 + $0xa0] sm:$0xff] %vm2377_vm9, %v2322_v59  ;;  %7129 = vmatmul.mubr.msk.f32.gmra.mrb[34].mxu1 %vm2837_vm7, %v2815_v30 }
 0x2d3   : > { %1952 = vrot.lane.b32.xlu1 %v8639_v22, %s7418_s1  ;;  %v1555_v43 = vpop.permute.xlu0 %1554 }
 0x2d4   : > { %1628 = vst.msk [vmem:[#allocation3 + $0xb8] sm:$0xff] %vm1604_vm5, %v1555_v43 }
 0x2d5   : > { %v1746_v26 = vpop.permute.xlu1 %1745  ;;  %2143 = vrot.lane.b32.xlu0 %v8641_v29, %s10443_s22 }
 0x2d6   : > { %1820 = vst.msk [vmem:[#allocation3 + $0xb0] sm:$0xff] %vm1797_vm14, %v1746_v26 }
 0x2d7   : > { %2721 = vrot.lane.b32.xlu1 %v8643_v60, %s7423_s0  ;;  %v2324_v11 = vpop.permute.xlu0 %2323 }
 0x2d8   : > { %2399 = vst.msk [vmem:[#allocation3 + $0xa8] sm:$0xff] %vm2377_vm9, %v2324_v11 }
 0x2d9   : > { %v2515_v25 = vpop.permute.xlu1 %2514  ;;  %1377 = vrot.lane.b32.xlu0 %v8639_v22, %s10445_s27 }
 0x2da   : > { %2591 = vst.msk [vmem:[#allocation3 + $0xa0] sm:$0xff] %vm2570_vm10, %v2515_v25  ;;  %v7109_v31 = vpop.f32.mrb[20].mxu1 }
 0x2db   : > { %v3171_v44 = vmul.f32 %v7109_v31, %v8861_v35  ;;  %v3020_v23 = vpop.f32.mrb[21].mxu1  ;;  %1568 = vrot.lane.b32.xlu1 %v8641_v29, %s10441_s28  ;;  %v1748_v32 = vpop.permute.xlu0 %1747 }
 0x2dc   : > { %v3170_v14 = vmul.f32 %v8861_v35, %v3020_v23  ;;  %1821 = vst.msk [vmem:[#allocation3 + $0xb8] sm:$0xff] %vm1797_vm14, %v1748_v32 }
 0x2dd   : > { %v3210_v50 = vadd.f32 %v8868_v5, %v3171_v44  ;;  %v1939_v9 = vpop.permute.xlu1 %1938  ;;  %2145 = vrot.lane.b32.xlu0 %v8643_v60, %s10443_s22 }
 0x2de   : > { %v3209_v0 = vadd.f32 %v8868_v5, %v3170_v14  ;;  %2013 = vst.msk [vmem:[#allocation3 + $0xb0] sm:$0xff] %vm1990_vm15, %v1939_v9 }
 0x2df   : > { %v3276_v22 = vmul.f32 %v8875_v24, %v3210_v50  ;;  %2337 = vrot.lane.b32.xlu1 %v8661_v62, %s7422_s29  ;;  %v2517_v46 = vpop.permute.xlu0 %2516  ;;  %vm3243_vm0 = vcmp.gt.f32.partialorder %v3210_v50, 0.0 }
 0x2e0   : > { %v3275_v29 = vmul.f32 %v8875_v24, %v3209_v0  ;;  %vm3242_vm13 = vcmp.gt.f32.partialorder %v3209_v0, 0.0  ;;  %2592 = vst.msk [vmem:[#allocation3 + $0xa8] sm:$0xff] %vm2570_vm10, %v2517_v46 }
 0x2e1   : > { %v2708_v17 = vpop.permute.xlu1 %2707  ;;  %1570 = vrot.lane.b32.xlu0 %v8643_v60, %s10441_s28  ;;  %v3308_v7 = vsel %vm3243_vm0, %v3210_v50, %v3276_v22 }
 0x2e2   : > { %2784 = vst.msk [vmem:[#allocation3 + $0xa0] sm:$0xff] %vm2763_vm12, %v2708_v17  ;;  %v3307_v34 = vsel %vm3242_vm13, %v3209_v0, %v3275_v29 }
 0x2e3   : > { %7157 = vmatprep.mubr.msk.f32.mxu0 %vm596_vm1, %v3307_v34  ;;  %1761 = vrot.lane.b32.xlu1 %v8661_v62, %s7419_s21  ;;  %v1364_v37 = vpop.permute.xlu0 %1363 }
 0x2e4   : > { %7158 = vmatmul.mubr.msk.f32.gmra.mrb[20].mxu0 %vm596_vm1, %v3308_v7  ;;  %1436 = vst.msk [vmem:[#allocation3 + $0xc0] sm:$0xff] %vm1411_vm4, %v1364_v37 }
 0x2e5   : > { %v1941_v10 = vpop.permute.xlu1 %1940  ;;  %2339 = vrot.lane.b32.xlu0 %v8663_v45, %s7422_s29 }
 0x2e6   : > { %2014 = vst.msk [vmem:[#allocation3 + $0xb8] sm:$0xff] %vm1990_vm15, %v1941_v10 }
 0x2e7   : > { %2530 = vrot.lane.b32.xlu1 %v8665_v13, %s7421_s23  ;;  %v2132_v60 = vpop.permute.xlu0 %2131 }
 0x2e8   : > { %2206 = vst.msk [vmem:[#allocation3 + $0xb0] sm:$0xff] %vm2183_vm6, %v2132_v60 }
 0x2e9   : > { %v2710_v21 = vpop.permute.xlu1 %2709  ;;  %v2816_v62 = vld [vmem:[#allocation3 + $0xa0] sm:$0xff]  ;;  %1763 = vrot.lane.b32.xlu0 %v8663_v45, %s7419_s21 }
 0x2ea   : > { %2785 = vst.msk [vmem:[#allocation3 + $0xa8] sm:$0xff] %vm2763_vm12, %v2710_v21  ;;  %7131 = vmatprep.mubr.msk.f32.mxu1 %vm2837_vm7, %v2816_v62 }
 0x2eb   : > { %1954 = vrot.lane.b32.xlu1 %v8665_v13, %s7418_s1  ;;  %v1366_v12 = vpop.permute.xlu0 %1365 }
 0x2ec   : > { %1437 = vst.msk [vmem:[#allocation3 + $0xc8] sm:$0xff] %vm1411_vm4, %v1366_v12 }
 0x2ed   : > { %v1557_v27 = vpop.permute.xlu1 %1556  ;;  %2532 = vrot.lane.b32.xlu0 %v8667_v2, %s7421_s23 }
 0x2ee   : > { %1629 = vst.msk [vmem:[#allocation3 + $0xc0] sm:$0xff] %vm1604_vm5, %v1557_v27 }
 0x2ef   : > { %2723 = vrot.lane.b32.xlu1 %v8669_v48, %s7423_s0  ;;  %v2134_v55 = vpop.permute.xlu0 %2133 }
 0x2f0   : > { %2207 = vst.msk [vmem:[#allocation3 + $0xb8] sm:$0xff] %vm2183_vm6, %v2134_v55 }
 0x2f1   : > { %v2326_v45 = vpop.permute.xlu1 %2325  ;;  %v2817_v61 = vld [vmem:[#allocation3 + $0xa8] sm:$0xff]  ;;  %1956 = vrot.lane.b32.xlu0 %v8667_v2, %s7418_s1 }
 0x2f2   : > { %2400 = vst.msk [vmem:[#allocation3 + $0xb0] sm:$0xff] %vm2377_vm9, %v2326_v45  ;;  %7132 = vmatmul.mubr.msk.f32.gmra.mrb[36].mxu1 %vm2837_vm7, %v2817_v61 }
 0x2f3   : > { %2147 = vrot.lane.b32.xlu1 %v8669_v48, %s10443_s22  ;;  %v1559_v13 = vpop.permute.xlu0 %1558 }
 0x2f4   : > { %1630 = vst.msk [vmem:[#allocation3 + $0xc8] sm:$0xff] %vm1604_vm5, %v1559_v13 }
 0x2f5   : > { %v1750_v41 = vpop.permute.xlu1 %1749  ;;  %2725 = vrot.lane.b32.xlu0 %v8671_v56, %s7423_s0 }
 0x2f6   : > { %1822 = vst.msk [vmem:[#allocation3 + $0xc0] sm:$0xff] %vm1797_vm14, %v1750_v41 }
 0x2f7   : > { %2149 = vrot.lane.b32.xlu1 %v8671_v56, %s10443_s22  ;;  %v2328_v49 = vpop.permute.xlu0 %2327 }
 0x2f8   : > { %2401 = vst.msk [vmem:[#allocation3 + $0xb8] sm:$0xff] %vm2377_vm9, %v2328_v49 }
 0x2f9   : > { %v2519_v2 = vpop.permute.xlu1 %2518  ;;  %2341 = vrot.lane.b32.xlu0 %v8895_v52, %s7422_s29 }
 0x2fa   : > { %2593 = vst.msk [vmem:[#allocation3 + $0xb0] sm:$0xff] %vm2570_vm10, %v2519_v2  ;;  %v7112_v38 = vpop.f32.mrb[22].mxu1 }
 0x2fb   : > { %v3173_v48 = vmul.f32 %v7112_v38, %v8861_v35  ;;  %v3030_v51 = vpop.f32.mrb[23].mxu1  ;;  %2343 = vrot.lane.b32.xlu1 %v8902_v36, %s7422_s29  ;;  %v1752_v57 = vpop.permute.xlu0 %1751 }
 0x2fc   : > { %v3172_v53 = vmul.f32 %v8861_v35, %v3030_v51  ;;  %1823 = vst.msk [vmem:[#allocation3 + $0xc8] sm:$0xff] %vm1797_vm14, %v1752_v57 }
 0x2fd   : > { %v3212_v56 = vadd.f32 %v8868_v5, %v3173_v48  ;;  %v1943_v58 = vpop.permute.xlu1 %1942  ;;  %2534 = vrot.lane.b32.xlu0 %v8897_v4, %s7421_s23 }
 0x2fe   : > { %v3211_v54 = vadd.f32 %v8868_v5, %v3172_v53  ;;  %2015 = vst.msk [vmem:[#allocation3 + $0xc0] sm:$0xff] %vm1990_vm15, %v1943_v58 }
 0x2ff   : > { %v3278_v52 = vmul.f32 %v8875_v24, %v3212_v56  ;;  %2536 = vrot.lane.b32.xlu1 %v8904_v47, %s7421_s23  ;;  %v2521_v8 = vpop.permute.xlu0 %2520  ;;  %vm3245_vm3 = vcmp.gt.f32.partialorder %v3212_v56, 0.0  ;;  %v3986_v47 = vld [vmem:[#allocation2 + $0x1] sm:$0xff] }
 0x300   : > { %v3277_v36 = vmul.f32 %v8875_v24, %v3211_v54  ;;  %vm3244_vm8 = vcmp.gt.f32.partialorder %v3211_v54, 0.0  ;;  %2594 = vst.msk [vmem:[#allocation3 + $0xb8] sm:$0xff] %vm2570_vm10, %v2521_v8 }
 0x301   : > { %v2712_v42 = vpop.permute.xlu1 %2711  ;;  %2727 = vrot.lane.b32.xlu0 %v8899_v1, %s7423_s0  ;;  %v3310_v4 = vsel %vm3245_vm3, %v3212_v56, %v3278_v52  ;;  %v4178_v1 = vld [vmem:[#allocation2 + $0x2] sm:$0xff] }
 0x302   : > { %2786 = vst.msk [vmem:[#allocation3 + $0xb0] sm:$0xff] %vm2763_vm12, %v2712_v42  ;;  %v3309_v39 = vsel %vm3244_vm8, %v3211_v54, %v3277_v36 }
 0x303   : > { %7160 = vmatprep.mubr.msk.f32.mxu0 %vm596_vm1, %v3309_v39  ;;  %2729 = vrot.lane.b32.xlu1 %v8908_v40, %s7423_s0  ;;  %v1368_v63 = vpop.permute.xlu0 %1367 }
 0x304   : > { %7161 = vmatmul.mubr.msk.f32.gmra.mrb[22].mxu0 %vm596_vm1, %v3310_v4  ;;  %1438 = vst.msk [vmem:[#allocation3 + $0xd0] sm:$0xff] %vm1411_vm4, %v1368_v63 }
 0x305   : > { %v1945_v28 = vpop.permute.xlu1 %1944  ;;  %4050 = vrot.lane.b32.xlu0 %v3986_v47, %s10445_s27 }
 0x306   : > { %2016 = vst.msk [vmem:[#allocation3 + $0xc8] sm:$0xff] %vm1990_vm15, %v1945_v28 }
 0x307   : > { %4052 = vrot.lane.b32.xlu1 %v3987_v15, %s10445_s27  ;;  %v2136_v16 = vpop.permute.xlu0 %2135 }
 0x308   : > { %2208 = vst.msk [vmem:[#allocation3 + $0xc0] sm:$0xff] %vm2183_vm6, %v2136_v16 }
 0x309   : > { %v2714_v40 = vpop.permute.xlu1 %2713  ;;  %v2818_v19 = vld [vmem:[#allocation3 + $0xb0] sm:$0xff]  ;;  %4242 = vrot.lane.b32.xlu0 %v4178_v1, %s10441_s28 }
 0x30a   : > { %2787 = vst.msk [vmem:[#allocation3 + $0xb8] sm:$0xff] %vm2763_vm12, %v2714_v40  ;;  %7134 = vmatprep.mubr.msk.f32.mxu1 %vm2837_vm7, %v2818_v19 }
 0x30b   : > { %4244 = vrot.lane.b32.xlu1 %v4179_v33, %s10441_s28  ;;  %v1370_v20 = vpop.permute.xlu0 %1369 }
 0x30c   : > { %1439 = vst.msk [vmem:[#allocation3 + $0xd8] sm:$0xff] %vm1411_vm4, %v1370_v20 }
 0x30d   : > { %v1561_v3 = vpop.permute.xlu1 %1560 }
 0x30e   : > { %1631 = vst.msk [vmem:[#allocation3 + $0xd0] sm:$0xff] %vm1604_vm5, %v1561_v3 }
 0x30f   : > { %v2138_v18 = vpop.permute.xlu0 %2137 }
 0x310   : > { %2209 = vst.msk [vmem:[#allocation3 + $0xc8] sm:$0xff] %vm2183_vm6, %v2138_v18 }
 0x311   : > { %v2330_v6 = vpop.permute.xlu1 %2329  ;;  %v2819_v59 = vld [vmem:[#allocation3 + $0xb8] sm:$0xff] }
 0x312   : > { %2402 = vst.msk [vmem:[#allocation3 + $0xc0] sm:$0xff] %vm2377_vm9, %v2330_v6  ;;  %7135 = vmatmul.mubr.msk.f32.gmra.mrb[38].mxu1 %vm2837_vm7, %v2819_v59 }
 0x313   : > { %v1563_v30 = vpop.permute.xlu0 %1562 }
 0x314   : > { %1632 = vst.msk [vmem:[#allocation3 + $0xd8] sm:$0xff] %vm1604_vm5, %v1563_v30 }
 0x315   : > { %v1754_v43 = vpop.permute.xlu1 %1753 }
 0x316   : > { %1824 = vst.msk [vmem:[#allocation3 + $0xd0] sm:$0xff] %vm1797_vm14, %v1754_v43 }
 0x317   : > { %v2332_v26 = vpop.permute.xlu0 %2331 }
 0x318   : > { %2403 = vst.msk [vmem:[#allocation3 + $0xc8] sm:$0xff] %vm2377_vm9, %v2332_v26 }
 0x319   : > { %v2523_v11 = vpop.permute.xlu1 %2522 }
 0x31a   : > { %2595 = vst.msk [vmem:[#allocation3 + $0xc0] sm:$0xff] %vm2570_vm10, %v2523_v11  ;;  %v7115_v25 = vpop.f32.mrb[24].mxu1 }
 0x31b   : > { %v3175_v31 = vmul.f32 %v7115_v25, %v8861_v35  ;;  %v3040_v44 = vpop.f32.mrb[25].mxu1  ;;  %v1756_v14 = vpop.permute.xlu0 %1755 }
 0x31c   : > { %v3174_v23 = vmul.f32 %v8861_v35, %v3040_v44  ;;  %1825 = vst.msk [vmem:[#allocation3 + $0xd8] sm:$0xff] %vm1797_vm14, %v1756_v14 }
 0x31d   : > { %v3214_v32 = vadd.f32 %v8868_v5, %v3175_v31  ;;  %v1947_v50 = vpop.permute.xlu1 %1946 }
 0x31e   : > { %v3213_v9 = vadd.f32 %v8868_v5, %v3174_v23  ;;  %2017 = vst.msk [vmem:[#allocation3 + $0xd0] sm:$0xff] %vm1990_vm15, %v1947_v50 }
 0x31f   : > { %v3280_v0 = vmul.f32 %v8875_v24, %v3214_v32  ;;  %v2525_v29 = vpop.permute.xlu0 %2524  ;;  %vm3247_vm13 = vcmp.gt.f32.partialorder %v3214_v32, 0.0 }
 0x320   : > { %v3279_v22 = vmul.f32 %v8875_v24, %v3213_v9  ;;  %vm3246_vm11 = vcmp.gt.f32.partialorder %v3213_v9, 0.0  ;;  %2596 = vst.msk [vmem:[#allocation3 + $0xc8] sm:$0xff] %vm2570_vm10, %v2525_v29 }
 0x321   : > { %v2716_v46 = vpop.permute.xlu1 %2715  ;;  %v3312_v34 = vsel %vm3247_vm13, %v3214_v32, %v3280_v0 }
 0x322   : > { %2788 = vst.msk [vmem:[#allocation3 + $0xc0] sm:$0xff] %vm2763_vm12, %v2716_v46  ;;  %v3311_v17 = vsel %vm3246_vm11, %v3213_v9, %v3279_v22 }
 0x323   : > { %7163 = vmatprep.mubr.msk.f32.mxu0 %vm596_vm1, %v3311_v17  ;;  %v1372_v7 = vpop.permute.xlu0 %1371 }
 0x324   : > { %7164 = vmatmul.mubr.msk.f32.gmra.mrb[24].mxu0 %vm596_vm1, %v3312_v34  ;;  %1440 = vst.msk [vmem:[#allocation3 + $0xe0] sm:$0xff] %vm1411_vm4, %v1372_v7 }
 0x325   : > { %v1949_v37 = vpop.permute.xlu1 %1948 }
 0x326   : > { %2018 = vst.msk [vmem:[#allocation3 + $0xd8] sm:$0xff] %vm1990_vm15, %v1949_v37 }
 0x327   : > { %v2140_v10 = vpop.permute.xlu0 %2139 }
 0x328   : > { %2210 = vst.msk [vmem:[#allocation3 + $0xd0] sm:$0xff] %vm2183_vm6, %v2140_v10 }
 0x329   : > { %v2718_v60 = vpop.permute.xlu1 %2717  ;;  %v2820_v21 = vld [vmem:[#allocation3 + $0xc0] sm:$0xff] }
 0x32a   : > { %2789 = vst.msk [vmem:[#allocation3 + $0xc8] sm:$0xff] %vm2763_vm12, %v2718_v60  ;;  %7137 = vmatprep.mubr.msk.f32.mxu1 %vm2837_vm7, %v2820_v21 }
 0x32b   : > { %v1374_v62 = vpop.permute.xlu0 %1373 }
 0x32c   : > { %1441 = vst.msk [vmem:[#allocation3 + $0xe8] sm:$0xff] %vm1411_vm4, %v1374_v62 }
 0x32d   : > { %v1565_v12 = vpop.permute.xlu1 %1564 }
 0x32e   : > { %1633 = vst.msk [vmem:[#allocation3 + $0xe0] sm:$0xff] %vm1604_vm5, %v1565_v12 }
 0x32f   : > { %v2142_v27 = vpop.permute.xlu0 %2141 }
 0x330   : > { %2211 = vst.msk [vmem:[#allocation3 + $0xd8] sm:$0xff] %vm2183_vm6, %v2142_v27 }
 0x331   : > { %v2334_v55 = vpop.permute.xlu1 %2333  ;;  %v2821_v45 = vld [vmem:[#allocation3 + $0xc8] sm:$0xff] }
 0x332   : > { %2404 = vst.msk [vmem:[#allocation3 + $0xd0] sm:$0xff] %vm2377_vm9, %v2334_v55  ;;  %7138 = vmatmul.mubr.msk.f32.gmra.mrb[40].mxu1 %vm2837_vm7, %v2821_v45 }
 0x333   : > { %v1567_v61 = vpop.permute.xlu0 %1566 }
 0x334   : > { %1634 = vst.msk [vmem:[#allocation3 + $0xe8] sm:$0xff] %vm1604_vm5, %v1567_v61 }
 0x335   : > { %v1758_v13 = vpop.permute.xlu1 %1757 }
 0x336   : > { %1826 = vst.msk [vmem:[#allocation3 + $0xe0] sm:$0xff] %vm1797_vm14, %v1758_v13 }
 0x337   : > { %v2336_v41 = vpop.permute.xlu0 %2335 }
 0x338   : > { %2405 = vst.msk [vmem:[#allocation3 + $0xd8] sm:$0xff] %vm2377_vm9, %v2336_v41 }
 0x339   : > { %v2527_v49 = vpop.permute.xlu1 %2526 }
 0x33a   : > { %2597 = vst.msk [vmem:[#allocation3 + $0xd0] sm:$0xff] %vm2570_vm10, %v2527_v49  ;;  %v7118_v2 = vpop.f32.mrb[26].mxu1 }
 0x33b   : > { %v3177_v38 = vmul.f32 %v7118_v2, %v8861_v35  ;;  %v3050_v48 = vpop.f32.mrb[27].mxu1  ;;  %v1760_v53 = vpop.permute.xlu0 %1759  ;;  %v3922_v2 = vld [vmem:[#allocation2] sm:$0xff] }
 0x33c   : > { %v3176_v51 = vmul.f32 %v8861_v35, %v3050_v48  ;;  %1827 = vst.msk [vmem:[#allocation3 + $0xe8] sm:$0xff] %vm1797_vm14, %v1760_v53  ;;  %v9193_v53 = vld [vmem:[%s10429_s8] ss:$0 sm:$0xff] }
 0x33d   : > { %v3216_v57 = vadd.f32 %v8868_v5, %v3177_v38  ;;  %v1951_v56 = vpop.permute.xlu1 %1950  ;;  %v3923_v38 = vld [vmem:[#allocation2 + $0x8] sm:$0xff]  ;;  %3954 = vst.msk [vmem:[#allocation3] sm:$0xff] %vm1098_vm2, %v3922_v2 }
 0x33e   : > { %v3215_v58 = vadd.f32 %v8868_v5, %v3176_v51  ;;  %2019 = vst.msk [vmem:[#allocation3 + $0xe0] sm:$0xff] %vm1990_vm15, %v1951_v56 }
 0x33f   : > { %v3282_v54 = vmul.f32 %v8875_v24, %v3216_v57  ;;  %v2529_v36 = vpop.permute.xlu0 %2528  ;;  %vm3249_vm8 = vcmp.gt.f32.partialorder %v3216_v57, 0.0  ;;  %3955 = vst.msk [vmem:[#allocation3 + $0x8] sm:$0xff] %vm1098_vm2, %v3923_v38 }
 0x340   : > { %v3281_v52 = vmul.f32 %v8875_v24, %v3215_v58  ;;  %vm3248_vm0 = vcmp.gt.f32.partialorder %v3215_v58, 0.0  ;;  %2598 = vst.msk [vmem:[#allocation3 + $0xd8] sm:$0xff] %vm2570_vm10, %v2529_v36 }
 0x341   : > { %v2720_v8 = vpop.permute.xlu1 %2719  ;;  %v3314_v39 = vsel %vm3249_vm8, %v3216_v57, %v3282_v54 }
 0x342   : > { %2790 = vst.msk [vmem:[#allocation3 + $0xd0] sm:$0xff] %vm2763_vm12, %v2720_v8  ;;  %v3313_v42 = vsel %vm3248_vm0, %v3215_v58, %v3281_v52  ;;  %v9200_v58 = vld [vmem:[%s10430_s9] ss:$0 sm:$0xff]  ;;  %v9203_v8 = vstv %s6776_s18 }
 0x343   : > { %7166 = vmatprep.mubr.msk.f32.mxu0 %vm596_vm1, %v3313_v42  ;;  %v1376_v4 = vpop.permute.xlu0 %1375 }
 0x344   : > { %7167 = vmatmul.mubr.msk.f32.gmra.mrb[26].mxu0 %vm596_vm1, %v3314_v39  ;;  %1442 = vst.msk [vmem:[#allocation3 + $0xf0] sm:$0xff] %vm1411_vm4, %v1376_v4 }
 0x345   : > { %v1953_v47 = vpop.permute.xlu1 %1952 }
 0x346   : > { %2020 = vst.msk [vmem:[#allocation3 + $0xe8] sm:$0xff] %vm1990_vm15, %v1953_v47 }
 0x347   : > { %v2144_v63 = vpop.permute.xlu0 %2143 }
 0x348   : > { %2212 = vst.msk [vmem:[#allocation3 + $0xe0] sm:$0xff] %vm2183_vm6, %v2144_v63 }
 0x349   : > { %v2722_v15 = vpop.permute.xlu1 %2721  ;;  %v2822_v28 = vld [vmem:[#allocation3 + $0xd0] sm:$0xff] }
 0x34a   : > { %2791 = vst.msk [vmem:[#allocation3 + $0xd8] sm:$0xff] %vm2763_vm12, %v2722_v15  ;;  %7140 = vmatprep.mubr.msk.f32.mxu1 %vm2837_vm7, %v2822_v28 }
 0x34b   : > { %v1378_v1 = vpop.permute.xlu0 %1377 }
 0x34c   : > { %1443 = vst.msk [vmem:[#allocation3 + $0xf8] sm:$0xff] %vm1411_vm4, %v1378_v1 }
 0x34d   : > { %v1569_v16 = vpop.permute.xlu1 %1568 }
 0x34e   : > { %1635 = vst.msk [vmem:[#allocation3 + $0xf0] sm:$0xff] %vm1604_vm5, %v1569_v16 }
 0x34f   : > { %v2146_v33 = vpop.permute.xlu0 %2145 }
 0x350   : > { %2213 = vst.msk [vmem:[#allocation3 + $0xe8] sm:$0xff] %vm2183_vm6, %v2146_v33 }
 0x351   : > { %v2338_v40 = vpop.permute.xlu1 %2337  ;;  %v2823_v19 = vld [vmem:[#allocation3 + $0xd8] sm:$0xff] }
 0x352   : > { %2406 = vst.msk [vmem:[#allocation3 + $0xe0] sm:$0xff] %vm2377_vm9, %v2338_v40  ;;  %7141 = vmatmul.mubr.msk.f32.gmra.mrb[42].mxu1 %vm2837_vm7, %v2823_v19 }
 0x353   : > { %v1571_v20 = vpop.permute.xlu0 %1570 }
 0x354   : > { %1636 = vst.msk [vmem:[#allocation3 + $0xf8] sm:$0xff] %vm1604_vm5, %v1571_v20 }
 0x355   : > { %v1762_v3 = vpop.permute.xlu1 %1761 }
 0x356   : > { %1828 = vst.msk [vmem:[#allocation3 + $0xf0] sm:$0xff] %vm1797_vm14, %v1762_v3 }
 0x357   : > { %v2340_v18 = vpop.permute.xlu0 %2339 }
 0x358   : > { %2407 = vst.msk [vmem:[#allocation3 + $0xe8] sm:$0xff] %vm2377_vm9, %v2340_v18 }
 0x359   : > { %v2531_v6 = vpop.permute.xlu1 %2530 }
 0x35a   : > { %2599 = vst.msk [vmem:[#allocation3 + $0xe0] sm:$0xff] %vm2570_vm10, %v2531_v6 }
 0x35b   : > { %v7121_v59 = vpop.f32.mrb[28].mxu1  ;;  %v1764_v11 = vpop.permute.xlu0 %1763 }
 0x35c   : > { %v3179_v30 = vmul.f32 %v7121_v59, %v8861_v35  ;;  %v3060_v43 = vpop.f32.mrb[29].mxu1  ;;  %1829 = vst.msk [vmem:[#allocation3 + $0xf8] sm:$0xff] %vm1797_vm14, %v1764_v11 }
 0x35d   : > { %v3178_v26 = vmul.f32 %v8861_v35, %v3060_v43  ;;  %v1955_v31 = vpop.permute.xlu1 %1954 }
 0x35e   : > { %v3218_v25 = vadd.f32 %v8868_v5, %v3179_v30  ;;  %2021 = vst.msk [vmem:[#allocation3 + $0xf0] sm:$0xff] %vm1990_vm15, %v1955_v31 }
 0x35f   : > { %v3217_v44 = vadd.f32 %v8868_v5, %v3178_v26  ;;  %v2533_v32 = vpop.permute.xlu0 %2532 }
 0x360   : > { %v3284_v23 = vmul.f32 %v8875_v24, %v3218_v25  ;;  %vm3251_vm11 = vcmp.gt.f32.partialorder %v3218_v25, 0.0  ;;  %2600 = vst.msk [vmem:[#allocation3 + $0xe8] sm:$0xff] %vm2570_vm10, %v2533_v32 }
 0x361   : > { %v3283_v14 = vmul.f32 %v8875_v24, %v3217_v44  ;;  %vm3250_vm3 = vcmp.gt.f32.partialorder %v3217_v44, 0.0  ;;  %v2724_v50 = vpop.permute.xlu1 %2723 }
 0x362   : > { %2792 = vst.msk [vmem:[#allocation3 + $0xe0] sm:$0xff] %vm2763_vm12, %v2724_v50  ;;  %v3316_v0 = vsel %vm3251_vm11, %v3218_v25, %v3284_v23 }
 0x363   : > { %v3315_v9 = vsel %vm3250_vm3, %v3217_v44, %v3283_v14  ;;  %v1957_v22 = vpop.permute.xlu0 %1956 }
 0x364   : > { %7169 = vmatprep.mubr.msk.f32.mxu0 %vm596_vm1, %v3315_v9  ;;  %2022 = vst.msk [vmem:[#allocation3 + $0xf8] sm:$0xff] %vm1990_vm15, %v1957_v22 }
 0x365   : > { %7170 = vmatmul.mubr.msk.f32.gmra.mrb[28].mxu0 %vm596_vm1, %v3316_v0  ;;  %v2148_v29 = vpop.permute.xlu1 %2147  ;;  %v7124_v46 = vpop.f32.mrb[30].mxu1 }
 0x366   : > { %2214 = vst.msk [vmem:[#allocation3 + $0xf0] sm:$0xff] %vm2183_vm6, %v2148_v29  ;;  %v3181_v17 = vmul.f32 %v7124_v46, %v8861_v35  ;;  %v3070_v34 = vpop.f32.mrb[31].mxu1 }
 0x367   : > { %v3180_v7 = vmul.f32 %v8861_v35, %v3070_v34  ;;  %v2726_v10 = vpop.permute.xlu0 %2725 }
 0x368   : > { %v3220_v37 = vadd.f32 %v8868_v5, %v3181_v17  ;;  %2793 = vst.msk [vmem:[#allocation3 + $0xe8] sm:$0xff] %vm2763_vm12, %v2726_v10  ;;  %v9249_v10 = vld [vmem:[%s10426_s5] ss:$0 sm:$0xff] }
 0x369   : > { %v3219_v60 = vadd.f32 %v8868_v5, %v3180_v7  ;;  %v2150_v21 = vpop.permute.xlu1 %2149  ;;  %v2824_v62 = vld [vmem:[#allocation3 + $0xe0] sm:$0xff] }
 0x36a   : > { %v3286_v12 = vmul.f32 %v8875_v24, %v3220_v37  ;;  %2215 = vst.msk [vmem:[#allocation3 + $0xf8] sm:$0xff] %vm2183_vm6, %v2150_v21  ;;  %7143 = vmatprep.mubr.msk.f32.mxu1 %vm2837_vm7, %v2824_v62  ;;  %vm3253_vm0 = vcmp.gt.f32.partialorder %v3220_v37, 0.0 }
 0x36b   : > { %v3285_v27 = vmul.f32 %v8875_v24, %v3219_v60  ;;  %vm3252_vm13 = vcmp.gt.f32.partialorder %v3219_v60, 0.0  ;;  %v2342_v55 = vpop.permute.xlu0 %2341 }
 0x36c   : > { %2408 = vst.msk [vmem:[#allocation3 + $0xf0] sm:$0xff] %vm2377_vm9, %v2342_v55  ;;  %v3318_v13 = vsel %vm3253_vm0, %v3220_v37, %v3286_v12 }
 0x36d   : > { %v3317_v45 = vsel %vm3252_vm13, %v3219_v60, %v3285_v27  ;;  %v2344_v61 = vpop.permute.xlu1 %2343 }
 0x36e   : > { %7172 = vmatprep.mubr.msk.f32.mxu0 %vm596_vm1, %v3317_v45  ;;  %2409 = vst.msk [vmem:[#allocation3 + $0xf8] sm:$0xff] %vm2377_vm9, %v2344_v61  ;;  %v9258_v45 = vld [vmem:[%s10427_s6] ss:$0 sm:$0xff] }
 0x36f   : > { %7173 = vmatmul.mubr.msk.f32.gmra.mrb[30].mxu0 %vm596_vm1, %v3318_v13  ;;  %v2825_v41 = vld [vmem:[#allocation3 + $0xe8] sm:$0xff]  ;;  %v2535_v49 = vpop.permute.xlu0 %2534  ;;  %v5554_v13 = vld [vmem:[%s10431_s10] sm:$0xff] }
 0x370   : > { %7144 = vmatmul.mubr.msk.f32.gmra.mrb[44].mxu1 %vm2837_vm7, %v2825_v41  ;;  %2601 = vst.msk [vmem:[#allocation3 + $0xf0] sm:$0xff] %vm2570_vm10, %v2535_v49  ;;  %v5555_v41 = vld [vmem:[%s10431_s10 + $0x8] sm:$0xff] }
 0x371   : > { %v2537_v48 = vpop.permute.xlu1 %2536  ;;  %v7331_v2 = vpack.c.bf16 %v5555_v41, %v5554_v13 }
 0x372   : > { %2602 = vst.msk [vmem:[#allocation3 + $0xf8] sm:$0xff] %vm2570_vm10, %v2537_v48 }
 0x373   : > { %v2728_v51 = vpop.permute.xlu0 %2727  ;;  %7332 = vmatprep.subr.bf16.mxu1 %v7331_v2 }
 0x374   : > { %2794 = vst.msk [vmem:[#allocation3 + $0xf0] sm:$0xff] %vm2763_vm12, %v2728_v51  ;;  %7334 = vmatpush3.bf16.msra.mxu1 %v7331_v2 }
 0x375   : > { %v2730_v57 = vpop.permute.xlu1 %2729 }
 0x376   : > { %2795 = vst.msk [vmem:[#allocation3 + $0xf8] sm:$0xff] %vm2763_vm12, %v2730_v57  ;;  %v5556_v57 = vld [vmem:[%s10431_s10 + $0x10] sm:$0xff] }
 0x377   : > { %v7153_v56 = vpop.f32.mrb[16].mxu0  ;;  %v4051_v36 = vpop.permute.xlu0 %4050 }
 0x378   : > { %v3668_v54 = vmul.f32 %v7153_v56, %v9193_v53  ;;  %v3501_v52 = vpop.f32.mrb[17].mxu0  ;;  %4146 = vst.msk [vmem:[#allocation3] sm:$0xff] %vm1411_vm4, %v4051_v36  ;;  %v5557_v56 = vld [vmem:[%s10431_s10 + $0x18] sm:$0xff] }
 0x379   : > { %v3667_v42 = vmul.f32 %v9193_v53, %v3501_v52  ;;  %v4053_v39 = vpop.permute.xlu1 %4052 }
 0x37a   : > { %v3707_v4 = vadd.f32 %v9200_v58, %v3668_v54  ;;  %4147 = vst.msk [vmem:[#allocation3 + $0x8] sm:$0xff] %vm1411_vm4, %v4053_v39  ;;  %v7335_v54 = vpack.c.bf16 %v5557_v56, %v5556_v57  ;;  %v5559_v39 = vld [vmem:[%s10431_s10 + $0x28] sm:$0xff] }
 0x37b   : > { %v3706_v47 = vadd.f32 %v9200_v58, %v3667_v42  ;;  %v2826_v15 = vld [vmem:[#allocation3 + $0xf0] sm:$0xff]  ;;  %v4243_v28 = vpop.permute.xlu0 %4242 }
 0x37c   : > { %vm3740_vm8 = vcmp.gt.f32.partialorder %v3707_v4, 0.0  ;;  %v3773_v63 = vmul.f32 %v9203_v8, %v3707_v4  ;;  %7146 = vmatprep.mubr.msk.f32.mxu1 %vm2837_vm7, %v2826_v15  ;;  %4338 = vst.msk [vmem:[#allocation3] sm:$0xff] %vm1604_vm5, %v4243_v28  ;;  %7336 = vmatprep.subr.bf16.mxu1 %v7335_v54  ;;  %v5558_v42 = vld [vmem:[%s10431_s10 + $0x20] sm:$0xff] }
 0x37d   : > { %vm3739_vm3 = vcmp.gt.f32.partialorder %v3706_v47, 0.0  ;;  %v3772_v1 = vmul.f32 %v9203_v8, %v3706_v47  ;;  %v2827_v16 = vld [vmem:[#allocation3 + $0xf8] sm:$0xff]  ;;  %v4245_v33 = vpop.permute.xlu1 %4244  ;;  %7338 = vmatpush3.bf16.msra.mxu1 %v7335_v54 }
 0x37e   : > { %v3805_v40 = vsel %vm3740_vm8, %v3707_v4, %v3773_v63  ;;  %7147 = vmatmul.mubr.msk.f32.gmra.mrb[46].mxu1 %vm2837_vm7, %v2827_v16  ;;  %4339 = vst.msk [vmem:[#allocation3 + $0x8] sm:$0xff] %vm1604_vm5, %v4245_v33  ;;  %v7339_v4 = vpack.c.bf16 %v5559_v39, %v5558_v42  ;;  %v5561_v63 = vld [vmem:[%s10431_s10 + $0x38] sm:$0xff] }
 0x37f   : > { %3891 = vst.msk [vmem:[#allocation2 + $0x21] sm:$0xff] %vm1098_vm2, %v3805_v40  ;;  %v3804_v19 = vsel %vm3739_vm3, %v3706_v47, %v3772_v1  ;;  %v5560_v47 = vld [vmem:[%s10431_s10 + $0x30] sm:$0xff] }
 0x380   : > { %3890 = vst.msk [vmem:[#allocation2 + $0x19] sm:$0xff] %vm1098_vm2, %v3804_v19  ;;  %7340 = vmatprep.subr.bf16.mxu1 %v7339_v4  ;;  %v7343_v15 = vpack.c.bf16 %v5561_v63, %v5560_v47  ;;  %v5562_v19 = vld [vmem:[%s10431_s10 + $0x40] sm:$0xff] }
 0x381   : > { %7342 = vmatpush3.bf16.msra.mxu1 %v7339_v4 }
 0x382   : > { %7344 = vmatprep.subr.bf16.mxu1 %v7343_v15 }
 0x385   : > { %v7127_v20 = vpop.f32.mrb[32].mxu1  ;;  %7346 = vmatpush3.bf16.msra.mxu1 %v7343_v15 }
 0x386   : > { %v3183_v3 = vmul.f32 %v7127_v20, %v8861_v35  ;;  %v3080_v18 = vpop.f32.mrb[33].mxu1  ;;  %v4563_v6 = vld [vmem:[#allocation2 + $0x21] sm:$0xff]  ;;  %7215 = vmatprep.subr.mxu1 %v5562_v19 }
 0x387   : > { %v3182_v59 = vmul.f32 %v8861_v35, %v3080_v18  ;;  %4628 = vrot.lane.b32.xlu0 %v4563_v6, %s7418_s1  ;;  %v4371_v30 = vld [vmem:[#allocation2 + $0x20] sm:$0xff]  ;;  %v4370_v26 = vld [vmem:[#allocation2 + $0x18] sm:$0xff] }
 0x388   : > { %v3222_v43 = vadd.f32 %v8868_v5, %v3183_v3  ;;  %4436 = vrot.lane.b32.xlu1 %v4371_v30, %s7419_s21  ;;  %3957 = vst.msk [vmem:[#allocation3 + $0x18] sm:$0xff] %vm1098_vm2, %v4371_v30  ;;  %3956 = vst.msk [vmem:[#allocation3 + $0x10] sm:$0xff] %vm1098_vm2, %v4370_v26  ;;  %v3988_v35 = vld [vmem:[#allocation2 + $0x19] sm:$0xff]  ;;  %v4755_v23 = vld [vmem:[#allocation2 + $0x22] sm:$0xff] }
 0x389   : > { %v3221_v11 = vadd.f32 %v8868_v5, %v3182_v59  ;;  %v4754_v5 = vld [vmem:[#allocation2 + $0x1a] sm:$0xff]  ;;  %7216 = vmatpush3.msra.mxu1 %v5562_v19 }
 0x38a   : > { %v3288_v25 = vmul.f32 %v8875_v24, %v3222_v43  ;;  %vm3255_vm13 = vcmp.gt.f32.partialorder %v3222_v43, 0.0 }
 0x38b   : > { %v3287_v31 = vmul.f32 %v8875_v24, %v3221_v11  ;;  %4056 = vrot.lane.b32.xlu0 %v4563_v6, %s10445_s27  ;;  %vm3254_vm11 = vcmp.gt.f32.partialorder %v3221_v11, 0.0 }
 0x38c   : > { %4054 = vrot.lane.b32.xlu1 %v3988_v35, %s10445_s27  ;;  %v3320_v14 = vsel %vm3255_vm13, %v3222_v43, %v3288_v25 }
 0x38d   : > { %v3319_v44 = vsel %vm3254_vm11, %v3221_v11, %v3287_v31 }
 0x38e   : > { %7175 = vmatprep.mubr.msk.f32.mxu0 %vm596_vm1, %v3319_v44 }
 0x38f   : > { %4820 = vrot.lane.b32.xlu0 %v4755_v23, %s10443_s22  ;;  %7176 = vmatmul.mubr.msk.f32.gmra.mrb[32].mxu0 %vm596_vm1, %v3320_v14 }
 0x390   : > { %4818 = vrot.lane.b32.xlu1 %v4754_v5, %s10443_s22 }
 0x393   : > { %4248 = vrot.lane.b32.xlu0 %v4755_v23, %s10441_s28 }
 0x394   : > { %4246 = vrot.lane.b32.xlu1 %v4754_v5, %s10441_s28  ;;  %s10452_s28 = smov 16  }
 0x397   : > { %v7156_v32 = vpop.f32.mrb[18].mxu0  ;;  %4434 = vrot.lane.b32.xlu0 %v4370_v26, %s7419_s21 }
 0x398   : > { %v3670_v50 = vmul.f32 %v7156_v32, %v9193_v53  ;;  %v3511_v9 = vpop.f32.mrb[19].mxu0 }
 0x399   : > { %v3669_v0 = vmul.f32 %v9193_v53, %v3511_v9 }
 0x39a   : > { %v3709_v22 = vadd.f32 %v9200_v58, %v3670_v50 }
 0x39b   : > { %v3708_v29 = vadd.f32 %v9200_v58, %v3669_v0  ;;  %4626 = vrot.lane.b32.xlu0 %v3988_v35, %s7418_s1 }
 0x39c   : > { %vm3742_vm0 = vcmp.gt.f32.partialorder %v3709_v22, 0.0  ;;  %v3775_v46 = vmul.f32 %v9203_v8, %v3709_v22 }
 0x39d   : > { %vm3741_vm8 = vcmp.gt.f32.partialorder %v3708_v29, 0.0  ;;  %v3774_v17 = vmul.f32 %v9203_v8, %v3708_v29 }
 0x39e   : > { %v3807_v34 = vsel %vm3742_vm0, %v3709_v22, %v3775_v46 }
 0x39f   : > { %3893 = vst.msk [vmem:[#allocation2 + $0x39] sm:$0xff] %vm1098_vm2, %v3807_v34  ;;  %v3806_v7 = vsel %vm3741_vm8, %v3708_v29, %v3774_v17 }
 0x3a0   : > { %3892 = vst.msk [vmem:[#allocation2 + $0x31] sm:$0xff] %vm1098_vm2, %v3806_v7 }
 0x3a5   : > { %v7130_v37 = vpop.f32.mrb[34].mxu1 }
 0x3a6   : > { %v3185_v60 = vmul.f32 %v9249_v10, %v7130_v37  ;;  %v3090_v21 = vpop.f32.mrb[35].mxu1  ;;  %v4565_v62 = vld [vmem:[#allocation2 + $0x39] sm:$0xff] }
 0x3a7   : > { %v3184_v12 = vmul.f32 %v9249_v10, %v3090_v21  ;;  %4632 = vrot.lane.b32.xlu1 %v4565_v62, %s7418_s1  ;;  %5204 = vrot.lane.b32.xlu0 %v4565_v62, %s7421_s23  ;;  %v4946_v27 = vld [vmem:[#allocation2 + $0x30] sm:$0xff]  ;;  %v4947_v55 = vld [vmem:[#allocation2 + $0x38] sm:$0xff] }
 0x3a8   : > { %v3224_v61 = vadd.f32 %v9258_v45, %v3185_v60  ;;  %3959 = vst.msk [vmem:[#allocation3 + $0x28] sm:$0xff] %vm1098_vm2, %v4947_v55  ;;  %3958 = vst.msk [vmem:[#allocation3 + $0x20] sm:$0xff] %vm1098_vm2, %v4946_v27  ;;  %v5331_v38 = vld [vmem:[#allocation2 + $0x3a] sm:$0xff]  ;;  %v5138_v28 = vld [vmem:[#allocation2 + $0x31] sm:$0xff] }
 0x3a9   : > { %v3223_v49 = vadd.f32 %v9258_v45, %v3184_v12  ;;  %v5330_v30 = vld [vmem:[#allocation2 + $0x32] sm:$0xff] }
 0x3aa   : > { %v3290_v48 = vmul.f32 %v8875_v24, %v3224_v61  ;;  %vm3257_vm11 = vcmp.gt.f32.partialorder %v3224_v61, 0.0 }
 0x3ab   : > { %v3289_v51 = vmul.f32 %v8875_v24, %v3223_v49  ;;  %5396 = vrot.lane.b32.xlu1 %v5331_v38, %s7423_s0  ;;  %4060 = vrot.lane.b32.xlu0 %v4565_v62, %s10445_s27  ;;  %vm3256_vm3 = vcmp.gt.f32.partialorder %v3223_v49, 0.0  ;;  %s10453_s27 = smov 8  }
 0x3ac   : > { %v3322_v36 = vsel %vm3257_vm11, %v3224_v61, %v3290_v48 }
 0x3ad   : > { %v3321_v52 = vsel %vm3256_vm3, %v3223_v49, %v3289_v51 }
 0x3ae   : > { %7178 = vmatprep.mubr.msk.f32.mxu0 %vm596_vm1, %v3321_v52 }
 0x3af   : > { %5010 = vrot.lane.b32.xlu1 %v4946_v27, %s7422_s29  ;;  %4824 = vrot.lane.b32.xlu0 %v5331_v38, %s10443_s22 }
 0x3b0   : > { %7179 = vmatmul.mubr.msk.f32.gmra.mrb[34].mxu0 %vm596_vm1, %v3322_v36 }
 0x3b3   : > { %4438 = vrot.lane.b32.xlu1 %v4946_v27, %s7419_s21  ;;  %4252 = vrot.lane.b32.xlu0 %v5331_v38, %s10452_s28 }
 0x3b7   : > { %v7159_v1 = vpop.f32.mrb[20].mxu0  ;;  %5202 = vrot.lane.b32.xlu1 %v5138_v28, %s7421_s23  ;;  %5012 = vrot.lane.b32.xlu0 %v4947_v55, %s7422_s29 }
 0x3b8   : > { %v3672_v16 = vmul.f32 %v7159_v1, %v9193_v53  ;;  %v3521_v33 = vpop.f32.mrb[21].mxu0 }
 0x3b9   : > { %v3671_v40 = vmul.f32 %v9193_v53, %v3521_v33 }
 0x3ba   : > { %v3711_v20 = vadd.f32 %v9200_v58, %v3672_v16 }
 0x3bb   : > { %v3710_v3 = vadd.f32 %v9200_v58, %v3671_v40  ;;  %4630 = vrot.lane.b32.xlu1 %v5138_v28, %s7418_s1  ;;  %4440 = vrot.lane.b32.xlu0 %v4947_v55, %s7419_s21 }
 0x3bc   : > { %vm3744_vm13 = vcmp.gt.f32.partialorder %v3711_v20, 0.0  ;;  %v3777_v18 = vmul.f32 %v9203_v8, %v3711_v20 }
 0x3bd   : > { %vm3743_vm0 = vcmp.gt.f32.partialorder %v3710_v3, 0.0  ;;  %v3776_v6 = vmul.f32 %v9203_v8, %v3710_v3 }
 0x3be   : > { %v3809_v59 = vsel %vm3744_vm13, %v3711_v20, %v3777_v18 }
 0x3bf   : > { %3895 = vst.msk [vmem:[#allocation2 + $0x51] sm:$0xff] %vm1098_vm2, %v3809_v59  ;;  %v3808_v43 = vsel %vm3743_vm0, %v3710_v3, %v3776_v6  ;;  %5394 = vrot.lane.b32.xlu1 %v5330_v30, %s7423_s0  ;;  %4058 = vrot.lane.b32.xlu0 %v5138_v28, %s10453_s27 }
 0x3c0   : > { %3894 = vst.msk [vmem:[#allocation2 + $0x49] sm:$0xff] %vm1098_vm2, %v3808_v43 }
 0x3c3   : > { %4250 = vrot.lane.b32.xlu1 %v5330_v30, %s10452_s28  ;;  %4822 = vrot.lane.b32.xlu0 %v5330_v30, %s10454_s20 }
 0x3c5   : > { %v7133_v26 = vpop.f32.mrb[36].mxu1 }
 0x3c6   : > { %v3187_v11 = vmul.f32 %v9249_v10, %v7133_v26  ;;  %v3100_v25 = vpop.f32.mrb[37].mxu1  ;;  %v4567_v31 = vld [vmem:[#allocation2 + $0x51] sm:$0xff] }
 0x3c7   : > { %v3186_v35 = vmul.f32 %v9249_v10, %v3100_v25  ;;  %4636 = vrot.lane.b32.xlu1 %v4567_v31, %s7418_s1  ;;  %5208 = vrot.lane.b32.xlu0 %v4567_v31, %s7421_s23  ;;  %v4948_v44 = vld [vmem:[#allocation2 + $0x48] sm:$0xff]  ;;  %v4949_v23 = vld [vmem:[#allocation2 + $0x50] sm:$0xff] }
 0x3c8   : > { %v3226_v14 = vadd.f32 %v9258_v45, %v3187_v11  ;;  %3961 = vst.msk [vmem:[#allocation3 + $0x38] sm:$0xff] %vm1098_vm2, %v4949_v23  ;;  %3960 = vst.msk [vmem:[#allocation3 + $0x30] sm:$0xff] %vm1098_vm2, %v4948_v44  ;;  %v5333_v32 = vld [vmem:[#allocation2 + $0x52] sm:$0xff]  ;;  %v5140_v29 = vld [vmem:[#allocation2 + $0x49] sm:$0xff] }
 0x3c9   : > { %v3225_v5 = vadd.f32 %v9258_v45, %v3186_v35  ;;  %v5332_v27 = vld [vmem:[#allocation2 + $0x4a] sm:$0xff] }
 0x3ca   : > { %v3292_v50 = vmul.f32 %v8875_v24, %v3226_v14  ;;  %vm3259_vm3 = vcmp.gt.f32.partialorder %v3226_v14, 0.0 }
 0x3cb   : > { %v3291_v9 = vmul.f32 %v8875_v24, %v3225_v5  ;;  %5400 = vrot.lane.b32.xlu1 %v5333_v32, %s7423_s0  ;;  %4064 = vrot.lane.b32.xlu0 %v4567_v31, %s10453_s27  ;;  %vm3258_vm8 = vcmp.gt.f32.partialorder %v3225_v5, 0.0 }
 0x3cc   : > { %v3324_v22 = vsel %vm3259_vm3, %v3226_v14, %v3292_v50 }
 0x3cd   : > { %v3323_v0 = vsel %vm3258_vm8, %v3225_v5, %v3291_v9 }
 0x3ce   : > { %7181 = vmatprep.mubr.msk.f32.mxu0 %vm596_vm1, %v3323_v0 }
 0x3cf   : > { %5014 = vrot.lane.b32.xlu1 %v4948_v44, %s7422_s29  ;;  %4828 = vrot.lane.b32.xlu0 %v5333_v32, %s10454_s20 }
 0x3d0   : > { %7182 = vmatmul.mubr.msk.f32.gmra.mrb[36].mxu0 %vm596_vm1, %v3324_v22 }
 0x3d3   : > { %4442 = vrot.lane.b32.xlu1 %v4948_v44, %s7419_s21  ;;  %4256 = vrot.lane.b32.xlu0 %v5333_v32, %s10452_s28 }
 0x3d7   : > { %v7162_v46 = vpop.f32.mrb[22].mxu0  ;;  %5206 = vrot.lane.b32.xlu1 %v5140_v29, %s7421_s23  ;;  %5016 = vrot.lane.b32.xlu0 %v4949_v23, %s7422_s29 }
 0x3d8   : > { %v3674_v17 = vmul.f32 %v7162_v46, %v9193_v53  ;;  %v3531_v34 = vpop.f32.mrb[23].mxu0 }
 0x3d9   : > { %v3673_v7 = vmul.f32 %v9193_v53, %v3531_v34 }
 0x3da   : > { %v3713_v37 = vadd.f32 %v9200_v58, %v3674_v17 }
 0x3db   : > { %v3712_v60 = vadd.f32 %v9200_v58, %v3673_v7  ;;  %4634 = vrot.lane.b32.xlu1 %v5140_v29, %s7418_s1  ;;  %4444 = vrot.lane.b32.xlu0 %v4949_v23, %s7419_s21 }
 0x3dc   : > { %vm3746_vm11 = vcmp.gt.f32.partialorder %v3713_v37, 0.0  ;;  %v3779_v21 = vmul.f32 %v9203_v8, %v3713_v37 }
 0x3dd   : > { %vm3745_vm13 = vcmp.gt.f32.partialorder %v3712_v60, 0.0  ;;  %v3778_v62 = vmul.f32 %v9203_v8, %v3712_v60 }
 0x3de   : > { %v3811_v12 = vsel %vm3746_vm11, %v3713_v37, %v3779_v21 }
 0x3df   : > { %3897 = vst.msk [vmem:[#allocation2 + $0x69] sm:$0xff] %vm1098_vm2, %v3811_v12  ;;  %v3810_v55 = vsel %vm3745_vm13, %v3712_v60, %v3778_v62  ;;  %5398 = vrot.lane.b32.xlu1 %v5332_v27, %s7423_s0  ;;  %4062 = vrot.lane.b32.xlu0 %v5140_v29, %s10453_s27 }
 0x3e0   : > { %3896 = vst.msk [vmem:[#allocation2 + $0x61] sm:$0xff] %vm1098_vm2, %v3810_v55 }
 0x3e3   : > { %4254 = vrot.lane.b32.xlu1 %v5332_v27, %s10452_s28  ;;  %4826 = vrot.lane.b32.xlu0 %v5332_v27, %s10454_s20 }
 0x3e5   : > { %v7136_v61 = vpop.f32.mrb[38].mxu1 }
 0x3e6   : > { %v3189_v13 = vmul.f32 %v9249_v10, %v7136_v61  ;;  %v3110_v41 = vpop.f32.mrb[39].mxu1  ;;  %v4569_v49 = vld [vmem:[#allocation2 + $0x69] sm:$0xff] }
 0x3e7   : > { %v3188_v2 = vmul.f32 %v9249_v10, %v3110_v41  ;;  %4640 = vrot.lane.b32.xlu1 %v4569_v49, %s7418_s1  ;;  %5212 = vrot.lane.b32.xlu0 %v4569_v49, %s7421_s23  ;;  %v4950_v38 = vld [vmem:[#allocation2 + $0x60] sm:$0xff]  ;;  %v4951_v48 = vld [vmem:[#allocation2 + $0x68] sm:$0xff] }
 0x3e8   : > { %v3228_v51 = vadd.f32 %v9258_v45, %v3189_v13  ;;  %3963 = vst.msk [vmem:[#allocation3 + $0x48] sm:$0xff] %vm1098_vm2, %v4951_v48  ;;  %3962 = vst.msk [vmem:[#allocation3 + $0x40] sm:$0xff] %vm1098_vm2, %v4950_v38  ;;  %v5335_v56 = vld [vmem:[#allocation2 + $0x6a] sm:$0xff]  ;;  %v5142_v39 = vld [vmem:[#allocation2 + $0x61] sm:$0xff] }
 0x3e9   : > { %v3227_v57 = vadd.f32 %v9258_v45, %v3188_v2  ;;  %v5334_v6 = vld [vmem:[#allocation2 + $0x62] sm:$0xff] }
 0x3ea   : > { %v3294_v54 = vmul.f32 %v8875_v24, %v3228_v51  ;;  %vm3261_vm8 = vcmp.gt.f32.partialorder %v3228_v51, 0.0 }
 0x3eb   : > { %v3293_v52 = vmul.f32 %v8875_v24, %v3227_v57  ;;  %5404 = vrot.lane.b32.xlu1 %v5335_v56, %s7423_s0  ;;  %4068 = vrot.lane.b32.xlu0 %v4569_v49, %s10453_s27  ;;  %vm3260_vm0 = vcmp.gt.f32.partialorder %v3227_v57, 0.0 }
 0x3ec   : > { %v3326_v42 = vsel %vm3261_vm8, %v3228_v51, %v3294_v54 }
 0x3ed   : > { %v3325_v36 = vsel %vm3260_vm0, %v3227_v57, %v3293_v52 }
 0x3ee   : > { %7184 = vmatprep.mubr.msk.f32.mxu0 %vm596_vm1, %v3325_v36 }
 0x3ef   : > { %5018 = vrot.lane.b32.xlu1 %v4950_v38, %s7422_s29  ;;  %4832 = vrot.lane.b32.xlu0 %v5335_v56, %s10454_s20 }
 0x3f0   : > { %7185 = vmatmul.mubr.msk.f32.gmra.mrb[38].mxu0 %vm596_vm1, %v3326_v42 }
 0x3f3   : > { %4446 = vrot.lane.b32.xlu1 %v4950_v38, %s7419_s21  ;;  %4260 = vrot.lane.b32.xlu0 %v5335_v56, %s10452_s28 }
 0x3f7   : > { %v7165_v4 = vpop.f32.mrb[24].mxu0  ;;  %5210 = vrot.lane.b32.xlu1 %v5142_v39, %s7421_s23  ;;  %5020 = vrot.lane.b32.xlu0 %v4951_v48, %s7422_s29 }
 0x3f8   : > { %v3676_v47 = vmul.f32 %v7165_v4, %v9193_v53  ;;  %v3541_v63 = vpop.f32.mrb[25].mxu0 }
 0x3f9   : > { %v3675_v15 = vmul.f32 %v9193_v53, %v3541_v63  ;;  %v4629_v28 = vpop.permute.xlu0 %4628 }
 0x3fa   : > { %v3715_v1 = vadd.f32 %v9200_v58, %v3676_v47  ;;  %v4437_v16 = vpop.permute.xlu1 %4436 }
 0x3fb   : > { %v3714_v33 = vadd.f32 %v9200_v58, %v3675_v15  ;;  %4531 = vst.msk [vmem:[#allocation3 + $0x8] sm:$0xff] %vm1797_vm14, %v4437_v16  ;;  %4638 = vrot.lane.b32.xlu1 %v5142_v39, %s7418_s1  ;;  %4448 = vrot.lane.b32.xlu0 %v4951_v48, %s7419_s21 }
 0x3fc   : > { %vm3748_vm3 = vcmp.gt.f32.partialorder %v3715_v1, 0.0  ;;  %v3781_v40 = vmul.f32 %v9203_v8, %v3715_v1  ;;  %4723 = vst.msk [vmem:[#allocation3 + $0x8] sm:$0xff] %vm1990_vm15, %v4629_v28 }
 0x3fd   : > { %vm3747_vm11 = vcmp.gt.f32.partialorder %v3714_v33, 0.0  ;;  %v3780_v19 = vmul.f32 %v9203_v8, %v3714_v33  ;;  %v4057_v20 = vpop.permute.xlu0 %4056 }
 0x3fe   : > { %v3813_v3 = vsel %vm3748_vm3, %v3715_v1, %v3781_v40  ;;  %4149 = vst.msk [vmem:[#allocation3 + $0x18] sm:$0xff] %vm1411_vm4, %v4057_v20  ;;  %v4055_v18 = vpop.permute.xlu1 %4054 }
 0x3ff   : > { %3899 = vst.msk [vmem:[#allocation2 + $0x81] sm:$0xff] %vm1098_vm2, %v3813_v3  ;;  %v3812_v59 = vsel %vm3747_vm11, %v3714_v33, %v3780_v19  ;;  %5402 = vrot.lane.b32.xlu1 %v5334_v6, %s7423_s0  ;;  %4066 = vrot.lane.b32.xlu0 %v5142_v39, %s10453_s27 }
 0x400   : > { %4148 = vst.msk [vmem:[#allocation3 + $0x10] sm:$0xff] %vm1411_vm4, %v4055_v18 }
 0x401   : > { %3898 = vst.msk [vmem:[#allocation2 + $0x79] sm:$0xff] %vm1098_vm2, %v3812_v59  ;;  %v4821_v30 = vpop.permute.xlu0 %4820 }
 0x402   : > { %4915 = vst.msk [vmem:[#allocation3 + $0x8] sm:$0xff] %vm2183_vm6, %v4821_v30  ;;  %v4819_v43 = vpop.permute.xlu1 %4818 }
 0x403   : > { %4258 = vrot.lane.b32.xlu1 %v5334_v6, %s10452_s28  ;;  %4830 = vrot.lane.b32.xlu0 %v5334_v6, %s10454_s20 }
 0x405   : > { %v4249_v26 = vpop.permute.xlu0 %4248  ;;  %v7139_v11 = vpop.f32.mrb[40].mxu1 }
 0x406   : > { %4341 = vst.msk [vmem:[#allocation3 + $0x18] sm:$0xff] %vm1604_vm5, %v4249_v26  ;;  %v3191_v25 = vmul.f32 %v9249_v10, %v7139_v11  ;;  %v4247_v31 = vpop.permute.xlu1 %4246  ;;  %v3120_v35 = vpop.f32.mrb[41].mxu1  ;;  %v4571_v44 = vld [vmem:[#allocation2 + $0x81] sm:$0xff] }
 0x407   : > { %4340 = vst.msk [vmem:[#allocation3 + $0x10] sm:$0xff] %vm1604_vm5, %v4247_v31  ;;  %v3190_v23 = vmul.f32 %v9249_v10, %v3120_v35  ;;  %4644 = vrot.lane.b32.xlu1 %v4571_v44, %s7418_s1  ;;  %5216 = vrot.lane.b32.xlu0 %v4571_v44, %s7421_s23  ;;  %v5337_v0 = vld [vmem:[#allocation2 + $0x82] sm:$0xff] }
 0x408   : > { %v4952_v14 = vld [vmem:[#allocation2 + $0x78] sm:$0xff]  ;;  %v4953_v5 = vld [vmem:[#allocation2 + $0x80] sm:$0xff]  ;;  %v3230_v32 = vadd.f32 %v9258_v45, %v3191_v25 }
 0x409   : > { %3965 = vst.msk [vmem:[#allocation3 + $0x58] sm:$0xff] %vm1098_vm2, %v4953_v5  ;;  %3964 = vst.msk [vmem:[#allocation3 + $0x50] sm:$0xff] %vm1098_vm2, %v4952_v14  ;;  %v3229_v50 = vadd.f32 %v9258_v45, %v3190_v23  ;;  %v4435_v9 = vpop.permute.xlu0 %4434  ;;  %v5144_v7 = vld [vmem:[#allocation2 + $0x79] sm:$0xff] }
 0x40a   : > { %4530 = vst.msk [vmem:[#allocation3] sm:$0xff] %vm1797_vm14, %v4435_v9  ;;  %v3296_v22 = vmul.f32 %v8875_v24, %v3230_v32  ;;  %vm3263_vm0 = vcmp.gt.f32.partialorder %v3230_v32, 0.0  ;;  %v5336_v48 = vld [vmem:[#allocation2 + $0x7a] sm:$0xff] }
 0x40b   : > { %v3295_v29 = vmul.f32 %v8875_v24, %v3229_v50  ;;  %5408 = vrot.lane.b32.xlu1 %v5337_v0, %s7423_s0  ;;  %4072 = vrot.lane.b32.xlu0 %v4571_v44, %s10453_s27  ;;  %vm3262_vm13 = vcmp.gt.f32.partialorder %v3229_v50, 0.0 }
 0x40c   : > { %v3328_v34 = vsel %vm3263_vm0, %v3230_v32, %v3296_v22 }
 0x40d   : > { %v4627_v46 = vpop.permute.xlu0 %4626  ;;  %v3327_v17 = vsel %vm3262_vm13, %v3229_v50, %v3295_v29 }
 0x40e   : > { %4722 = vst.msk [vmem:[#allocation3] sm:$0xff] %vm1990_vm15, %v4627_v46  ;;  %7187 = vmatprep.mubr.msk.f32.mxu0 %vm596_vm1, %v3327_v17 }
 0x40f   : > { %4914 = vst.msk [vmem:[#allocation3] sm:$0xff] %vm2183_vm6, %v4819_v43  ;;  %5022 = vrot.lane.b32.xlu1 %v4952_v14, %s7422_s29  ;;  %4836 = vrot.lane.b32.xlu0 %v5337_v0, %s10454_s20 }
 0x410   : > { %7188 = vmatmul.mubr.msk.f32.gmra.mrb[40].mxu0 %vm596_vm1, %v3328_v34 }
 0x413   : > { %4450 = vrot.lane.b32.xlu1 %v4952_v14, %s7419_s21  ;;  %4264 = vrot.lane.b32.xlu0 %v5337_v0, %s10452_s28 }
 0x417   : > { %v7168_v37 = vpop.f32.mrb[26].mxu0  ;;  %5214 = vrot.lane.b32.xlu1 %v5144_v7, %s7421_s23  ;;  %5024 = vrot.lane.b32.xlu0 %v4953_v5, %s7422_s29 }
 0x418   : > { %v3678_v60 = vmul.f32 %v7168_v37, %v9193_v53  ;;  %v3551_v21 = vpop.f32.mrb[27].mxu0 }
 0x419   : > { %v3677_v62 = vmul.f32 %v9193_v53, %v3551_v21  ;;  %v4633_v12 = vpop.permute.xlu1 %4632  ;;  %v5205_v27 = vpop.permute.xlu0 %5204 }
 0x41a   : > { %v3717_v55 = vadd.f32 %v9200_v58, %v3678_v60 }
 0x41b   : > { %v3716_v61 = vadd.f32 %v9200_v58, %v3677_v62  ;;  %4642 = vrot.lane.b32.xlu1 %v5144_v7, %s7418_s1  ;;  %4452 = vrot.lane.b32.xlu0 %v4953_v5, %s7419_s21 }
 0x41c   : > { %vm3750_vm8 = vcmp.gt.f32.partialorder %v3717_v55, 0.0  ;;  %v3783_v13 = vmul.f32 %v9203_v8, %v3717_v55 }
 0x41d   : > { %vm3749_vm3 = vcmp.gt.f32.partialorder %v3716_v61, 0.0  ;;  %v3782_v41 = vmul.f32 %v9203_v8, %v3716_v61  ;;  %v5397_v49 = vpop.permute.xlu1 %5396  ;;  %v4061_v2 = vpop.permute.xlu0 %4060 }
 0x41e   : > { %v3815_v38 = vsel %vm3750_vm8, %v3717_v55, %v3783_v13  ;;  %4151 = vst.msk [vmem:[#allocation3 + $0x28] sm:$0xff] %vm1411_vm4, %v4061_v2 }
 0x41f   : > { %3901 = vst.msk [vmem:[#allocation2 + $0x99] sm:$0xff] %vm1098_vm2, %v3815_v38  ;;  %v3814_v51 = vsel %vm3749_vm3, %v3716_v61, %v3782_v41  ;;  %5406 = vrot.lane.b32.xlu1 %v5336_v48, %s7423_s0  ;;  %4070 = vrot.lane.b32.xlu0 %v5144_v7, %s10453_s27 }
 0x420   : > { %3900 = vst.msk [vmem:[#allocation2 + $0x91] sm:$0xff] %vm1098_vm2, %v3814_v51 }
 0x421   : > { %v5011_v57 = vpop.permute.xlu1 %5010  ;;  %v4825_v56 = vpop.permute.xlu0 %4824 }
 0x422   : > { %5106 = vst.msk [vmem:[#allocation3] sm:$0xff] %vm2377_vm9, %v5011_v57 }
 0x423   : > { %4262 = vrot.lane.b32.xlu1 %v5336_v48, %s10452_s28  ;;  %4834 = vrot.lane.b32.xlu0 %v5336_v48, %s10454_s20 }
 0x425   : > { %v4439_v54 = vpop.permute.xlu1 %4438  ;;  %v4253_v52 = vpop.permute.xlu0 %4252 }
 0x426   : > { %4532 = vst.msk [vmem:[#allocation3 + $0x10] sm:$0xff] %vm1797_vm14, %v4439_v54  ;;  %v7142_v36 = vpop.f32.mrb[42].mxu1  ;;  %v4573_v42 = vld [vmem:[#allocation2 + $0x99] sm:$0xff] }
 0x427   : > { %4343 = vst.msk [vmem:[#allocation3 + $0x28] sm:$0xff] %vm1604_vm5, %v4253_v52  ;;  %v3193_v39 = vmul.f32 %v9249_v10, %v7142_v36  ;;  %v3130_v4 = vpop.f32.mrb[43].mxu1  ;;  %4648 = vrot.lane.b32.xlu1 %v4573_v42, %s7418_s1  ;;  %5220 = vrot.lane.b32.xlu0 %v4573_v42, %s7421_s23  ;;  %v4954_v47 = vld [vmem:[#allocation2 + $0x90] sm:$0xff]  ;;  %v4955_v63 = vld [vmem:[#allocation2 + $0x98] sm:$0xff] }
 0x428   : > { %v3192_v15 = vmul.f32 %v9249_v10, %v3130_v4  ;;  %3967 = vst.msk [vmem:[#allocation3 + $0x68] sm:$0xff] %vm1098_vm2, %v4955_v63  ;;  %3966 = vst.msk [vmem:[#allocation3 + $0x60] sm:$0xff] %vm1098_vm2, %v4954_v47  ;;  %v5339_v40 = vld [vmem:[#allocation2 + $0x9a] sm:$0xff]  ;;  %v5146_v25 = vld [vmem:[#allocation2 + $0x91] sm:$0xff] }
 0x429   : > { %v3232_v28 = vadd.f32 %v9258_v45, %v3193_v39  ;;  %v5203_v1 = vpop.permute.xlu1 %5202  ;;  %v5013_v16 = vpop.permute.xlu0 %5012  ;;  %v5338_v7 = vld [vmem:[#allocation2 + $0x92] sm:$0xff] }
 0x42a   : > { %v3231_v33 = vadd.f32 %v9258_v45, %v3192_v15  ;;  %5298 = vst.msk [vmem:[#allocation3] sm:$0xff] %vm2570_vm10, %v5203_v1 }
 0x42b   : > { %5107 = vst.msk [vmem:[#allocation3 + $0x8] sm:$0xff] %vm2377_vm9, %v5013_v16  ;;  %v3298_v19 = vmul.f32 %v8875_v24, %v3232_v28  ;;  %5412 = vrot.lane.b32.xlu1 %v5339_v40, %s7423_s0  ;;  %4076 = vrot.lane.b32.xlu0 %v4573_v42, %s10453_s27  ;;  %vm3265_vm13 = vcmp.gt.f32.partialorder %v3232_v28, 0.0 }
 0x42c   : > { %5299 = vst.msk [vmem:[#allocation3 + $0x8] sm:$0xff] %vm2570_vm10, %v5205_v27  ;;  %v3297_v20 = vmul.f32 %v8875_v24, %v3231_v33  ;;  %vm3264_vm11 = vcmp.gt.f32.partialorder %v3231_v33, 0.0 }
 0x42d   : > { %5491 = vst.msk [vmem:[#allocation3 + $0x8] sm:$0xff] %vm2763_vm12, %v5397_v49  ;;  %v4631_v3 = vpop.permute.xlu1 %4630  ;;  %v4441_v18 = vpop.permute.xlu0 %4440  ;;  %v3330_v59 = vsel %vm3265_vm13, %v3232_v28, %v3298_v19 }
 0x42e   : > { %4724 = vst.msk [vmem:[#allocation3 + $0x10] sm:$0xff] %vm1990_vm15, %v4631_v3  ;;  %v3329_v6 = vsel %vm3264_vm11, %v3231_v33, %v3297_v20 }
 0x42f   : > { %4533 = vst.msk [vmem:[#allocation3 + $0x18] sm:$0xff] %vm1797_vm14, %v4441_v18  ;;  %7190 = vmatprep.mubr.msk.f32.mxu0 %vm596_vm1, %v3329_v6  ;;  %5026 = vrot.lane.b32.xlu1 %v4954_v47, %s7422_s29 }
 0x430   : > { %4725 = vst.msk [vmem:[#allocation3 + $0x18] sm:$0xff] %vm1990_vm15, %v4633_v12  ;;  %4840 = vrot.lane.b32.xlu0 %v5339_v40, %s10454_s20  ;;  %7191 = vmatmul.mubr.msk.f32.gmra.mrb[42].mxu0 %vm596_vm1, %v3330_v59 }
 0x431   : > { %4917 = vst.msk [vmem:[#allocation3 + $0x18] sm:$0xff] %vm2183_vm6, %v4825_v56  ;;  %v5395_v30 = vpop.permute.xlu1 %5394  ;;  %v4059_v43 = vpop.permute.xlu0 %4058 }
 0x432   : > { %5490 = vst.msk [vmem:[#allocation3] sm:$0xff] %vm2763_vm12, %v5395_v30 }
 0x433   : > { %4150 = vst.msk [vmem:[#allocation3 + $0x20] sm:$0xff] %vm1411_vm4, %v4059_v43  ;;  %4454 = vrot.lane.b32.xlu1 %v4954_v47, %s7419_s21 }
 0x434   : > { %4268 = vrot.lane.b32.xlu0 %v5339_v40, %s10452_s28  ;;  %v5523_v9 = vld [vmem:[#allocation3 + $0x8] sm:$0xff] }
 0x435   : > { %v4251_v26 = vpop.permute.xlu1 %4250  ;;  %v4823_v11 = vpop.permute.xlu0 %4822 }
 0x436   : > { %4342 = vst.msk [vmem:[#allocation3 + $0x20] sm:$0xff] %vm1604_vm5, %v4251_v26 }
 0x437   : > { %4916 = vst.msk [vmem:[#allocation3 + $0x10] sm:$0xff] %vm2183_vm6, %v4823_v11  ;;  %5218 = vrot.lane.b32.xlu1 %v5146_v25, %s7421_s23 }
 0x438   : > { %v7171_v31 = vpop.f32.mrb[28].mxu0  ;;  %5028 = vrot.lane.b32.xlu0 %v4955_v63, %s7422_s29 }
 0x439   : > { %v3680_v35 = vmul.f32 %v7171_v31, %v9193_v53  ;;  %v3561_v44 = vpop.f32.mrb[29].mxu0  ;;  %v9467_v14 = vpop.permute.xlu1 %4636  ;;  %v5522_v32 = vld [vmem:[#allocation3] sm:$0xff] }
 0x43a   : > { %v3679_v23 = vmul.f32 %v9193_v53, %v3561_v44  ;;  %v9469_v5 = vpop.permute.xlu0 %5208  ;;  %7217 = vmatprep.mubr.msk.f32.mxu1 %vm2837_vm7, %v5522_v32 }
 0x43b   : > { %v3719_v50 = vadd.f32 %v9200_v58, %v3680_v35  ;;  %4646 = vrot.lane.b32.xlu1 %v5146_v25, %s7418_s1  ;;  %7218 = vmatmul.mubr.msk.f32.vlgmr.msra.gmra.mrb[48].mxu1 %vm2837_vm7, %v5523_v9 }
 0x43c   : > { %v3718_v0 = vadd.f32 %v9200_v58, %v3679_v23  ;;  %4456 = vrot.lane.b32.xlu0 %v4955_v63, %s7419_s21 }
 0x43d   : > { %vm3752_vm0 = vcmp.gt.f32.partialorder %v3719_v50, 0.0  ;;  %v3785_v22 = vmul.f32 %v9203_v8, %v3719_v50  ;;  %v5401_v46 = vpop.permute.xlu1 %5400 }
 0x43e   : > { %vm3751_vm8 = vcmp.gt.f32.partialorder %v3718_v0, 0.0  ;;  %v3784_v29 = vmul.f32 %v9203_v8, %v3718_v0  ;;  %v4065_v17 = vpop.permute.xlu0 %4064 }
 0x43f   : > { %v3817_v34 = vsel %vm3752_vm0, %v3719_v50, %v3785_v22  ;;  %4153 = vst.msk [vmem:[#allocation3 + $0x38] sm:$0xff] %vm1411_vm4, %v4065_v17  ;;  %5410 = vrot.lane.b32.xlu1 %v5338_v7, %s7423_s0  ;;  %v9563_v17 = vld [vmem:[%s10429_s8] ss:$0 sm:$0xff] }
 0x440   : > { %3903 = vst.msk [vmem:[#allocation2 + $0xb1] sm:$0xff] %vm1098_vm2, %v3817_v34  ;;  %v3816_v37 = vsel %vm3751_vm8, %v3718_v0, %v3784_v29  ;;  %4074 = vrot.lane.b32.xlu0 %v5146_v25, %s10453_s27 }
 0x441   : > { %3902 = vst.msk [vmem:[#allocation2 + $0xa9] sm:$0xff] %vm1098_vm2, %v3816_v37  ;;  %v5015_v60 = vpop.permute.xlu1 %5014 }
 0x442   : > { %v4829_v21 = vpop.permute.xlu0 %4828  ;;  %5108 = vst.msk [vmem:[#allocation3 + $0x10] sm:$0xff] %vm2377_vm9, %v5015_v60  ;;  %v7174_v62 = vpop.f32.mrb[30].mxu0  ;;  %v9572_v60 = vld [vmem:[%s10430_s9] ss:$0 sm:$0xff] }
 0x443   : > { %v3682_v12 = vmul.f32 %v7174_v62, %v9193_v53  ;;  %4266 = vrot.lane.b32.xlu1 %v5338_v7, %s10452_s28  ;;  %v3571_v27 = vpop.f32.mrb[31].mxu0  ;;  %v7145_v61 = vpop.f32.mrb[44].mxu1 }
 0x444   : > { %v3681_v55 = vmul.f32 %v9193_v53, %v3571_v27  ;;  %4838 = vrot.lane.b32.xlu0 %v5338_v7, %s10454_s20  ;;  %v3195_v41 = vmul.f32 %v9249_v10, %v7145_v61  ;;  %v3140_v48 = vpop.f32.mrb[45].mxu1 }
 0x445   : > { %v3721_v13 = vadd.f32 %v9200_v58, %v3682_v12  ;;  %v4443_v49 = vpop.permute.xlu1 %4442  ;;  %v3194_v56 = vmul.f32 %v9249_v10, %v3140_v48 }
 0x446   : > { %v4257_v2 = vpop.permute.xlu0 %4256  ;;  %v3720_v38 = vadd.f32 %v9200_v58, %v3681_v55  ;;  %4534 = vst.msk [vmem:[#allocation3 + $0x20] sm:$0xff] %vm1797_vm14, %v4443_v49  ;;  %v3234_v57 = vadd.f32 %v9258_v45, %v3195_v41 }
 0x447   : > { %4345 = vst.msk [vmem:[#allocation3 + $0x38] sm:$0xff] %vm1604_vm5, %v4257_v2  ;;  %v4575_v51 = vld [vmem:[#allocation2 + $0xb1] sm:$0xff]  ;;  %vm3754_vm3 = vcmp.gt.f32.partialorder %v3721_v13, 0.0  ;;  %v3787_v53 = vmul.f32 %v9203_v8, %v3721_v13  ;;  %v3233_v42 = vadd.f32 %v9258_v45, %v3194_v56 }
 0x448   : > { %4652 = vrot.lane.b32.xlu1 %v4575_v51, %s7418_s1  ;;  %v4956_v54 = vld [vmem:[#allocation2 + $0xa8] sm:$0xff]  ;;  %v9498_v52 = vld [vmem:[#allocation2 + $0xb0] sm:$0xff]  ;;  %vm3753_vm11 = vcmp.gt.f32.partialorder %v3720_v38, 0.0  ;;  %v3786_v58 = vmul.f32 %v9203_v8, %v3720_v38  ;;  %5224 = vrot.lane.b32.xlu0 %v4575_v51, %s7421_s23  ;;  %v3300_v63 = vmul.f32 %v8875_v24, %v3234_v57  ;;  %vm3267_vm0 = vcmp.gt.f32.partialorder %v3234_v57, 0.0 }
 0x449   : > { %3969 = vst.msk [vmem:[#allocation3 + $0x78] sm:$0xff] %vm1098_vm2, %v9498_v52  ;;  %3968 = vst.msk [vmem:[#allocation3 + $0x70] sm:$0xff] %vm1098_vm2, %v4956_v54  ;;  %v3819_v36 = vsel %vm3754_vm3, %v3721_v13, %v3787_v53  ;;  %v5207_v39 = vpop.permute.xlu1 %5206  ;;  %v5341_v15 = vld [vmem:[#allocation2 + $0xb2] sm:$0xff]  ;;  %v3299_v28 = vmul.f32 %v8875_v24, %v3233_v42  ;;  %vm3266_vm13 = vcmp.gt.f32.partialorder %v3233_v42, 0.0  ;;  %v5148_v31 = vld [vmem:[#allocation2 + $0xa9] sm:$0xff] }
 0x44a   : > { %v5017_v4 = vpop.permute.xlu0 %5016  ;;  %3905 = vst.msk [vmem:[#allocation2 + $0xc9] sm:$0xff] %vm1098_vm2, %v3819_v36  ;;  %v3818_v47 = vsel %vm3753_vm11, %v3720_v38, %v3786_v58  ;;  %v3332_v40 = vsel %vm3267_vm0, %v3234_v57, %v3300_v63  ;;  %v5340_v0 = vld [vmem:[#allocation2 + $0xaa] sm:$0xff] }
 0x44b   : > { %5300 = vst.msk [vmem:[#allocation3 + $0x10] sm:$0xff] %vm2570_vm10, %v5207_v39  ;;  %v3331_v33 = vsel %vm3266_vm13, %v3233_v42, %v3299_v28 }
 0x44c   : > { %5109 = vst.msk [vmem:[#allocation3 + $0x18] sm:$0xff] %vm2377_vm9, %v5017_v4  ;;  %5416 = vrot.lane.b32.xlu1 %v5341_v15, %s7423_s0  ;;  %4080 = vrot.lane.b32.xlu0 %v4575_v51, %s10453_s27 }
 0x44d   : > { %3904 = vst.msk [vmem:[#allocation2 + $0xc1] sm:$0xff] %vm1098_vm2, %v3818_v47  ;;  %v4635_v1 = vpop.permute.xlu1 %4634  ;;  %7193 = vmatprep.mubr.msk.f32.mxu0 %vm596_vm1, %v3331_v33 }
 0x44e   : > { %5301 = vst.msk [vmem:[#allocation3 + $0x18] sm:$0xff] %vm2570_vm10, %v9469_v5  ;;  %v4445_v16 = vpop.permute.xlu0 %4444  ;;  %7194 = vmatmul.mubr.msk.f32.gmra.mrb[44].mxu0 %vm596_vm1, %v3332_v40 }
 0x44f   : > { %5493 = vst.msk [vmem:[#allocation3 + $0x18] sm:$0xff] %vm2763_vm12, %v5401_v46 }
 0x450   : > { %4726 = vst.msk [vmem:[#allocation3 + $0x20] sm:$0xff] %vm1990_vm15, %v4635_v1  ;;  %5030 = vrot.lane.b32.xlu1 %v4956_v54, %s7422_s29  ;;  %4844 = vrot.lane.b32.xlu0 %v5341_v15, %s10454_s20 }
 0x451   : > { %4535 = vst.msk [vmem:[#allocation3 + $0x28] sm:$0xff] %vm1797_vm14, %v4445_v16  ;;  %v5399_v19 = vpop.permute.xlu1 %5398  ;;  %v7148_v18 = vpop.f32.mrb[46].mxu1  ;;  %v5151_v55 = vld [vmem:[#allocation2 + $0xc9] sm:$0xff] }
 0x452   : > { %4727 = vst.msk [vmem:[#allocation3 + $0x28] sm:$0xff] %vm1990_vm15, %v9467_v14  ;;  %v4063_v20 = vpop.permute.xlu0 %4062  ;;  %v3197_v59 = vmul.f32 %v9249_v10, %v7148_v18  ;;  %v3150_v30 = vpop.f32.mrb[47].mxu1  ;;  %v5343_v48 = vld [vmem:[#allocation2 + $0xca] sm:$0xff] }
 0x453   : > { %4919 = vst.msk [vmem:[#allocation3 + $0x28] sm:$0xff] %vm2183_vm6, %v4829_v21  ;;  %v3196_v43 = vmul.f32 %v9249_v10, %v3150_v30 }
 0x454   : > { %5492 = vst.msk [vmem:[#allocation3 + $0x10] sm:$0xff] %vm2763_vm12, %v5399_v19  ;;  %v9528_v3 = vld [vmem:[#allocation2 + $0xc0] sm:$0xff]  ;;  %v9530_v6 = vld [vmem:[#allocation2 + $0xc8] sm:$0xff]  ;;  %4458 = vrot.lane.b32.xlu1 %v4956_v54, %s7419_s21  ;;  %4272 = vrot.lane.b32.xlu0 %v5341_v15, %s10452_s28  ;;  %v3236_v25 = vadd.f32 %v9258_v45, %v3197_v59 }
 0x455   : > { %4152 = vst.msk [vmem:[#allocation3 + $0x30] sm:$0xff] %vm1411_vm4, %v4063_v20  ;;  %v4255_v26 = vpop.permute.xlu1 %4254  ;;  %v3235_v35 = vadd.f32 %v9258_v45, %v3196_v43  ;;  %v5150_v42 = vld [vmem:[#allocation2 + $0xc1] sm:$0xff] }
 0x456   : > { %3971 = vst.msk [vmem:[#allocation3 + $0x88] sm:$0xff] %vm1098_vm2, %v9530_v6  ;;  %3970 = vst.msk [vmem:[#allocation3 + $0x80] sm:$0xff] %vm1098_vm2, %v9528_v3  ;;  %v4827_v11 = vpop.permute.xlu0 %4826  ;;  %v3302_v44 = vmul.f32 %v8875_v24, %v3236_v25  ;;  %vm3269_vm8 = vcmp.gt.f32.partialorder %v3236_v25, 0.0  ;;  %v5525_v32 = vld [vmem:[#allocation3 + $0x18] sm:$0xff] }
 0x457   : > { %4344 = vst.msk [vmem:[#allocation3 + $0x30] sm:$0xff] %vm1604_vm5, %v4255_v26  ;;  %v3301_v10 = vmul.f32 %v8875_v24, %v3235_v35  ;;  %vm3268_vm3 = vcmp.gt.f32.partialorder %v3235_v35, 0.0  ;;  %v5342_v1 = vld [vmem:[#allocation2 + $0xc2] sm:$0xff] }
 0x458   : > { %4918 = vst.msk [vmem:[#allocation3 + $0x20] sm:$0xff] %vm2183_vm6, %v4827_v11  ;;  %5222 = vrot.lane.b32.xlu1 %v5148_v31, %s7421_s23  ;;  %5032 = vrot.lane.b32.xlu0 %v9498_v52, %s7422_s29  ;;  %v3334_v9 = vsel %vm3269_vm8, %v3236_v25, %v3302_v44 }
 0x459   : > { %v4641_v23 = vpop.permute.xlu1 %4640  ;;  %v3333_v50 = vsel %vm3268_vm3, %v3235_v35, %v3301_v10  ;;  %vm10455_vm3 = vcmask 1043456  }
 0x45a   : > { %v5213_v14 = vpop.permute.xlu0 %5212  ;;  %7196 = vmatprep.mubr.msk.f32.mxu0 %vm596_vm1, %v3333_v50 }
 0x45b   : > { %v5524_v5 = vld [vmem:[#allocation3 + $0x10] sm:$0xff]  ;;  %7197 = vmatmul.mubr.msk.f32.gmra.mrb[46].mxu0 %vm596_vm1, %v3334_v9 }
 0x45c   : > { %7220 = vmatprep.mubr.msk.f32.mxu1 %vm2837_vm7, %v5524_v5  ;;  %4650 = vrot.lane.b32.xlu1 %v5148_v31, %s7418_s1 }
 0x45d   : > { %7221 = vmatmul.mubr.msk.f32.gmra.mrb[50].mxu1 %vm2837_vm7, %v5525_v32  ;;  %4460 = vrot.lane.b32.xlu0 %v9498_v52, %s7419_s21  ;;  %v5405_v45 = vpop.permute.xlu1 %5404 }
 0x45e   : > { %v4069_v24 = vpop.permute.xlu0 %4068 }
 0x45f   : > { %4155 = vst.msk [vmem:[#allocation3 + $0x48] sm:$0xff] %vm1411_vm4, %v4069_v24 }
 0x460   : > { %5414 = vrot.lane.b32.xlu1 %v5340_v0, %s7423_s0 }
 0x461   : > { %4078 = vrot.lane.b32.xlu0 %v5148_v31, %s10453_s27  ;;  %v5019_v22 = vpop.permute.xlu1 %5018 }
 0x462   : > { %v4833_v29 = vpop.permute.xlu0 %4832  ;;  %5110 = vst.msk [vmem:[#allocation3 + $0x20] sm:$0xff] %vm2377_vm9, %v5019_v22  ;;  %v7177_v46 = vpop.f32.mrb[32].mxu0  ;;  %v6060_v22 = vld [vmem:[%s10434_s13] sm:$0xf] }
 0x463   : > { %v3684_v34 = vmul.f32 %v9563_v17, %v7177_v46  ;;  %v3581_v7 = vpop.f32.mrb[33].mxu0  ;;  %7265 = vmatprep.subr.msk.mxu0 %vm10455_vm3, %v6060_v22 }
 0x464   : > { %4270 = vrot.lane.b32.xlu1 %v5340_v0, %s10452_s28  ;;  %v3683_v37 = vmul.f32 %v9563_v17, %v3581_v7 }
 0x465   : > { %4842 = vrot.lane.b32.xlu0 %v5340_v0, %s10454_s20  ;;  %v3723_v21 = vadd.f32 %v9572_v60, %v3684_v34  ;;  %v4447_v62 = vpop.permute.xlu1 %4446 }
 0x466   : > { %v4261_v12 = vpop.permute.xlu0 %4260  ;;  %v3722_v27 = vadd.f32 %v9572_v60, %v3683_v37  ;;  %4536 = vst.msk [vmem:[#allocation3 + $0x30] sm:$0xff] %vm1797_vm14, %v4447_v62 }
 0x467   : > { %4347 = vst.msk [vmem:[#allocation3 + $0x48] sm:$0xff] %vm1604_vm5, %v4261_v12  ;;  %vm3756_vm11 = vcmp.gt.f32.partialorder %v3723_v21, 0.0  ;;  %v3789_v61 = vmul.f32 %v9203_v8, %v3723_v21 }
 0x468   : > { %4656 = vrot.lane.b32.xlu1 %v5151_v55, %s7418_s1  ;;  %vm3755_vm13 = vcmp.gt.f32.partialorder %v3722_v27, 0.0  ;;  %v3788_v13 = vmul.f32 %v9203_v8, %v3722_v27 }
 0x469   : > { %5228 = vrot.lane.b32.xlu0 %v5151_v55, %s7421_s23  ;;  %v3821_v41 = vsel %vm3756_vm11, %v3723_v21, %v3789_v61  ;;  %v5211_v49 = vpop.permute.xlu1 %5210  ;;  %vm10456_vm11 = vmmov %vm10455_vm3 }
 0x46a   : > { %v5021_v2 = vpop.permute.xlu0 %5020  ;;  %3907 = vst.msk [vmem:[#allocation2 + $0xe1] sm:$0xff] %vm1098_vm2, %v3821_v41  ;;  %v3820_v38 = vsel %vm3755_vm13, %v3722_v27, %v3788_v13  ;;  %7266 = vmatpush3.msk.msra.mxu0 %vm10456_vm11, %v6060_v22 }
 0x46b   : > { %5302 = vst.msk [vmem:[#allocation3 + $0x20] sm:$0xff] %vm2570_vm10, %v5211_v49 }
 0x46c   : > { %5111 = vst.msk [vmem:[#allocation3 + $0x28] sm:$0xff] %vm2377_vm9, %v5021_v2  ;;  %5420 = vrot.lane.b32.xlu1 %v5343_v48, %s7423_s0 }
 0x46d   : > { %3906 = vst.msk [vmem:[#allocation2 + $0xd9] sm:$0xff] %vm1098_vm2, %v3820_v38  ;;  %4084 = vrot.lane.b32.xlu0 %v5151_v55, %s10453_s27  ;;  %v4639_v51 = vpop.permute.xlu1 %4638 }
 0x46e   : > { %5303 = vst.msk [vmem:[#allocation3 + $0x28] sm:$0xff] %vm2570_vm10, %v5213_v14  ;;  %v4449_v53 = vpop.permute.xlu0 %4448 }
 0x46f   : > { %5495 = vst.msk [vmem:[#allocation3 + $0x28] sm:$0xff] %vm2763_vm12, %v5405_v45 }
 0x470   : > { %4728 = vst.msk [vmem:[#allocation3 + $0x30] sm:$0xff] %vm1990_vm15, %v4639_v51  ;;  %5034 = vrot.lane.b32.xlu1 %v9528_v3, %s7422_s29 }
 0x471   : > { %4537 = vst.msk [vmem:[#allocation3 + $0x38] sm:$0xff] %vm1797_vm14, %v4449_v53  ;;  %4848 = vrot.lane.b32.xlu0 %v5343_v48, %s10454_s20  ;;  %v5403_v57 = vpop.permute.xlu1 %5402  ;;  %v5153_v30 = vld [vmem:[#allocation2 + $0xe1] sm:$0xff] }
 0x472   : > { %4729 = vst.msk [vmem:[#allocation3 + $0x38] sm:$0xff] %vm1990_vm15, %v4641_v23  ;;  %v4067_v56 = vpop.permute.xlu0 %4066  ;;  %v5345_v44 = vld [vmem:[#allocation2 + $0xe2] sm:$0xff] }
 0x473   : > { %4921 = vst.msk [vmem:[#allocation3 + $0x38] sm:$0xff] %vm2183_vm6, %v4833_v29 }
 0x474   : > { %5494 = vst.msk [vmem:[#allocation3 + $0x20] sm:$0xff] %vm2763_vm12, %v5403_v57  ;;  %v9599_v54 = vld [vmem:[#allocation2 + $0xd8] sm:$0xff]  ;;  %v9601_v52 = vld [vmem:[#allocation2 + $0xe0] sm:$0xff]  ;;  %4462 = vrot.lane.b32.xlu1 %v9528_v3, %s7419_s21 }
 0x475   : > { %4154 = vst.msk [vmem:[#allocation3 + $0x40] sm:$0xff] %vm1411_vm4, %v4067_v56  ;;  %4276 = vrot.lane.b32.xlu0 %v5343_v48, %s10452_s28  ;;  %v4259_v58 = vpop.permute.xlu1 %4258  ;;  %v5152_v0 = vld [vmem:[#allocation2 + $0xd9] sm:$0xff] }
 0x476   : > { %3973 = vst.msk [vmem:[#allocation3 + $0x98] sm:$0xff] %vm1098_vm2, %v9601_v52  ;;  %3972 = vst.msk [vmem:[#allocation3 + $0x90] sm:$0xff] %vm1098_vm2, %v9599_v54  ;;  %v4831_v36 = vpop.permute.xlu0 %4830  ;;  %v5527_v63 = vld [vmem:[#allocation3 + $0x28] sm:$0xff] }
 0x477   : > { %4346 = vst.msk [vmem:[#allocation3 + $0x40] sm:$0xff] %vm1604_vm5, %v4259_v58  ;;  %v5344_v62 = vld [vmem:[#allocation2 + $0xda] sm:$0xff] }
 0x478   : > { %4920 = vst.msk [vmem:[#allocation3 + $0x30] sm:$0xff] %vm2183_vm6, %v4831_v36  ;;  %5226 = vrot.lane.b32.xlu1 %v5150_v42, %s7421_s23 }
 0x479   : > { %5036 = vrot.lane.b32.xlu0 %v9530_v6, %s7422_s29  ;;  %v4645_v39 = vpop.permute.xlu1 %4644 }
 0x47a   : > { %v5217_v4 = vpop.permute.xlu0 %5216 }
 0x47b   : > { %v5526_v47 = vld [vmem:[#allocation3 + $0x20] sm:$0xff] }
 0x47c   : > { %7223 = vmatprep.mubr.msk.f32.mxu1 %vm2837_vm7, %v5526_v47  ;;  %4654 = vrot.lane.b32.xlu1 %v5150_v42, %s7418_s1 }
 0x47d   : > { %7224 = vmatmul.mubr.msk.f32.gmra.mrb[52].mxu1 %vm2837_vm7, %v5527_v63  ;;  %4464 = vrot.lane.b32.xlu0 %v9530_v6, %s7419_s21  ;;  %v5409_v15 = vpop.permute.xlu1 %5408 }
 0x47e   : > { %v4073_v28 = vpop.permute.xlu0 %4072 }
 0x47f   : > { %4157 = vst.msk [vmem:[#allocation3 + $0x58] sm:$0xff] %vm1411_vm4, %v4073_v28 }
 0x480   : > { %5418 = vrot.lane.b32.xlu1 %v5342_v1, %s7423_s0 }
 0x481   : > { %4082 = vrot.lane.b32.xlu0 %v5150_v42, %s10453_s27  ;;  %v5023_v16 = vpop.permute.xlu1 %5022 }
 0x482   : > { %v4837_v33 = vpop.permute.xlu0 %4836  ;;  %5112 = vst.msk [vmem:[#allocation3 + $0x30] sm:$0xff] %vm2377_vm9, %v5023_v16 }
 0x483   : > { %v7180_v40 = vpop.f32.mrb[34].mxu0 }
 0x484   : > { %4274 = vrot.lane.b32.xlu1 %v5342_v1, %s10452_s28  ;;  %v3686_v19 = vmul.f32 %v9563_v17, %v7180_v40  ;;  %v3591_v20 = vpop.f32.mrb[35].mxu0 }
 0x485   : > { %4846 = vrot.lane.b32.xlu0 %v5342_v1, %s10454_s20  ;;  %v3685_v3 = vmul.f32 %v9563_v17, %v3591_v20  ;;  %v4451_v18 = vpop.permute.xlu1 %4450 }
 0x486   : > { %v4265_v6 = vpop.permute.xlu0 %4264  ;;  %v3725_v59 = vadd.f32 %v9572_v60, %v3686_v19  ;;  %4538 = vst.msk [vmem:[#allocation3 + $0x40] sm:$0xff] %vm1797_vm14, %v4451_v18 }
 0x487   : > { %4349 = vst.msk [vmem:[#allocation3 + $0x58] sm:$0xff] %vm1604_vm5, %v4265_v6  ;;  %v3724_v43 = vadd.f32 %v9572_v60, %v3685_v3 }
 0x488   : > { %4660 = vrot.lane.b32.xlu1 %v5153_v30, %s7418_s1  ;;  %vm3758_vm0 = vcmp.gt.f32.partialorder %v3725_v59, 0.0  ;;  %v3791_v26 = vmul.f32 %v9203_v8, %v3725_v59 }
 0x489   : > { %5232 = vrot.lane.b32.xlu0 %v5153_v30, %s7421_s23  ;;  %vm3757_vm8 = vcmp.gt.f32.partialorder %v3724_v43, 0.0  ;;  %v3790_v11 = vmul.f32 %v9203_v8, %v3724_v43  ;;  %v5215_v25 = vpop.permute.xlu1 %5214 }
 0x48a   : > { %v5025_v31 = vpop.permute.xlu0 %5024  ;;  %v3823_v35 = vsel %vm3758_vm0, %v3725_v59, %v3791_v26  ;;  %5304 = vst.msk [vmem:[#allocation3 + $0x30] sm:$0xff] %vm2570_vm10, %v5215_v25 }
 0x48b   : > { %5113 = vst.msk [vmem:[#allocation3 + $0x38] sm:$0xff] %vm2377_vm9, %v5025_v31  ;;  %v3822_v10 = vsel %vm3757_vm8, %v3724_v43, %v3790_v11 }
 0x48c   : > { %3909 = vst.msk [vmem:[#allocation2 + $0xf9] sm:$0xff] %vm1098_vm2, %v3823_v35  ;;  %5424 = vrot.lane.b32.xlu1 %v5345_v44, %s7423_s0  ;;  %3908 = vst.msk [vmem:[#allocation2 + $0xf1] sm:$0xff] %vm1098_vm2, %v3822_v10 }
 0x48d   : > { %5305 = vst.msk [vmem:[#allocation3 + $0x38] sm:$0xff] %vm2570_vm10, %v5217_v4  ;;  %4088 = vrot.lane.b32.xlu0 %v5153_v30, %s10453_s27  ;;  %v4643_v23 = vpop.permute.xlu1 %4642 }
 0x48e   : > { %5497 = vst.msk [vmem:[#allocation3 + $0x38] sm:$0xff] %vm2763_vm12, %v5409_v15  ;;  %v4453_v14 = vpop.permute.xlu0 %4452 }
 0x48f   : > { %4730 = vst.msk [vmem:[#allocation3 + $0x40] sm:$0xff] %vm1990_vm15, %v4643_v23 }
 0x490   : > { %4539 = vst.msk [vmem:[#allocation3 + $0x48] sm:$0xff] %vm1797_vm14, %v4453_v14  ;;  %5038 = vrot.lane.b32.xlu1 %v9599_v54, %s7422_s29 }
 0x491   : > { %4731 = vst.msk [vmem:[#allocation3 + $0x48] sm:$0xff] %vm1990_vm15, %v4645_v39  ;;  %4852 = vrot.lane.b32.xlu0 %v5345_v44, %s10454_s20  ;;  %v5407_v5 = vpop.permute.xlu1 %5406 }
 0x492   : > { %4923 = vst.msk [vmem:[#allocation3 + $0x48] sm:$0xff] %vm2183_vm6, %v4837_v33  ;;  %v4071_v32 = vpop.permute.xlu0 %4070 }
 0x493   : > { %5496 = vst.msk [vmem:[#allocation3 + $0x30] sm:$0xff] %vm2763_vm12, %v5407_v5  ;;  %v9655_v50 = vld [vmem:[#allocation2 + $0xf0] sm:$0xff]  ;;  %v9657_v9 = vld [vmem:[#allocation2 + $0xf8] sm:$0xff] }
 0x494   : > { %4156 = vst.msk [vmem:[#allocation3 + $0x50] sm:$0xff] %vm1411_vm4, %v4071_v32  ;;  %4466 = vrot.lane.b32.xlu1 %v9599_v54, %s7419_s21  ;;  %v5155_v48 = vld [vmem:[#allocation2 + $0xf9] sm:$0xff]  ;;  %v5154_v16 = vld [vmem:[#allocation2 + $0xf1] sm:$0xff] }
 0x495   : > { %4280 = vrot.lane.b32.xlu0 %v5345_v44, %s10452_s28  ;;  %3975 = vst.msk [vmem:[#allocation3 + $0xa8] sm:$0xff] %vm1098_vm2, %v9657_v9  ;;  %3974 = vst.msk [vmem:[#allocation3 + $0xa0] sm:$0xff] %vm1098_vm2, %v9655_v50  ;;  %v4263_v45 = vpop.permute.xlu1 %4262  ;;  %v5529_v7 = vld [vmem:[#allocation3 + $0x38] sm:$0xff]  ;;  %v5347_v58 = vld [vmem:[#allocation2 + $0xfa] sm:$0xff] }
 0x496   : > { %v4835_v24 = vpop.permute.xlu0 %4834  ;;  %4348 = vst.msk [vmem:[#allocation3 + $0x50] sm:$0xff] %vm1604_vm5, %v4263_v45  ;;  %v5346_v6 = vld [vmem:[#allocation2 + $0xf2] sm:$0xff] }
 0x497   : > { %4922 = vst.msk [vmem:[#allocation3 + $0x40] sm:$0xff] %vm2183_vm6, %v4835_v24 }
 0x498   : > { %5230 = vrot.lane.b32.xlu1 %v5152_v0, %s7421_s23 }
 0x499   : > { %5040 = vrot.lane.b32.xlu0 %v9601_v52, %s7422_s29  ;;  %v4649_v29 = vpop.permute.xlu1 %4648 }
 0x49a   : > { %v5221_v46 = vpop.permute.xlu0 %5220  ;;  %v5528_v34 = vld [vmem:[#allocation3 + $0x30] sm:$0xff] }
 0x49b   : > { %7226 = vmatprep.mubr.msk.f32.mxu1 %vm2837_vm7, %v5528_v34 }
 0x49c   : > { %7227 = vmatmul.mubr.msk.f32.gmra.mrb[54].mxu1 %vm2837_vm7, %v5529_v7  ;;  %4658 = vrot.lane.b32.xlu1 %v5152_v0, %s7418_s1 }
 0x49d   : > { %4468 = vrot.lane.b32.xlu0 %v9601_v52, %s7419_s21  ;;  %v5413_v37 = vpop.permute.xlu1 %5412 }
 0x49e   : > { %v4077_v21 = vpop.permute.xlu0 %4076 }
 0x49f   : > { %4159 = vst.msk [vmem:[#allocation3 + $0x68] sm:$0xff] %vm1411_vm4, %v4077_v21 }
 0x4a0   : > { %5422 = vrot.lane.b32.xlu1 %v5344_v62, %s7423_s0 }
 0x4a1   : > { %4086 = vrot.lane.b32.xlu0 %v5152_v0, %s10453_s27  ;;  %v5027_v12 = vpop.permute.xlu1 %5026 }
 0x4a2   : > { %5114 = vst.msk [vmem:[#allocation3 + $0x40] sm:$0xff] %vm2377_vm9, %v5027_v12  ;;  %v4841_v27 = vpop.permute.xlu0 %4840 }
 0x4a3   : > { %v7183_v55 = vpop.f32.mrb[36].mxu0 }
 0x4a4   : > { %4278 = vrot.lane.b32.xlu1 %v5344_v62, %s10452_s28  ;;  %v3688_v61 = vmul.f32 %v9563_v17, %v7183_v55  ;;  %v3601_v13 = vpop.f32.mrb[37].mxu0 }
 0x4a5   : > { %4850 = vrot.lane.b32.xlu0 %v5344_v62, %s10454_s20  ;;  %v3687_v41 = vmul.f32 %v9563_v17, %v3601_v13  ;;  %v4455_v49 = vpop.permute.xlu1 %4454 }
 0x4a6   : > { %v3727_v2 = vadd.f32 %v9572_v60, %v3688_v61  ;;  %4540 = vst.msk [vmem:[#allocation3 + $0x50] sm:$0xff] %vm1797_vm14, %v4455_v49  ;;  %v4269_v38 = vpop.permute.xlu0 %4268 }
 0x4a7   : > { %v3726_v51 = vadd.f32 %v9572_v60, %v3687_v41  ;;  %4351 = vst.msk [vmem:[#allocation3 + $0x68] sm:$0xff] %vm1604_vm5, %v4269_v38 }
 0x4a8   : > { %4664 = vrot.lane.b32.xlu1 %v5155_v48, %s7418_s1  ;;  %vm3760_vm13 = vcmp.gt.f32.partialorder %v3727_v2, 0.0  ;;  %v3793_v53 = vmul.f32 %v9203_v8, %v3727_v2 }
 0x4a9   : > { %5236 = vrot.lane.b32.xlu0 %v5155_v48, %s7421_s23  ;;  %vm3759_vm0 = vcmp.gt.f32.partialorder %v3726_v51, 0.0  ;;  %v3792_v57 = vmul.f32 %v9203_v8, %v3726_v51  ;;  %v5219_v56 = vpop.permute.xlu1 %5218 }
 0x4aa   : > { %v3825_v54 = vsel %vm3760_vm13, %v3727_v2, %v3793_v53  ;;  %5306 = vst.msk [vmem:[#allocation3 + $0x40] sm:$0xff] %vm2570_vm10, %v5219_v56  ;;  %v5029_v52 = vpop.permute.xlu0 %5028 }
 0x4ab   : > { %3911 = vst.msk [vmem:[#allocation2 + $0x111] sm:$0xff] %vm1098_vm2, %v3825_v54  ;;  %v3824_v36 = vsel %vm3759_vm0, %v3726_v51, %v3792_v57 }
 0x4ac   : > { %5115 = vst.msk [vmem:[#allocation3 + $0x48] sm:$0xff] %vm2377_vm9, %v5029_v52  ;;  %5428 = vrot.lane.b32.xlu1 %v5347_v58, %s7423_s0 }
 0x4ad   : > { %3910 = vst.msk [vmem:[#allocation2 + $0x109] sm:$0xff] %vm1098_vm2, %v3824_v36  ;;  %4092 = vrot.lane.b32.xlu0 %v5155_v48, %s10453_s27  ;;  %v4647_v42 = vpop.permute.xlu1 %4646 }
 0x4ae   : > { %5307 = vst.msk [vmem:[#allocation3 + $0x48] sm:$0xff] %vm2570_vm10, %v5221_v46  ;;  %v4457_v39 = vpop.permute.xlu0 %4456 }
 0x4af   : > { %5499 = vst.msk [vmem:[#allocation3 + $0x48] sm:$0xff] %vm2763_vm12, %v5413_v37 }
 0x4b0   : > { %4732 = vst.msk [vmem:[#allocation3 + $0x50] sm:$0xff] %vm1990_vm15, %v4647_v42  ;;  %5042 = vrot.lane.b32.xlu1 %v9655_v50, %s7422_s29 }
 0x4b1   : > { %4541 = vst.msk [vmem:[#allocation3 + $0x58] sm:$0xff] %vm1797_vm14, %v4457_v39  ;;  %4856 = vrot.lane.b32.xlu0 %v5347_v58, %s10454_s20  ;;  %v5411_v4 = vpop.permute.xlu1 %5410 }
 0x4b2   : > { %4733 = vst.msk [vmem:[#allocation3 + $0x58] sm:$0xff] %vm1990_vm15, %v4649_v29  ;;  %v4075_v47 = vpop.permute.xlu0 %4074  ;;  %v5157_v10 = vld [vmem:[#allocation2 + $0x111] sm:$0xff] }
 0x4b3   : > { %4925 = vst.msk [vmem:[#allocation3 + $0x58] sm:$0xff] %vm2183_vm6, %v4841_v27  ;;  %v5349_v45 = vld [vmem:[#allocation2 + $0x112] sm:$0xff] }
 0x4b4   : > { %5498 = vst.msk [vmem:[#allocation3 + $0x40] sm:$0xff] %vm2763_vm12, %v5411_v4  ;;  %4470 = vrot.lane.b32.xlu1 %v9655_v50, %s7419_s21  ;;  %v9714_v63 = vld [vmem:[#allocation2 + $0x110] sm:$0xff]  ;;  %v9716_v15 = vld [vmem:[#allocation2 + $0x108] sm:$0xff] }
 0x4b5   : > { %4158 = vst.msk [vmem:[#allocation3 + $0x60] sm:$0xff] %vm1411_vm4, %v4075_v47  ;;  %4284 = vrot.lane.b32.xlu0 %v5347_v58, %s10452_s28  ;;  %v4267_v28 = vpop.permute.xlu1 %4266  ;;  %v5156_v62 = vld [vmem:[#allocation2 + $0x109] sm:$0xff] }
 0x4b6   : > { %3977 = vst.msk [vmem:[#allocation3 + $0xb8] sm:$0xff] %vm1098_vm2, %v9714_v63  ;;  %3976 = vst.msk [vmem:[#allocation3 + $0xb0] sm:$0xff] %vm1098_vm2, %v9716_v15  ;;  %v4839_v1 = vpop.permute.xlu0 %4838  ;;  %v5531_v20 = vld [vmem:[#allocation3 + $0x48] sm:$0xff]  ;;  %v4774_v13 = vld [vmem:[#allocation2 + $0x10a] sm:$0xff] }
 0x4b7   : > { %4350 = vst.msk [vmem:[#allocation3 + $0x60] sm:$0xff] %vm1604_vm5, %v4267_v28 }
 0x4b8   : > { %4924 = vst.msk [vmem:[#allocation3 + $0x50] sm:$0xff] %vm2183_vm6, %v4839_v1  ;;  %5234 = vrot.lane.b32.xlu1 %v5154_v16, %s7421_s23 }
 0x4b9   : > { %5044 = vrot.lane.b32.xlu0 %v9657_v9, %s7422_s29 }
 0x4ba   : > { %v4653_v33 = vpop.permute.xlu1 %4652  ;;  %v5225_v19 = vpop.permute.xlu0 %5224 }
 0x4bb   : > { %v5530_v40 = vld [vmem:[#allocation3 + $0x40] sm:$0xff] }
 0x4bc   : > { %7229 = vmatprep.mubr.msk.f32.mxu1 %vm2837_vm7, %v5530_v40  ;;  %4662 = vrot.lane.b32.xlu1 %v5154_v16, %s7418_s1 }
 0x4bd   : > { %7230 = vmatmul.mubr.msk.f32.gmra.mrb[56].mxu1 %vm2837_vm7, %v5531_v20  ;;  %4472 = vrot.lane.b32.xlu0 %v9657_v9, %s7419_s21 }
 0x4be   : > { %v5417_v3 = vpop.permute.xlu1 %5416  ;;  %v4081_v18 = vpop.permute.xlu0 %4080 }
 0x4bf   : > { %4161 = vst.msk [vmem:[#allocation3 + $0x78] sm:$0xff] %vm1411_vm4, %v4081_v18 }
 0x4c0   : > { %5426 = vrot.lane.b32.xlu1 %v5346_v6, %s7423_s0 }
 0x4c1   : > { %4090 = vrot.lane.b32.xlu0 %v5154_v16, %s10453_s27 }
 0x4c2   : > { %v5031_v59 = vpop.permute.xlu1 %5030  ;;  %v4845_v30 = vpop.permute.xlu0 %4844 }
 0x4c3   : > { %5116 = vst.msk [vmem:[#allocation3 + $0x50] sm:$0xff] %vm2377_vm9, %v5031_v59  ;;  %v7186_v43 = vpop.f32.mrb[38].mxu0 }
 0x4c4   : > { %4282 = vrot.lane.b32.xlu1 %v5346_v6, %s10452_s28  ;;  %v3690_v26 = vmul.f32 %v9563_v17, %v7186_v43  ;;  %v3611_v11 = vpop.f32.mrb[39].mxu0 }
 0x4c5   : > { %4854 = vrot.lane.b32.xlu0 %v5346_v6, %s10454_s20  ;;  %v3689_v25 = vmul.f32 %v9563_v17, %v3611_v11 }
 0x4c6   : > { %v4459_v31 = vpop.permute.xlu1 %4458  ;;  %v3729_v35 = vadd.f32 %v9572_v60, %v3690_v26  ;;  %v4273_v44 = vpop.permute.xlu0 %4272 }
 0x4c7   : > { %4542 = vst.msk [vmem:[#allocation3 + $0x60] sm:$0xff] %vm1797_vm14, %v4459_v31  ;;  %v3728_v23 = vadd.f32 %v9572_v60, %v3689_v25 }
 0x4c8   : > { %4353 = vst.msk [vmem:[#allocation3 + $0x78] sm:$0xff] %vm1604_vm5, %v4273_v44  ;;  %4668 = vrot.lane.b32.xlu1 %v5157_v10, %s7418_s1  ;;  %vm3762_vm8 = vcmp.gt.f32.partialorder %v3729_v35, 0.0  ;;  %v3795_v14 = vmul.f32 %v9203_v8, %v3729_v35 }
 0x4c9   : > { %5240 = vrot.lane.b32.xlu0 %v5157_v10, %s7421_s23  ;;  %vm3761_vm3 = vcmp.gt.f32.partialorder %v3728_v23, 0.0  ;;  %v3794_v5 = vmul.f32 %v9203_v8, %v3728_v23 }
 0x4ca   : > { %v5223_v32 = vpop.permute.xlu1 %5222  ;;  %v3827_v50 = vsel %vm3762_vm8, %v3729_v35, %v3795_v14  ;;  %v5033_v9 = vpop.permute.xlu0 %5032 }
 0x4cb   : > { %5308 = vst.msk [vmem:[#allocation3 + $0x50] sm:$0xff] %vm2570_vm10, %v5223_v32  ;;  %v3826_v24 = vsel %vm3761_vm3, %v3728_v23, %v3794_v5 }
 0x4cc   : > { %3913 = vst.msk [vmem:[#allocation2 + $0x129] sm:$0xff] %vm1098_vm2, %v3827_v50  ;;  %5432 = vrot.lane.b32.xlu1 %v5349_v45, %s7423_s0  ;;  %3912 = vst.msk [vmem:[#allocation2 + $0x121] sm:$0xff] %vm1098_vm2, %v3826_v24 }
 0x4cd   : > { %5117 = vst.msk [vmem:[#allocation3 + $0x58] sm:$0xff] %vm2377_vm9, %v5033_v9  ;;  %4096 = vrot.lane.b32.xlu0 %v5157_v10, %s10453_s27 }
 0x4ce   : > { %5309 = vst.msk [vmem:[#allocation3 + $0x58] sm:$0xff] %vm2570_vm10, %v5225_v19  ;;  %v4651_v0 = vpop.permute.xlu1 %4650 }
 0x4cf   : > { %5501 = vst.msk [vmem:[#allocation3 + $0x58] sm:$0xff] %vm2763_vm12, %v5417_v3  ;;  %v4461_v22 = vpop.permute.xlu0 %4460 }
 0x4d0   : > { %4734 = vst.msk [vmem:[#allocation3 + $0x60] sm:$0xff] %vm1990_vm15, %v4651_v0  ;;  %5046 = vrot.lane.b32.xlu1 %v9716_v15, %s7422_s29 }
 0x4d1   : > { %4543 = vst.msk [vmem:[#allocation3 + $0x68] sm:$0xff] %vm1797_vm14, %v4461_v22  ;;  %5048 = vrot.lane.b32.xlu0 %v9714_v63, %s7422_s29 }
 0x4d2   : > { %4735 = vst.msk [vmem:[#allocation3 + $0x68] sm:$0xff] %vm1990_vm15, %v4653_v33  ;;  %v5415_v29 = vpop.permute.xlu1 %5414 }
 0x4d3   : > { %4927 = vst.msk [vmem:[#allocation3 + $0x68] sm:$0xff] %vm2183_vm6, %v4845_v30  ;;  %v4079_v46 = vpop.permute.xlu0 %4078  ;;  %v4967_v34 = vld [vmem:[#allocation2 + $0x128] sm:$0xff]  ;;  %v4966_v7 = vld [vmem:[#allocation2 + $0x120] sm:$0xff] }
 0x4d4   : > { %5500 = vst.msk [vmem:[#allocation3 + $0x50] sm:$0xff] %vm2763_vm12, %v5415_v29  ;;  %4474 = vrot.lane.b32.xlu1 %v9716_v15, %s7419_s21  ;;  %v5158_v1 = vld [vmem:[#allocation2 + $0x121] sm:$0xff]  ;;  %v5159_v16 = vld [vmem:[#allocation2 + $0x129] sm:$0xff] }
 0x4d5   : > { %4160 = vst.msk [vmem:[#allocation3 + $0x70] sm:$0xff] %vm1411_vm4, %v4079_v46  ;;  %4476 = vrot.lane.b32.xlu0 %v9714_v63, %s7419_s21  ;;  %v5350_v6 = vld [vmem:[#allocation2 + $0x122] sm:$0xff]  ;;  %v5351_v31 = vld [vmem:[#allocation2 + $0x12a] sm:$0xff] }
 0x4d6   : > { %3978 = vst.msk [vmem:[#allocation3 + $0xc0] sm:$0xff] %vm1098_vm2, %v4966_v7  ;;  %3979 = vst.msk [vmem:[#allocation3 + $0xc8] sm:$0xff] %vm1098_vm2, %v4967_v34  ;;  %v4271_v37 = vpop.permute.xlu1 %4270  ;;  %v5533_v61 = vld [vmem:[#allocation3 + $0x58] sm:$0xff] }
 0x4d7   : > { %4352 = vst.msk [vmem:[#allocation3 + $0x70] sm:$0xff] %vm1604_vm5, %v4271_v37  ;;  %v4843_v21 = vpop.permute.xlu0 %4842 }
 0x4d8   : > { %4926 = vst.msk [vmem:[#allocation3 + $0x60] sm:$0xff] %vm2183_vm6, %v4843_v21  ;;  %5238 = vrot.lane.b32.xlu1 %v5156_v62, %s7421_s23 }
 0x4d9   : > { %4094 = vrot.lane.b32.xlu0 %v5156_v62, %s10453_s27 }
 0x4da   : > { %v4657_v12 = vpop.permute.xlu1 %4656 }
 0x4db   : > { %v5532_v27 = vld [vmem:[#allocation3 + $0x50] sm:$0xff]  ;;  %v5229_v55 = vpop.permute.xlu0 %5228 }
 0x4dc   : > { %7232 = vmatprep.mubr.msk.f32.mxu1 %vm2837_vm7, %v5532_v27  ;;  %4666 = vrot.lane.b32.xlu1 %v5156_v62, %s7418_s1 }
 0x4dd   : > { %7233 = vmatmul.mubr.msk.f32.gmra.mrb[58].mxu1 %vm2837_vm7, %v5533_v61  ;;  %4858 = vrot.lane.b32.xlu0 %v4774_v13, %s10454_s20 }
 0x4de   : > { %v5421_v41 = vpop.permute.xlu1 %5420 }
 0x4df   : > { %v4085_v49 = vpop.permute.xlu0 %4084 }
 0x4e0   : > { %4163 = vst.msk [vmem:[#allocation3 + $0x88] sm:$0xff] %vm1411_vm4, %v4085_v49  ;;  %5430 = vrot.lane.b32.xlu1 %v4774_v13, %s7423_s0 }
 0x4e1   : > { %4860 = vrot.lane.b32.xlu0 %v5349_v45, %s10454_s20 }
 0x4e2   : > { %v5035_v2 = vpop.permute.xlu1 %5034 }
 0x4e3   : > { %v4849_v38 = vpop.permute.xlu0 %4848  ;;  %5118 = vst.msk [vmem:[#allocation3 + $0x60] sm:$0xff] %vm2377_vm9, %v5035_v2  ;;  %v7189_v48 = vpop.f32.mrb[40].mxu0 }
 0x4e4   : > { %4286 = vrot.lane.b32.xlu1 %v4774_v13, %s10452_s28  ;;  %v3692_v51 = vmul.f32 %v9563_v17, %v7189_v48  ;;  %v3621_v53 = vpop.f32.mrb[41].mxu0 }
 0x4e5   : > { %4288 = vrot.lane.b32.xlu0 %v5349_v45, %s10452_s28  ;;  %v3691_v57 = vmul.f32 %v9563_v17, %v3621_v53 }
 0x4e6   : > { %v4463_v56 = vpop.permute.xlu1 %4462  ;;  %v3731_v54 = vadd.f32 %v9572_v60, %v3692_v51 }
 0x4e7   : > { %v4277_v52 = vpop.permute.xlu0 %4276  ;;  %4544 = vst.msk [vmem:[#allocation3 + $0x70] sm:$0xff] %vm1797_vm14, %v4463_v56  ;;  %v3730_v58 = vadd.f32 %v9572_v60, %v3691_v57 }
 0x4e8   : > { %4355 = vst.msk [vmem:[#allocation3 + $0x88] sm:$0xff] %vm1604_vm5, %v4277_v52  ;;  %5050 = vrot.lane.b32.xlu1 %v4966_v7, %s7422_s29  ;;  %vm3764_vm11 = vcmp.gt.f32.partialorder %v3731_v54, 0.0  ;;  %v3797_v36 = vmul.f32 %v9203_v8, %v3731_v54 }
 0x4e9   : > { %5052 = vrot.lane.b32.xlu0 %v4967_v34, %s7422_s29  ;;  %vm3763_vm13 = vcmp.gt.f32.partialorder %v3730_v58, 0.0  ;;  %v3796_v42 = vmul.f32 %v9203_v8, %v3730_v58 }
 0x4ea   : > { %v5227_v39 = vpop.permute.xlu1 %5226  ;;  %v3829_v4 = vsel %vm3764_vm11, %v3731_v54, %v3797_v36 }
 0x4eb   : > { %v5037_v47 = vpop.permute.xlu0 %5036  ;;  %5310 = vst.msk [vmem:[#allocation3 + $0x60] sm:$0xff] %vm2570_vm10, %v5227_v39  ;;  %v3828_v63 = vsel %vm3763_vm13, %v3730_v58, %v3796_v42 }
 0x4ec   : > { %3915 = vst.msk [vmem:[#allocation2 + $0x141] sm:$0xff] %vm1098_vm2, %v3829_v4  ;;  %4478 = vrot.lane.b32.xlu1 %v4966_v7, %s7419_s21  ;;  %3914 = vst.msk [vmem:[#allocation2 + $0x139] sm:$0xff] %vm1098_vm2, %v3828_v63  ;;  %v9851_v7 = vld [vmem:[%s10432_s11] ss:$0 sm:$0xff] }
 0x4ed   : > { %5119 = vst.msk [vmem:[#allocation3 + $0x68] sm:$0xff] %vm2377_vm9, %v5037_v47  ;;  %4480 = vrot.lane.b32.xlu0 %v4967_v34, %s7419_s21 }
 0x4ee   : > { %5311 = vst.msk [vmem:[#allocation3 + $0x68] sm:$0xff] %vm2570_vm10, %v5229_v55  ;;  %v4655_v15 = vpop.permute.xlu1 %4654 }
 0x4ef   : > { %5503 = vst.msk [vmem:[#allocation3 + $0x68] sm:$0xff] %vm2763_vm12, %v5421_v41  ;;  %v4465_v28 = vpop.permute.xlu0 %4464  ;;  %v9864_v41 = vstv %s6811_s26 }
 0x4f0   : > { %4736 = vst.msk [vmem:[#allocation3 + $0x70] sm:$0xff] %vm1990_vm15, %v4655_v15  ;;  %5242 = vrot.lane.b32.xlu1 %v5158_v1, %s7421_s23 }
 0x4f1   : > { %4545 = vst.msk [vmem:[#allocation3 + $0x78] sm:$0xff] %vm1797_vm14, %v4465_v28  ;;  %5244 = vrot.lane.b32.xlu0 %v5159_v16, %s7421_s23 }
 0x4f2   : > { %4737 = vst.msk [vmem:[#allocation3 + $0x78] sm:$0xff] %vm1990_vm15, %v4657_v12  ;;  %v5419_v33 = vpop.permute.xlu1 %5418  ;;  %v9858_v12 = vld [vmem:[%s10433_s12] ss:$0 sm:$0xff] }
 0x4f3   : > { %4929 = vst.msk [vmem:[#allocation3 + $0x78] sm:$0xff] %vm2183_vm6, %v4849_v38  ;;  %v4083_v40 = vpop.permute.xlu0 %4082  ;;  %v4969_v19 = vld [vmem:[#allocation2 + $0x140] sm:$0xff]  ;;  %v4968_v20 = vld [vmem:[#allocation2 + $0x138] sm:$0xff] }
 0x4f4   : > { %5502 = vst.msk [vmem:[#allocation3 + $0x60] sm:$0xff] %vm2763_vm12, %v5419_v33  ;;  %4670 = vrot.lane.b32.xlu1 %v5158_v1, %s7418_s1  ;;  %v5160_v27 = vld [vmem:[#allocation2 + $0x139] sm:$0xff]  ;;  %v5161_v61 = vld [vmem:[#allocation2 + $0x141] sm:$0xff] }
 0x4f5   : > { %4162 = vst.msk [vmem:[#allocation3 + $0x80] sm:$0xff] %vm1411_vm4, %v4083_v40  ;;  %4098 = vrot.lane.b32.xlu0 %v5158_v1, %s10453_s27  ;;  %v5352_v36 = vld [vmem:[#allocation2 + $0x13a] sm:$0xff] }
 0x4f6   : > { %3980 = vst.msk [vmem:[#allocation3 + $0xd0] sm:$0xff] %vm1098_vm2, %v4968_v20  ;;  %3981 = vst.msk [vmem:[#allocation3 + $0xd8] sm:$0xff] %vm1098_vm2, %v4969_v19  ;;  %v4275_v3 = vpop.permute.xlu1 %4274  ;;  %v5535_v26 = vld [vmem:[#allocation3 + $0x68] sm:$0xff] }
 0x4f7   : > { %4354 = vst.msk [vmem:[#allocation3 + $0x80] sm:$0xff] %vm1604_vm5, %v4275_v3  ;;  %v4847_v18 = vpop.permute.xlu0 %4846 }
 0x4f8   : > { %4928 = vst.msk [vmem:[#allocation3 + $0x70] sm:$0xff] %vm2183_vm6, %v4847_v18  ;;  %5434 = vrot.lane.b32.xlu1 %v5350_v6, %s7423_s0 }
 0x4f9   : > { %4862 = vrot.lane.b32.xlu0 %v5350_v6, %s10454_s20 }
 0x4fa   : > { %v4661_v59 = vpop.permute.xlu1 %4660 }
 0x4fb   : > { %v5534_v30 = vld [vmem:[#allocation3 + $0x60] sm:$0xff]  ;;  %v5233_v43 = vpop.permute.xlu0 %5232 }
 0x4fc   : > { %7235 = vmatprep.mubr.msk.f32.mxu1 %vm2837_vm7, %v5534_v30  ;;  %4672 = vrot.lane.b32.xlu1 %v5159_v16, %s7418_s1 }
 0x4fd   : > { %7236 = vmatmul.mubr.msk.f32.gmra.mrb[60].mxu1 %vm2837_vm7, %v5535_v26  ;;  %4100 = vrot.lane.b32.xlu0 %v5159_v16, %s10453_s27  ;;  %v5353_v16 = vld [vmem:[#allocation2 + $0x142] sm:$0xff] }
 0x4fe   : > { %v5425_v11 = vpop.permute.xlu1 %5424 }
 0x4ff   : > { %v4089_v25 = vpop.permute.xlu0 %4088 }
 0x500   : > { %4165 = vst.msk [vmem:[#allocation3 + $0x98] sm:$0xff] %vm1411_vm4, %v4089_v25  ;;  %5436 = vrot.lane.b32.xlu1 %v5351_v31, %s7423_s0 }
 0x501   : > { %4864 = vrot.lane.b32.xlu0 %v5351_v31, %s10454_s20 }
 0x502   : > { %v5039_v35 = vpop.permute.xlu1 %5038 }
 0x503   : > { %v4853_v44 = vpop.permute.xlu0 %4852  ;;  %5120 = vst.msk [vmem:[#allocation3 + $0x70] sm:$0xff] %vm2377_vm9, %v5039_v35  ;;  %v7192_v10 = vpop.f32.mrb[42].mxu0 }
 0x504   : > { %4290 = vrot.lane.b32.xlu1 %v5350_v6, %s10452_s28  ;;  %v3694_v23 = vmul.f32 %v9563_v17, %v7192_v10  ;;  %v3631_v14 = vpop.f32.mrb[43].mxu0 }
 0x505   : > { %4292 = vrot.lane.b32.xlu0 %v5351_v31, %s10452_s28  ;;  %v3693_v5 = vmul.f32 %v9563_v17, %v3631_v14 }
 0x506   : > { %v4467_v32 = vpop.permute.xlu1 %4466  ;;  %v3733_v50 = vadd.f32 %v9572_v60, %v3694_v23 }
 0x507   : > { %v4281_v9 = vpop.permute.xlu0 %4280  ;;  %4546 = vst.msk [vmem:[#allocation3 + $0x80] sm:$0xff] %vm1797_vm14, %v4467_v32  ;;  %v3732_v45 = vadd.f32 %v9572_v60, %v3693_v5 }
 0x508   : > { %4357 = vst.msk [vmem:[#allocation3 + $0x98] sm:$0xff] %vm1604_vm5, %v4281_v9  ;;  %5054 = vrot.lane.b32.xlu1 %v4968_v20, %s7422_s29  ;;  %vm3766_vm0 = vcmp.gt.f32.partialorder %v3733_v50, 0.0  ;;  %v3799_v24 = vmul.f32 %v9203_v8, %v3733_v50 }
 0x509   : > { %5056 = vrot.lane.b32.xlu0 %v4969_v19, %s7422_s29  ;;  %vm3765_vm8 = vcmp.gt.f32.partialorder %v3732_v45, 0.0  ;;  %v3798_v0 = vmul.f32 %v9203_v8, %v3732_v45 }
 0x50a   : > { %v5231_v22 = vpop.permute.xlu1 %5230  ;;  %v3831_v29 = vsel %vm3766_vm0, %v3733_v50, %v3799_v24 }
 0x50b   : > { %v5041_v46 = vpop.permute.xlu0 %5040  ;;  %5312 = vst.msk [vmem:[#allocation3 + $0x70] sm:$0xff] %vm2570_vm10, %v5231_v22  ;;  %v3830_v34 = vsel %vm3765_vm8, %v3732_v45, %v3798_v0 }
 0x50c   : > { %3917 = vst.msk [vmem:[#allocation2 + $0x159] sm:$0xff] %vm1098_vm2, %v3831_v29  ;;  %4482 = vrot.lane.b32.xlu1 %v4968_v20, %s7419_s21  ;;  %3916 = vst.msk [vmem:[#allocation2 + $0x151] sm:$0xff] %vm1098_vm2, %v3830_v34 }
 0x50d   : > { %5121 = vst.msk [vmem:[#allocation3 + $0x78] sm:$0xff] %vm2377_vm9, %v5041_v46  ;;  %4484 = vrot.lane.b32.xlu0 %v4969_v19, %s7419_s21 }
 0x50e   : > { %5313 = vst.msk [vmem:[#allocation3 + $0x78] sm:$0xff] %vm2570_vm10, %v5233_v43  ;;  %v4659_v37 = vpop.permute.xlu1 %4658  ;;  %v7219_v62 = vpop.f32.mrb[48].mxu1 }
 0x50f   : > { %5505 = vst.msk [vmem:[#allocation3 + $0x78] sm:$0xff] %vm2763_vm12, %v5425_v11  ;;  %v4469_v21 = vpop.permute.xlu0 %4468  ;;  %v5892_v55 = vmul.f32 %v7219_v62, %v9851_v7  ;;  %v5725_v13 = vpop.f32.mrb[49].mxu1  ;;  %v7383_v62 = vld [vmem:[%s10429_s8] ss:$0 sm:$0xff] }
 0x510   : > { %4738 = vst.msk [vmem:[#allocation3 + $0x80] sm:$0xff] %vm1990_vm15, %v4659_v37  ;;  %5246 = vrot.lane.b32.xlu1 %v5160_v27, %s7421_s23  ;;  %v5891_v49 = vmul.f32 %v9851_v7, %v5725_v13 }
 0x511   : > { %4547 = vst.msk [vmem:[#allocation3 + $0x88] sm:$0xff] %vm1797_vm14, %v4469_v21  ;;  %5248 = vrot.lane.b32.xlu0 %v5161_v61, %s7421_s23  ;;  %v5931_v2 = vadd.f32 %v9858_v12, %v5892_v55 }
 0x512   : > { %4739 = vst.msk [vmem:[#allocation3 + $0x88] sm:$0xff] %vm1990_vm15, %v4661_v59  ;;  %v5423_v38 = vpop.permute.xlu1 %5422  ;;  %v5930_v48 = vadd.f32 %v9858_v12, %v5891_v49 }
 0x513   : > { %4931 = vst.msk [vmem:[#allocation3 + $0x88] sm:$0xff] %vm2183_vm6, %v4853_v44  ;;  %v4087_v51 = vpop.permute.xlu0 %4086  ;;  %v5997_v53 = vmul.f32 %v9864_v41, %v5931_v2  ;;  %v9875_v57 = vld [vmem:[#allocation2 + $0x158] sm:$0xff]  ;;  %v4970_v56 = vld [vmem:[#allocation2 + $0x150] sm:$0xff]  ;;  %vm5964_vm3 = vcmp.gt.f32.partialorder %v5931_v2, 0.0 }
 0x514   : > { %5504 = vst.msk [vmem:[#allocation3 + $0x70] sm:$0xff] %vm2763_vm12, %v5423_v38  ;;  %4674 = vrot.lane.b32.xlu1 %v5160_v27, %s7418_s1  ;;  %v5996_v54 = vmul.f32 %v9864_v41, %v5930_v48  ;;  %vm5963_vm11 = vcmp.gt.f32.partialorder %v5930_v48, 0.0  ;;  %v5162_v14 = vld [vmem:[#allocation2 + $0x151] sm:$0xff]  ;;  %v5163_v32 = vld [vmem:[#allocation2 + $0x159] sm:$0xff] }
 0x515   : > { %4164 = vst.msk [vmem:[#allocation3 + $0x90] sm:$0xff] %vm1411_vm4, %v4087_v51  ;;  %4102 = vrot.lane.b32.xlu0 %v5160_v27, %s10453_s27  ;;  %v6029_v39 = vsel %vm5964_vm3, %v5931_v2, %v5997_v53  ;;  %v5354_v51 = vld [vmem:[#allocation2 + $0x152] sm:$0xff] }
 0x516   : > { %3982 = vst.msk [vmem:[#allocation3 + $0xe0] sm:$0xff] %vm1098_vm2, %v4970_v56  ;;  %3983 = vst.msk [vmem:[#allocation3 + $0xe8] sm:$0xff] %vm1098_vm2, %v9875_v57  ;;  %v4279_v52 = vpop.permute.xlu1 %4278  ;;  %v6028_v42 = vsel %vm5963_vm11, %v5930_v48, %v5996_v54  ;;  %v5537_v15 = vld [vmem:[#allocation3 + $0x78] sm:$0xff] }
 0x517   : > { %4356 = vst.msk [vmem:[#allocation3 + $0x90] sm:$0xff] %vm1604_vm5, %v4279_v52  ;;  %v4851_v58 = vpop.permute.xlu0 %4850  ;;  %7267 = vmatprep.mubr.msk.f32.mxu0 %vm596_vm1, %v6028_v42 }
 0x518   : > { %4930 = vst.msk [vmem:[#allocation3 + $0x80] sm:$0xff] %vm2183_vm6, %v4851_v58  ;;  %5438 = vrot.lane.b32.xlu1 %v5352_v36, %s7423_s0  ;;  %7268 = vmatmul.mubr.msk.f32.vlgmr.msra.gmra.mrb[48].mxu0 %vm596_vm1, %v6029_v39 }
 0x519   : > { %4866 = vrot.lane.b32.xlu0 %v5352_v36, %s10454_s20 }
 0x51a   : > { %v4665_v4 = vpop.permute.xlu1 %4664 }
 0x51b   : > { %v5536_v47 = vld [vmem:[#allocation3 + $0x70] sm:$0xff]  ;;  %v5237_v63 = vpop.permute.xlu0 %5236 }
 0x51c   : > { %7238 = vmatprep.mubr.msk.f32.mxu1 %vm2837_vm7, %v5536_v47  ;;  %4676 = vrot.lane.b32.xlu1 %v5161_v61, %s7418_s1  ;;  %v5355_v47 = vld [vmem:[#allocation2 + $0x15a] sm:$0xff] }
 0x51d   : > { %7239 = vmatmul.mubr.msk.f32.gmra.mrb[62].mxu1 %vm2837_vm7, %v5537_v15  ;;  %4104 = vrot.lane.b32.xlu0 %v5161_v61, %s10453_s27 }
 0x51e   : > { %v5429_v28 = vpop.permute.xlu1 %5428 }
 0x51f   : > { %v4093_v1 = vpop.permute.xlu0 %4092 }
 0x520   : > { %4167 = vst.msk [vmem:[#allocation3 + $0xa8] sm:$0xff] %vm1411_vm4, %v4093_v1  ;;  %5440 = vrot.lane.b32.xlu1 %v5353_v16, %s7423_s0 }
 0x521   : > { %4868 = vrot.lane.b32.xlu0 %v5353_v16, %s10454_s20  ;;  %v7195_v19 = vpop.f32.mrb[44].mxu0 }
 0x522   : > { %v5043_v33 = vpop.permute.xlu1 %5042  ;;  %v3696_v20 = vmul.f32 %v9563_v17, %v7195_v19  ;;  %v3641_v3 = vpop.f32.mrb[45].mxu0 }
 0x523   : > { %v4857_v40 = vpop.permute.xlu0 %4856  ;;  %5122 = vst.msk [vmem:[#allocation3 + $0x80] sm:$0xff] %vm2377_vm9, %v5043_v33  ;;  %v3695_v18 = vmul.f32 %v9563_v17, %v3641_v3 }
 0x524   : > { %4294 = vrot.lane.b32.xlu1 %v5352_v36, %s10452_s28  ;;  %v3735_v6 = vadd.f32 %v9572_v60, %v3696_v20 }
 0x525   : > { %4296 = vrot.lane.b32.xlu0 %v5353_v16, %s10452_s28  ;;  %v3734_v30 = vadd.f32 %v9572_v60, %v3695_v18 }
 0x526   : > { %v4471_v59 = vpop.permute.xlu1 %4470  ;;  %vm3768_vm13 = vcmp.gt.f32.partialorder %v3735_v6, 0.0  ;;  %v3801_v26 = vmul.f32 %v9203_v8, %v3735_v6 }
 0x527   : > { %v4285_v43 = vpop.permute.xlu0 %4284  ;;  %4548 = vst.msk [vmem:[#allocation3 + $0x90] sm:$0xff] %vm1797_vm14, %v4471_v59  ;;  %vm3767_vm0 = vcmp.gt.f32.partialorder %v3734_v30, 0.0  ;;  %v3800_v11 = vmul.f32 %v9203_v8, %v3734_v30 }
 0x528   : > { %4359 = vst.msk [vmem:[#allocation3 + $0xa8] sm:$0xff] %vm1604_vm5, %v4285_v43  ;;  %5058 = vrot.lane.b32.xlu1 %v4970_v56, %s7422_s29  ;;  %v3833_v25 = vsel %vm3768_vm13, %v3735_v6, %v3801_v26 }
 0x529   : > { %5060 = vrot.lane.b32.xlu0 %v9875_v57, %s7422_s29  ;;  %3919 = vst.msk [vmem:[#allocation2 + $0x171] sm:$0xff] %vm1098_vm2, %v3833_v25  ;;  %v3832_v60 = vsel %vm3767_vm0, %v3734_v30, %v3800_v11 }
 0x52a   : > { %v5235_v31 = vpop.permute.xlu1 %5234  ;;  %3918 = vst.msk [vmem:[#allocation2 + $0x169] sm:$0xff] %vm1098_vm2, %v3832_v60 }
 0x52b   : > { %v5045_v35 = vpop.permute.xlu0 %5044  ;;  %5314 = vst.msk [vmem:[#allocation3 + $0x80] sm:$0xff] %vm2570_vm10, %v5235_v31 }
 0x52c   : > { %5123 = vst.msk [vmem:[#allocation3 + $0x88] sm:$0xff] %vm2377_vm9, %v5045_v35  ;;  %4486 = vrot.lane.b32.xlu1 %v4970_v56, %s7419_s21 }
 0x52d   : > { %5315 = vst.msk [vmem:[#allocation3 + $0x88] sm:$0xff] %vm2570_vm10, %v5237_v63  ;;  %4488 = vrot.lane.b32.xlu0 %v9875_v57, %s7419_s21 }
 0x52e   : > { %5507 = vst.msk [vmem:[#allocation3 + $0x88] sm:$0xff] %vm2763_vm12, %v5429_v28  ;;  %v4663_v44 = vpop.permute.xlu1 %4662  ;;  %v7198_v45 = vpop.f32.mrb[46].mxu0 }
 0x52f   : > { %v4473_v10 = vpop.permute.xlu0 %4472  ;;  %4740 = vst.msk [vmem:[#allocation3 + $0x90] sm:$0xff] %vm1990_vm15, %v4663_v44  ;;  %v3698_v22 = vmul.f32 %v9563_v17, %v7198_v45  ;;  %v3651_v29 = vpop.f32.mrb[47].mxu0  ;;  %v7384_v17 = vld [vmem:[%s10430_s9] ss:$0 sm:$0xff] }
 0x530   : > { %v7222_v23 = vpop.f32.mrb[50].mxu1  ;;  %4549 = vst.msk [vmem:[#allocation3 + $0x98] sm:$0xff] %vm1797_vm14, %v4473_v10  ;;  %5250 = vrot.lane.b32.xlu1 %v5162_v14, %s7421_s23  ;;  %v3697_v27 = vmul.f32 %v7383_v62, %v3651_v29  ;;  %v5165_v6 = vld [vmem:[#allocation2 + $0x171] sm:$0xff] }
 0x531   : > { %v5894_v5 = vmul.f32 %v7222_v23, %v9851_v7  ;;  %v5735_v50 = vpop.f32.mrb[51].mxu1  ;;  %4741 = vst.msk [vmem:[#allocation3 + $0x98] sm:$0xff] %vm1990_vm15, %v4665_v4  ;;  %5252 = vrot.lane.b32.xlu0 %v5163_v32, %s7421_s23  ;;  %v9930_v37 = vld [vmem:[#allocation2 + $0x170] sm:$0xff]  ;;  %v9932_v21 = vld [vmem:[#allocation2 + $0x168] sm:$0xff]  ;;  %v3737_v61 = vadd.f32 %v7384_v17, %v3698_v22 }
 0x532   : > { %v5893_v9 = vmul.f32 %v9851_v7, %v5735_v50  ;;  %4933 = vst.msk [vmem:[#allocation3 + $0x98] sm:$0xff] %vm2183_vm6, %v4857_v40  ;;  %v5427_v0 = vpop.permute.xlu1 %5426  ;;  %v3736_v49 = vadd.f32 %v7384_v17, %v3697_v27  ;;  %v5164_v3 = vld [vmem:[#allocation2 + $0x169] sm:$0xff] }
 0x533   : > { %v5933_v24 = vadd.f32 %v9858_v12, %v5894_v5  ;;  %5506 = vst.msk [vmem:[#allocation3 + $0x80] sm:$0xff] %vm2763_vm12, %v5427_v0  ;;  %v4091_v34 = vpop.permute.xlu0 %4090  ;;  %vm3770_vm11 = vcmp.gt.f32.partialorder %v3737_v61, 0.0  ;;  %v3803_v38 = vmul.f32 %v9203_v8, %v3737_v61  ;;  %v5356_v10 = vld [vmem:[#allocation2 + $0x16a] sm:$0xff]  ;;  %v5357_v0 = vld [vmem:[#allocation2 + $0x172] sm:$0xff] }
 0x534   : > { %v5932_v46 = vadd.f32 %v9858_v12, %v5893_v9  ;;  %4166 = vst.msk [vmem:[#allocation3 + $0xa0] sm:$0xff] %vm1411_vm4, %v4091_v34  ;;  %4678 = vrot.lane.b32.xlu1 %v5162_v14, %s7418_s1  ;;  %vm3769_vm13 = vcmp.gt.f32.partialorder %v3736_v49, 0.0  ;;  %v3802_v57 = vmul.f32 %v9203_v8, %v3736_v49 }
 0x535   : > { %v5999_v55 = vmul.f32 %v9864_v41, %v5933_v24  ;;  %3984 = vst.msk [vmem:[#allocation3 + $0xf0] sm:$0xff] %vm1098_vm2, %v9932_v21  ;;  %3985 = vst.msk [vmem:[#allocation3 + $0xf8] sm:$0xff] %vm1098_vm2, %v9930_v37  ;;  %4106 = vrot.lane.b32.xlu0 %v5162_v14, %s10453_s27  ;;  %vm5966_vm3 = vcmp.gt.f32.partialorder %v5933_v24, 0.0  ;;  %v3835_v54 = vsel %vm3770_vm11, %v3737_v61, %v3803_v38  ;;  %v5539_v42 = vld [vmem:[#allocation3 + $0x88] sm:$0xff] }
 0x536   : > { %v5998_v13 = vmul.f32 %v9864_v41, %v5932_v46  ;;  %vm5965_vm8 = vcmp.gt.f32.partialorder %v5932_v46, 0.0  ;;  %v4283_v2 = vpop.permute.xlu1 %4282  ;;  %3921 = vst.msk [vmem:[#allocation2 + $0x189] sm:$0xff] %vm1098_vm2, %v3835_v54  ;;  %v3834_v52 = vsel %vm3769_vm13, %v3736_v49, %v3802_v57 }
 0x537   : > { %4358 = vst.msk [vmem:[#allocation3 + $0xa0] sm:$0xff] %vm1604_vm5, %v4283_v2  ;;  %v4855_v48 = vpop.permute.xlu0 %4854  ;;  %v6031_v56 = vsel %vm5966_vm3, %v5933_v24, %v5999_v55 }
 0x538   : > { %v6030_v53 = vsel %vm5965_vm8, %v5932_v46, %v5998_v13  ;;  %4932 = vst.msk [vmem:[#allocation3 + $0x90] sm:$0xff] %vm2183_vm6, %v4855_v48  ;;  %5442 = vrot.lane.b32.xlu1 %v5354_v51, %s7423_s0 }
 0x539   : > { %7270 = vmatprep.mubr.msk.f32.mxu0 %vm596_vm1, %v6030_v53  ;;  %4870 = vrot.lane.b32.xlu0 %v5354_v51, %s10454_s20  ;;  %3920 = vst.msk [vmem:[#allocation2 + $0x181] sm:$0xff] %vm1098_vm2, %v3834_v52 }
 0x53a   : > { %7271 = vmatmul.mubr.msk.f32.gmra.mrb[50].mxu0 %vm596_vm1, %v6031_v56  ;;  %v4669_v58 = vpop.permute.xlu1 %4668  ;;  %v5538_v36 = vld [vmem:[#allocation3 + $0x80] sm:$0xff] }
 0x53b   : > { %v5241_v8 = vpop.permute.xlu0 %5240  ;;  %7241 = vmatprep.mubr.msk.f32.mxu1 %vm2837_vm7, %v5538_v36 }
 0x53c   : > { %7242 = vmatmul.mubr.msk.f32.gmra.mrb[64].mxu1 %vm2837_vm7, %v5539_v42  ;;  %4680 = vrot.lane.b32.xlu1 %v5163_v32, %s7418_s1 }
 0x53d   : > { %4108 = vrot.lane.b32.xlu0 %v5163_v32, %s10453_s27  ;;  %v5167_v38 = vld [vmem:[#allocation2 + $0x189] sm:$0xff] }
 0x53e   : > { %v5433_v39 = vpop.permute.xlu1 %5432 }
 0x53f   : > { %v4097_v4 = vpop.permute.xlu0 %4096 }
 0x540   : > { %4169 = vst.msk [vmem:[#allocation3 + $0xb8] sm:$0xff] %vm1411_vm4, %v4097_v4  ;;  %5444 = vrot.lane.b32.xlu1 %v5355_v47, %s7423_s0  ;;  %v5166_v13 = vld [vmem:[#allocation2 + $0x181] sm:$0xff]  ;;  %v5359_v4 = vld [vmem:[#allocation2 + $0x18a] sm:$0xff] }
 0x541   : > { %4872 = vrot.lane.b32.xlu0 %v5355_v47, %s10454_s20 }
 0x542   : > { %v5047_v63 = vpop.permute.xlu1 %5046 }
 0x543   : > { %v5049_v15 = vpop.permute.xlu0 %5048  ;;  %5124 = vst.msk [vmem:[#allocation3 + $0x90] sm:$0xff] %vm2377_vm9, %v5047_v63 }
 0x544   : > { %5125 = vst.msk [vmem:[#allocation3 + $0x98] sm:$0xff] %vm2377_vm9, %v5049_v15  ;;  %4298 = vrot.lane.b32.xlu1 %v5354_v51, %s10452_s28 }
 0x545   : > { %5317 = vst.msk [vmem:[#allocation3 + $0x98] sm:$0xff] %vm2570_vm10, %v5241_v8  ;;  %4300 = vrot.lane.b32.xlu0 %v5355_v47, %s10452_s28 }
 0x546   : > { %5509 = vst.msk [vmem:[#allocation3 + $0x98] sm:$0xff] %vm2763_vm12, %v5433_v39  ;;  %v4475_v28 = vpop.permute.xlu1 %4474  ;;  %v5358_v39 = vld [vmem:[#allocation2 + $0x182] sm:$0xff] }
 0x547   : > { %v4477_v1 = vpop.permute.xlu0 %4476  ;;  %4550 = vst.msk [vmem:[#allocation3 + $0xa0] sm:$0xff] %vm1797_vm14, %v4475_v28  ;;  %v4976_v28 = vld [vmem:[#allocation2 + $0x198] sm:$0xff] }
 0x548   : > { %4551 = vst.msk [vmem:[#allocation3 + $0xa8] sm:$0xff] %vm1797_vm14, %v4477_v1  ;;  %5062 = vrot.lane.b32.xlu1 %v9932_v21, %s7422_s29 }
 0x549   : > { %4743 = vst.msk [vmem:[#allocation3 + $0xa8] sm:$0xff] %vm1990_vm15, %v4669_v58  ;;  %5064 = vrot.lane.b32.xlu0 %v9930_v37, %s7422_s29 }
 0x54a   : > { %v5239_v16 = vpop.permute.xlu1 %5238 }
 0x54b   : > { %5316 = vst.msk [vmem:[#allocation3 + $0x90] sm:$0xff] %vm2570_vm10, %v5239_v16  ;;  %v4095_v33 = vpop.permute.xlu0 %4094 }
 0x54c   : > { %4168 = vst.msk [vmem:[#allocation3 + $0xb0] sm:$0xff] %vm1411_vm4, %v4095_v33  ;;  %4490 = vrot.lane.b32.xlu1 %v9932_v21, %s7419_s21  ;;  %v4975_v21 = vld [vmem:[#allocation2 + $0x188] sm:$0xff]  ;;  %v5168_v33 = vld [vmem:[#allocation2 + $0x199] sm:$0xff] }
 0x54d   : > { %4492 = vrot.lane.b32.xlu0 %v9930_v37, %s7419_s21  ;;  %v5541_v9 = vld [vmem:[#allocation3 + $0x98] sm:$0xff]  ;;  %v4974_v37 = vld [vmem:[#allocation2 + $0x180] sm:$0xff] }
 0x54e   : > { %v4667_v40 = vpop.permute.xlu1 %4666 }
 0x54f   : > { %4742 = vst.msk [vmem:[#allocation3 + $0xa0] sm:$0xff] %vm1990_vm15, %v4667_v40  ;;  %v4859_v19 = vpop.permute.xlu0 %4858 }
 0x550   : > { %v7225_v20 = vpop.f32.mrb[52].mxu1  ;;  %4934 = vst.msk [vmem:[#allocation3 + $0xa0] sm:$0xff] %vm2183_vm6, %v4859_v19  ;;  %5254 = vrot.lane.b32.xlu1 %v5164_v3, %s7421_s23  ;;  %v4977_v19 = vld [vmem:[#allocation2 + $0x1a0] sm:$0xff] }
 0x551   : > { %v5896_v18 = vmul.f32 %v7225_v20, %v9851_v7  ;;  %v5745_v59 = vpop.f32.mrb[53].mxu1  ;;  %5256 = vrot.lane.b32.xlu0 %v5165_v6, %s7421_s23 }
 0x552   : > { %v5895_v30 = vmul.f32 %v9851_v7, %v5745_v59  ;;  %v5431_v26 = vpop.permute.xlu1 %5430 }
 0x553   : > { %v5935_v43 = vadd.f32 %v9858_v12, %v5896_v18  ;;  %5508 = vst.msk [vmem:[#allocation3 + $0x90] sm:$0xff] %vm2763_vm12, %v5431_v26  ;;  %v4861_v25 = vpop.permute.xlu0 %4860 }
 0x554   : > { %v5934_v11 = vadd.f32 %v9858_v12, %v5895_v30  ;;  %4935 = vst.msk [vmem:[#allocation3 + $0xa8] sm:$0xff] %vm2183_vm6, %v4861_v25  ;;  %4682 = vrot.lane.b32.xlu1 %v5164_v3, %s7418_s1 }
 0x555   : > { %v6001_v31 = vmul.f32 %v9864_v41, %v5935_v43  ;;  %4110 = vrot.lane.b32.xlu0 %v5164_v3, %s10453_s27  ;;  %vm5968_vm8 = vcmp.gt.f32.partialorder %v5935_v43, 0.0  ;;  %v5360_v3 = vld [vmem:[#allocation2 + $0x19a] sm:$0xff] }
 0x556   : > { %v6000_v60 = vmul.f32 %v9864_v41, %v5934_v11  ;;  %vm5967_vm0 = vcmp.gt.f32.partialorder %v5934_v11, 0.0  ;;  %v4287_v35 = vpop.permute.xlu1 %4286 }
 0x557   : > { %4360 = vst.msk [vmem:[#allocation3 + $0xb0] sm:$0xff] %vm1604_vm5, %v4287_v35  ;;  %v4289_v44 = vpop.permute.xlu0 %4288  ;;  %v6033_v14 = vsel %vm5968_vm8, %v5935_v43, %v6001_v31  ;;  %v5361_v43 = vld [vmem:[#allocation2 + $0x1a2] sm:$0xff] }
 0x558   : > { %v6032_v23 = vsel %vm5967_vm0, %v5934_v11, %v6000_v60  ;;  %4361 = vst.msk [vmem:[#allocation3 + $0xb8] sm:$0xff] %vm1604_vm5, %v4289_v44  ;;  %5446 = vrot.lane.b32.xlu1 %v5356_v10, %s7423_s0 }
 0x559   : > { %7273 = vmatprep.mubr.msk.f32.mxu0 %vm596_vm1, %v6032_v23  ;;  %4874 = vrot.lane.b32.xlu0 %v5356_v10, %s10454_s20 }
 0x55a   : > { %7274 = vmatmul.mubr.msk.f32.gmra.mrb[52].mxu0 %vm596_vm1, %v6033_v14  ;;  %v5051_v5 = vpop.permute.xlu1 %5050  ;;  %v5540_v32 = vld [vmem:[#allocation3 + $0x90] sm:$0xff] }
 0x55b   : > { %v5053_v50 = vpop.permute.xlu0 %5052  ;;  %5126 = vst.msk [vmem:[#allocation3 + $0xa0] sm:$0xff] %vm2377_vm9, %v5051_v5  ;;  %7244 = vmatprep.mubr.msk.f32.mxu1 %vm2837_vm7, %v5540_v32 }
 0x55c   : > { %5127 = vst.msk [vmem:[#allocation3 + $0xa8] sm:$0xff] %vm2377_vm9, %v5053_v50  ;;  %7245 = vmatmul.mubr.msk.f32.gmra.mrb[66].mxu1 %vm2837_vm7, %v5541_v9  ;;  %4684 = vrot.lane.b32.xlu1 %v5165_v6, %s7418_s1 }
 0x55d   : > { %4112 = vrot.lane.b32.xlu0 %v5165_v6, %s10453_s27  ;;  %v5169_v6 = vld [vmem:[#allocation2 + $0x1a1] sm:$0xff] }
 0x55e   : > { %v4479_v45 = vpop.permute.xlu1 %4478 }
 0x55f   : > { %v4481_v24 = vpop.permute.xlu0 %4480  ;;  %4552 = vst.msk [vmem:[#allocation3 + $0xb0] sm:$0xff] %vm1797_vm14, %v4479_v45 }
 0x560   : > { %4553 = vst.msk [vmem:[#allocation3 + $0xb8] sm:$0xff] %vm1797_vm14, %v4481_v24  ;;  %5448 = vrot.lane.b32.xlu1 %v5357_v0, %s7423_s0 }
 0x561   : > { %4876 = vrot.lane.b32.xlu0 %v5357_v0, %s10454_s20 }
 0x562   : > { %v5243_v22 = vpop.permute.xlu1 %5242 }
 0x563   : > { %v5245_v29 = vpop.permute.xlu0 %5244  ;;  %5318 = vst.msk [vmem:[#allocation3 + $0xa0] sm:$0xff] %vm2570_vm10, %v5243_v22 }
 0x564   : > { %5319 = vst.msk [vmem:[#allocation3 + $0xa8] sm:$0xff] %vm2570_vm10, %v5245_v29  ;;  %4302 = vrot.lane.b32.xlu1 %v5356_v10, %s10452_s28 }
 0x565   : > { %4304 = vrot.lane.b32.xlu0 %v5357_v0, %s10452_s28  ;;  %s10457_s28 = sshll.u32 %s10459_s25, 8 }
 0x566   : > { %v4671_v46 = vpop.permute.xlu1 %4670  ;;  %s10169_s30 = scalar_lea.vmem %s10438_s17, %s10457_s28 }
 0x567   : > { %4744 = vst.msk [vmem:[#allocation3 + $0xb0] sm:$0xff] %vm1990_vm15, %v4671_v46  ;;  %v4099_v34 = vpop.permute.xlu0 %4098 }
 0x568   : > { %4170 = vst.msk [vmem:[#allocation3 + $0xc0] sm:$0xff] %vm1411_vm4, %v4099_v34  ;;  %5066 = vrot.lane.b32.xlu1 %v4974_v37, %s7422_s29 }
 0x569   : > { %5068 = vrot.lane.b32.xlu0 %v4975_v21, %s7422_s29 }
 0x56a   : > { %v5435_v62 = vpop.permute.xlu1 %5434 }
 0x56b   : > { %5510 = vst.msk [vmem:[#allocation3 + $0xa0] sm:$0xff] %vm2763_vm12, %v5435_v62  ;;  %v4863_v27 = vpop.permute.xlu0 %4862 }
 0x56c   : > { %4936 = vst.msk [vmem:[#allocation3 + $0xb0] sm:$0xff] %vm2183_vm6, %v4863_v27  ;;  %4494 = vrot.lane.b32.xlu1 %v4974_v37, %s7419_s21 }
 0x56d   : > { %4496 = vrot.lane.b32.xlu0 %v4975_v21, %s7419_s21 }
 0x56e   : > { %v4673_v55 = vpop.permute.xlu1 %4672 }
 0x56f   : > { %4745 = vst.msk [vmem:[#allocation3 + $0xb8] sm:$0xff] %vm1990_vm15, %v4673_v55  ;;  %v4101_v17 = vpop.permute.xlu0 %4100  ;;  %v7228_v61 = vpop.f32.mrb[54].mxu1 }
 0x570   : > { %4171 = vst.msk [vmem:[#allocation3 + $0xc8] sm:$0xff] %vm1411_vm4, %v4101_v17  ;;  %v5898_v49 = vmul.f32 %v7228_v61, %v9851_v7  ;;  %v5755_v2 = vpop.f32.mrb[55].mxu1  ;;  %5258 = vrot.lane.b32.xlu1 %v5166_v13, %s7421_s23 }
 0x571   : > { %v5897_v48 = vmul.f32 %v9851_v7, %v5755_v2  ;;  %5260 = vrot.lane.b32.xlu0 %v5167_v38, %s7421_s23 }
 0x572   : > { %v5937_v51 = vadd.f32 %v9858_v12, %v5898_v49  ;;  %v5437_v53 = vpop.permute.xlu1 %5436  ;;  %v5542_v57 = vld [vmem:[#allocation3 + $0xa0] sm:$0xff] }
 0x573   : > { %v5936_v56 = vadd.f32 %v9858_v12, %v5897_v48  ;;  %5511 = vst.msk [vmem:[#allocation3 + $0xa8] sm:$0xff] %vm2763_vm12, %v5437_v53  ;;  %v4865_v54 = vpop.permute.xlu0 %4864  ;;  %7247 = vmatprep.mubr.msk.f32.mxu1 %vm2837_vm7, %v5542_v57 }
 0x574   : > { %v6003_v52 = vmul.f32 %v9864_v41, %v5937_v51  ;;  %4937 = vst.msk [vmem:[#allocation3 + $0xb8] sm:$0xff] %vm2183_vm6, %v4865_v54  ;;  %4686 = vrot.lane.b32.xlu1 %v5166_v13, %s7418_s1  ;;  %vm5970_vm11 = vcmp.gt.f32.partialorder %v5937_v51, 0.0 }
 0x575   : > { %v6002_v58 = vmul.f32 %v9864_v41, %v5936_v56  ;;  %4688 = vrot.lane.b32.xlu0 %v5167_v38, %s7418_s1  ;;  %vm5969_vm3 = vcmp.gt.f32.partialorder %v5936_v56, 0.0  ;;  %s6847_s1 = sld [smem:[#allocation4 + $0x4]] }
 0x576   : > { %v4291_v36 = vpop.permute.xlu1 %4290  ;;  %v6035_v47 = vsel %vm5970_vm11, %v5937_v51, %v6003_v52 }
 0x577   : > { %4362 = vst.msk [vmem:[#allocation3 + $0xc0] sm:$0xff] %vm1604_vm5, %v4291_v36  ;;  %v4293_v8 = vpop.permute.xlu0 %4292  ;;  %v6034_v42 = vsel %vm5969_vm3, %v5936_v56, %v6002_v58 }
 0x578   : > { %4363 = vst.msk [vmem:[#allocation3 + $0xc8] sm:$0xff] %vm1604_vm5, %v4293_v8  ;;  %7276 = vmatprep.mubr.msk.f32.mxu0 %vm596_vm1, %v6034_v42  ;;  %5450 = vrot.lane.b32.xlu1 %v5358_v39, %s7423_s0 }
 0x579   : > { %5452 = vrot.lane.b32.xlu0 %v5359_v4, %s7423_s0  ;;  %7277 = vmatmul.mubr.msk.f32.gmra.mrb[54].mxu0 %vm596_vm1, %v6035_v47 }
 0x57a   : > { %v5055_v63 = vpop.permute.xlu1 %5054  ;;  %v5543_v15 = vld [vmem:[#allocation3 + $0xa8] sm:$0xff] }
 0x57b   : > { %v5057_v1 = vpop.permute.xlu0 %5056  ;;  %5128 = vst.msk [vmem:[#allocation3 + $0xb0] sm:$0xff] %vm2377_vm9, %v5055_v63  ;;  %7248 = vmatmul.mubr.msk.f32.gmra.mrb[68].mxu1 %vm2837_vm7, %v5543_v15 }
 0x57c   : > { %5129 = vst.msk [vmem:[#allocation3 + $0xb8] sm:$0xff] %vm2377_vm9, %v5057_v1  ;;  %4878 = vrot.lane.b32.xlu1 %v5358_v39, %s10454_s20 }
 0x57d   : > { %5070 = vrot.lane.b32.xlu0 %v4976_v28, %s7422_s29 }
 0x57e   : > { %v4483_v16 = vpop.permute.xlu1 %4482 }
 0x57f   : > { %v4485_v40 = vpop.permute.xlu0 %4484  ;;  %4554 = vst.msk [vmem:[#allocation3 + $0xc0] sm:$0xff] %vm1797_vm14, %v4483_v16 }
 0x580   : > { %4555 = vst.msk [vmem:[#allocation3 + $0xc8] sm:$0xff] %vm1797_vm14, %v4485_v40  ;;  %4880 = vrot.lane.b32.xlu1 %v5359_v4, %s10454_s20 }
 0x581   : > { %5262 = vrot.lane.b32.xlu0 %v5168_v33, %s7421_s23 }
 0x582   : > { %v5247_v20 = vpop.permute.xlu1 %5246 }
 0x583   : > { %v5249_v18 = vpop.permute.xlu0 %5248  ;;  %5320 = vst.msk [vmem:[#allocation3 + $0xb0] sm:$0xff] %vm2570_vm10, %v5247_v20 }
 0x584   : > { %5321 = vst.msk [vmem:[#allocation3 + $0xb8] sm:$0xff] %vm2570_vm10, %v5249_v18  ;;  %5072 = vrot.lane.b32.xlu1 %v4977_v19, %s7422_s29 }
 0x585   : > { %5454 = vrot.lane.b32.xlu0 %v5360_v3, %s7423_s0 }
 0x586   : > { %v4675_v59 = vpop.permute.xlu1 %4674 }
 0x587   : > { %4746 = vst.msk [vmem:[#allocation3 + $0xc0] sm:$0xff] %vm1990_vm15, %v4675_v59  ;;  %v4103_v30 = vpop.permute.xlu0 %4102 }
 0x588   : > { %4172 = vst.msk [vmem:[#allocation3 + $0xd0] sm:$0xff] %vm1411_vm4, %v4103_v30  ;;  %5264 = vrot.lane.b32.xlu1 %v5169_v6, %s7421_s23 }
 0x58a   : > { %v5439_v26 = vpop.permute.xlu1 %5438 }
 0x58b   : > { %5512 = vst.msk [vmem:[#allocation3 + $0xb0] sm:$0xff] %vm2763_vm12, %v5439_v26  ;;  %v4867_v11 = vpop.permute.xlu0 %4866 }
 0x58c   : > { %4938 = vst.msk [vmem:[#allocation3 + $0xc0] sm:$0xff] %vm2183_vm6, %v4867_v11  ;;  %5456 = vrot.lane.b32.xlu1 %v5361_v43, %s7423_s0 }
 0x58e   : > { %v4677_v25 = vpop.permute.xlu1 %4676 }
 0x58f   : > { %4747 = vst.msk [vmem:[#allocation3 + $0xc8] sm:$0xff] %vm1990_vm15, %v4677_v25  ;;  %v4105_v31 = vpop.permute.xlu0 %4104 }
 0x590   : > { %v7231_v60 = vpop.f32.mrb[56].mxu1  ;;  %4173 = vst.msk [vmem:[#allocation3 + $0xd8] sm:$0xff] %vm1411_vm4, %v4105_v31 }
 0x591   : > { %v5900_v35 = vmul.f32 %v7231_v60, %v9851_v7  ;;  %v5765_v44 = vpop.f32.mrb[57].mxu1 }
 0x592   : > { %v5899_v10 = vmul.f32 %v9851_v7, %v5765_v44  ;;  %v5441_v14 = vpop.permute.xlu1 %5440  ;;  %v5544_v5 = vld [vmem:[#allocation3 + $0xb0] sm:$0xff] }
 0x593   : > { %v5939_v23 = vadd.f32 %v9858_v12, %v5900_v35  ;;  %5513 = vst.msk [vmem:[#allocation3 + $0xb8] sm:$0xff] %vm2763_vm12, %v5441_v14  ;;  %v4869_v50 = vpop.permute.xlu0 %4868  ;;  %7250 = vmatprep.mubr.msk.f32.mxu1 %vm2837_vm7, %v5544_v5 }
 0x594   : > { %v5938_v32 = vadd.f32 %v9858_v12, %v5899_v10  ;;  %4939 = vst.msk [vmem:[#allocation3 + $0xc8] sm:$0xff] %vm2183_vm6, %v4869_v50 }
 0x595   : > { %v6005_v9 = vmul.f32 %v9864_v41, %v5939_v23  ;;  %vm5972_vm0 = vcmp.gt.f32.partialorder %v5939_v23, 0.0 }
 0x596   : > { %v6004_v45 = vmul.f32 %v9864_v41, %v5938_v32  ;;  %vm5971_vm13 = vcmp.gt.f32.partialorder %v5938_v32, 0.0  ;;  %v4295_v24 = vpop.permute.xlu1 %4294 }
 0x597   : > { %4364 = vst.msk [vmem:[#allocation3 + $0xd0] sm:$0xff] %vm1604_vm5, %v4295_v24  ;;  %v4297_v0 = vpop.permute.xlu0 %4296  ;;  %v6037_v29 = vsel %vm5972_vm0, %v5939_v23, %v6005_v9 }
 0x598   : > { %v6036_v22 = vsel %vm5971_vm13, %v5938_v32, %v6004_v45  ;;  %4365 = vst.msk [vmem:[#allocation3 + $0xd8] sm:$0xff] %vm1604_vm5, %v4297_v0 }
 0x599   : > { %7279 = vmatprep.mubr.msk.f32.mxu0 %vm596_vm1, %v6036_v22 }
 0x59a   : > { %7280 = vmatmul.mubr.msk.f32.gmra.mrb[56].mxu0 %vm596_vm1, %v6037_v29  ;;  %v5059_v46 = vpop.permute.xlu1 %5058  ;;  %v5545_v34 = vld [vmem:[#allocation3 + $0xb8] sm:$0xff] }
 0x59b   : > { %v5061_v37 = vpop.permute.xlu0 %5060  ;;  %5130 = vst.msk [vmem:[#allocation3 + $0xc0] sm:$0xff] %vm2377_vm9, %v5059_v46  ;;  %7251 = vmatmul.mubr.msk.f32.gmra.mrb[70].mxu1 %vm2837_vm7, %v5545_v34 }
 0x59c   : > { %5131 = vst.msk [vmem:[#allocation3 + $0xc8] sm:$0xff] %vm2377_vm9, %v5061_v37 }
 0x59e   : > { %v4487_v21 = vpop.permute.xlu1 %4486 }
 0x59f   : > { %v4489_v62 = vpop.permute.xlu0 %4488  ;;  %4556 = vst.msk [vmem:[#allocation3 + $0xd0] sm:$0xff] %vm1797_vm14, %v4487_v21 }
 0x5a0   : > { %4557 = vst.msk [vmem:[#allocation3 + $0xd8] sm:$0xff] %vm1797_vm14, %v4489_v62 }
 0x5a2   : > { %v5251_v27 = vpop.permute.xlu1 %5250 }
 0x5a3   : > { %v5253_v55 = vpop.permute.xlu0 %5252  ;;  %5322 = vst.msk [vmem:[#allocation3 + $0xc0] sm:$0xff] %vm2570_vm10, %v5251_v27  ;;  %v10146_v27 = vld [vmem:[%s10435_s14] ss:$0 sm:$0xff] }
 0x5a4   : > { %5323 = vst.msk [vmem:[#allocation3 + $0xc8] sm:$0xff] %vm2570_vm10, %v5253_v55 }
 0x5a6   : > { %v4679_v17 = vpop.permute.xlu1 %4678 }
 0x5a7   : > { %4748 = vst.msk [vmem:[#allocation3 + $0xd0] sm:$0xff] %vm1990_vm15, %v4679_v17  ;;  %v4107_v61 = vpop.permute.xlu0 %4106 }
 0x5a8   : > { %4174 = vst.msk [vmem:[#allocation3 + $0xe0] sm:$0xff] %vm1411_vm4, %v4107_v61  ;;  %v10153_v61 = vld [vmem:[%s10436_s15] ss:$0 sm:$0xff] }
 0x5aa   : > { %v5443_v13 = vpop.permute.xlu1 %5442 }
 0x5ab   : > { %5514 = vst.msk [vmem:[#allocation3 + $0xc0] sm:$0xff] %vm2763_vm12, %v5443_v13  ;;  %v4871_v49 = vpop.permute.xlu0 %4870 }
 0x5ac   : > { %4940 = vst.msk [vmem:[#allocation3 + $0xd0] sm:$0xff] %vm2183_vm6, %v4871_v49 }
 0x5ae   : > { %v4681_v2 = vpop.permute.xlu1 %4680 }
 0x5af   : > { %4749 = vst.msk [vmem:[#allocation3 + $0xd8] sm:$0xff] %vm1990_vm15, %v4681_v2  ;;  %v4109_v38 = vpop.permute.xlu0 %4108  ;;  %v10156_v2 = vstv %s6847_s1 }
 0x5b0   : > { %v7234_v48 = vpop.f32.mrb[58].mxu1  ;;  %4175 = vst.msk [vmem:[#allocation3 + $0xe8] sm:$0xff] %vm1411_vm4, %v4109_v38 }
 0x5b1   : > { %v5902_v51 = vmul.f32 %v7234_v48, %v9851_v7  ;;  %v5775_v53 = vpop.f32.mrb[59].mxu1 }
 0x5b2   : > { %v5901_v57 = vmul.f32 %v9851_v7, %v5775_v53  ;;  %v5445_v54 = vpop.permute.xlu1 %5444  ;;  %v5546_v52 = vld [vmem:[#allocation3 + $0xc0] sm:$0xff] }
 0x5b3   : > { %v5941_v56 = vadd.f32 %v9858_v12, %v5902_v51  ;;  %5515 = vst.msk [vmem:[#allocation3 + $0xc8] sm:$0xff] %vm2763_vm12, %v5445_v54  ;;  %v4873_v36 = vpop.permute.xlu0 %4872  ;;  %7253 = vmatprep.mubr.msk.f32.mxu1 %vm2837_vm7, %v5546_v52 }
 0x5b4   : > { %v5940_v58 = vadd.f32 %v9858_v12, %v5901_v57  ;;  %4941 = vst.msk [vmem:[#allocation3 + $0xd8] sm:$0xff] %vm2183_vm6, %v4873_v36 }
 0x5b5   : > { %v6007_v8 = vmul.f32 %v9864_v41, %v5941_v56  ;;  %vm5974_vm3 = vcmp.gt.f32.partialorder %v5941_v56, 0.0 }
 0x5b6   : > { %v6006_v42 = vmul.f32 %v9864_v41, %v5940_v58  ;;  %vm5973_vm8 = vcmp.gt.f32.partialorder %v5940_v58, 0.0  ;;  %v4299_v39 = vpop.permute.xlu1 %4298 }
 0x5b7   : > { %4366 = vst.msk [vmem:[#allocation3 + $0xe0] sm:$0xff] %vm1604_vm5, %v4299_v39  ;;  %v4301_v4 = vpop.permute.xlu0 %4300  ;;  %v6039_v63 = vsel %vm5974_vm3, %v5941_v56, %v6007_v8 }
 0x5b8   : > { %v6038_v47 = vsel %vm5973_vm8, %v5940_v58, %v6006_v42  ;;  %4367 = vst.msk [vmem:[#allocation3 + $0xe8] sm:$0xff] %vm1604_vm5, %v4301_v4 }
 0x5b9   : > { %7282 = vmatprep.mubr.msk.f32.mxu0 %vm596_vm1, %v6038_v47 }
 0x5ba   : > { %7283 = vmatmul.mubr.msk.f32.gmra.mrb[58].mxu0 %vm596_vm1, %v6039_v63  ;;  %v5063_v15 = vpop.permute.xlu1 %5062  ;;  %v5547_v28 = vld [vmem:[#allocation3 + $0xc8] sm:$0xff] }
 0x5bb   : > { %v5065_v1 = vpop.permute.xlu0 %5064  ;;  %5132 = vst.msk [vmem:[#allocation3 + $0xd0] sm:$0xff] %vm2377_vm9, %v5063_v15  ;;  %7254 = vmatmul.mubr.msk.f32.gmra.mrb[72].mxu1 %vm2837_vm7, %v5547_v28 }
 0x5bc   : > { %5133 = vst.msk [vmem:[#allocation3 + $0xd8] sm:$0xff] %vm2377_vm9, %v5065_v1 }
 0x5be   : > { %v4491_v16 = vpop.permute.xlu1 %4490 }
 0x5bf   : > { %v4493_v33 = vpop.permute.xlu0 %4492  ;;  %4558 = vst.msk [vmem:[#allocation3 + $0xe0] sm:$0xff] %vm1797_vm14, %v4491_v16 }
 0x5c0   : > { %4559 = vst.msk [vmem:[#allocation3 + $0xe8] sm:$0xff] %vm1797_vm14, %v4493_v33 }
 0x5c2   : > { %v5255_v40 = vpop.permute.xlu1 %5254 }
 0x5c3   : > { %v5257_v19 = vpop.permute.xlu0 %5256  ;;  %5324 = vst.msk [vmem:[#allocation3 + $0xd0] sm:$0xff] %vm2570_vm10, %v5255_v40 }
 0x5c4   : > { %5325 = vst.msk [vmem:[#allocation3 + $0xd8] sm:$0xff] %vm2570_vm10, %v5257_v19 }
 0x5c6   : > { %v4683_v20 = vpop.permute.xlu1 %4682 }
 0x5c7   : > { %4750 = vst.msk [vmem:[#allocation3 + $0xe0] sm:$0xff] %vm1990_vm15, %v4683_v20  ;;  %v4111_v3 = vpop.permute.xlu0 %4110 }
 0x5c8   : > { %4176 = vst.msk [vmem:[#allocation3 + $0xf0] sm:$0xff] %vm1411_vm4, %v4111_v3 }
 0x5ca   : > { %v5447_v18 = vpop.permute.xlu1 %5446 }
 0x5cb   : > { %5516 = vst.msk [vmem:[#allocation3 + $0xd0] sm:$0xff] %vm2763_vm12, %v5447_v18  ;;  %v4875_v6 = vpop.permute.xlu0 %4874 }
 0x5cc   : > { %4942 = vst.msk [vmem:[#allocation3 + $0xe0] sm:$0xff] %vm2183_vm6, %v4875_v6 }
 0x5ce   : > { %v4685_v59 = vpop.permute.xlu1 %4684 }
 0x5cf   : > { %4751 = vst.msk [vmem:[#allocation3 + $0xe8] sm:$0xff] %vm1990_vm15, %v4685_v59  ;;  %v4113_v30 = vpop.permute.xlu0 %4112 }
 0x5d0   : > { %v7237_v43 = vpop.f32.mrb[60].mxu1  ;;  %4177 = vst.msk [vmem:[#allocation3 + $0xf8] sm:$0xff] %vm1411_vm4, %v4113_v30 }
 0x5d1   : > { %v5904_v26 = vmul.f32 %v7237_v43, %v9851_v7  ;;  %v5785_v11 = vpop.f32.mrb[61].mxu1 }
 0x5d2   : > { %v5903_v25 = vmul.f32 %v9851_v7, %v5785_v11  ;;  %v5449_v60 = vpop.permute.xlu1 %5448  ;;  %v5548_v35 = vld [vmem:[#allocation3 + $0xd0] sm:$0xff] }
 0x5d3   : > { %v5943_v31 = vadd.f32 %v9858_v12, %v5904_v26  ;;  %5517 = vst.msk [vmem:[#allocation3 + $0xd8] sm:$0xff] %vm2763_vm12, %v5449_v60  ;;  %v4877_v10 = vpop.permute.xlu0 %4876  ;;  %7256 = vmatprep.mubr.msk.f32.mxu1 %vm2837_vm7, %v5548_v35  ;;  %v10201_v60 = vld [vmem:[%s10432_s11] ss:$0 sm:$0xff] }
 0x5d4   : > { %v5942_v44 = vadd.f32 %v9858_v12, %v5903_v25  ;;  %4943 = vst.msk [vmem:[#allocation3 + $0xe8] sm:$0xff] %vm2183_vm6, %v4877_v10 }
 0x5d5   : > { %v6009_v23 = vmul.f32 %v9864_v41, %v5943_v31  ;;  %vm5976_vm11 = vcmp.gt.f32.partialorder %v5943_v31, 0.0 }
 0x5d6   : > { %v6008_v14 = vmul.f32 %v9864_v41, %v5942_v44  ;;  %vm5975_vm4 = vcmp.gt.f32.partialorder %v5942_v44, 0.0  ;;  %v4303_v5 = vpop.permute.xlu1 %4302 }
 0x5d7   : > { %4368 = vst.msk [vmem:[#allocation3 + $0xf0] sm:$0xff] %vm1604_vm5, %v4303_v5  ;;  %v4305_v32 = vpop.permute.xlu0 %4304  ;;  %v6041_v9 = vsel %vm5976_vm11, %v5943_v31, %v6009_v23  ;;  %v10210_v5 = vld [vmem:[%s10433_s12] ss:$0 sm:$0xff] }
 0x5d8   : > { %v6040_v50 = vsel %vm5975_vm4, %v5942_v44, %v6008_v14  ;;  %4369 = vst.msk [vmem:[#allocation3 + $0xf8] sm:$0xff] %vm1604_vm5, %v4305_v32 }
 0x5d9   : > { %7285 = vmatprep.mubr.msk.f32.mxu0 %vm596_vm1, %v6040_v50 }
 0x5da   : > { %7286 = vmatmul.mubr.msk.f32.gmra.mrb[60].mxu0 %vm596_vm1, %v6041_v9  ;;  %v5067_v45 = vpop.permute.xlu1 %5066  ;;  %v5549_v24 = vld [vmem:[#allocation3 + $0xd8] sm:$0xff] }
 0x5db   : > { %v5069_v0 = vpop.permute.xlu0 %5068  ;;  %5134 = vst.msk [vmem:[#allocation3 + $0xe0] sm:$0xff] %vm2377_vm9, %v5067_v45  ;;  %7257 = vmatmul.mubr.msk.f32.gmra.mrb[74].mxu1 %vm2837_vm7, %v5549_v24 }
 0x5dc   : > { %5135 = vst.msk [vmem:[#allocation3 + $0xe8] sm:$0xff] %vm2377_vm9, %v5069_v0 }
 0x5de   : > { %v4495_v22 = vpop.permute.xlu1 %4494 }
 0x5df   : > { %v4497_v29 = vpop.permute.xlu0 %4496  ;;  %4560 = vst.msk [vmem:[#allocation3 + $0xf0] sm:$0xff] %vm1797_vm14, %v4495_v22 }
 0x5e0   : > { %4561 = vst.msk [vmem:[#allocation3 + $0xf8] sm:$0xff] %vm1797_vm14, %v4497_v29 }
 0x5e2   : > { %v5259_v46 = vpop.permute.xlu1 %5258 }
 0x5e3   : > { %v5261_v34 = vpop.permute.xlu0 %5260  ;;  %5326 = vst.msk [vmem:[#allocation3 + $0xe0] sm:$0xff] %vm2570_vm10, %v5259_v46 }
 0x5e4   : > { %5327 = vst.msk [vmem:[#allocation3 + $0xe8] sm:$0xff] %vm2570_vm10, %v5261_v34 }
 0x5e6   : > { %v4687_v37 = vpop.permute.xlu1 %4686 }
 0x5e7   : > { %v4689_v21 = vpop.permute.xlu0 %4688  ;;  %4752 = vst.msk [vmem:[#allocation3 + $0xf0] sm:$0xff] %vm1990_vm15, %v4687_v37 }
 0x5e8   : > { %4753 = vst.msk [vmem:[#allocation3 + $0xf8] sm:$0xff] %vm1990_vm15, %v4689_v21 }
 0x5ea   : > { %v5451_v62 = vpop.permute.xlu1 %5450 }
 0x5eb   : > { %v5453_v55 = vpop.permute.xlu0 %5452  ;;  %5518 = vst.msk [vmem:[#allocation3 + $0xe0] sm:$0xff] %vm2763_vm12, %v5451_v62  ;;  %v7269_v17 = vpop.f32.mrb[48].mxu0 }
 0x5ec   : > { %5519 = vst.msk [vmem:[#allocation3 + $0xe8] sm:$0xff] %vm2763_vm12, %v5453_v55  ;;  %v6393_v13 = vmul.f32 %v7269_v17, %v10146_v27  ;;  %v6226_v49 = vpop.f32.mrb[49].mxu0 }
 0x5ed   : > { %v6392_v38 = vmul.f32 %v10146_v27, %v6226_v49 }
 0x5ee   : > { %v4879_v48 = vpop.permute.xlu1 %4878  ;;  %v6432_v51 = vadd.f32 %v10153_v61, %v6393_v13 }
 0x5ef   : > { %4944 = vst.msk [vmem:[#allocation3 + $0xf0] sm:$0xff] %vm2183_vm6, %v4879_v48  ;;  %v5071_v57 = vpop.permute.xlu0 %5070  ;;  %v6431_v56 = vadd.f32 %v10153_v61, %v6392_v38 }
 0x5f0   : > { %v7240_v53 = vpop.f32.mrb[62].mxu1  ;;  %5136 = vst.msk [vmem:[#allocation3 + $0xf0] sm:$0xff] %vm2377_vm9, %v5071_v57  ;;  %vm6465_vm5 = vcmp.gt.f32.partialorder %v6432_v51, 0.0  ;;  %v6498_v58 = vmul.f32 %v10156_v2, %v6432_v51 }
 0x5f1   : > { %v5906_v54 = vmul.f32 %v7240_v53, %v9851_v7  ;;  %v5795_v52 = vpop.f32.mrb[63].mxu1  ;;  %vm6464_vm14 = vcmp.gt.f32.partialorder %v6431_v56, 0.0  ;;  %v6497_v8 = vmul.f32 %v10156_v2, %v6431_v56 }
 0x5f2   : > { %v5905_v36 = vmul.f32 %v9851_v7, %v5795_v52  ;;  %v4881_v39 = vpop.permute.xlu1 %4880  ;;  %v5550_v4 = vld [vmem:[#allocation3 + $0xe0] sm:$0xff]  ;;  %v6530_v47 = vsel %vm6465_vm5, %v6432_v51, %v6498_v58 }
 0x5f3   : > { %v5945_v42 = vadd.f32 %v9858_v12, %v5906_v54  ;;  %4945 = vst.msk [vmem:[#allocation3 + $0xf8] sm:$0xff] %vm2183_vm6, %v4881_v39  ;;  %7259 = vmatprep.mubr.msk.f32.mxu1 %vm2837_vm7, %v5550_v4  ;;  %v5551_v15 = vld [vmem:[#allocation3 + $0xe8] sm:$0xff]  ;;  %v5263_v28 = vpop.permute.xlu0 %5262  ;;  %v6529_v7 = vsel %vm6464_vm14, %v6431_v56, %v6497_v8 }
 0x5f4   : > { %v5944_v63 = vadd.f32 %v9858_v12, %v5905_v36  ;;  %6562 = vst.msk [vmem:[%s10169_s30 + $0x8] sm:$0xff] %vm1098_vm2, %v6530_v47  ;;  %7260 = vmatmul.mubr.msk.f32.gmra.mrb[76].mxu1 %vm2837_vm7, %v5551_v15  ;;  %6561 = vst.msk [vmem:[%s10169_s30] sm:$0xff] %vm1098_vm2, %v6529_v7 }
 0x5f5   : > { %v6011_v1 = vmul.f32 %v9864_v41, %v5945_v42  ;;  %5328 = vst.msk [vmem:[#allocation3 + $0xf0] sm:$0xff] %vm2570_vm10, %v5263_v28  ;;  %vm5978_vm13 = vcmp.gt.f32.partialorder %v5945_v42, 0.0 }
 0x5f6   : > { %v6010_v16 = vmul.f32 %v9864_v41, %v5944_v63  ;;  %vm5977_vm15 = vcmp.gt.f32.partialorder %v5944_v63, 0.0  ;;  %v5073_v12 = vpop.permute.xlu1 %5072 }
 0x5f7   : > { %5137 = vst.msk [vmem:[#allocation3 + $0xf8] sm:$0xff] %vm2377_vm9, %v5073_v12  ;;  %v5455_v40 = vpop.permute.xlu0 %5454  ;;  %v6043_v19 = vsel %vm5978_vm13, %v5945_v42, %v6011_v1 }
 0x5f8   : > { %v6042_v33 = vsel %vm5977_vm15, %v5944_v63, %v6010_v16  ;;  %5520 = vst.msk [vmem:[#allocation3 + $0xf0] sm:$0xff] %vm2763_vm12, %v5455_v40 }
 0x5f9   : > { %7288 = vmatprep.mubr.msk.f32.mxu0 %vm596_vm1, %v6042_v33 }
 0x5fa   : > { %7289 = vmatmul.mubr.msk.f32.gmra.mrb[62].mxu0 %vm596_vm1, %v6043_v19  ;;  %v5265_v20 = vpop.permute.xlu1 %5264 }
 0x5fb   : > { %5329 = vst.msk [vmem:[#allocation3 + $0xf8] sm:$0xff] %vm2570_vm10, %v5265_v20 }
 0x5fe   : > { %v5457_v3 = vpop.permute.xlu1 %5456 }
 0x5ff   : > { %5521 = vst.msk [vmem:[#allocation3 + $0xf8] sm:$0xff] %vm2763_vm12, %v5457_v3  ;;  %v5552_v18 = vld [vmem:[#allocation3 + $0xf0] sm:$0xff] }
 0x600   : > { %7262 = vmatprep.mubr.msk.f32.mxu1 %vm2837_vm7, %v5552_v18 }
 0x606   : > { %v5553_v6 = vld [vmem:[#allocation3 + $0xf8] sm:$0xff] }
 0x607   : > { %7263 = vmatmul.mubr.msk.f32.gmra.mrb[78].mxu1 %vm2837_vm7, %v5553_v6 }
 0x60d   : > { %v7272_v59 = vpop.f32.mrb[50].mxu0 }
 0x60e   : > { %v6395_v30 = vmul.f32 %v7272_v59, %v10146_v27  ;;  %v6236_v43 = vpop.f32.mrb[51].mxu0 }
 0x60f   : > { %v6394_v26 = vmul.f32 %v10146_v27, %v6236_v43  ;;  %v7243_v25 = vpop.f32.mrb[64].mxu1 }
 0x610   : > { %v6434_v11 = vadd.f32 %v10153_v61, %v6395_v30  ;;  %v5908_v35 = vmul.f32 %v10201_v60, %v7243_v25  ;;  %v5805_v44 = vpop.f32.mrb[65].mxu1 }
 0x611   : > { %v6433_v31 = vadd.f32 %v10153_v61, %v6394_v26  ;;  %v5907_v23 = vmul.f32 %v10201_v60, %v5805_v44 }
 0x612   : > { %vm6467_vm6 = vcmp.gt.f32.partialorder %v6434_v11, 0.0  ;;  %v6500_v10 = vmul.f32 %v10156_v2, %v6434_v11  ;;  %v5947_v32 = vadd.f32 %v10210_v5, %v5908_v35 }
 0x613   : > { %vm6466_vm9 = vcmp.gt.f32.partialorder %v6433_v31, 0.0  ;;  %v6499_v14 = vmul.f32 %v10156_v2, %v6433_v31  ;;  %v5946_v9 = vadd.f32 %v10210_v5, %v5907_v23 }
 0x614   : > { %v6532_v50 = vsel %vm6467_vm6, %v6434_v11, %v6500_v10  ;;  %v6013_v24 = vmul.f32 %v9864_v41, %v5947_v32  ;;  %vm5980_vm12 = vcmp.gt.f32.partialorder %v5947_v32, 0.0 }
 0x615   : > { %6564 = vst.msk [vmem:[%s10169_s30 + $0x18] sm:$0xff] %vm1098_vm2, %v6532_v50  ;;  %v6531_v45 = vsel %vm6466_vm9, %v6433_v31, %v6499_v14  ;;  %v6012_v0 = vmul.f32 %v9864_v41, %v5946_v9  ;;  %vm5979_vm10 = vcmp.gt.f32.partialorder %v5946_v9, 0.0 }
 0x616   : > { %6563 = vst.msk [vmem:[%s10169_s30 + $0x10] sm:$0xff] %vm1098_vm2, %v6531_v45  ;;  %v6045_v29 = vsel %vm5980_vm12, %v5947_v32, %v6013_v24 }
 0x617   : > { %v6044_v22 = vsel %vm5979_vm10, %v5946_v9, %v6012_v0 }
 0x618   : > { %7291 = vmatprep.mubr.msk.f32.mxu0 %vm596_vm1, %v6044_v22 }
 0x619   : > { %7292 = vmatmul.mubr.msk.f32.gmra.mrb[64].mxu0 %vm596_vm1, %v6045_v29 }
 0x62d   : > { %v7275_v46 = vpop.f32.mrb[52].mxu0 }
 0x62e   : > { %v6397_v34 = vmul.f32 %v7275_v46, %v10146_v27  ;;  %v6246_v37 = vpop.f32.mrb[53].mxu0 }
 0x62f   : > { %v6396_v21 = vmul.f32 %v10146_v27, %v6246_v37  ;;  %v7246_v55 = vpop.f32.mrb[66].mxu1 }
 0x630   : > { %v6436_v62 = vadd.f32 %v10153_v61, %v6397_v34  ;;  %v5910_v13 = vmul.f32 %v10201_v60, %v7246_v55  ;;  %v5815_v49 = vpop.f32.mrb[67].mxu1 }
 0x631   : > { %v6435_v17 = vadd.f32 %v10153_v61, %v6396_v21  ;;  %v5909_v48 = vmul.f32 %v10201_v60, %v5815_v49 }
 0x632   : > { %vm6469_vm7 = vcmp.gt.f32.partialorder %v6436_v62, 0.0  ;;  %v6502_v38 = vmul.f32 %v10156_v2, %v6436_v62  ;;  %v5949_v53 = vadd.f32 %v10210_v5, %v5910_v13 }
 0x633   : > { %vm6468_vm0 = vcmp.gt.f32.partialorder %v6435_v17, 0.0  ;;  %v6501_v51 = vmul.f32 %v10156_v2, %v6435_v17  ;;  %v5948_v56 = vadd.f32 %v10210_v5, %v5909_v48 }
 0x634   : > { %v6534_v57 = vsel %vm6469_vm7, %v6436_v62, %v6502_v38  ;;  %v6015_v52 = vmul.f32 %v9864_v41, %v5949_v53  ;;  %vm5982_vm3 = vcmp.gt.f32.partialorder %v5949_v53, 0.0 }
 0x635   : > { %6566 = vst.msk [vmem:[%s10169_s30 + $0x28] sm:$0xff] %vm1098_vm2, %v6534_v57  ;;  %v6533_v54 = vsel %vm6468_vm0, %v6435_v17, %v6501_v51  ;;  %v6014_v58 = vmul.f32 %v9864_v41, %v5948_v56  ;;  %vm5981_vm8 = vcmp.gt.f32.partialorder %v5948_v56, 0.0 }
 0x636   : > { %6565 = vst.msk [vmem:[%s10169_s30 + $0x20] sm:$0xff] %vm1098_vm2, %v6533_v54  ;;  %v6047_v8 = vsel %vm5982_vm3, %v5949_v53, %v6015_v52 }
 0x637   : > { %v6046_v36 = vsel %vm5981_vm8, %v5948_v56, %v6014_v58 }
 0x638   : > { %7294 = vmatprep.mubr.msk.f32.mxu0 %vm596_vm1, %v6046_v36 }
 0x639   : > { %7295 = vmatmul.mubr.msk.f32.gmra.mrb[66].mxu0 %vm596_vm1, %v6047_v8 }
 0x64c   : > { %v7278_v42 = vpop.f32.mrb[54].mxu0 }
 0x64d   : > { %v6399_v39 = vmul.f32 %v7278_v42, %v10146_v27  ;;  %v6256_v4 = vpop.f32.mrb[55].mxu0 }
 0x64e   : > { %v6398_v47 = vmul.f32 %v10146_v27, %v6256_v4  ;;  %v7249_v63 = vpop.f32.mrb[68].mxu1 }
 0x64f   : > { %v6438_v15 = vadd.f32 %v10153_v61, %v6399_v39  ;;  %v5912_v28 = vmul.f32 %v10201_v60, %v7249_v63  ;;  %v5825_v7 = vpop.f32.mrb[69].mxu1 }
 0x650   : > { %v6437_v1 = vadd.f32 %v10153_v61, %v6398_v47  ;;  %v5911_v16 = vmul.f32 %v10201_v60, %v5825_v7 }
 0x651   : > { %vm6471_vm4 = vcmp.gt.f32.partialorder %v6438_v15, 0.0  ;;  %v6504_v12 = vmul.f32 %v10156_v2, %v6438_v15  ;;  %v5951_v33 = vadd.f32 %v10210_v5, %v5912_v28 }
 0x652   : > { %vm6470_vm11 = vcmp.gt.f32.partialorder %v6437_v1, 0.0  ;;  %v6503_v40 = vmul.f32 %v10156_v2, %v6437_v1  ;;  %v5950_v19 = vadd.f32 %v10210_v5, %v5911_v16 }
 0x653   : > { %v6536_v20 = vsel %vm6471_vm4, %v6438_v15, %v6504_v12  ;;  %v6017_v3 = vmul.f32 %v9864_v41, %v5951_v33  ;;  %vm5984_vm14 = vcmp.gt.f32.partialorder %v5951_v33, 0.0 }
 0x654   : > { %6568 = vst.msk [vmem:[%s10169_s30 + $0x38] sm:$0xff] %vm1098_vm2, %v6536_v20  ;;  %v6535_v18 = vsel %vm6470_vm11, %v6437_v1, %v6503_v40  ;;  %v6016_v6 = vmul.f32 %v9864_v41, %v5950_v19  ;;  %vm5983_vm5 = vcmp.gt.f32.partialorder %v5950_v19, 0.0 }
 0x655   : > { %6567 = vst.msk [vmem:[%s10169_s30 + $0x30] sm:$0xff] %vm1098_vm2, %v6535_v18  ;;  %v6049_v30 = vsel %vm5984_vm14, %v5951_v33, %v6017_v3 }
 0x656   : > { %v6048_v59 = vsel %vm5983_vm5, %v5950_v19, %v6016_v6 }
 0x657   : > { %7297 = vmatprep.mubr.msk.f32.mxu0 %vm596_vm1, %v6048_v59 }
 0x658   : > { %7298 = vmatmul.mubr.msk.f32.gmra.mrb[68].mxu0 %vm596_vm1, %v6049_v30 }
 0x66d   : > { %v7281_v43 = vpop.f32.mrb[56].mxu0 }
 0x66e   : > { %v6401_v26 = vmul.f32 %v7281_v43, %v10146_v27  ;;  %v6266_v11 = vpop.f32.mrb[57].mxu0  ;;  %v7252_v31 = vpop.f32.mrb[70].mxu1 }
 0x66f   : > { %v6400_v25 = vmul.f32 %v10146_v27, %v6266_v11  ;;  %v5914_v44 = vmul.f32 %v10201_v60, %v7252_v31  ;;  %v5835_v10 = vpop.f32.mrb[71].mxu1 }
 0x670   : > { %v6440_v35 = vadd.f32 %v10153_v61, %v6401_v26  ;;  %v5913_v14 = vmul.f32 %v10201_v60, %v5835_v10 }
 0x671   : > { %v6439_v23 = vadd.f32 %v10153_v61, %v6400_v25  ;;  %v5953_v50 = vadd.f32 %v10210_v5, %v5914_v44 }
 0x672   : > { %vm6473_vm15 = vcmp.gt.f32.partialorder %v6440_v35, 0.0  ;;  %v6506_v32 = vmul.f32 %v10156_v2, %v6440_v35  ;;  %v5952_v45 = vadd.f32 %v10210_v5, %v5913_v14 }
 0x673   : > { %vm6472_vm13 = vcmp.gt.f32.partialorder %v6439_v23, 0.0  ;;  %v6505_v9 = vmul.f32 %v10156_v2, %v6439_v23  ;;  %v6019_v0 = vmul.f32 %v9864_v41, %v5953_v50  ;;  %vm5986_vm9 = vcmp.gt.f32.partialorder %v5953_v50, 0.0 }
 0x674   : > { %v6538_v24 = vsel %vm6473_vm15, %v6440_v35, %v6506_v32  ;;  %v6018_v29 = vmul.f32 %v9864_v41, %v5952_v45  ;;  %vm5985_vm6 = vcmp.gt.f32.partialorder %v5952_v45, 0.0 }
 0x675   : > { %6570 = vst.msk [vmem:[%s10169_s30 + $0x48] sm:$0xff] %vm1098_vm2, %v6538_v24  ;;  %v6537_v22 = vsel %vm6472_vm13, %v6439_v23, %v6505_v9  ;;  %v6051_v34 = vsel %vm5986_vm9, %v5953_v50, %v6019_v0 }
 0x676   : > { %6569 = vst.msk [vmem:[%s10169_s30 + $0x40] sm:$0xff] %vm1098_vm2, %v6537_v22  ;;  %v6050_v46 = vsel %vm5985_vm6, %v5952_v45, %v6018_v29 }
 0x677   : > { %7300 = vmatprep.mubr.msk.f32.mxu0 %vm596_vm1, %v6050_v46 }
 0x678   : > { %7301 = vmatmul.mubr.msk.f32.gmra.mrb[70].mxu0 %vm596_vm1, %v6051_v34 }
 0x68d   : > { %v7284_v37 = vpop.f32.mrb[58].mxu0 }
 0x68e   : > { %v6403_v21 = vmul.f32 %v7284_v37, %v10146_v27  ;;  %v6276_v62 = vpop.f32.mrb[59].mxu0  ;;  %v7255_v17 = vpop.f32.mrb[72].mxu1 }
 0x68f   : > { %v6402_v55 = vmul.f32 %v10146_v27, %v6276_v62  ;;  %v5916_v49 = vmul.f32 %v10201_v60, %v7255_v17  ;;  %v5845_v38 = vpop.f32.mrb[73].mxu1 }
 0x690   : > { %v6442_v13 = vadd.f32 %v10153_v61, %v6403_v21  ;;  %v5915_v51 = vmul.f32 %v10201_v60, %v5845_v38 }
 0x691   : > { %v6441_v48 = vadd.f32 %v10153_v61, %v6402_v55  ;;  %v5955_v57 = vadd.f32 %v10210_v5, %v5916_v49 }
 0x692   : > { %vm6475_vm10 = vcmp.gt.f32.partialorder %v6442_v13, 0.0  ;;  %v6508_v53 = vmul.f32 %v10156_v2, %v6442_v13  ;;  %v5954_v54 = vadd.f32 %v10210_v5, %v5915_v51 }
 0x693   : > { %vm6474_vm12 = vcmp.gt.f32.partialorder %v6441_v48, 0.0  ;;  %v6507_v56 = vmul.f32 %v10156_v2, %v6441_v48  ;;  %v6021_v58 = vmul.f32 %v9864_v41, %v5955_v57  ;;  %vm5988_vm0 = vcmp.gt.f32.partialorder %v5955_v57, 0.0 }
 0x694   : > { %v6540_v52 = vsel %vm6475_vm10, %v6442_v13, %v6508_v53  ;;  %v6020_v8 = vmul.f32 %v9864_v41, %v5954_v54  ;;  %vm5987_vm7 = vcmp.gt.f32.partialorder %v5954_v54, 0.0 }
 0x695   : > { %6572 = vst.msk [vmem:[%s10169_s30 + $0x58] sm:$0xff] %vm1098_vm2, %v6540_v52  ;;  %v6539_v36 = vsel %vm6474_vm12, %v6441_v48, %v6507_v56  ;;  %v6053_v39 = vsel %vm5988_vm0, %v5955_v57, %v6021_v58 }
 0x696   : > { %6571 = vst.msk [vmem:[%s10169_s30 + $0x50] sm:$0xff] %vm1098_vm2, %v6539_v36  ;;  %v6052_v42 = vsel %vm5987_vm7, %v5954_v54, %v6020_v8 }
 0x697   : > { %7303 = vmatprep.mubr.msk.f32.mxu0 %vm596_vm1, %v6052_v42 }
 0x698   : > { %7304 = vmatmul.mubr.msk.f32.gmra.mrb[72].mxu0 %vm596_vm1, %v6053_v39 }
 0x6ad   : > { %v7287_v4 = vpop.f32.mrb[60].mxu0 }
 0x6ae   : > { %v6405_v47 = vmul.f32 %v7287_v4, %v10146_v27  ;;  %v6286_v63 = vpop.f32.mrb[61].mxu0  ;;  %v7258_v28 = vpop.f32.mrb[74].mxu1 }
 0x6af   : > { %v6404_v15 = vmul.f32 %v10146_v27, %v6286_v63  ;;  %v5918_v1 = vmul.f32 %v10201_v60, %v7258_v28  ;;  %v5855_v16 = vpop.f32.mrb[75].mxu1 }
 0x6b0   : > { %v6444_v7 = vadd.f32 %v10153_v61, %v6405_v47  ;;  %v5917_v33 = vmul.f32 %v10201_v60, %v5855_v16 }
 0x6b1   : > { %v6443_v12 = vadd.f32 %v10153_v61, %v6404_v15  ;;  %v5957_v19 = vadd.f32 %v10210_v5, %v5918_v1 }
 0x6b2   : > { %vm6477_vm8 = vcmp.gt.f32.partialorder %v6444_v7, 0.0  ;;  %v6510_v40 = vmul.f32 %v10156_v2, %v6444_v7  ;;  %v5956_v3 = vadd.f32 %v10210_v5, %v5917_v33 }
 0x6b3   : > { %vm6476_vm3 = vcmp.gt.f32.partialorder %v6443_v12, 0.0  ;;  %v6509_v20 = vmul.f32 %v10156_v2, %v6443_v12  ;;  %v6023_v6 = vmul.f32 %v9864_v41, %v5957_v19  ;;  %vm5990_vm11 = vcmp.gt.f32.partialorder %v5957_v19, 0.0 }
 0x6b4   : > { %v6542_v18 = vsel %vm6477_vm8, %v6444_v7, %v6510_v40  ;;  %v6022_v30 = vmul.f32 %v9864_v41, %v5956_v3  ;;  %vm5989_vm4 = vcmp.gt.f32.partialorder %v5956_v3, 0.0 }
 0x6b5   : > { %6574 = vst.msk [vmem:[%s10169_s30 + $0x68] sm:$0xff] %vm1098_vm2, %v6542_v18  ;;  %v6541_v59 = vsel %vm6476_vm3, %v6443_v12, %v6509_v20  ;;  %v6055_v26 = vsel %vm5990_vm11, %v5957_v19, %v6023_v6 }
 0x6b6   : > { %6573 = vst.msk [vmem:[%s10169_s30 + $0x60] sm:$0xff] %vm1098_vm2, %v6541_v59  ;;  %v6054_v43 = vsel %vm5989_vm4, %v5956_v3, %v6022_v30 }
 0x6b7   : > { %7306 = vmatprep.mubr.msk.f32.mxu0 %vm596_vm1, %v6054_v43 }
 0x6b8   : > { %7307 = vmatmul.mubr.msk.f32.gmra.mrb[74].mxu0 %vm596_vm1, %v6055_v26 }
 0x6c7   : > { %v7261_v11 = vpop.f32.mrb[76].mxu1 }
 0x6c8   : > { %v5920_v25 = vmul.f32 %v10201_v60, %v7261_v11  ;;  %v5865_v31 = vpop.f32.mrb[77].mxu1 }
 0x6c9   : > { %v5919_v35 = vmul.f32 %v10201_v60, %v5865_v31 }
 0x6ca   : > { %v5959_v44 = vadd.f32 %v10210_v5, %v5920_v25 }
 0x6cb   : > { %v5958_v10 = vadd.f32 %v10210_v5, %v5919_v35 }
 0x6cc   : > { %v6025_v23 = vmul.f32 %v9864_v41, %v5959_v44  ;;  %vm5992_vm14 = vcmp.gt.f32.partialorder %v5959_v44, 0.0 }
 0x6cd   : > { %v7290_v14 = vpop.f32.mrb[62].mxu0  ;;  %v6024_v32 = vmul.f32 %v9864_v41, %v5958_v10  ;;  %vm5991_vm5 = vcmp.gt.f32.partialorder %v5958_v10, 0.0 }
 0x6ce   : > { %v6407_v50 = vmul.f32 %v7290_v14, %v10146_v27  ;;  %v6296_v9 = vpop.f32.mrb[63].mxu0  ;;  %v6057_v29 = vsel %vm5992_vm14, %v5959_v44, %v6025_v23 }
 0x6cf   : > { %v6406_v45 = vmul.f32 %v10146_v27, %v6296_v9  ;;  %v6056_v0 = vsel %vm5991_vm5, %v5958_v10, %v6024_v32 }
 0x6d0   : > { %v6446_v24 = vadd.f32 %v10153_v61, %v6407_v50  ;;  %7309 = vmatprep.mubr.msk.f32.mxu0 %vm596_vm1, %v6056_v0 }
 0x6d1   : > { %v6445_v22 = vadd.f32 %v10153_v61, %v6406_v45  ;;  %7310 = vmatmul.mubr.msk.f32.gmra.mrb[76].mxu0 %vm596_vm1, %v6057_v29 }
 0x6d2   : > { %vm6479_vm15 = vcmp.gt.f32.partialorder %v6446_v24, 0.0  ;;  %v6512_v46 = vmul.f32 %v10156_v2, %v6446_v24 }
 0x6d3   : > { %vm6478_vm13 = vcmp.gt.f32.partialorder %v6445_v22, 0.0  ;;  %v6511_v34 = vmul.f32 %v10156_v2, %v6445_v22 }
 0x6d4   : > { %v6544_v37 = vsel %vm6479_vm15, %v6446_v24, %v6512_v46 }
 0x6d5   : > { %6576 = vst.msk [vmem:[%s10169_s30 + $0x78] sm:$0xff] %vm1098_vm2, %v6544_v37  ;;  %v6543_v21 = vsel %vm6478_vm13, %v6445_v22, %v6511_v34 }
 0x6d6   : > { %6575 = vst.msk [vmem:[%s10169_s30 + $0x70] sm:$0xff] %vm1098_vm2, %v6543_v21 }
 0x6da   : > { %v7264_v62 = vpop.f32.mrb[78].mxu1 }
 0x6db   : > { %v5922_v55 = vmul.f32 %v10201_v60, %v7264_v62  ;;  %v5875_v17 = vpop.f32.mrb[79].mxu1 }
 0x6dc   : > { %v5921_v13 = vmul.f32 %v10201_v60, %v5875_v17 }
 0x6dd   : > { %v5961_v49 = vadd.f32 %v10210_v5, %v5922_v55 }
 0x6de   : > { %v5960_v38 = vadd.f32 %v10210_v5, %v5921_v13 }
 0x6df   : > { %v6027_v48 = vmul.f32 %v9864_v41, %v5961_v49  ;;  %vm5994_vm9 = vcmp.gt.f32.partialorder %v5961_v49, 0.0 }
 0x6e0   : > { %v6026_v51 = vmul.f32 %v9864_v41, %v5960_v38  ;;  %vm5993_vm6 = vcmp.gt.f32.partialorder %v5960_v38, 0.0 }
 0x6e1   : > { %v6059_v57 = vsel %vm5994_vm9, %v5961_v49, %v6027_v48 }
 0x6e2   : > { %v6058_v53 = vsel %vm5993_vm6, %v5960_v38, %v6026_v51 }
 0x6e3   : > { %7312 = vmatprep.mubr.msk.f32.mxu0 %vm596_vm1, %v6058_v53 }
 0x6e4   : > { %7313 = vmatmul.mubr.msk.f32.gmra.mrb[78].mxu0 %vm596_vm1, %v6059_v57 }
 0x6ec   : > { %v7293_v56 = vpop.f32.mrb[64].mxu0 }
 0x6ed   : > { %v6409_v60 = vmul.f32 %v7293_v56, %v10146_v27  ;;  %v6306_v54 = vpop.f32.mrb[65].mxu0 }
 0x6ee   : > { %v6408_v5 = vmul.f32 %v10146_v27, %v6306_v54 }
 0x6ef   : > { %v6448_v52 = vadd.f32 %v10153_v61, %v6409_v60 }
 0x6f0   : > { %v6447_v41 = vadd.f32 %v10153_v61, %v6408_v5 }
 0x6f1   : > { %vm6481_vm10 = vcmp.gt.f32.partialorder %v6448_v52, 0.0  ;;  %v6514_v58 = vmul.f32 %v10156_v2, %v6448_v52 }
 0x6f2   : > { %vm6480_vm12 = vcmp.gt.f32.partialorder %v6447_v41, 0.0  ;;  %v6513_v36 = vmul.f32 %v10156_v2, %v6447_v41 }
 0x6f3   : > { %v6546_v8 = vsel %vm6481_vm10, %v6448_v52, %v6514_v58 }
 0x6f4   : > { %6578 = vst.msk [vmem:[%s10169_s30 + $0x88] sm:$0xff] %vm1098_vm2, %v6546_v8  ;;  %v6545_v42 = vsel %vm6480_vm12, %v6447_v41, %v6513_v36 }
 0x6f5   : > { %6577 = vst.msk [vmem:[%s10169_s30 + $0x80] sm:$0xff] %vm1098_vm2, %v6545_v42 }
 0x70c   : > { %v7296_v39 = vpop.f32.mrb[66].mxu0 }
 0x70d   : > { %v6411_v4 = vmul.f32 %v7296_v39, %v10146_v27  ;;  %v6316_v47 = vpop.f32.mrb[67].mxu0 }
 0x70e   : > { %v6410_v63 = vmul.f32 %v10146_v27, %v6316_v47 }
 0x70f   : > { %v6450_v15 = vadd.f32 %v10153_v61, %v6411_v4 }
 0x710   : > { %v6449_v28 = vadd.f32 %v10153_v61, %v6410_v63 }
 0x711   : > { %vm6483_vm1 = vcmp.gt.f32.partialorder %v6450_v15, 0.0  ;;  %v6516_v7 = vmul.f32 %v10156_v2, %v6450_v15 }
 0x712   : > { %vm6482_vm7 = vcmp.gt.f32.partialorder %v6449_v28, 0.0  ;;  %v6515_v1 = vmul.f32 %v10156_v2, %v6449_v28 }
 0x713   : > { %v6548_v16 = vsel %vm6483_vm1, %v6450_v15, %v6516_v7 }
 0x714   : > { %6580 = vst.msk [vmem:[%s10169_s30 + $0x98] sm:$0xff] %vm1098_vm2, %v6548_v16  ;;  %v6547_v12 = vsel %vm6482_vm7, %v6449_v28, %v6515_v1 }
 0x715   : > { %6579 = vst.msk [vmem:[%s10169_s30 + $0x90] sm:$0xff] %vm1098_vm2, %v6547_v12 }
 0x72b   : > { %v7299_v33 = vpop.f32.mrb[68].mxu0 }
 0x72c   : > { %v6413_v40 = vmul.f32 %v7299_v33, %v10146_v27  ;;  %v6326_v19 = vpop.f32.mrb[69].mxu0 }
 0x72d   : > { %v6412_v20 = vmul.f32 %v10146_v27, %v6326_v19 }
 0x72e   : > { %v6452_v3 = vadd.f32 %v10153_v61, %v6413_v40 }
 0x72f   : > { %v6451_v18 = vadd.f32 %v10153_v61, %v6412_v20 }
 0x730   : > { %vm6485_vm0 = vcmp.gt.f32.partialorder %v6452_v3, 0.0  ;;  %v6518_v6 = vmul.f32 %v10156_v2, %v6452_v3 }
 0x731   : > { %vm6484_vm8 = vcmp.gt.f32.partialorder %v6451_v18, 0.0  ;;  %v6517_v59 = vmul.f32 %v10156_v2, %v6451_v18 }
 0x732   : > { %v6550_v30 = vsel %vm6485_vm0, %v6452_v3, %v6518_v6 }
 0x733   : > { %6582 = vst.msk [vmem:[%s10169_s30 + $0xa8] sm:$0xff] %vm1098_vm2, %v6550_v30  ;;  %v6549_v43 = vsel %vm6484_vm8, %v6451_v18, %v6517_v59 }
 0x734   : > { %6581 = vst.msk [vmem:[%s10169_s30 + $0xa0] sm:$0xff] %vm1098_vm2, %v6549_v43 }
 0x74b   : > { %v7302_v26 = vpop.f32.mrb[70].mxu0 }
 0x74c   : > { %v6415_v11 = vmul.f32 %v7302_v26, %v10146_v27  ;;  %v6336_v25 = vpop.f32.mrb[71].mxu0 }
 0x74d   : > { %v6414_v31 = vmul.f32 %v10146_v27, %v6336_v25 }
 0x74e   : > { %v6454_v35 = vadd.f32 %v10153_v61, %v6415_v11 }
 0x74f   : > { %v6453_v44 = vadd.f32 %v10153_v61, %v6414_v31 }
 0x750   : > { %vm6487_vm3 = vcmp.gt.f32.partialorder %v6454_v35, 0.0  ;;  %v6520_v10 = vmul.f32 %v10156_v2, %v6454_v35 }
 0x751   : > { %vm6486_vm4 = vcmp.gt.f32.partialorder %v6453_v44, 0.0  ;;  %v6519_v23 = vmul.f32 %v10156_v2, %v6453_v44 }
 0x752   : > { %v6552_v14 = vsel %vm6487_vm3, %v6454_v35, %v6520_v10 }
 0x753   : > { %6584 = vst.msk [vmem:[%s10169_s30 + $0xb8] sm:$0xff] %vm1098_vm2, %v6552_v14  ;;  %v6551_v32 = vsel %vm6486_vm4, %v6453_v44, %v6519_v23 }
 0x754   : > { %6583 = vst.msk [vmem:[%s10169_s30 + $0xb0] sm:$0xff] %vm1098_vm2, %v6551_v32 }
 0x76b   : > { %v7305_v50 = vpop.f32.mrb[72].mxu0 }
 0x76c   : > { %v6417_v9 = vmul.f32 %v7305_v50, %v10146_v27  ;;  %v6346_v45 = vpop.f32.mrb[73].mxu0 }
 0x76d   : > { %v6416_v24 = vmul.f32 %v10146_v27, %v6346_v45 }
 0x76e   : > { %v6456_v0 = vadd.f32 %v10153_v61, %v6417_v9 }
 0x76f   : > { %v6455_v22 = vadd.f32 %v10153_v61, %v6416_v24 }
 0x770   : > { %vm6489_vm11 = vcmp.gt.f32.partialorder %v6456_v0, 0.0  ;;  %v6522_v29 = vmul.f32 %v10156_v2, %v6456_v0 }
 0x771   : > { %vm6488_vm5 = vcmp.gt.f32.partialorder %v6455_v22, 0.0  ;;  %v6521_v46 = vmul.f32 %v10156_v2, %v6455_v22 }
 0x772   : > { %v6554_v34 = vsel %vm6489_vm11, %v6456_v0, %v6522_v29 }
 0x773   : > { %6586 = vst.msk [vmem:[%s10169_s30 + $0xc8] sm:$0xff] %vm1098_vm2, %v6554_v34  ;;  %v6553_v37 = vsel %vm6488_vm5, %v6455_v22, %v6521_v46 }
 0x774   : > { %6585 = vst.msk [vmem:[%s10169_s30 + $0xc0] sm:$0xff] %vm1098_vm2, %v6553_v37 }
 0x78b   : > { %v7308_v21 = vpop.f32.mrb[74].mxu0 }
 0x78c   : > { %v6419_v62 = vmul.f32 %v7308_v21, %v10146_v27  ;;  %v6356_v55 = vpop.f32.mrb[75].mxu0 }
 0x78d   : > { %v6418_v17 = vmul.f32 %v10146_v27, %v6356_v55 }
 0x78e   : > { %v6458_v13 = vadd.f32 %v10153_v61, %v6419_v62 }
 0x78f   : > { %v6457_v49 = vadd.f32 %v10153_v61, %v6418_v17 }
 0x790   : > { %vm6491_vm14 = vcmp.gt.f32.partialorder %v6458_v13, 0.0  ;;  %v6524_v38 = vmul.f32 %v10156_v2, %v6458_v13 }
 0x791   : > { %vm6490_vm15 = vcmp.gt.f32.partialorder %v6457_v49, 0.0  ;;  %v6523_v48 = vmul.f32 %v10156_v2, %v6457_v49 }
 0x792   : > { %v6556_v51 = vsel %vm6491_vm14, %v6458_v13, %v6524_v38 }
 0x793   : > { %6588 = vst.msk [vmem:[%s10169_s30 + $0xd8] sm:$0xff] %vm1098_vm2, %v6556_v51  ;;  %v6555_v53 = vsel %vm6490_vm15, %v6457_v49, %v6523_v48 }
 0x794   : > { %6587 = vst.msk [vmem:[%s10169_s30 + $0xd0] sm:$0xff] %vm1098_vm2, %v6555_v53 }
 0x7a4   : > { %v7311_v57 = vpop.f32.mrb[76].mxu0 }
 0x7a5   : > { %v6421_v56 = vmul.f32 %v7311_v57, %v10146_v27  ;;  %v6366_v60 = vpop.f32.mrb[77].mxu0 }
 0x7a6   : > { %v6420_v54 = vmul.f32 %v10146_v27, %v6366_v60 }
 0x7a7   : > { %v6460_v5 = vadd.f32 %v10153_v61, %v6421_v56 }
 0x7a8   : > { %v6459_v52 = vadd.f32 %v10153_v61, %v6420_v54 }
 0x7a9   : > { %vm6493_vm13 = vcmp.gt.f32.partialorder %v6460_v5, 0.0  ;;  %v6526_v41 = vmul.f32 %v10156_v2, %v6460_v5 }
 0x7aa   : > { %vm6492_vm6 = vcmp.gt.f32.partialorder %v6459_v52, 0.0  ;;  %v6525_v58 = vmul.f32 %v10156_v2, %v6459_v52 }
 0x7ab   : > { %v6558_v36 = vsel %vm6493_vm13, %v6460_v5, %v6526_v41 }
 0x7ac   : > { %6590 = vst.msk [vmem:[%s10169_s30 + $0xe8] sm:$0xff] %vm1098_vm2, %v6558_v36  ;;  %v6557_v8 = vsel %vm6492_vm6, %v6459_v52, %v6525_v58 }
 0x7ad   : > { %6589 = vst.msk [vmem:[%s10169_s30 + $0xe0] sm:$0xff] %vm1098_vm2, %v6557_v8 }
 0x7b7   : > { %v7314_v42 = vpop.f32.mrb[78].mxu0 }
 0x7b8   : > { %v6423_v39 = vmul.f32 %v7314_v42, %v10146_v27  ;;  %v6376_v4 = vpop.f32.mrb[79].mxu0 }
 0x7b9   : > { %v6422_v47 = vmul.f32 %v10146_v27, %v6376_v4 }
 0x7ba   : > { %v6462_v63 = vadd.f32 %v10153_v61, %v6423_v39 }
 0x7bb   : > { %v6461_v15 = vadd.f32 %v10153_v61, %v6422_v47 }
 0x7bc   : > { %vm6495_vm9 = vcmp.gt.f32.partialorder %v6462_v63, 0.0  ;;  %v6528_v28 = vmul.f32 %v10156_v2, %v6462_v63 }
 0x7bd   : > { %vm6494_vm10 = vcmp.gt.f32.partialorder %v6461_v15, 0.0  ;;  %v6527_v7 = vmul.f32 %v10156_v2, %v6461_v15 }
 0x7be   : > { %v6560_v1 = vsel %vm6495_vm9, %v6462_v63, %v6528_v28 }
 0x7bf   : > { %6592 = vst.msk [vmem:[%s10169_s30 + $0xf8] sm:$0xff] %vm1098_vm2, %v6560_v1  ;;  %v6559_v16 = vsel %vm6494_vm10, %v6461_v15, %v6527_v7 }
 0x7c0   : > { %6591 = vst.msk [vmem:[%s10169_s30 + $0xf0] sm:$0xff] %vm1098_vm2, %v6559_v16 }
 0x7c1 PF: > { %s28_s24 = sadd.s32 1, %s7412_s24  }
 0x7c2   : > { %p25_p1 = scmp.ge.s32.totalorder %s28_s24, 4  }
 0x7c4   :  { %27 = sbr.rel (!%p25_p1) target bundleno = 4 (0x4), region = 125 }
 0x7cb   :  { %6614 = vsyncpa [#allocation5], 1 }
 0x7cc   :  { %6616 = vsyncpa [#allocation5 + $0x1], 1 }

</bundles_post_ra>
